<compile_context>
chip_gen: v5e
topology: v5e:2x2
jax: 0.10.0
libtpu: 0.0.40
codegen_flags: <defaults>
</compile_context>

<pallas_src>
import jax
import jax.numpy as jnp
from jax.experimental import pallas as pl
from jax.experimental.pallas import tpu as pltpu


LEFT = 16    # sublane-tile aligned left margin inside the padded scratch (bf16 tile = 16)
RIGHT = 16   # sublane-tile aligned right margin (only column LEFT+W is actually read)


def fused_double_conv_kernel(x_ref, w1_ref, s1_ref, w2_ref, s2_ref, o_ref,
                             pad1_ref, pad2_ref):
    """Fused [conv3x3 + folded-BN + ReLU] x 2 for one batch element.

    x_ref:  (1, H, W, Cin)           bf16 input tile (unpadded)
    w1_ref: (9, Cin, Cmid)           bf16 conv1 weights (BN1 scale folded in)
    s1_ref: (1, Cmid)                f32 folded shift (beta - mean*scale + bias*scale)
    w2_ref: (9, Cmid, Cout)          bf16 conv2 weights (BN2 scale folded in)
    s2_ref: (1, Cout)                f32 folded shift
    o_ref:  (1, H, W, Cout)          bf16 output tile
    pad*_ref: (H+2, LEFT+W+RIGHT, C) bf16 halo scratch (zero border, image at
                                     rows 1..H, cols LEFT..LEFT+W-1)
    """
    H = o_ref.shape[1]
    W = o_ref.shape[2]
    Cmid = pad2_ref.shape[2]
    Cout = o_ref.shape[3]

    def zero_halo(pad_ref):
        # Zero only the halo the tap windows read; the interior
        # (rows 1..H, cols LEFT..LEFT+W-1) is fully rewritten every step.
        # All four stores are sublane-tile aligned (offsets 0 / LEFT+W, width 16,
        # or full-width leading-dim rows), so none lower to rotate+masked stores.
        wp = pad_ref.shape[1]
        c = pad_ref.shape[2]
        zmargin = jnp.zeros((H + 2, LEFT, c), pad_ref.dtype)
        pad_ref[:, 0:LEFT, :] = zmargin                      # left margin (col LEFT-1)
        pad_ref[:, LEFT + W:LEFT + W + RIGHT, :] = zmargin   # right margin (col LEFT+W)
        zrow = jnp.zeros((1, wp, c), pad_ref.dtype)
        pad_ref[0:1, :, :] = zrow                            # top halo row
        pad_ref[H + 1:H + 2, :, :] = zrow                    # bottom halo row

    def conv_block(pad_ref, x_val, w_ref, s_ref):
        cin = pad_ref.shape[2]
        cout = w_ref.shape[2]
        zero_halo(pad_ref)
        pad_ref[1:H + 1, LEFT:LEFT + W, :] = x_val
        # 9 shifted-window matmuls accumulated in f32: no im2col slab (saves the
        # 9x VMEM activation copy and the 9 store passes per block); on v7x the
        # MRB accumulates the per-tap results in place.
        acc = jnp.zeros((H * W, cout), jnp.float32)
        for kh in range(3):
            for kw in range(3):
                t = kh * 3 + kw
                c0 = LEFT - 1 + kw
                win = pad_ref[kh:kh + H, c0:c0 + W, :].reshape(H * W, cin)
                acc = acc + jnp.dot(win, w_ref[t],
                                    preferred_element_type=jnp.float32)
        # Folded conv-bias + BatchNorm affine + ReLU (f32 epilogue).
        return jnp.maximum(acc + s_ref[...], 0.0)

    # Block 1: input -> (H*W, Cmid); the intermediate stays in VMEM.
    a1 = conv_block(pad1_ref, x_ref[0], w1_ref, s1_ref)
    # Block 2: bf16 hand-off into the second padded buffer.
    a2 = conv_block(pad2_ref,
                    a1.reshape(H, W, Cmid).astype(pad2_ref.dtype),
                    w2_ref, s2_ref)
    o_ref[...] = a2.reshape(1, H, W, Cout).astype(o_ref.dtype)


def _tile_padded_bytes(shape, dtype):
    """VMEM footprint of an array after (sublane, 128)-lane tile padding."""
    itemsize = jnp.dtype(dtype).itemsize
    dims = (1, 1) + tuple(int(d) for d in shape)
    sub_tile = 32 // itemsize            # 8 rows (f32) / 16 rows (bf16) per tile
    lead = 1
    for d in dims[:-2]:
        lead *= d
    s2 = -(-dims[-2] // sub_tile) * sub_tile
    s1 = -(-dims[-1] // 128) * 128
    return lead * s2 * s1 * itemsize


def make_folded_params(key, in_size, out_size, n=2, ks=3, eps=1e-5):
    """Synthetic kaiming-style params with conv bias + eval BatchNorm folded in.

    Returns a list of (w_folded (9, cin, cout) bf16, shift (1, cout) f32).
    """
    params = []
    cin = in_size
    for _ in range(n):
        key, k_w, k_g = jax.random.split(key, 3)
        fan_in = cin * ks * ks
        std = (2.0 / fan_in) ** 0.5
        w = std * jax.random.normal(k_w, (ks, ks, cin, out_size), jnp.float32)  # HWIO
        b = jnp.zeros((out_size,), jnp.float32)
        gamma = 1.0 + 0.02 * jax.random.normal(k_g, (out_size,), jnp.float32)
        beta = jnp.zeros((out_size,), jnp.float32)
        running_mean = jnp.zeros((out_size,), jnp.float32)
        running_var = jnp.ones((out_size,), jnp.float32)
        scale = gamma / jnp.sqrt(running_var + eps)            # BN scale
        w_folded = (w * scale).reshape(ks * ks, cin, out_size).astype(jnp.bfloat16)
        shift = (beta - running_mean * scale + b * scale).reshape(1, out_size)
        params.append((w_folded, shift))
        cin = out_size
    return params


@jax.jit
def unet_conv21_forward(x_nchw, params):
    (w1, s1), (w2, s2) = params
    N, Cin, H, W = x_nchw.shape
    Cmid = w1.shape[2]
    Cout = w2.shape[2]

    # NCHW -> NHWC (channels on the lane axis) and bf16 for the MXU.
    x = jnp.transpose(x_nchw, (0, 2, 3, 1)).astype(jnp.bfloat16)

    pad1_shape = (H + 2, LEFT + W + RIGHT, Cin)
    pad2_shape = (H + 2, LEFT + W + RIGHT, Cmid)

    # Scoped-VMEM budget: scratch + double-buffered in/out/weight blocks +
    # headroom, capped well below physical VMEM on any generation (64 MiB v7x).
    scratch_bytes = (_tile_padded_bytes(pad1_shape, jnp.bfloat16)
                     + _tile_padded_bytes(pad2_shape, jnp.bfloat16))
    io_bytes = (_tile_padded_bytes((1, H, W, Cin), jnp.bfloat16)
                + _tile_padded_bytes((1, H, W, Cout), jnp.bfloat16)
                + _tile_padded_bytes((9, Cin, Cmid), jnp.bfloat16)
                + _tile_padded_bytes((9, Cmid, Cout), jnp.bfloat16)
                + _tile_padded_bytes((1, Cmid), jnp.float32)
                + _tile_padded_bytes((1, Cout), jnp.float32))
    vmem_limit = int(min((8 << 20) + 2 * (scratch_bytes + 2 * io_bytes), 48 << 20))

    out_nhwc = pl.pallas_call(
        fused_double_conv_kernel,
        out_shape=jax.ShapeDtypeStruct((N, H, W, Cout), jnp.bfloat16),
        grid_spec=pltpu.PrefetchScalarGridSpec(
            num_scalar_prefetch=0,
            grid=(N,),
            in_specs=[
                pl.BlockSpec((1, H, W, Cin), lambda n: (n, 0, 0, 0)),
                pl.BlockSpec((9, Cin, Cmid), lambda n: (0, 0, 0)),
                pl.BlockSpec((1, Cmid), lambda n: (0, 0)),
                pl.BlockSpec((9, Cmid, Cout), lambda n: (0, 0, 0)),
                pl.BlockSpec((1, Cout), lambda n: (0, 0)),
            ],
            out_specs=pl.BlockSpec((1, H, W, Cout), lambda n: (n, 0, 0, 0)),
            scratch_shapes=[
                pltpu.VMEM(pad1_shape, jnp.bfloat16),   # pad1 halo buffer
                pltpu.VMEM(pad2_shape, jnp.bfloat16),   # pad2 halo buffer
            ],
        ),
        compiler_params=pltpu.CompilerParams(
            dimension_semantics=("parallel",),
            vmem_limit_bytes=vmem_limit,
        ),
    )(x, w1, s1, w2, s2)

    # NHWC(bf16) -> NCHW(f32) to match the PyTorch module's output layout.
    return jnp.transpose(out_nhwc, (0, 3, 1, 2)).astype(jnp.float32)


def reference_forward(x_nchw, params):
    """Pure-JAX reference with the same bf16-operand / f32-accumulate numerics."""
    x = jnp.transpose(x_nchw, (0, 2, 3, 1)).astype(jnp.bfloat16)
    last = None
    for (w_taps, shift) in params:
        cin = x.shape[-1]
        cout = w_taps.shape[2]
        w = w_taps.astype(jnp.float32).reshape(3, 3, cin, cout)
        y = jax.lax.conv_general_dilated(
            x.astype(jnp.float32), w, window_strides=(1, 1),
            padding=((1, 1), (1, 1)),
            dimension_numbers=("NHWC", "HWIO", "NHWC"))
        y = jnp.maximum(y + shift.reshape(1, 1, 1, cout), 0.0)
        last = y
        x = y.astype(jnp.bfloat16)   # matches the kernel's bf16 hand-off
    return jnp.transpose(last, (0, 3, 1, 2))


if __name__ == "__main__":
    key = jax.random.PRNGKey(0)
    k_x, k_p = jax.random.split(key)

    N, Cin, H, W = 2, 4, 16, 16
    Cout = 8

    x = jax.random.normal(k_x, (N, Cin, H, W), jnp.float32)
    params = make_folded_params(k_p, Cin, Cout, n=2, ks=3)

    out = unet_conv21_forward(x, params)
    out = jax.block_until_ready(out)

    assert out.shape == (N, Cout, H, W), out.shape
    assert bool(jnp.all(out >= 0.0))  # ReLU output

    ref = reference_forward(x, params)
    max_err = float(jnp.max(jnp.abs(out - ref)))
    # bf16 output + bf16 hand-off is an accepted approximation vs PyTorch f32.
    assert max_err < 5e-2, f"mismatch vs reference: {max_err}"

    print("KERNEL_OK")
</pallas_src>

<mosaic_0001>
module attributes {stable_mosaic.version = 11 : i64} {
  func.func @fused_double_conv_kernel(%arg0: i32, %arg1: memref<1x16x16x4xbf16, #tpu.memory_space<vmem>>, %arg2: memref<9x4x8xbf16, #tpu.memory_space<vmem>>, %arg3: memref<1x8xf32, #tpu.memory_space<vmem>>, %arg4: memref<9x8x8xbf16, #tpu.memory_space<vmem>>, %arg5: memref<1x8xf32, #tpu.memory_space<vmem>>, %arg6: memref<1x16x16x8xbf16, #tpu.memory_space<vmem>>, %arg7: memref<18x48x4xbf16, #tpu.memory_space<vmem>>, %arg8: memref<18x48x8xbf16, #tpu.memory_space<vmem>>) attributes {dimension_semantics = [#tpu.dimension_semantics<parallel>], iteration_bounds = array<i64: 2>, scalar_prefetch = 0 : i64, scratch_operands = 2 : i64, tpu.core_type = #tpu.core_type<tc>, window_params = [{transform_indices = @transform_0, window_bounds = array<i64: 1, 16, 16, 4>}, {pipeline_mode = #tpu.pipeline_mode<synchronous>, transform_indices = @transform_1, window_bounds = array<i64: 9, 4, 8>}, {pipeline_mode = #tpu.pipeline_mode<synchronous>, transform_indices = @transform_2, window_bounds = array<i64: 1, 8>}, {pipeline_mode = #tpu.pipeline_mode<synchronous>, transform_indices = @transform_3, window_bounds = array<i64: 9, 8, 8>}, {pipeline_mode = #tpu.pipeline_mode<synchronous>, transform_indices = @transform_4, window_bounds = array<i64: 1, 8>}, {transform_indices = @transform_5, window_bounds = array<i64: 1, 16, 16, 8>}]} {
    %c0 = arith.constant 0 : index
    %c0_0 = arith.constant 0 : index
    %c0_1 = arith.constant 0 : index
    %c0_2 = arith.constant 0 : index
    %0 = vector.load %arg1[%c0, %c0_0, %c0_1, %c0_2] : memref<1x16x16x4xbf16, #tpu.memory_space<vmem>>, vector<1x16x16x4xbf16>
    %1 = vector.shape_cast %0 : vector<1x16x16x4xbf16> to vector<16x16x4xbf16>
    %cst = arith.constant 0.000000e+00 : bf16
    %2 = vector.broadcast %cst : bf16 to vector<18x16x4xbf16>
    %c0_3 = arith.constant 0 : index
    %c0_4 = arith.constant 0 : index
    %c0_5 = arith.constant 0 : index
    %3 = vector.load %arg7[%c0_3, %c0_4, %c0_5] : memref<18x48x4xbf16, #tpu.memory_space<vmem>>, vector<18x16x4xbf16>
    tpu.vector_store %arg7[%c0_3, %c0_4, %c0_5], %2 {strides = array<i32>} : memref<18x48x4xbf16, #tpu.memory_space<vmem>>, vector<18x16x4xbf16>,
    %c0_6 = arith.constant 0 : index
    %c32 = arith.constant 32 : index
    %c0_7 = arith.constant 0 : index
    %4 = vector.load %arg7[%c0_6, %c32, %c0_7] : memref<18x48x4xbf16, #tpu.memory_space<vmem>>, vector<18x16x4xbf16>
    tpu.vector_store %arg7[%c0_6, %c32, %c0_7], %2 {strides = array<i32>} : memref<18x48x4xbf16, #tpu.memory_space<vmem>>, vector<18x16x4xbf16>,
    %cst_8 = arith.constant 0.000000e+00 : bf16
    %5 = vector.broadcast %cst_8 : bf16 to vector<1x48x4xbf16>
    %c0_9 = arith.constant 0 : index
    %c0_10 = arith.constant 0 : index
    %c0_11 = arith.constant 0 : index
    %6 = vector.load %arg7[%c0_9, %c0_10, %c0_11] : memref<18x48x4xbf16, #tpu.memory_space<vmem>>, vector<1x48x4xbf16>
    tpu.vector_store %arg7[%c0_9, %c0_10, %c0_11], %5 {strides = array<i32>} : memref<18x48x4xbf16, #tpu.memory_space<vmem>>, vector<1x48x4xbf16>,
    %c17 = arith.constant 17 : index
    %c0_12 = arith.constant 0 : index
    %c0_13 = arith.constant 0 : index
    %7 = vector.load %arg7[%c17, %c0_12, %c0_13] : memref<18x48x4xbf16, #tpu.memory_space<vmem>>, vector<1x48x4xbf16>
    tpu.vector_store %arg7[%c17, %c0_12, %c0_13], %5 {strides = array<i32>} : memref<18x48x4xbf16, #tpu.memory_space<vmem>>, vector<1x48x4xbf16>,
    %c1 = arith.constant 1 : index
    %c16 = arith.constant 16 : index
    %c0_14 = arith.constant 0 : index
    %8 = vector.load %arg7[%c1, %c16, %c0_14] : memref<18x48x4xbf16, #tpu.memory_space<vmem>>, vector<16x16x4xbf16>
    tpu.vector_store %arg7[%c1, %c16, %c0_14], %1 {strides = array<i32>} : memref<18x48x4xbf16, #tpu.memory_space<vmem>>, vector<16x16x4xbf16>,
    %cst_15 = arith.constant 0.000000e+00 : f32
    %9 = vector.broadcast %cst_15 : f32 to vector<256x8xf32>
    %c0_16 = arith.constant 0 : index
    %c15 = arith.constant 15 : index
    %c0_17 = arith.constant 0 : index
    %10 = vector.load %arg7[%c0_16, %c15, %c0_17] : memref<18x48x4xbf16, #tpu.memory_space<vmem>>, vector<16x16x4xbf16>
    %11 = vector.shape_cast %10 : vector<16x16x4xbf16> to vector<256x4xbf16>
    %c0_18 = arith.constant 0 : index
    %c0_19 = arith.constant 0 : index
    %c0_20 = arith.constant 0 : index
    %12 = vector.load %arg2[%c0_18, %c0_19, %c0_20] : memref<9x4x8xbf16, #tpu.memory_space<vmem>>, vector<1x4x8xbf16>
    %13 = vector.shape_cast %12 : vector<1x4x8xbf16> to vector<4x8xbf16>
    %cst_21 = arith.constant dense<0.000000e+00> : vector<256x8xf32>
    %14 = tpu.matmul %11, %13, %cst_21 {dimension_numbers = #tpu.dot_dimension_numbers<[1], [0], [0], [1], [0, 0, 1, 1], [], []>} : vector<256x4xbf16>, vector<4x8xbf16>, vector<256x8xf32> -> vector<256x8xf32>
    %15 = arith.addf %9, %14 : vector<256x8xf32>
    %c0_22 = arith.constant 0 : index
    %c16_23 = arith.constant 16 : index
    %c0_24 = arith.constant 0 : index
    %16 = vector.load %arg7[%c0_22, %c16_23, %c0_24] : memref<18x48x4xbf16, #tpu.memory_space<vmem>>, vector<16x16x4xbf16>
    %17 = vector.shape_cast %16 : vector<16x16x4xbf16> to vector<256x4xbf16>
    %c1_25 = arith.constant 1 : index
    %c0_26 = arith.constant 0 : index
    %c0_27 = arith.constant 0 : index
    %18 = vector.load %arg2[%c1_25, %c0_26, %c0_27] : memref<9x4x8xbf16, #tpu.memory_space<vmem>>, vector<1x4x8xbf16>
    %19 = vector.shape_cast %18 : vector<1x4x8xbf16> to vector<4x8xbf16>
    %cst_28 = arith.constant dense<0.000000e+00> : vector<256x8xf32>
    %20 = tpu.matmul %17, %19, %cst_28 {dimension_numbers = #tpu.dot_dimension_numbers<[1], [0], [0], [1], [0, 0, 1, 1], [], []>} : vector<256x4xbf16>, vector<4x8xbf16>, vector<256x8xf32> -> vector<256x8xf32>
    %21 = arith.addf %15, %20 : vector<256x8xf32>
    %c0_29 = arith.constant 0 : index
    %c17_30 = arith.constant 17 : index
    %c0_31 = arith.constant 0 : index
    %22 = vector.load %arg7[%c0_29, %c17_30, %c0_31] : memref<18x48x4xbf16, #tpu.memory_space<vmem>>, vector<16x16x4xbf16>
    %23 = vector.shape_cast %22 : vector<16x16x4xbf16> to vector<256x4xbf16>
    %c2 = arith.constant 2 : index
    %c0_32 = arith.constant 0 : index
    %c0_33 = arith.constant 0 : index
    %24 = vector.load %arg2[%c2, %c0_32, %c0_33] : memref<9x4x8xbf16, #tpu.memory_space<vmem>>, vector<1x4x8xbf16>
    %25 = vector.shape_cast %24 : vector<1x4x8xbf16> to vector<4x8xbf16>
    %cst_34 = arith.constant dense<0.000000e+00> : vector<256x8xf32>
    %26 = tpu.matmul %23, %25, %cst_34 {dimension_numbers = #tpu.dot_dimension_numbers<[1], [0], [0], [1], [0, 0, 1, 1], [], []>} : vector<256x4xbf16>, vector<4x8xbf16>, vector<256x8xf32> -> vector<256x8xf32>
    %27 = arith.addf %21, %26 : vector<256x8xf32>
    %c1_35 = arith.constant 1 : index
    %c15_36 = arith.constant 15 : index
    %c0_37 = arith.constant 0 : index
    %28 = vector.load %arg7[%c1_35, %c15_36, %c0_37] : memref<18x48x4xbf16, #tpu.memory_space<vmem>>, vector<16x16x4xbf16>
    %29 = vector.shape_cast %28 : vector<16x16x4xbf16> to vector<256x4xbf16>
    %c3 = arith.constant 3 : index
    %c0_38 = arith.constant 0 : index
    %c0_39 = arith.constant 0 : index
    %30 = vector.load %arg2[%c3, %c0_38, %c0_39] : memref<9x4x8xbf16, #tpu.memory_space<vmem>>, vector<1x4x8xbf16>
    %31 = vector.shape_cast %30 : vector<1x4x8xbf16> to vector<4x8xbf16>
    %cst_40 = arith.constant dense<0.000000e+00> : vector<256x8xf32>
    %32 = tpu.matmul %29, %31, %cst_40 {dimension_numbers = #tpu.dot_dimension_numbers<[1], [0], [0], [1], [0, 0, 1, 1], [], []>} : vector<256x4xbf16>, vector<4x8xbf16>, vector<256x8xf32> -> vector<256x8xf32>
    %33 = arith.addf %27, %32 : vector<256x8xf32>
    %c1_41 = arith.constant 1 : index
    %c16_42 = arith.constant 16 : index
    %c0_43 = arith.constant 0 : index
    %34 = vector.load %arg7[%c1_41, %c16_42, %c0_43] : memref<18x48x4xbf16, #tpu.memory_space<vmem>>, vector<16x16x4xbf16>
    %35 = vector.shape_cast %34 : vector<16x16x4xbf16> to vector<256x4xbf16>
    %c4 = arith.constant 4 : index
    %c0_44 = arith.constant 0 : index
    %c0_45 = arith.constant 0 : index
    %36 = vector.load %arg2[%c4, %c0_44, %c0_45] : memref<9x4x8xbf16, #tpu.memory_space<vmem>>, vector<1x4x8xbf16>
    %37 = vector.shape_cast %36 : vector<1x4x8xbf16> to vector<4x8xbf16>
    %cst_46 = arith.constant dense<0.000000e+00> : vector<256x8xf32>
    %38 = tpu.matmul %35, %37, %cst_46 {dimension_numbers = #tpu.dot_dimension_numbers<[1], [0], [0], [1], [0, 0, 1, 1], [], []>} : vector<256x4xbf16>, vector<4x8xbf16>, vector<256x8xf32> -> vector<256x8xf32>
    %39 = arith.addf %33, %38 : vector<256x8xf32>
    %c1_47 = arith.constant 1 : index
    %c17_48 = arith.constant 17 : index
    %c0_49 = arith.constant 0 : index
    %40 = vector.load %arg7[%c1_47, %c17_48, %c0_49] : memref<18x48x4xbf16, #tpu.memory_space<vmem>>, vector<16x16x4xbf16>
    %41 = vector.shape_cast %40 : vector<16x16x4xbf16> to vector<256x4xbf16>
    %c5 = arith.constant 5 : index
    %c0_50 = arith.constant 0 : index
    %c0_51 = arith.constant 0 : index
    %42 = vector.load %arg2[%c5, %c0_50, %c0_51] : memref<9x4x8xbf16, #tpu.memory_space<vmem>>, vector<1x4x8xbf16>
    %43 = vector.shape_cast %42 : vector<1x4x8xbf16> to vector<4x8xbf16>
    %cst_52 = arith.constant dense<0.000000e+00> : vector<256x8xf32>
    %44 = tpu.matmul %41, %43, %cst_52 {dimension_numbers = #tpu.dot_dimension_numbers<[1], [0], [0], [1], [0, 0, 1, 1], [], []>} : vector<256x4xbf16>, vector<4x8xbf16>, vector<256x8xf32> -> vector<256x8xf32>
    %45 = arith.addf %39, %44 : vector<256x8xf32>
    %c2_53 = arith.constant 2 : index
    %c15_54 = arith.constant 15 : index
    %c0_55 = arith.constant 0 : index
    %46 = vector.load %arg7[%c2_53, %c15_54, %c0_55] : memref<18x48x4xbf16, #tpu.memory_space<vmem>>, vector<16x16x4xbf16>
    %47 = vector.shape_cast %46 : vector<16x16x4xbf16> to vector<256x4xbf16>
    %c6 = arith.constant 6 : index
    %c0_56 = arith.constant 0 : index
    %c0_57 = arith.constant 0 : index
    %48 = vector.load %arg2[%c6, %c0_56, %c0_57] : memref<9x4x8xbf16, #tpu.memory_space<vmem>>, vector<1x4x8xbf16>
    %49 = vector.shape_cast %48 : vector<1x4x8xbf16> to vector<4x8xbf16>
    %cst_58 = arith.constant dense<0.000000e+00> : vector<256x8xf32>
    %50 = tpu.matmul %47, %49, %cst_58 {dimension_numbers = #tpu.dot_dimension_numbers<[1], [0], [0], [1], [0, 0, 1, 1], [], []>} : vector<256x4xbf16>, vector<4x8xbf16>, vector<256x8xf32> -> vector<256x8xf32>
    %51 = arith.addf %45, %50 : vector<256x8xf32>
    %c2_59 = arith.constant 2 : index
    %c16_60 = arith.constant 16 : index
    %c0_61 = arith.constant 0 : index
    %52 = vector.load %arg7[%c2_59, %c16_60, %c0_61] : memref<18x48x4xbf16, #tpu.memory_space<vmem>>, vector<16x16x4xbf16>
    %53 = vector.shape_cast %52 : vector<16x16x4xbf16> to vector<256x4xbf16>
    %c7 = arith.constant 7 : index
    %c0_62 = arith.constant 0 : index
    %c0_63 = arith.constant 0 : index
    %54 = vector.load %arg2[%c7, %c0_62, %c0_63] : memref<9x4x8xbf16, #tpu.memory_space<vmem>>, vector<1x4x8xbf16>
    %55 = vector.shape_cast %54 : vector<1x4x8xbf16> to vector<4x8xbf16>
    %cst_64 = arith.constant dense<0.000000e+00> : vector<256x8xf32>
    %56 = tpu.matmul %53, %55, %cst_64 {dimension_numbers = #tpu.dot_dimension_numbers<[1], [0], [0], [1], [0, 0, 1, 1], [], []>} : vector<256x4xbf16>, vector<4x8xbf16>, vector<256x8xf32> -> vector<256x8xf32>
    %57 = arith.addf %51, %56 : vector<256x8xf32>
    %c2_65 = arith.constant 2 : index
    %c17_66 = arith.constant 17 : index
    %c0_67 = arith.constant 0 : index
    %58 = vector.load %arg7[%c2_65, %c17_66, %c0_67] : memref<18x48x4xbf16, #tpu.memory_space<vmem>>, vector<16x16x4xbf16>
    %59 = vector.shape_cast %58 : vector<16x16x4xbf16> to vector<256x4xbf16>
    %c8 = arith.constant 8 : index
    %c0_68 = arith.constant 0 : index
    %c0_69 = arith.constant 0 : index
    %60 = vector.load %arg2[%c8, %c0_68, %c0_69] : memref<9x4x8xbf16, #tpu.memory_space<vmem>>, vector<1x4x8xbf16>
    %61 = vector.shape_cast %60 : vector<1x4x8xbf16> to vector<4x8xbf16>
    %cst_70 = arith.constant dense<0.000000e+00> : vector<256x8xf32>
    %62 = tpu.matmul %59, %61, %cst_70 {dimension_numbers = #tpu.dot_dimension_numbers<[1], [0], [0], [1], [0, 0, 1, 1], [], []>} : vector<256x4xbf16>, vector<4x8xbf16>, vector<256x8xf32> -> vector<256x8xf32>
    %63 = arith.addf %57, %62 : vector<256x8xf32>
    %c0_71 = arith.constant 0 : index
    %c0_72 = arith.constant 0 : index
    %64 = vector.load %arg3[%c0_71, %c0_72] : memref<1x8xf32, #tpu.memory_space<vmem>>, vector<1x8xf32>
    %65 = vector.broadcast %64 : vector<1x8xf32> to vector<256x8xf32>
    %66 = arith.addf %63, %65 : vector<256x8xf32>
    %cst_73 = arith.constant 0.000000e+00 : f32
    %67 = vector.broadcast %cst_73 : f32 to vector<256x8xf32>
    %68 = arith.maximumf %66, %67 : vector<256x8xf32>
    %69 = vector.shape_cast %68 : vector<256x8xf32> to vector<16x16x8xf32>
    %70 = arith.truncf %69 : vector<16x16x8xf32> to vector<16x16x8xbf16>
    %cst_74 = arith.constant 0.000000e+00 : bf16
    %71 = vector.broadcast %cst_74 : bf16 to vector<18x16x8xbf16>
    %c0_75 = arith.constant 0 : index
    %c0_76 = arith.constant 0 : index
    %c0_77 = arith.constant 0 : index
    %72 = vector.load %arg8[%c0_75, %c0_76, %c0_77] : memref<18x48x8xbf16, #tpu.memory_space<vmem>>, vector<18x16x8xbf16>
    tpu.vector_store %arg8[%c0_75, %c0_76, %c0_77], %71 {strides = array<i32>} : memref<18x48x8xbf16, #tpu.memory_space<vmem>>, vector<18x16x8xbf16>,
    %c0_78 = arith.constant 0 : index
    %c32_79 = arith.constant 32 : index
    %c0_80 = arith.constant 0 : index
    %73 = vector.load %arg8[%c0_78, %c32_79, %c0_80] : memref<18x48x8xbf16, #tpu.memory_space<vmem>>, vector<18x16x8xbf16>
    tpu.vector_store %arg8[%c0_78, %c32_79, %c0_80], %71 {strides = array<i32>} : memref<18x48x8xbf16, #tpu.memory_space<vmem>>, vector<18x16x8xbf16>,
    %cst_81 = arith.constant 0.000000e+00 : bf16
    %74 = vector.broadcast %cst_81 : bf16 to vector<1x48x8xbf16>
    %c0_82 = arith.constant 0 : index
    %c0_83 = arith.constant 0 : index
    %c0_84 = arith.constant 0 : index
    %75 = vector.load %arg8[%c0_82, %c0_83, %c0_84] : memref<18x48x8xbf16, #tpu.memory_space<vmem>>, vector<1x48x8xbf16>
    tpu.vector_store %arg8[%c0_82, %c0_83, %c0_84], %74 {strides = array<i32>} : memref<18x48x8xbf16, #tpu.memory_space<vmem>>, vector<1x48x8xbf16>,
    %c17_85 = arith.constant 17 : index
    %c0_86 = arith.constant 0 : index
    %c0_87 = arith.constant 0 : index
    %76 = vector.load %arg8[%c17_85, %c0_86, %c0_87] : memref<18x48x8xbf16, #tpu.memory_space<vmem>>, vector<1x48x8xbf16>
    tpu.vector_store %arg8[%c17_85, %c0_86, %c0_87], %74 {strides = array<i32>} : memref<18x48x8xbf16, #tpu.memory_space<vmem>>, vector<1x48x8xbf16>,
    %c1_88 = arith.constant 1 : index
    %c16_89 = arith.constant 16 : index
    %c0_90 = arith.constant 0 : index
    %77 = vector.load %arg8[%c1_88, %c16_89, %c0_90] : memref<18x48x8xbf16, #tpu.memory_space<vmem>>, vector<16x16x8xbf16>
    tpu.vector_store %arg8[%c1_88, %c16_89, %c0_90], %70 {strides = array<i32>} : memref<18x48x8xbf16, #tpu.memory_space<vmem>>, vector<16x16x8xbf16>,
    %cst_91 = arith.constant 0.000000e+00 : f32
    %78 = vector.broadcast %cst_91 : f32 to vector<256x8xf32>
    %c0_92 = arith.constant 0 : index
    %c15_93 = arith.constant 15 : index
    %c0_94 = arith.constant 0 : index
    %79 = vector.load %arg8[%c0_92, %c15_93, %c0_94] : memref<18x48x8xbf16, #tpu.memory_space<vmem>>, vector<16x16x8xbf16>
    %80 = vector.shape_cast %79 : vector<16x16x8xbf16> to vector<256x8xbf16>
    %c0_95 = arith.constant 0 : index
    %c0_96 = arith.constant 0 : index
    %c0_97 = arith.constant 0 : index
    %81 = vector.load %arg4[%c0_95, %c0_96, %c0_97] : memref<9x8x8xbf16, #tpu.memory_space<vmem>>, vector<1x8x8xbf16>
    %82 = vector.shape_cast %81 : vector<1x8x8xbf16> to vector<8x8xbf16>
    %cst_98 = arith.constant dense<0.000000e+00> : vector<256x8xf32>
    %83 = tpu.matmul %80, %82, %cst_98 {dimension_numbers = #tpu.dot_dimension_numbers<[1], [0], [0], [1], [0, 0, 1, 1], [], []>} : vector<256x8xbf16>, vector<8x8xbf16>, vector<256x8xf32> -> vector<256x8xf32>
    %84 = arith.addf %78, %83 : vector<256x8xf32>
    %c0_99 = arith.constant 0 : index
    %c16_100 = arith.constant 16 : index
    %c0_101 = arith.constant 0 : index
    %85 = vector.load %arg8[%c0_99, %c16_100, %c0_101] : memref<18x48x8xbf16, #tpu.memory_space<vmem>>, vector<16x16x8xbf16>
    %86 = vector.shape_cast %85 : vector<16x16x8xbf16> to vector<256x8xbf16>
    %c1_102 = arith.constant 1 : index
    %c0_103 = arith.constant 0 : index
    %c0_104 = arith.constant 0 : index
    %87 = vector.load %arg4[%c1_102, %c0_103, %c0_104] : memref<9x8x8xbf16, #tpu.memory_space<vmem>>, vector<1x8x8xbf16>
    %88 = vector.shape_cast %87 : vector<1x8x8xbf16> to vector<8x8xbf16>
    %cst_105 = arith.constant dense<0.000000e+00> : vector<256x8xf32>
    %89 = tpu.matmul %86, %88, %cst_105 {dimension_numbers = #tpu.dot_dimension_numbers<[1], [0], [0], [1], [0, 0, 1, 1], [], []>} : vector<256x8xbf16>, vector<8x8xbf16>, vector<256x8xf32> -> vector<256x8xf32>
    %90 = arith.addf %84, %89 : vector<256x8xf32>
    %c0_106 = arith.constant 0 : index
    %c17_107 = arith.constant 17 : index
    %c0_108 = arith.constant 0 : index
    %91 = vector.load %arg8[%c0_106, %c17_107, %c0_108] : memref<18x48x8xbf16, #tpu.memory_space<vmem>>, vector<16x16x8xbf16>
    %92 = vector.shape_cast %91 : vector<16x16x8xbf16> to vector<256x8xbf16>
    %c2_109 = arith.constant 2 : index
    %c0_110 = arith.constant 0 : index
    %c0_111 = arith.constant 0 : index
    %93 = vector.load %arg4[%c2_109, %c0_110, %c0_111] : memref<9x8x8xbf16, #tpu.memory_space<vmem>>, vector<1x8x8xbf16>
    %94 = vector.shape_cast %93 : vector<1x8x8xbf16> to vector<8x8xbf16>
    %cst_112 = arith.constant dense<0.000000e+00> : vector<256x8xf32>
    %95 = tpu.matmul %92, %94, %cst_112 {dimension_numbers = #tpu.dot_dimension_numbers<[1], [0], [0], [1], [0, 0, 1, 1], [], []>} : vector<256x8xbf16>, vector<8x8xbf16>, vector<256x8xf32> -> vector<256x8xf32>
    %96 = arith.addf %90, %95 : vector<256x8xf32>
    %c1_113 = arith.constant 1 : index
    %c15_114 = arith.constant 15 : index
    %c0_115 = arith.constant 0 : index
    %97 = vector.load %arg8[%c1_113, %c15_114, %c0_115] : memref<18x48x8xbf16, #tpu.memory_space<vmem>>, vector<16x16x8xbf16>
    %98 = vector.shape_cast %97 : vector<16x16x8xbf16> to vector<256x8xbf16>
    %c3_116 = arith.constant 3 : index
    %c0_117 = arith.constant 0 : index
    %c0_118 = arith.constant 0 : index
    %99 = vector.load %arg4[%c3_116, %c0_117, %c0_118] : memref<9x8x8xbf16, #tpu.memory_space<vmem>>, vector<1x8x8xbf16>
    %100 = vector.shape_cast %99 : vector<1x8x8xbf16> to vector<8x8xbf16>
    %cst_119 = arith.constant dense<0.000000e+00> : vector<256x8xf32>
    %101 = tpu.matmul %98, %100, %cst_119 {dimension_numbers = #tpu.dot_dimension_numbers<[1], [0], [0], [1], [0, 0, 1, 1], [], []>} : vector<256x8xbf16>, vector<8x8xbf16>, vector<256x8xf32> -> vector<256x8xf32>
    %102 = arith.addf %96, %101 : vector<256x8xf32>
    %c1_120 = arith.constant 1 : index
    %c16_121 = arith.constant 16 : index
    %c0_122 = arith.constant 0 : index
    %103 = vector.load %arg8[%c1_120, %c16_121, %c0_122] : memref<18x48x8xbf16, #tpu.memory_space<vmem>>, vector<16x16x8xbf16>
    %104 = vector.shape_cast %103 : vector<16x16x8xbf16> to vector<256x8xbf16>
    %c4_123 = arith.constant 4 : index
    %c0_124 = arith.constant 0 : index
    %c0_125 = arith.constant 0 : index
    %105 = vector.load %arg4[%c4_123, %c0_124, %c0_125] : memref<9x8x8xbf16, #tpu.memory_space<vmem>>, vector<1x8x8xbf16>
    %106 = vector.shape_cast %105 : vector<1x8x8xbf16> to vector<8x8xbf16>
    %cst_126 = arith.constant dense<0.000000e+00> : vector<256x8xf32>
    %107 = tpu.matmul %104, %106, %cst_126 {dimension_numbers = #tpu.dot_dimension_numbers<[1], [0], [0], [1], [0, 0, 1, 1], [], []>} : vector<256x8xbf16>, vector<8x8xbf16>, vector<256x8xf32> -> vector<256x8xf32>
    %108 = arith.addf %102, %107 : vector<256x8xf32>
    %c1_127 = arith.constant 1 : index
    %c17_128 = arith.constant 17 : index
    %c0_129 = arith.constant 0 : index
    %109 = vector.load %arg8[%c1_127, %c17_128, %c0_129] : memref<18x48x8xbf16, #tpu.memory_space<vmem>>, vector<16x16x8xbf16>
    %110 = vector.shape_cast %109 : vector<16x16x8xbf16> to vector<256x8xbf16>
    %c5_130 = arith.constant 5 : index
    %c0_131 = arith.constant 0 : index
    %c0_132 = arith.constant 0 : index
    %111 = vector.load %arg4[%c5_130, %c0_131, %c0_132] : memref<9x8x8xbf16, #tpu.memory_space<vmem>>, vector<1x8x8xbf16>
    %112 = vector.shape_cast %111 : vector<1x8x8xbf16> to vector<8x8xbf16>
    %cst_133 = arith.constant dense<0.000000e+00> : vector<256x8xf32>
    %113 = tpu.matmul %110, %112, %cst_133 {dimension_numbers = #tpu.dot_dimension_numbers<[1], [0], [0], [1], [0, 0, 1, 1], [], []>} : vector<256x8xbf16>, vector<8x8xbf16>, vector<256x8xf32> -> vector<256x8xf32>
    %114 = arith.addf %108, %113 : vector<256x8xf32>
    %c2_134 = arith.constant 2 : index
    %c15_135 = arith.constant 15 : index
    %c0_136 = arith.constant 0 : index
    %115 = vector.load %arg8[%c2_134, %c15_135, %c0_136] : memref<18x48x8xbf16, #tpu.memory_space<vmem>>, vector<16x16x8xbf16>
    %116 = vector.shape_cast %115 : vector<16x16x8xbf16> to vector<256x8xbf16>
    %c6_137 = arith.constant 6 : index
    %c0_138 = arith.constant 0 : index
    %c0_139 = arith.constant 0 : index
    %117 = vector.load %arg4[%c6_137, %c0_138, %c0_139] : memref<9x8x8xbf16, #tpu.memory_space<vmem>>, vector<1x8x8xbf16>
    %118 = vector.shape_cast %117 : vector<1x8x8xbf16> to vector<8x8xbf16>
    %cst_140 = arith.constant dense<0.000000e+00> : vector<256x8xf32>
    %119 = tpu.matmul %116, %118, %cst_140 {dimension_numbers = #tpu.dot_dimension_numbers<[1], [0], [0], [1], [0, 0, 1, 1], [], []>} : vector<256x8xbf16>, vector<8x8xbf16>, vector<256x8xf32> -> vector<256x8xf32>
    %120 = arith.addf %114, %119 : vector<256x8xf32>
    %c2_141 = arith.constant 2 : index
    %c16_142 = arith.constant 16 : index
    %c0_143 = arith.constant 0 : index
    %121 = vector.load %arg8[%c2_141, %c16_142, %c0_143] : memref<18x48x8xbf16, #tpu.memory_space<vmem>>, vector<16x16x8xbf16>
    %122 = vector.shape_cast %121 : vector<16x16x8xbf16> to vector<256x8xbf16>
    %c7_144 = arith.constant 7 : index
    %c0_145 = arith.constant 0 : index
    %c0_146 = arith.constant 0 : index
    %123 = vector.load %arg4[%c7_144, %c0_145, %c0_146] : memref<9x8x8xbf16, #tpu.memory_space<vmem>>, vector<1x8x8xbf16>
    %124 = vector.shape_cast %123 : vector<1x8x8xbf16> to vector<8x8xbf16>
    %cst_147 = arith.constant dense<0.000000e+00> : vector<256x8xf32>
    %125 = tpu.matmul %122, %124, %cst_147 {dimension_numbers = #tpu.dot_dimension_numbers<[1], [0], [0], [1], [0, 0, 1, 1], [], []>} : vector<256x8xbf16>, vector<8x8xbf16>, vector<256x8xf32> -> vector<256x8xf32>
    %126 = arith.addf %120, %125 : vector<256x8xf32>
    %c2_148 = arith.constant 2 : index
    %c17_149 = arith.constant 17 : index
    %c0_150 = arith.constant 0 : index
    %127 = vector.load %arg8[%c2_148, %c17_149, %c0_150] : memref<18x48x8xbf16, #tpu.memory_space<vmem>>, vector<16x16x8xbf16>
    %128 = vector.shape_cast %127 : vector<16x16x8xbf16> to vector<256x8xbf16>
    %c8_151 = arith.constant 8 : index
    %c0_152 = arith.constant 0 : index
    %c0_153 = arith.constant 0 : index
    %129 = vector.load %arg4[%c8_151, %c0_152, %c0_153] : memref<9x8x8xbf16, #tpu.memory_space<vmem>>, vector<1x8x8xbf16>
    %130 = vector.shape_cast %129 : vector<1x8x8xbf16> to vector<8x8xbf16>
    %cst_154 = arith.constant dense<0.000000e+00> : vector<256x8xf32>
    %131 = tpu.matmul %128, %130, %cst_154 {dimension_numbers = #tpu.dot_dimension_numbers<[1], [0], [0], [1], [0, 0, 1, 1], [], []>} : vector<256x8xbf16>, vector<8x8xbf16>, vector<256x8xf32> -> vector<256x8xf32>
    %132 = arith.addf %126, %131 : vector<256x8xf32>
    %c0_155 = arith.constant 0 : index
    %c0_156 = arith.constant 0 : index
    %133 = vector.load %arg5[%c0_155, %c0_156] : memref<1x8xf32, #tpu.memory_space<vmem>>, vector<1x8xf32>
    %134 = vector.broadcast %133 : vector<1x8xf32> to vector<256x8xf32>
    %135 = arith.addf %132, %134 : vector<256x8xf32>
    %cst_157 = arith.constant 0.000000e+00 : f32
    %136 = vector.broadcast %cst_157 : f32 to vector<256x8xf32>
    %137 = arith.maximumf %135, %136 : vector<256x8xf32>
    %138 = vector.shape_cast %137 : vector<256x8xf32> to vector<1x16x16x8xf32>
    %139 = arith.truncf %138 : vector<1x16x16x8xf32> to vector<1x16x16x8xbf16>
    %c0_158 = arith.constant 0 : index
    %c0_159 = arith.constant 0 : index
    %c0_160 = arith.constant 0 : index
    %c0_161 = arith.constant 0 : index
    %140 = vector.load %arg6[%c0_158, %c0_159, %c0_160, %c0_161] : memref<1x16x16x8xbf16, #tpu.memory_space<vmem>>, vector<1x16x16x8xbf16>
    tpu.vector_store %arg6[%c0_158, %c0_159, %c0_160, %c0_161], %139 {strides = array<i32>} : memref<1x16x16x8xbf16, #tpu.memory_space<vmem>>, vector<1x16x16x8xbf16>,
    return
  }
  func.func @transform_0(%arg0: i32) -> (i32, i32, i32, i32) {
    %c0_i32 = arith.constant 0 : i32
    %c0_i32_0 = arith.constant 0 : i32
    %c0_i32_1 = arith.constant 0 : i32
    %c0_i32_2 = arith.constant 0 : i32
    return %arg0, %c0_i32, %c0_i32_0, %c0_i32_1 : i32, i32, i32, i32
  }
  func.func @transform_1(%arg0: i32) -> (i32, i32, i32) {
    %c0_i32 = arith.constant 0 : i32
    %c0_i32_0 = arith.constant 0 : i32
    %c0_i32_1 = arith.constant 0 : i32
    %c0_i32_2 = arith.constant 0 : i32
    return %c0_i32, %c0_i32_0, %c0_i32_1 : i32, i32, i32
  }
  func.func @transform_2(%arg0: i32) -> (i32, i32) {
    %c0_i32 = arith.constant 0 : i32
    %c0_i32_0 = arith.constant 0 : i32
    %c0_i32_1 = arith.constant 0 : i32
    return %c0_i32, %c0_i32_0 : i32, i32
  }
  func.func @transform_3(%arg0: i32) -> (i32, i32, i32) {
    %c0_i32 = arith.constant 0 : i32
    %c0_i32_0 = arith.constant 0 : i32
    %c0_i32_1 = arith.constant 0 : i32
    %c0_i32_2 = arith.constant 0 : i32
    return %c0_i32, %c0_i32_0, %c0_i32_1 : i32, i32, i32
  }
  func.func @transform_4(%arg0: i32) -> (i32, i32) {
    %c0_i32 = arith.constant 0 : i32
    %c0_i32_0 = arith.constant 0 : i32
    %c0_i32_1 = arith.constant 0 : i32
    return %c0_i32, %c0_i32_0 : i32, i32
  }
  func.func @transform_5(%arg0: i32) -> (i32, i32, i32, i32) {
    %c0_i32 = arith.constant 0 : i32
    %c0_i32_0 = arith.constant 0 : i32
    %c0_i32_1 = arith.constant 0 : i32
    %c0_i32_2 = arith.constant 0 : i32
    return %arg0, %c0_i32, %c0_i32_0, %c0_i32_1 : i32, i32, i32, i32
  }
}

</mosaic_0001>

<bundles_post_ra>
// kernel: unet_conv21_forward.1
= control target key start
LH: loop header
LB: loop body
LE: loop exit
PB: predicated region body
PF: predicated region fallthrough
CT: control target
= control target key end

     0   :  { %s10792_s18 = smov 0   ;;  %s14135_s0 = inlined_call_operand.vmem [shape: bf16[2,16,16,4], index: 0, kind: input, shape index: {}]   ;;  %s14136_s1 = inlined_call_operand.vmem [shape: bf16[9,4,8], index: 1, kind: input, shape index: {}]   ;;  %s14137_s2 = inlined_call_operand.vmem [shape: f32[1,8], index: 2, kind: input, shape index: {}]   ;;  %s14138_s3 = inlined_call_operand.vmem [shape: bf16[9,8,8], index: 3, kind: input, shape index: {}]   ;;  %s14139_s4 = inlined_call_operand.vmem [shape: f32[1,8], index: 4, kind: input, shape index: {}]   ;;  %s14140_s5 = inlined_call_operand.vmem [shape: bf16[2,16,16,8], index: 5, kind: output, shape index: {}]  }
   0x1 LB: > { %s9845_s19 = sadd.s32 4294967295, %s10759_s18   ;;  %p9849_p0 = scmp.ge.s32.totalorder %s10759_s18, 1  ;;  %s10759_s18 = sphi %s10792_s18, %s15_s18  }
   0x2   : > { %p187_p1 = scmp.lt.s32.totalorder %s10759_s18, 3 }
   0x4   : > { %p188_p2 = pnand %p9849_p0, %p187_p1 }
   0x6   : > { %191 = sbr.rel (%p188_p2) target bundleno = 1519 (0x5ef), region = 40 }
   0xb   : > { %v9870_v0 = vld [vmem:[%s14136_s1 + $0x2] sm:$0x3]  ;;  %vm912_vm0 = vcmask 1041408   ;;  %vm258_vm1 = vcmask 27648   ;;  %v14141_v2 = vmov 0   ;;  %vm863_vm2 = vcmask 31744  }
   0xc   : > { %v914_v1 = vsel %vm912_vm0, %v9870_v0, 0  ;;  %333 = vst.msk [vmem:[#allocation2 + $0x8] sm:$0xf] %vm258_vm1, %v14141_v2  ;;  %v780_v4 = vld [vmem:[%s14136_s1] sm:$0x3]  ;;  %p215_p3 = scmp.lt.s32.totalorder %s9845_s19, 1 }
   0xd   : > { %923 = vmatpush.bf16.msra.mxu0 %v914_v1  ;;  %334 = vst.msk [vmem:[#allocation2 + $0xc] sm:$0xf] %vm258_vm1, %v14141_v2  ;;  %10738 = vmatpush.bf16.msra.mxu2 %v914_v1  ;;  %v9967_v5 = vld [vmem:[%s14136_s1 + $0x4] sm:$0x3]  ;;  %v1102_v6 = vsel %vm912_vm0, %v780_v4, 0  ;;  %vm5662_vm9 = vcmask 1043456  }
   0xe   : > { %260 = vst.msk [vmem:[#allocation2 + $0x4] sm:$0xf] %vm258_vm1, %v14141_v2  ;;  %v1727_v7 = vsel %vm912_vm0, %v9967_v5, 0  ;;  %1111 = vmatpush.bf16.msra.mxu1 %v1102_v6  ;;  %10739 = vmatpush.bf16.msra.mxu3 %v1102_v6  ;;  %s14282_s19 = smov (!%p215_p3, %s9845_s19), 1  ;;  %v10000_v9 = vld [vmem:[%s14136_s1 + $0x6] sm:$0x3] }
   0xf   : > { %262 = vst.msk [vmem:[#allocation2 + $0x1c] sm:$0xf] %vm258_vm1, %v14141_v2  ;;  %v2349_v11 = vsel %vm912_vm0, %v10000_v9, 0  ;;  %s10640_s28 = sshll.u32 %s14282_s19, 7  ;;  %v10017_v14 = vld [vmem:[%s14136_s1 + $0x8] sm:$0x3] }
  0x10   : > { %264 = vst.msk [vmem:[#allocation2 + $0x34] sm:$0xf] %vm258_vm1, %v14141_v2  ;;  %s10909_s6 = scalar_lea.vmem %s14135_s0, %s10640_s28  ;;  %v2603_v15 = vsel %vm912_vm0, %v10017_v14, 0  ;;  %vm425_vm3 = vsmask.f32 256  ;;  %vm5011_vm10 = vcmask 60416   ;;  %s13884_s25 = scalar_lea.vmem %s14140_s5, %s10640_s28 }
  0x11   : > { %266 = vst.msk [vmem:[#allocation2 + $0x4c] sm:$0xf] %vm258_vm1, %v14141_v2  ;;  %1736 = vmatpush.bf16.msrb.mxu2 %v1727_v7  ;;  %2612 = vmatpush.bf16.msrb.mxu0 %v2603_v15  ;;  %v240_v19 = vld [vmem:[%s10909_s6 + $0x38] sm:$0xf]  ;;  %v241_v20 = vld [vmem:[%s10909_s6 + $0x3c] sm:$0xf] }
  0x12   : > { %268 = vst.msk [vmem:[#allocation2 + $0x64] sm:$0xf] %vm258_vm1, %v14141_v2  ;;  %2358 = vmatpush.bf16.msrb.mxu3 %v2349_v11  ;;  %vm426_vm4 = vsmask.f32 4368  ;;  %v226_v22 = vld [vmem:[%s10909_s6] sm:$0xf] }
  0x13   : > { %270 = vst.msk [vmem:[#allocation2 + $0x7c] sm:$0xf] %vm258_vm1, %v14141_v2  ;;  %v378_v8 = vld [vmem:[#allocation2 + $0x8] sm:$0xf]  ;;  %v227_v26 = vld [vmem:[%s10909_s6 + $0x4] sm:$0xf]  ;;  %vm10929_vm5 = vmor %vm425_vm3, %vm426_vm4 }
  0x14   : > { %v10642_v3 = vld [vmem:[#allocation2 + $0x8] sm:$0xff]  ;;  %272 = vst.msk [vmem:[#allocation2 + $0x94] sm:$0xf] %vm258_vm1, %v14141_v2  ;;  %v434_v12 = vshrl.u32 %v378_v8, 16  ;;  %v437_v23 = vshll.u32 %v378_v8, 16  ;;  %vm5613_vm11 = vcmask 64512  }
  0x15   : > { %9935 = vmatmul.msk.bf16.vlgmr.msra.gmra.mxu0 %vm863_vm2, %v10642_v3  ;;  %274 = vst.msk [vmem:[#allocation2 + $0xac] sm:$0xf] %vm258_vm1, %v14141_v2  ;;  %v379_v10 = vld [vmem:[#allocation2 + $0xc] sm:$0xf]  ;;  %v242_v28 = vld [vmem:[%s10909_s6 + $0x40] sm:$0xf] }
  0x16   : > { %276 = vst.msk [vmem:[#allocation2 + $0xc4] sm:$0xf] %vm258_vm1, %v14141_v2  ;;  %v443_v13 = vshrl.u32 %v379_v10, 16  ;;  %v436_v16 = vrot.slane %v434_v12, 7  ;;  %v446_v18 = vshll.u32 %v379_v10, 16 }
  0x17   : > { %278 = vst.msk [vmem:[#allocation2 + $0xdc] sm:$0xf] %vm258_vm1, %v14141_v2  ;;  %v243_v30 = vld [vmem:[%s10909_s6 + $0x44] sm:$0xf]  ;;  %v228_v32 = vld [vmem:[%s10909_s6 + $0x8] sm:$0xf] }
  0x18   : > { %280 = vst.msk [vmem:[#allocation2 + $0xf4] sm:$0xf] %vm258_vm1, %v14141_v2  ;;  %v445_v17 = vrot.slane %v443_v13, 7  ;;  %v441_v24 = vrot.slane %v436_v16, 4  ;;  %v439_v34 = vor.u32 %v437_v23, %v436_v16  ;;  %v229_v36 = vld [vmem:[%s10909_s6 + $0xc] sm:$0xf] }
  0x19   : > { %282 = vst.msk [vmem:[#allocation2 + $0x10c] sm:$0xf] %vm258_vm1, %v14141_v2  ;;  %v380_v37 = vld [vmem:[#allocation2 + $0x1c] sm:$0x8]  ;;  %v244_v39 = vld [vmem:[%s10909_s6 + $0x48] sm:$0xf] }
  0x1a   : > { %284 = vst.msk [vmem:[#allocation2 + $0x124] sm:$0xf] %vm258_vm1, %v14141_v2  ;;  %v448_v25 = vor.u32 %v446_v18, %v445_v17  ;;  %v451_v48 = vshrl.u32 %v380_v37, 16  ;;  %v245_v49 = vld [vmem:[%s10909_s6 + $0x4c] sm:$0xf] }
  0x1b   : > { %286 = vst.msk [vmem:[#allocation2 + $0x13c] sm:$0xf] %vm258_vm1, %v14141_v2  ;;  %v230_v23 = vld [vmem:[%s10909_s6 + $0x10] sm:$0xf]  ;;  %vm1241_vm6 = vsmask.f32 3328 }
  0x1c   : > { %288 = vst.msk [vmem:[#allocation2 + $0x154] sm:$0xf] %vm258_vm1, %v14141_v2  ;;  %v449_v35 = vsel %vm10929_vm5, %v441_v24, %v448_v25  ;;  %v9855_v11 = vrot.slane %v451_v48, 11  ;;  %v231_v24 = vld [vmem:[%s10909_s6 + $0x14] sm:$0xf] }
  0x1d   : > { %290 = vst.msk [vmem:[#allocation2 + $0x16c] sm:$0xf] %vm258_vm1, %v14141_v2  ;;  %v401_v21 = vld [vmem:[#allocation2 + $0xc4] sm:$0x8]  ;;  %v1006_v40 = vunpack.c.l.b16 %v449_v35  ;;  %vm1242_vm7 = vsmask.f32 7440 }
  0x1e   : > { %292 = vst.msk [vmem:[#allocation2 + $0x184] sm:$0xf] %vm258_vm1, %v14141_v2  ;;  %v605_v29 = vshrl.u32 %v401_v21, 16  ;;  %v404_v8 = vld [vmem:[#allocation2 + $0xdc] sm:$0x8]  ;;  %vm11101_vm8 = vmor %vm1241_vm6, %vm1242_vm7 }
  0x1f   : > { %294 = vst.msk [vmem:[#allocation2 + $0x19c] sm:$0xf] %vm258_vm1, %v14141_v2  ;;  %v627_v18 = vshrl.u32 %v404_v8, 16 }
  0x20   : > { %295 = vst.msk [vmem:[#allocation2 + $0x10] sm:$0xf] %vm258_vm1, %v14141_v2  ;;  %v9862_v42 = vrot.slane %v605_v29, 11 }
  0x21   : > { %297 = vst.msk [vmem:[#allocation2 + $0x28] sm:$0xf] %vm258_vm1, %v14141_v2 }
  0x22   : > { %299 = vst.msk [vmem:[#allocation2 + $0x40] sm:$0xf] %vm258_vm1, %v14141_v2 }
  0x23   : > { %301 = vst.msk [vmem:[#allocation2 + $0x58] sm:$0xf] %vm258_vm1, %v14141_v2 }
  0x24   : > { %303 = vst.msk [vmem:[#allocation2 + $0x70] sm:$0xf] %vm258_vm1, %v14141_v2 }
  0x25   : > { %305 = vst.msk [vmem:[#allocation2 + $0x88] sm:$0xf] %vm258_vm1, %v14141_v2 }
  0x26   : > { %307 = vst.msk [vmem:[#allocation2 + $0xa0] sm:$0xf] %vm258_vm1, %v14141_v2 }
  0x27   : > { %309 = vst.msk [vmem:[#allocation2 + $0xb8] sm:$0xf] %vm258_vm1, %v14141_v2 }
  0x28   : > { %311 = vst.msk [vmem:[#allocation2 + $0xd0] sm:$0xf] %vm258_vm1, %v14141_v2 }
  0x29   : > { %313 = vst.msk [vmem:[#allocation2 + $0xe8] sm:$0xf] %vm258_vm1, %v14141_v2 }
  0x2a   : > { %315 = vst.msk [vmem:[#allocation2 + $0x100] sm:$0xf] %vm258_vm1, %v14141_v2 }
  0x2b   : > { %317 = vst.msk [vmem:[#allocation2 + $0x118] sm:$0xf] %vm258_vm1, %v14141_v2 }
  0x2c   : > { %319 = vst.msk [vmem:[#allocation2 + $0x130] sm:$0xf] %vm258_vm1, %v14141_v2 }
  0x2d   : > { %321 = vst.msk [vmem:[#allocation2 + $0x148] sm:$0xf] %vm258_vm1, %v14141_v2 }
  0x2e   : > { %323 = vst.msk [vmem:[#allocation2 + $0x160] sm:$0xf] %vm258_vm1, %v14141_v2 }
  0x2f   : > { %325 = vst.msk [vmem:[#allocation2 + $0x178] sm:$0xf] %vm258_vm1, %v14141_v2 }
  0x30   : > { %327 = vst.msk [vmem:[#allocation2 + $0x190] sm:$0xf] %vm258_vm1, %v14141_v2 }
  0x31   : > { %329 = vst.msk [vmem:[#allocation2 + $0x1a8] sm:$0xf] %vm258_vm1, %v14141_v2 }
  0x32   : > { %340 = vst.msk [vmem:[#allocation2 + $0x1a0] sm:$0xf] %vm258_vm1, %v14141_v2 }
  0x33   : > { %341 = vst.msk [vmem:[#allocation2 + $0x1a4] sm:$0xf] %vm258_vm1, %v14141_v2 }
  0x34   : > { %332 = vst.msk [vmem:[#allocation2 + $0x4] sm:$0xf] %vm258_vm1, %v14141_v2 }
  0x35   : > { %335 = vst.msk [vmem:[#allocation2 + $0x10] sm:$0xf] %vm258_vm1, %v14141_v2 }
  0x36   : > { %339 = vst.msk [vmem:[#allocation2 + $0x19c] sm:$0xf] %vm258_vm1, %v14141_v2 }
  0x37   : > { %342 = vst.msk [vmem:[#allocation2 + $0x1a8] sm:$0xf] %vm258_vm1, %v14141_v2 }
  0x38   : > { %359 = vst.msk [vmem:[#allocation2 + $0xc8] sm:$0xf] %vm258_vm1, %v240_v19 }
  0x39   : > { %360 = vst.msk [vmem:[#allocation2 + $0xcc] sm:$0xf] %vm258_vm1, %v241_v20 }
  0x3a   : > { %345 = vst.msk [vmem:[#allocation2 + $0x20] sm:$0xf] %vm258_vm1, %v226_v22 }
  0x3b   : > { %v377_v31 = vld [vmem:[#allocation2 + $0x4] sm:$0x8]  ;;  %346 = vst.msk [vmem:[#allocation2 + $0x24] sm:$0xf] %vm258_vm1, %v227_v26 }
  0x3c   : > { %v429_v33 = vshrl.u32 %v377_v31, 16  ;;  %361 = vst.msk [vmem:[#allocation2 + $0xe0] sm:$0xf] %vm258_vm1, %v242_v28 }
  0x3d   : > { %362 = vst.msk [vmem:[#allocation2 + $0xe4] sm:$0xf] %vm258_vm1, %v243_v30  ;;  %v246_v30 = vld [vmem:[%s10909_s6 + $0x50] sm:$0xf] }
  0x3e   : > { %v9854_v38 = vrot.slane %v429_v33, 11  ;;  %347 = vst.msk [vmem:[#allocation2 + $0x38] sm:$0xf] %vm258_vm1, %v228_v32  ;;  %v247_v32 = vld [vmem:[%s10909_s6 + $0x54] sm:$0xf]  ;;  %v9863_v33 = vrot.slane %v627_v18, 11 }
  0x3f   : > { %v402_v41 = vld [vmem:[#allocation2 + $0xc8] sm:$0xf]  ;;  %348 = vst.msk [vmem:[#allocation2 + $0x3c] sm:$0xf] %vm258_vm1, %v229_v36 }
  0x40   : > { %v10650_v43 = vld [vmem:[#allocation2 + $0xc8] sm:$0xff]  ;;  %v440_v44 = vsel %vm10929_vm5, %v9854_v38, %v439_v34  ;;  %v610_v46 = vshrl.u32 %v402_v41, 16  ;;  %v613_v47 = vshll.u32 %v402_v41, 16  ;;  %363 = vst.msk [vmem:[#allocation2 + $0xf8] sm:$0xf] %vm258_vm1, %v244_v39 }
  0x41   : > { %v403_v45 = vld [vmem:[#allocation2 + $0xcc] sm:$0xf]  ;;  %v1005_v50 = vunpack.c.l.b16 %v440_v44  ;;  %v381_v53 = vld [vmem:[#allocation2 + $0x20] sm:$0xf]  ;;  %9943 = vmatmul.msk.bf16.vlgmr.msra.gmra.mxu2 %vm863_vm2, %v10650_v43  ;;  %364 = vst.msk [vmem:[#allocation2 + $0xfc] sm:$0xf] %vm258_vm1, %v245_v49 }
  0x42   : > { %v619_v51 = vshrl.u32 %v403_v45, 16  ;;  %v622_v52 = vshll.u32 %v403_v45, 16  ;;  %v612_v54 = vrot.slane %v610_v46, 7  ;;  %v10643_v55 = vld [vmem:[#allocation2 + $0x20] sm:$0xff]  ;;  %v456_v57 = vshrl.u32 %v381_v53, 16 }
  0x43   : > { %v382_v56 = vld [vmem:[#allocation2 + $0x24] sm:$0xf]  ;;  %v459_v58 = vshll.u32 %v381_v53, 16  ;;  %v1037_v59 = vpack.c.b16 %v1006_v40, %v1005_v50  ;;  %v405_v63 = vld [vmem:[#allocation2 + $0xe0] sm:$0xf]  ;;  %9936 = vmatmul.msk.bf16.gmra.mxu0 %vm863_vm2, %v10643_v55 }
  0x44   : > { %v621_v60 = vrot.slane %v619_v51, 7  ;;  %v465_v61 = vshrl.u32 %v382_v56, 16  ;;  %v468_v62 = vshll.u32 %v382_v56, 16  ;;  %v615_v0 = vor.u32 %v613_v47, %v612_v54  ;;  %v406_v4 = vld [vmem:[#allocation2 + $0xe4] sm:$0xf] }
  0x45   : > { %v617_v1 = vrot.slane %v612_v54, 4  ;;  %v458_v3 = vrot.slane %v456_v57, 7  ;;  %v632_v5 = vshrl.u32 %v405_v63, 16  ;;  %9951 = vmatmul.msk.bf16.vlgmr.msra.gmra.mxu1 %vm863_vm2, %v1037_v59  ;;  %v641_v9 = vshrl.u32 %v406_v4, 16  ;;  %v384_v29 = vld [vmem:[#allocation2 + $0x38] sm:$0xf] }
  0x46   : > { %v624_v6 = vor.u32 %v622_v52, %v621_v60  ;;  %v467_v7 = vrot.slane %v465_v61, 7  ;;  %v616_v10 = vsel %vm10929_vm5, %v9862_v42, %v615_v0  ;;  %v635_v20 = vshll.u32 %v405_v63, 16  ;;  %349 = vst.msk [vmem:[#allocation2 + $0x50] sm:$0xf] %vm258_vm1, %v230_v23  ;;  %v385_v31 = vld [vmem:[#allocation2 + $0x3c] sm:$0xf] }
  0x47   : > { %v461_v12 = vor.u32 %v459_v58, %v458_v3  ;;  %v463_v13 = vrot.slane %v458_v3, 4  ;;  %v1021_v15 = vunpack.c.l.b16 %v616_v10  ;;  %v634_v19 = vrot.slane %v632_v5, 7  ;;  %350 = vst.msk [vmem:[#allocation2 + $0x54] sm:$0xf] %vm258_vm1, %v231_v24  ;;  %v383_v39 = vld [vmem:[#allocation2 + $0x34] sm:$0x8] }
  0x48   : > { %v625_v14 = vsel %vm10929_vm5, %v617_v1, %v624_v6  ;;  %v470_v16 = vor.u32 %v468_v62, %v467_v7  ;;  %v643_v21 = vrot.slane %v641_v9, 7  ;;  %v644_v22 = vshll.u32 %v406_v4, 16  ;;  %365 = vst.msk [vmem:[#allocation2 + $0x110] sm:$0xf] %vm258_vm1, %v246_v30  ;;  %v10651_v41 = vld [vmem:[#allocation2 + $0xe0] sm:$0xff]  ;;  %v10644_v44 = vld [vmem:[#allocation2 + $0x38] sm:$0xff] }
  0x49   : > { %v1022_v17 = vunpack.c.l.b16 %v625_v14  ;;  %v462_v26 = vsel %vm10929_vm5, %v9855_v11, %v461_v12  ;;  %v637_v34 = vor.u32 %v635_v20, %v634_v19  ;;  %v639_v35 = vrot.slane %v634_v19, 4  ;;  %366 = vst.msk [vmem:[#allocation2 + $0x114] sm:$0xf] %vm258_vm1, %v247_v32  ;;  %v408_v50 = vld [vmem:[#allocation2 + $0xf8] sm:$0xf] }
  0x4a   : > { %v471_v28 = vsel %vm10929_vm5, %v463_v13, %v470_v16  ;;  %v1007_v36 = vunpack.c.l.b16 %v462_v26  ;;  %v646_v38 = vor.u32 %v644_v22, %v643_v21  ;;  %v478_v40 = vshrl.u32 %v384_v29, 16  ;;  %v409_v53 = vld [vmem:[#allocation2 + $0xfc] sm:$0xf]  ;;  %v232_v54 = vld [vmem:[%s10909_s6 + $0x18] sm:$0xf] }
  0x4b   : > { %v1045_v25 = vpack.c.b16 %v1022_v17, %v1021_v15  ;;  %v1008_v37 = vunpack.c.l.b16 %v471_v28  ;;  %v487_v42 = vshrl.u32 %v385_v31, 16  ;;  %v638_v43 = vsel %vm10929_vm5, %v9863_v33, %v637_v34  ;;  %v407_v57 = vld [vmem:[#allocation2 + $0xf4] sm:$0x8]  ;;  %v233_v0 = vld [vmem:[%s10909_s6 + $0x1c] sm:$0xf] }
  0x4c   : > { %v473_v45 = vshrl.u32 %v383_v39, 16  ;;  %v647_v47 = vsel %vm10929_vm5, %v639_v35, %v646_v38  ;;  %v480_v48 = vrot.slane %v478_v40, 7  ;;  %v481_v49 = vshll.u32 %v384_v29, 16  ;;  %351 = vst.msk [vmem:[#allocation2 + $0x68] sm:$0xf] %vm258_vm1, %v232_v54  ;;  %v10652_v23 = vld [vmem:[#allocation2 + $0xf8] sm:$0xff] }
  0x4d   : > { %9959 = vmatmul.msk.bf16.vlgmr.msra.gmra.mxu3 %vm863_vm2, %v1045_v25  ;;  %v1038_v46 = vpack.c.b16 %v1008_v37, %v1007_v36  ;;  %v489_v51 = vrot.slane %v487_v42, 7  ;;  %v490_v52 = vshll.u32 %v385_v31, 16  ;;  %v1023_v55 = vunpack.c.l.b16 %v638_v43  ;;  %352 = vst.msk [vmem:[#allocation2 + $0x6c] sm:$0xf] %vm258_vm1, %v233_v0  ;;  %v248_v6 = vld [vmem:[%s10909_s6 + $0x58] sm:$0xf] }
  0x4e   : > { %v1024_v56 = vunpack.c.l.b16 %v647_v47  ;;  %v654_v58 = vshrl.u32 %v408_v50, 16  ;;  %v9856_v59 = vrot.slane %v473_v45, 11  ;;  %v483_v60 = vor.u32 %v481_v49, %v480_v48  ;;  %v249_v7 = vld [vmem:[%s10909_s6 + $0x5c] sm:$0xf]  ;;  %v387_v11 = vld [vmem:[#allocation2 + $0x50] sm:$0xf] }
  0x4f   : > { %v663_v61 = vshrl.u32 %v409_v53, 16  ;;  %v485_v62 = vrot.slane %v480_v48, 4  ;;  %v492_v63 = vor.u32 %v490_v52, %v489_v51  ;;  %v649_v1 = vshrl.u32 %v407_v57, 16  ;;  %367 = vst.msk [vmem:[#allocation2 + $0x128] sm:$0xf] %vm258_vm1, %v248_v6  ;;  %v10645_v26 = vld [vmem:[#allocation2 + $0x50] sm:$0xff] }
  0x50   : > { %v1046_v3 = vpack.c.b16 %v1024_v56, %v1023_v55  ;;  %v656_v4 = vrot.slane %v654_v58, 7  ;;  %v657_v5 = vshll.u32 %v408_v50, 16  ;;  %v484_v8 = vsel %vm10929_vm5, %v9856_v59, %v483_v60  ;;  %v388_v13 = vld [vmem:[#allocation2 + $0x54] sm:$0xf]  ;;  %368 = vst.msk [vmem:[#allocation2 + $0x12c] sm:$0xf] %vm258_vm1, %v249_v7 }
  0x51   : > { %9944 = vmatmul.msk.bf16.gmra.mxu2 %vm863_vm2, %v10651_v41  ;;  %v665_v9 = vrot.slane %v663_v61, 7  ;;  %v666_v10 = vshll.u32 %v409_v53, 16  ;;  %v493_v12 = vsel %vm10929_vm5, %v485_v62, %v492_v63  ;;  %v1009_v14 = vunpack.c.l.b16 %v484_v8  ;;  %v386_v17 = vld [vmem:[#allocation2 + $0x4c] sm:$0x8]  ;;  %v411_v34 = vld [vmem:[#allocation2 + $0x110] sm:$0xf] }
  0x52   : > { %v9864_v15 = vrot.slane %v649_v1, 11  ;;  %v659_v16 = vor.u32 %v657_v5, %v656_v4  ;;  %v500_v18 = vshrl.u32 %v387_v11, 16  ;;  %v1010_v19 = vunpack.c.l.b16 %v493_v12  ;;  %v412_v35 = vld [vmem:[#allocation2 + $0x114] sm:$0xf]  ;;  %v234_v38 = vld [vmem:[%s10909_s6 + $0x20] sm:$0xf] }
  0x53   : > { %9937 = vmatmul.msk.bf16.gmra.mxu0 %vm863_vm2, %v10644_v44  ;;  %v661_v20 = vrot.slane %v656_v4, 4  ;;  %v668_v21 = vor.u32 %v666_v10, %v665_v9  ;;  %v509_v22 = vshrl.u32 %v388_v13, 16  ;;  %v495_v24 = vshrl.u32 %v386_v17, 16  ;;  %v410_v41 = vld [vmem:[#allocation2 + $0x10c] sm:$0x8]  ;;  %v10653_v4 = vld [vmem:[#allocation2 + $0x110] sm:$0xff] }
  0x54   : > { %v660_v25 = vsel %vm10929_vm5, %v9864_v15, %v659_v16  ;;  %v502_v28 = vrot.slane %v500_v18, 7  ;;  %v503_v29 = vshll.u32 %v387_v11, 16  ;;  %v1039_v30 = vpack.c.b16 %v1010_v19, %v1009_v14  ;;  %v235_v44 = vld [vmem:[%s10909_s6 + $0x24] sm:$0xf]  ;;  %353 = vst.msk [vmem:[#allocation2 + $0x80] sm:$0xf] %vm258_vm1, %v234_v38 }
  0x55   : > { %9952 = vmatmul.msk.bf16.gmra.mxu1 %vm863_vm2, %v1038_v46  ;;  %v669_v31 = vsel %vm10929_vm5, %v661_v20, %v668_v21  ;;  %v511_v32 = vrot.slane %v509_v22, 7  ;;  %v512_v33 = vshll.u32 %v388_v13, 16  ;;  %v1025_v36 = vunpack.c.l.b16 %v660_v25  ;;  %354 = vst.msk [vmem:[#allocation2 + $0x84] sm:$0xf] %vm258_vm1, %v235_v44  ;;  %v250_v54 = vld [vmem:[%s10909_s6 + $0x60] sm:$0xf] }
  0x56   : > { %v9857_v37 = vrot.slane %v495_v24, 11  ;;  %v1026_v39 = vunpack.c.l.b16 %v669_v31  ;;  %v505_v40 = vor.u32 %v503_v29, %v502_v28  ;;  %v676_v42 = vshrl.u32 %v411_v34, 16  ;;  %v251_v55 = vld [vmem:[%s10909_s6 + $0x64] sm:$0xf]  ;;  %369 = vst.msk [vmem:[#allocation2 + $0x140] sm:$0xf] %vm258_vm1, %v250_v54 }
  0x57   : > { %v685_v43 = vshrl.u32 %v412_v35, 16  ;;  %v507_v45 = vrot.slane %v502_v28, 4  ;;  %v514_v46 = vor.u32 %v512_v33, %v511_v32  ;;  %v671_v47 = vshrl.u32 %v410_v41, 16  ;;  %v390_v57 = vld [vmem:[#allocation2 + $0x68] sm:$0xf] }
  0x58   : > { %v679_v48 = vshll.u32 %v411_v34, 16  ;;  %v688_v49 = vshll.u32 %v412_v35, 16  ;;  %v1047_v50 = vpack.c.b16 %v1026_v39, %v1025_v36  ;;  %v506_v51 = vsel %vm10929_vm5, %v9857_v37, %v505_v40  ;;  %v391_v58 = vld [vmem:[#allocation2 + $0x6c] sm:$0xf]  ;;  %370 = vst.msk [vmem:[#allocation2 + $0x144] sm:$0xf] %vm258_vm1, %v251_v55 }
  0x59   : > { %v678_v52 = vrot.slane %v676_v42, 7  ;;  %v687_v53 = vrot.slane %v685_v43, 7  ;;  %v515_v56 = vsel %vm10929_vm5, %v507_v45, %v514_v46  ;;  %v1011_v59 = vunpack.c.l.b16 %v506_v51  ;;  %v389_v5 = vld [vmem:[#allocation2 + $0x64] sm:$0x8]  ;;  %v10646_v9 = vld [vmem:[#allocation2 + $0x68] sm:$0xff] }
  0x5a   : > { %v9865_v60 = vrot.slane %v671_v47, 11  ;;  %v1012_v61 = vunpack.c.l.b16 %v515_v56  ;;  %v522_v1 = vshrl.u32 %v390_v57, 16  ;;  %v525_v10 = vshll.u32 %v390_v57, 16  ;;  %v414_v11 = vld [vmem:[#allocation2 + $0x128] sm:$0xf] }
  0x5b   : > { %v681_v62 = vor.u32 %v679_v48, %v678_v52  ;;  %v683_v63 = vrot.slane %v678_v52, 4  ;;  %v690_v0 = vor.u32 %v688_v49, %v687_v53  ;;  %v517_v12 = vshrl.u32 %v389_v5, 16  ;;  %v415_v16 = vld [vmem:[#allocation2 + $0x12c] sm:$0xf]  ;;  %v236_v18 = vld [vmem:[%s10909_s6 + $0x28] sm:$0xf] }
  0x5c   : > { %v1040_v6 = vpack.c.b16 %v1012_v61, %v1011_v59  ;;  %v524_v13 = vrot.slane %v522_v1, 7  ;;  %v534_v15 = vshll.u32 %v391_v58, 16  ;;  %v698_v17 = vshrl.u32 %v414_v11, 16  ;;  %v413_v21 = vld [vmem:[#allocation2 + $0x124] sm:$0x8]  ;;  %v10654_v49 = vld [vmem:[#allocation2 + $0x128] sm:$0xff] }
  0x5d   : > { %9960 = vmatmul.msk.bf16.gmra.mxu3 %vm863_vm2, %v1046_v3  ;;  %v531_v3 = vshrl.u32 %v391_v58, 16  ;;  %v682_v7 = vsel %vm10929_vm5, %v9865_v60, %v681_v62  ;;  %v691_v8 = vsel %vm10929_vm5, %v683_v63, %v690_v0  ;;  %v707_v22 = vshrl.u32 %v415_v16, 16  ;;  %355 = vst.msk [vmem:[#allocation2 + $0x98] sm:$0xf] %vm258_vm1, %v236_v18  ;;  %v252_v35 = vld [vmem:[%s10909_s6 + $0x68] sm:$0xf] }
  0x5e   : > { %v1027_v19 = vunpack.c.l.b16 %v682_v7  ;;  %v1028_v20 = vunpack.c.l.b16 %v691_v8  ;;  %v9858_v24 = vrot.slane %v517_v12, 11  ;;  %v527_v25 = vor.u32 %v525_v10, %v524_v13  ;;  %v253_v36 = vld [vmem:[%s10909_s6 + $0x6c] sm:$0xf]  ;;  %371 = vst.msk [vmem:[#allocation2 + $0x158] sm:$0xf] %vm258_vm1, %v252_v35  ;;  %v10647_v54 = vld [vmem:[#allocation2 + $0x80] sm:$0xff] }
  0x5f   : > { %v533_v14 = vrot.slane %v531_v3, 7  ;;  %v693_v29 = vshrl.u32 %v413_v21, 16  ;;  %v701_v31 = vshll.u32 %v414_v11, 16  ;;  %v709_v33 = vrot.slane %v707_v22, 7  ;;  %v393_v39 = vld [vmem:[#allocation2 + $0x80] sm:$0xf] }
  0x60   : > { %v1048_v32 = vpack.c.b16 %v1028_v20, %v1027_v19  ;;  %v710_v34 = vshll.u32 %v415_v16, 16  ;;  %v528_v37 = vsel %vm10929_vm5, %v9858_v24, %v527_v25  ;;  %v394_v40 = vld [vmem:[#allocation2 + $0x84] sm:$0xf]  ;;  %372 = vst.msk [vmem:[#allocation2 + $0x15c] sm:$0xf] %vm258_vm1, %v253_v36  ;;  %v544_v47 = vshrl.u32 %v393_v39, 16 }
  0x61   : > { %9945 = vmatmul.msk.bf16.gmra.mxu2 %vm863_vm2, %v10652_v23  ;;  %v237_v23 = vld [vmem:[%s10909_s6 + $0x2c] sm:$0xf]  ;;  %v536_v28 = vor.u32 %v534_v15, %v533_v14  ;;  %v9866_v41 = vrot.slane %v693_v29, 11  ;;  %v1013_v43 = vunpack.c.l.b16 %v528_v37  ;;  %v553_v48 = vshrl.u32 %v394_v40, 16  ;;  %v417_v56 = vld [vmem:[#allocation2 + $0x140] sm:$0xf] }
  0x62   : > { %356 = vst.msk [vmem:[#allocation2 + $0x9c] sm:$0xf] %vm258_vm1, %v237_v23  ;;  %v712_v46 = vor.u32 %v710_v34, %v709_v33  ;;  %v547_v55 = vshll.u32 %v393_v39, 16  ;;  %v546_v58 = vrot.slane %v544_v47, 7  ;;  %v556_v60 = vshll.u32 %v394_v40, 16 }
  0x63   : > { %9938 = vmatmul.msk.bf16.gmra.mxu0 %vm863_vm2, %v10645_v26  ;;  %v529_v26 = vrot.slane %v524_v13, 4  ;;  %v555_v59 = vrot.slane %v553_v48, 7  ;;  %v418_v61 = vld [vmem:[#allocation2 + $0x144] sm:$0xf]  ;;  %v720_v62 = vshrl.u32 %v417_v56, 16  ;;  %v723_v12 = vshll.u32 %v417_v56, 16 }
  0x64   : > { %v238_v63 = vld [vmem:[%s10909_s6 + $0x30] sm:$0xf]  ;;  %v416_v3 = vld [vmem:[#allocation2 + $0x13c] sm:$0x8]  ;;  %v239_v5 = vld [vmem:[%s10909_s6 + $0x34] sm:$0xf]  ;;  %v549_v7 = vor.u32 %v547_v55, %v546_v58 }
  0x65   : > { %9953 = vmatmul.msk.bf16.gmra.mxu1 %vm863_vm2, %v1039_v30  ;;  %v700_v30 = vrot.slane %v698_v17, 7  ;;  %v537_v38 = vsel %vm10929_vm5, %v529_v26, %v536_v28  ;;  %v551_v8 = vrot.slane %v546_v58, 4  ;;  %357 = vst.msk [vmem:[#allocation2 + $0xb0] sm:$0xf] %vm258_vm1, %v238_v63  ;;  %v715_v10 = vshrl.u32 %v416_v3, 16 }
  0x66   : > { %v1014_v44 = vunpack.c.l.b16 %v537_v38  ;;  %358 = vst.msk [vmem:[#allocation2 + $0xb4] sm:$0xf] %vm258_vm1, %v239_v5  ;;  %v722_v11 = vrot.slane %v720_v62, 7  ;;  %v732_v15 = vshll.u32 %v418_v61, 16  ;;  %v254_v16 = vld [vmem:[%s10909_s6 + $0x70] sm:$0xf] }
  0x67   : > { %v703_v42 = vor.u32 %v701_v31, %v700_v30  ;;  %v705_v45 = vrot.slane %v700_v30, 4  ;;  %v255_v17 = vld [vmem:[%s10909_s6 + $0x74] sm:$0xf]  ;;  %373 = vst.msk [vmem:[#allocation2 + $0x170] sm:$0xf] %vm258_vm1, %v254_v16  ;;  %v9867_v22 = vrot.slane %v715_v10, 11 }
  0x68   : > { %v1041_v51 = vpack.c.b16 %v1014_v44, %v1013_v43  ;;  %v396_v20 = vld [vmem:[#allocation2 + $0x98] sm:$0xf]  ;;  %374 = vst.msk [vmem:[#allocation2 + $0x174] sm:$0xf] %vm258_vm1, %v255_v17  ;;  %v725_v23 = vor.u32 %v723_v12, %v722_v11  ;;  %v727_v26 = vrot.slane %v722_v11, 4 }
  0x69   : > { %v704_v52 = vsel %vm10929_vm5, %v9866_v41, %v703_v42  ;;  %v713_v53 = vsel %vm10929_vm5, %v705_v45, %v712_v46  ;;  %v397_v21 = vld [vmem:[#allocation2 + $0x9c] sm:$0xf]  ;;  %v566_v29 = vshrl.u32 %v396_v20, 16  ;;  %v420_v31 = vld [vmem:[#allocation2 + $0x158] sm:$0xf]  ;;  %v569_v39 = vshll.u32 %v396_v20, 16 }
  0x6a   : > { %v1029_v0 = vunpack.c.l.b16 %v704_v52  ;;  %v1030_v1 = vunpack.c.l.b16 %v713_v53  ;;  %v575_v30 = vshrl.u32 %v397_v21, 16  ;;  %v395_v33 = vld [vmem:[#allocation2 + $0x94] sm:$0x8]  ;;  %v726_v34 = vsel %vm10929_vm5, %v9867_v22, %v725_v23  ;;  %v421_v35 = vld [vmem:[#allocation2 + $0x15c] sm:$0xf] }
  0x6b   : > { %v10648_v38 = vld [vmem:[#allocation2 + $0x98] sm:$0xff]  ;;  %v742_v40 = vshrl.u32 %v420_v31, 16  ;;  %v561_v41 = vshrl.u32 %v395_v33, 16  ;;  %v568_v42 = vrot.slane %v566_v29, 7  ;;  %v578_v44 = vshll.u32 %v397_v21, 16 }
  0x6c   : > { %v1049_v13 = vpack.c.b16 %v1030_v1, %v1029_v0  ;;  %v577_v43 = vrot.slane %v575_v30, 7  ;;  %v419_v45 = vld [vmem:[#allocation2 + $0x154] sm:$0x8]  ;;  %v751_v46 = vshrl.u32 %v421_v35, 16  ;;  %v1031_v47 = vunpack.c.l.b16 %v726_v34  ;;  %v399_v58 = vld [vmem:[#allocation2 + $0xb0] sm:$0xf] }
  0x6d   : > { %9961 = vmatmul.msk.bf16.gmra.mxu3 %vm863_vm2, %v1047_v50  ;;  %v392_v50 = vld [vmem:[#allocation2 + $0x7c] sm:$0x8]  ;;  %v9860_v52 = vrot.slane %v561_v41, 11  ;;  %v571_v53 = vor.u32 %v569_v39, %v568_v42  ;;  %v588_v1 = vshrl.u32 %v399_v58, 16  ;;  %v398_v5 = vld [vmem:[#allocation2 + $0xac] sm:$0x8] }
  0x6e   : > { %v539_v57 = vshrl.u32 %v392_v50, 16  ;;  %v744_v50 = vrot.slane %v742_v40, 7  ;;  %v580_v55 = vor.u32 %v578_v44, %v577_v43  ;;  %v753_v56 = vrot.slane %v751_v46, 7  ;;  %v1193_v10 = vld [vmem:[#allocation2 + $0x8] sm:$0xf]  ;;  %v10656_v17 = vld [vmem:[#allocation2 + $0x158] sm:$0xff] }
  0x6f   : > { %v572_v62 = vsel %vm10929_vm5, %v9860_v52, %v571_v53  ;;  %v1194_v11 = vld [vmem:[#allocation2 + $0xc] sm:$0xf]  ;;  %v424_v16 = vld [vmem:[#allocation2 + $0x174] sm:$0xf]  ;;  %v1245_v23 = vshrl.u32 %v1193_v10, 16 }
  0x70   : > { %v749_v3 = vrot.slane %v744_v50, 4  ;;  %v422_v21 = vld [vmem:[#allocation2 + $0x16c] sm:$0x8]  ;;  %v10649_v29 = vld [vmem:[#allocation2 + $0xb0] sm:$0xff]  ;;  %v773_v30 = vshrl.u32 %v424_v16, 16 }
  0x71   : > { %9946 = vmatmul.msk.bf16.gmra.mxu2 %vm863_vm2, %v10653_v4  ;;  %v729_v4 = vshrl.u32 %v418_v61, 16  ;;  %v759_v34 = vshrl.u32 %v422_v21, 16  ;;  %v1247_v39 = vrot.slane %v1245_v23, 4  ;;  %v1195_v46 = vld [vmem:[#allocation2 + $0x10] sm:$0x1] }
  0x72   : > { %v775_v44 = vrot.slane %v773_v30, 7 }
  0x73   : > { %9939 = vmatmul.msk.bf16.gmra.mxu0 %vm863_vm2, %v10646_v9  ;;  %v558_v9 = vor.u32 %v556_v60, %v555_v59  ;;  %v731_v14 = vrot.slane %v729_v4, 7  ;;  %v400_v59 = vld [vmem:[#allocation2 + $0xb4] sm:$0xf] }
  0x74   : > { %v600_v20 = vshll.u32 %v400_v59, 16 }
  0x75   : > { %9954 = vmatmul.msk.bf16.gmra.mxu1 %vm863_vm2, %v1040_v6  ;;  %v9859_v6 = vrot.slane %v539_v57, 11  ;;  %v559_v19 = vsel %vm10929_vm5, %v551_v8, %v558_v9  ;;  %v734_v28 = vor.u32 %v732_v15, %v731_v14  ;;  %v754_v57 = vshll.u32 %v421_v35, 16 }
  0x76   : > { %v1016_v25 = vunpack.c.l.b16 %v559_v19  ;;  %v1017_v8 = vunpack.c.l.b16 %v572_v62  ;;  %v590_v14 = vrot.slane %v588_v1, 7  ;;  %v591_v15 = vshll.u32 %v399_v58, 16  ;;  %v11081_v62 = vld [vmem:[#allocation2 + $0x20] sm:$0xf] }
  0x77   : > { %v550_v18 = vsel %vm10929_vm5, %v9859_v6, %v549_v7  ;;  %v735_v37 = vsel %vm10929_vm5, %v727_v26, %v734_v28  ;;  %v756_v4 = vor.u32 %v754_v57, %v753_v56  ;;  %v597_v6 = vshrl.u32 %v400_v59, 16  ;;  %v423_v7 = vld [vmem:[#allocation2 + $0x170] sm:$0xf] }
  0x78   : > { %v1015_v24 = vunpack.c.l.b16 %v550_v18  ;;  %v1032_v48 = vunpack.c.l.b16 %v735_v37  ;;  %v764_v22 = vshrl.u32 %v423_v7, 16  ;;  %v1258_v26 = vshrl.u32 %v1194_v11, 16 }
  0x79   : > { %v757_v18 = vsel %vm10929_vm5, %v749_v3, %v756_v4  ;;  %v599_v19 = vrot.slane %v597_v6, 7  ;;  %v593_v33 = vor.u32 %v591_v15, %v590_v14  ;;  %v767_v43 = vshll.u32 %v423_v7, 16 }
  0x7a   : > { %v1042_v36 = vpack.c.b16 %v1016_v25, %v1015_v24  ;;  %v1050_v60 = vpack.c.b16 %v1032_v48, %v1031_v47  ;;  %v1248_v24 = vshll.u32 %v1193_v10, 16  ;;  %v1254_v25 = vshll.u32 %v1194_v11, 16 }
  0x7b   : > { %v1034_v35 = vunpack.c.l.b16 %v757_v18  ;;  %v602_v37 = vor.u32 %v600_v20, %v599_v19  ;;  %v9869_v48 = vrot.slane %v759_v34, 11  ;;  %v1264_v58 = vshll.u32 %v1195_v46, 16  ;;  %v10148_v18 = vld [vmem:[%s14136_s1 + $0xe] sm:$0x3]  ;;  %v2728_v19 = vld [vmem:[#allocation2 + $0x28] sm:$0x1] }
  0x7c   : > { %v1250_v40 = vrot.slane %v1248_v24, 5  ;;  %v11068_v41 = vrot.slane %v1254_v25, 5  ;;  %v4134_v23 = vsel %vm912_vm0, %v10148_v18, 0 }
  0x7d   : > { %9962 = vmatmul.msk.bf16.gmra.mxu3 %vm863_vm2, %v1048_v32  ;;  %v10655_v32 = vld [vmem:[#allocation2 + $0x140] sm:$0xff] }
  0x7e   : > { %v1251_v56 = vor.u32 %v1250_v40, %v1247_v39  ;;  %4143 = vmatpush.bf16.msra.mxu3 %v4134_v23  ;;  %v10658_v40 = vld [vmem:[#allocation2 + $0x20] sm:$0xff]  ;;  %v2729_v23 = vld [vmem:[#allocation2 + $0x38] sm:$0xf] }
  0x80   : > { %v1252_v10 = vrot.slane %v1251_v56, 4 }
  0x81   : > { %9947 = vmatmul.msk.bf16.gmra.mxu2 %vm863_vm2, %v10654_v49  ;;  %v737_v49 = vshrl.u32 %v419_v45, 16  ;;  %v776_v45 = vshll.u32 %v424_v16, 16 }
  0x83   : > { %9940 = vmatmul.msk.bf16.gmra.mxu0 %vm863_vm2, %v10647_v54  ;;  %v573_v54 = vrot.slane %v568_v42, 4  ;;  %v9868_v61 = vrot.slane %v737_v49, 11  ;;  %v1260_v42 = vrot.slane %v1258_v26, 4  ;;  %v10131_v49 = vld [vmem:[%s14136_s1 + $0xc] sm:$0x3] }
  0x84   : > { %v3880_v53 = vsel %vm912_vm0, %v10131_v49, 0 }
  0x85   : > { %9955 = vmatmul.msk.bf16.gmra.mxu1 %vm863_vm2, %v1041_v51  ;;  %v745_v51 = vshll.u32 %v420_v31, 16  ;;  %v581_v63 = vsel %vm10929_vm5, %v573_v54, %v580_v55  ;;  %v1196_v54 = vld [vmem:[#allocation2 + $0x20] sm:$0xf]  ;;  %v1197_v55 = vld [vmem:[#allocation2 + $0x24] sm:$0xf]  ;;  %v1261_v57 = vor.u32 %v1260_v42, %v11068_v41  ;;  %3889 = vmatpush.bf16.msra.mxu2 %v3880_v53 }
  0x86   : > { %v1018_v9 = vunpack.c.l.b16 %v581_v63  ;;  %v2726_v63 = vld [vmem:[#allocation2 + $0x20] sm:$0xf]  ;;  %v1269_v1 = vshrl.u32 %v1196_v54, 16  ;;  %v1272_v3 = vshll.u32 %v1196_v54, 16  ;;  %v1278_v4 = vshll.u32 %v1197_v55, 16 }
  0x87   : > { %v747_v0 = vor.u32 %v745_v51, %v744_v50  ;;  %v1282_v6 = vshrl.u32 %v1197_v55, 16  ;;  %v2775_v7 = vshrl.u32 %v2726_v63, 16  ;;  %v1262_v11 = vrot.slane %v1261_v57, 4  ;;  %v11126_v57 = vld [vmem:[#allocation2 + $0x38] sm:$0xf] }
  0x88   : > { %v1043_v31 = vpack.c.b16 %v1018_v9, %v1017_v8  ;;  %v2778_v8 = vshll.u32 %v2726_v63, 16  ;;  %v1271_v24 = vrot.slane %v1269_v1, 4  ;;  %v1274_v30 = vrot.slane %v1272_v3, 5  ;;  %v1199_v1 = vld [vmem:[#allocation2 + $0x38] sm:$0xf] }
  0x89   : > { %v748_v12 = vsel %vm10929_vm5, %v9868_v61, %v747_v0  ;;  %v778_v61 = vor.u32 %v776_v45, %v775_v44  ;;  %v2777_v20 = vrot.slane %v2775_v7, 4  ;;  %v1257_v44 = vsel %vm11101_vm8, %v1252_v10, %v11068_v41  ;;  %v10229_v41 = vld [vmem:[%s14136_s1 + $0x10] sm:$0x3]  ;;  %v1200_v3 = vld [vmem:[#allocation2 + $0x3c] sm:$0xf] }
  0x8a   : > { %v1033_v28 = vunpack.c.l.b16 %v748_v12  ;;  %v1266_v12 = vrot.slane %v1264_v58, 5  ;;  %v2780_v25 = vrot.slane %v2778_v8, 5  ;;  %v1275_v49 = vor.u32 %v1274_v30, %v1271_v24  ;;  %v1853_v7 = vld [vmem:[#allocation2 + $0x34] sm:$0x8]  ;;  %v11135_v8 = vld [vmem:[#allocation2 + $0x3c] sm:$0xf] }
  0x8b   : > { %v4788_v53 = vsel %vm912_vm0, %v10229_v41, 0  ;;  %v1907_v58 = vshll.u32 %v11081_v62, 16  ;;  %v2730_v24 = vld [vmem:[#allocation2 + $0x3c] sm:$0xf]  ;;  %v2799_v30 = vshrl.u32 %v2729_v23, 16 }
  0x8c   : > { %v1051_v50 = vpack.c.b16 %v1034_v35, %v1033_v28  ;;  %v1198_v35 = vld [vmem:[#allocation2 + $0x28] sm:$0x1]  ;;  %v1267_v45 = vsel %vm11101_vm8, %v1262_v11, %v1266_v12  ;;  %4797 = vmatpush.bf16.msra.mxu0 %v4788_v53  ;;  %v1276_v10 = vrot.slane %v1275_v49, 4  ;;  %v1938_v53 = vshll.u32 %v11135_v8, 16 }
  0x8d   : > { %9963 = vmatmul.msk.bf16.gmra.mxu3 %vm863_vm2, %v1049_v13  ;;  %v583_v13 = vshrl.u32 %v398_v5, 16  ;;  %v2727_v5 = vld [vmem:[#allocation2 + $0x24] sm:$0xf] }
  0x8e   : > { %v2784_v9 = vshll.u32 %v2727_v5, 16 }
  0x90   : > { %v11097_v26 = vrot.slane %v2784_v9, 5 }
  0x91   : > { %9948 = vmatmul.msk.bf16.gmra.mxu2 %vm863_vm2, %v10655_v32  ;;  %v9861_v32 = vrot.slane %v583_v13, 11  ;;  %v2788_v13 = vshrl.u32 %v2727_v5, 16  ;;  %v1631_v5 = vunpack.c.l.b16 %v1267_v45 }
  0x92   : > { %v11092_v21 = vpop.f32.mrf.mxu0 }
  0x93   : > { %9941 = vmatmul.msk.bf16.gmra.mxu0 %vm863_vm2, %v10648_v38  ;;  %v766_v38 = vrot.slane %v764_v22, 7  ;;  %v594_v47 = vsel %vm10929_vm5, %v9861_v32, %v593_v33  ;;  %v11094_v22 = vld [vmem:[#allocation2 + $0x24] sm:$0xf]  ;;  %v1284_v32 = vrot.slane %v1282_v6, 4  ;;  %v2790_v33 = vrot.slane %v2788_v13, 4 }
  0x94   : > { %v1019_v59 = vunpack.c.l.b16 %v594_v47  ;;  %v1913_v42 = vshrl.u32 %v11094_v22, 16 }
  0x95   : > { %9956 = vmatmul.msk.bf16.gmra.mxu1 %vm863_vm2, %v1042_v36  ;;  %v595_v36 = vrot.slane %v590_v14, 4  ;;  %v771_v52 = vrot.slane %v766_v38, 4  ;;  %v10657_v14 = vld [vmem:[#allocation2 + $0x170] sm:$0xff] }
  0x97   : > { %v603_v51 = vsel %vm10929_vm5, %v595_v36, %v602_v37  ;;  %v779_v16 = vsel %vm10929_vm5, %v771_v52, %v778_v61  ;;  %v2781_v36 = vor.u32 %v2780_v25, %v2777_v20  ;;  %v2794_v37 = vshll.u32 %v2728_v19, 16 }
  0x98   : > { %v1020_v0 = vunpack.c.l.b16 %v603_v51  ;;  %v1036_v39 = vunpack.c.l.b16 %v779_v16  ;;  %v1288_v51 = vshll.u32 %v1198_v35, 16  ;;  %v1302_v16 = vshll.u32 %v1200_v3, 16 }
  0x99   : > { %v2782_v54 = vrot.slane %v2781_v36, 4  ;;  %v2796_v56 = vrot.slane %v2794_v37, 5  ;;  %v1921_v20 = vshrl.u32 %v1853_v7, 16  ;;  %v2812_v35 = vshrl.u32 %v2730_v24, 16 }
  0x9a   : > { %v1290_v6 = vrot.slane %v1288_v51, 5  ;;  %v11138_v9 = vpop.f32.mrf.mxu0 }
  0x9b   : > { %v2787_v12 = vsel %vm11101_vm8, %v2782_v54, %v11097_v26  ;;  %v2814_v45 = vrot.slane %v2812_v35, 4  ;;  %v10659_v54 = vld [vmem:[#allocation2 + $0x38] sm:$0xff]  ;;  %v2733_v35 = vld [vmem:[#allocation2 + $0x54] sm:$0xf] }
  0x9c   : > { %v3160_v25 = vunpack.c.l.b16 %v2787_v12 }
  0x9d   : > { %9964 = vmatmul.msk.bf16.gmra.mxu3 %vm863_vm2, %v1050_v60  ;;  %v769_v60 = vor.u32 %v767_v43, %v766_v38  ;;  %v1044_v38 = vpack.c.b16 %v1020_v0, %v1019_v59  ;;  %v2791_v43 = vor.u32 %v2790_v33, %v11097_v26  ;;  %v1915_v59 = vrot.slane %v1913_v42, 7 }
  0x9e   : > { %v1929_v33 = vshll.u32 %v11126_v57, 16  ;;  %v2801_v42 = vrot.slane %v2799_v30, 4 }
  0x9f   : > { %v770_v15 = vsel %vm10929_vm5, %v9869_v48, %v769_v60  ;;  %v10098_v48 = vld [vmem:[%s14136_s1 + $0xa] sm:$0x3]  ;;  %v2792_v55 = vrot.slane %v2791_v43, 4  ;;  %v1916_v60 = vshll.u32 %v11094_v22, 16  ;;  %v1935_v22 = vshrl.u32 %v11135_v8, 16 }
  0xa0   : > { %v1035_v34 = vunpack.c.l.b16 %v770_v15  ;;  %v3257_v52 = vsel %vm912_vm0, %v10098_v48, 0  ;;  %v1296_v15 = vshll.u32 %v1199_v1, 16 }
  0xa1   : > { %9949 = vmatmul.msk.bf16.gmra.mxu2 %vm863_vm2, %v10656_v17  ;;  %v1904_v17 = vshrl.u32 %v11081_v62, 16  ;;  %3266 = vmatpush.bf16.msrb.mxu1 %v3257_v52  ;;  %v1926_v62 = vshrl.u32 %v11126_v57, 16  ;;  %v2797_v13 = vsel %vm11101_vm8, %v2792_v55, %v2796_v56  ;;  %v1918_v19 = vor.u32 %v1916_v60, %v1915_v59 }
  0xa2   : > { %v1052_v61 = vpack.c.b16 %v1036_v39, %v1035_v34  ;;  %v3161_v26 = vunpack.c.l.b16 %v2797_v13  ;;  %v2808_v34 = vshll.u32 %v2730_v24, 16  ;;  %v1298_v37 = vrot.slane %v1296_v15, 5  ;;  %v1203_v24 = vld [vmem:[#allocation2 + $0x54] sm:$0xf] }
  0xa3   : > { %9942 = vmatmul.msk.bf16.gmra.mxu0 %vm863_vm2, %v10649_v29  ;;  %v1850_v29 = vld [vmem:[#allocation2 + $0x1c] sm:$0x8]  ;;  %v11114_v47 = vrot.slane %v1904_v17, 7  ;;  %v1306_v17 = vshrl.u32 %v1200_v3, 16  ;;  %v9985_v52 = vrot.slane %v1921_v20, 11  ;;  %v1937_v41 = vrot.slane %v1935_v22, 7 }
  0xa4   : > { %v1899_v46 = vshrl.u32 %v1850_v29, 16  ;;  %v1928_v29 = vrot.slane %v1926_v62, 7  ;;  %v3192_v55 = vpack.c.b16 %v3161_v26, %v3160_v25  ;;  %v2732_v25 = vld [vmem:[#allocation2 + $0x50] sm:$0xf] }
  0xa5   : > { %9957 = vmatmul.msk.bf16.gmra.mxu1 %vm863_vm2, %v1043_v31  ;;  %v11105_v31 = vrot.slane %v1278_v4, 5  ;;  %v1911_v0 = vrot.slane %v11114_v47, 4  ;;  %v1630_v4 = vunpack.c.l.b16 %v1257_v44  ;;  %v1909_v18 = vor.u32 %v1907_v58, %v11114_v47 }
  0xa6   : > { %v11132_v63 = vrot.slane %v1899_v46, 11  ;;  %v1308_v39 = vrot.slane %v1306_v17, 4  ;;  %v11151_v44 = vrot.slane %v2808_v34, 5  ;;  %v1931_v56 = vor.u32 %v1929_v33, %v1928_v29  ;;  %v11200_v33 = vld [vmem:[#allocation2 + $0x54] sm:$0xf] }
  0xa7   : > { %v1662_v46 = vpack.c.b16 %v1631_v5, %v1630_v4  ;;  %v1919_v48 = vsel %vm10929_vm5, %v1911_v0, %v1918_v19  ;;  %v1281_v49 = vsel %vm11101_vm8, %v1276_v10, %v11105_v31  ;;  %v1933_v7 = vrot.slane %v1928_v29, 4 }
  0xa8   : > { %v1910_v47 = vsel %vm10929_vm5, %v11132_v63, %v1909_v18  ;;  %v2253_v3 = vunpack.c.l.b16 %v1919_v48  ;;  %v11172_v5 = vunpack.c.l.b16 %v1281_v49  ;;  %v1932_v8 = vsel %vm10929_vm5, %v9985_v52, %v1931_v56  ;;  %v1202_v18 = vld [vmem:[#allocation2 + $0x50] sm:$0xf] }
  0xa9   : > { %v1940_v62 = vor.u32 %v1938_v53, %v1937_v41  ;;  %v11186_v22 = vunpack.c.l.b16 %v1932_v8  ;;  %v1957_v48 = vshrl.u32 %v11200_v33, 16  ;;  %v2734_v53 = vld [vmem:[#allocation2 + $0x58] sm:$0x1] }
  0xaa   : > { %v2842_v8 = vshll.u32 %v2734_v53, 16 }
  0xab   : > { %v11184_v20 = vsel %vm10929_vm5, %v1933_v7, %v1940_v62  ;;  %v1204_v7 = vld [vmem:[#allocation2 + $0x58] sm:$0x1] }
  0xad   : > { %9965 = vmatmul.msk.bf16.gmra.mxu3 %vm863_vm2, %v1051_v50  ;;  %v1285_v50 = vor.u32 %v1284_v32, %v11105_v31  ;;  %v2802_v32 = vshll.u32 %v2729_v23, 16  ;;  %v2815_v31 = vor.u32 %v2814_v45, %v11151_v44  ;;  %v1326_v45 = vshll.u32 %v1203_v24, 16 }
  0xaf   : > { %v1286_v11 = vrot.slane %v1285_v50, 4  ;;  %v2804_v43 = vrot.slane %v2802_v32, 5  ;;  %v2731_v50 = vld [vmem:[#allocation2 + $0x40] sm:$0x1] }
  0xb0   : > { %v2818_v63 = vshll.u32 %v2731_v50, 16 }
  0xb1   : > { %9950 = vmatmul.msk.bf16.gmra.mxu2 %vm863_vm2, %v10657_v14  ;;  %v1293_v14 = vshrl.u32 %v1199_v1, 16  ;;  %v1291_v51 = vsel %vm11101_vm8, %v1286_v11, %v1290_v6  ;;  %v2252_v1 = vunpack.c.l.b16 %v1910_v47  ;;  %v2832_v47 = vshll.u32 %v2733_v35, 16 }
  0xb2   : > { %v11174_v6 = vunpack.c.l.b16 %v1291_v51  ;;  %v2820_v15 = vrot.slane %v2818_v63, 5 }
  0xb3   : > { %10082 = vmatmul.msk.bf16.vlgmr.msrb.gmra.mxu0 %vm863_vm2, %v10658_v40  ;;  %v1295_v36 = vrot.slane %v1293_v14, 4  ;;  %v1201_v40 = vld [vmem:[#allocation2 + $0x40] sm:$0x1]  ;;  %v2284_v17 = vpack.c.b16 %v2253_v3, %v2252_v1  ;;  %v2255_v3 = vunpack.c.l.b16 %v11184_v20 }
  0xb4   : > { %v1312_v58 = vshll.u32 %v1201_v40, 16  ;;  %v1663_v19 = vpack.c.b16 %v11174_v6, %v11172_v5  ;;  %v2823_v40 = vshrl.u32 %v2732_v25, 16  ;;  %v10660_v5 = vld [vmem:[#allocation2 + $0x50] sm:$0xff] }
  0xb5   : > { %9958 = vmatmul.msk.bf16.gmra.mxu1 %vm863_vm2, %v1044_v38  ;;  %v11149_v38 = vrot.slane %v1302_v16, 5  ;;  %v1299_v57 = vor.u32 %v1298_v37, %v1295_v36  ;;  %v1857_v16 = vld [vmem:[#allocation2 + $0x50] sm:$0xf]  ;;  %v1856_v37 = vld [vmem:[#allocation2 + $0x4c] sm:$0x8] }
  0xb6   : > { %v1314_v11 = vrot.slane %v1312_v58, 5  ;;  %v1948_v34 = vshrl.u32 %v1857_v16, 16  ;;  %v2825_v49 = vrot.slane %v2823_v40, 4  ;;  %v1943_v41 = vshrl.u32 %v1856_v37, 16  ;;  %v11239_v37 = vld [vmem:[#allocation2 + $0x6c] sm:$0xf] }
  0xb7   : > { %v1309_v60 = vor.u32 %v1308_v39, %v11149_v38  ;;  %v1300_v10 = vrot.slane %v1299_v57, 4  ;;  %v1320_v39 = vshll.u32 %v1202_v18, 16 }
  0xb8   : > { %v11207_v56 = vrot.slane %v1948_v34, 7 }
  0xb9   : > { %v1310_v13 = vrot.slane %v1309_v60, 4  ;;  %v1305_v23 = vsel %vm11101_vm8, %v1300_v10, %v11149_v38  ;;  %v1317_v38 = vshrl.u32 %v1202_v18, 16 }
  0xba   : > { %v11214_v6 = vunpack.c.l.b16 %v1305_v23 }
  0xbb   : > { %v1315_v30 = vsel %vm11101_vm8, %v1310_v13, %v1314_v11  ;;  %v1319_v57 = vrot.slane %v1317_v38, 4  ;;  %v1959_v13 = vrot.slane %v1957_v48, 7 }
  0xbc   : > { %v11218_v10 = vunpack.c.l.b16 %v1315_v30  ;;  %v2844_v30 = vrot.slane %v2842_v8, 5 }
  0xbd   : > { %9966 = vmatmul.msk.bf16.gmra.mxu3 %vm863_vm2, %v1052_v61  ;;  %v2805_v61 = vor.u32 %v2804_v43, %v2801_v42  ;;  %v2826_v42 = vshll.u32 %v2732_v25, 16  ;;  %v1860_v25 = vld [vmem:[#allocation2 + $0x68] sm:$0xf] }
  0xbe   : > { %v1664_v34 = vpack.c.b16 %v11218_v10, %v11214_v6  ;;  %v1970_v38 = vshrl.u32 %v1860_v25, 16 }
  0xbf   : > { %v2806_v14 = vrot.slane %v2805_v61, 4  ;;  %v2828_v50 = vrot.slane %v2826_v42, 5  ;;  %v1322_v61 = vrot.slane %v1320_v39, 5  ;;  %v1206_v39 = vld [vmem:[#allocation2 + $0x6c] sm:$0xf] }
  0xc0   : > { %v11164_v59 = vpop.f32.mrf.mxu0 }
  0xc1   : > { %9968 = vmatmul.msk.bf16.vlgmr.msrb.gmra.mxu2 %vm863_vm2, %v1662_v46  ;;  %v2811_v32 = vsel %vm11101_vm8, %v2806_v14, %v11151_v44  ;;  %v1330_v46 = vshrl.u32 %v1203_v24, 16  ;;  %v2829_v58 = vor.u32 %v2828_v50, %v2825_v49  ;;  %v1323_v20 = vor.u32 %v1322_v61, %v1319_v57 }
  0xc2   : > { %v1113_v0 = vpop.f32.mrf.mxu1  ;;  %v3162_v44 = vunpack.c.l.b16 %v2811_v32  ;;  %v1336_v24 = vshll.u32 %v1204_v7, 16 }
  0xc3   : > { %v11170_v4 = vadd.f32 %v1113_v0, %v11092_v21  ;;  %10083 = vmatmul.msk.bf16.gmra.mxu0 %vm863_vm2, %v10659_v54  ;;  %v2816_v21 = vrot.slane %v2815_v31, 4  ;;  %v2834_v54 = vrot.slane %v2832_v47, 5  ;;  %v11209_v31 = vrot.slane %v1326_v45, 5  ;;  %v1859_v47 = vld [vmem:[#allocation2 + $0x64] sm:$0x8] }
  0xc4   : > { %v965_v12 = vpop.f32.mrf.mxu2  ;;  %v1332_v63 = vrot.slane %v1330_v46, 4  ;;  %v1324_v42 = vrot.slane %v1323_v20, 4  ;;  %v1338_v46 = vrot.slane %v1336_v24, 5  ;;  %v1207_v24 = vld [vmem:[#allocation2 + $0x70] sm:$0x1] }
  0xc5   : > { %10099 = vmatmul.msk.bf16.vlgmr.msrb.gmra.mxu1 %vm863_vm2, %v3192_v55  ;;  %v2821_v26 = vsel %vm11101_vm8, %v2816_v21, %v2820_v15  ;;  %v2836_v55 = vshrl.u32 %v2733_v35, 16  ;;  %v11221_v15 = vrot.slane %v1943_v41, 11  ;;  %v2736_v41 = vld [vmem:[#allocation2 + $0x6c] sm:$0xf] }
  0xc6   : > { %v3163_v52 = vunpack.c.l.b16 %v2821_v26  ;;  %v1333_v23 = vor.u32 %v1332_v63, %v11209_v31  ;;  %v2285_v26 = vpack.c.b16 %v2255_v3, %v11186_v22  ;;  %v1973_v3 = vshll.u32 %v1860_v25, 16  ;;  %v2737_v25 = vld [vmem:[#allocation2 + $0x70] sm:$0x1] }
  0xc7   : > { %v2838_v0 = vrot.slane %v2836_v55, 4  ;;  %v1979_v55 = vshrl.u32 %v11239_v37, 16 }
  0xc8   : > { %v11191_v29 = vpop.f32.mrf.mxu0  ;;  %v3193_v11 = vpack.c.b16 %v3163_v52, %v3162_v44  ;;  %v1334_v45 = vrot.slane %v1333_v23, 4  ;;  %v2735_v52 = vld [vmem:[#allocation2 + $0x68] sm:$0xf]  ;;  %v1982_v23 = vshll.u32 %v11239_v37, 16  ;;  %v1360_v37 = vshll.u32 %v1207_v24, 16 }
  0xc9   : > { %v2839_v14 = vor.u32 %v2838_v0, %v2834_v54  ;;  %v2847_v61 = vshrl.u32 %v2735_v52, 16  ;;  %v1981_v20 = vrot.slane %v1979_v55, 7 }
  0xca   : > { %v1115_v36 = vpop.f32.mrf.mxu1 }
  0xcb   : > { %v11203_v43 = vadd.f32 %v1115_v36, %v11138_v9  ;;  %v1951_v9 = vshll.u32 %v1857_v16, 16  ;;  %v1960_v16 = vshll.u32 %v11200_v33, 16  ;;  %v1205_v33 = vld [vmem:[#allocation2 + $0x68] sm:$0xf] }
  0xcc   : > { %v967_v51 = vpop.f32.mrf.mxu2  ;;  %v1341_v49 = vshrl.u32 %v1205_v33, 16  ;;  %v1344_v50 = vshll.u32 %v1205_v33, 16 }
  0xcd   : > { %10001 = vmatmul.msk.bf16.vlgmr.msrb.gmra.mxu3 %vm863_vm2, %v2284_v17  ;;  %v2830_v17 = vrot.slane %v2829_v58, 4  ;;  %v1962_v35 = vor.u32 %v1960_v16, %v1959_v13  ;;  %v1965_v58 = vshrl.u32 %v1859_v47, 16  ;;  %v2860_v16 = vshrl.u32 %v2736_v41, 16 }
  0xce   : > { %v1343_v7 = vrot.slane %v1341_v49, 4  ;;  %v1346_v8 = vrot.slane %v1344_v50, 5  ;;  %v1984_v49 = vor.u32 %v1982_v23, %v1981_v20  ;;  %v1862_v20 = vld [vmem:[#allocation2 + $0x7c] sm:$0x8]  ;;  %v1209_v23 = vld [vmem:[#allocation2 + $0x84] sm:$0xf] }
  0xcf   : > { %v2835_v36 = vsel %vm11101_vm8, %v2830_v17, %v2834_v54  ;;  %v1329_v17 = vsel %vm11101_vm8, %v1324_v42, %v11209_v31 }
  0xd0   : > { %v1153_v60 = vpop.f32.mrf.mxu3  ;;  %v11216_v62 = vpop.f32.mrf.mxu0  ;;  %v3164_v54 = vunpack.c.l.b16 %v2835_v36  ;;  %v2862_v36 = vrot.slane %v2860_v16, 4 }
  0xd1   : > { %v11211_v1 = vadd.f32 %v1153_v60, %v965_v12  ;;  %9969 = vmatmul.msk.bf16.gmra.mxu2 %vm863_vm2, %v1663_v19  ;;  %v11224_v12 = vor.u32 %v1951_v9, %v11207_v56  ;;  %v2840_v19 = vrot.slane %v2839_v14, 4  ;;  %v1354_v9 = vshrl.u32 %v1206_v39, 16 }
  0xd2   : > { %v1118_v21 = vpop.f32.mrf.mxu1  ;;  %v1972_v60 = vrot.slane %v1970_v38, 7 }
  0xd3   : > { %v11228_v18 = vadd.f32 %v1118_v21, %v11164_v59  ;;  %10084 = vmatmul.msk.bf16.gmra.mxu0 %vm863_vm2, %v10660_v5  ;;  %v1955_v59 = vrot.slane %v11207_v56, 4  ;;  %v1954_v22 = vsel %vm10929_vm5, %v11221_v15, %v11224_v12  ;;  %v2845_v48 = vsel %vm11101_vm8, %v2840_v19, %v2844_v30 }
  0xd4   : > { %v970_v32 = vpop.f32.mrf.mxu2  ;;  %v1350_v56 = vshll.u32 %v1206_v39, 16  ;;  %v3165_v0 = vunpack.c.l.b16 %v2845_v48  ;;  %v2856_v5 = vshll.u32 %v2736_v41, 16  ;;  %v1356_v15 = vrot.slane %v1354_v9, 4  ;;  %v10661_v39 = vld [vmem:[#allocation2 + $0x68] sm:$0xff] }
  0xd5   : > { %10100 = vmatmul.msk.bf16.gmra.mxu1 %vm863_vm2, %v3193_v11  ;;  %v2849_v11 = vrot.slane %v2847_v61, 4  ;;  %v1339_v30 = vsel %vm11101_vm8, %v1334_v45, %v1338_v46  ;;  %v1975_v33 = vor.u32 %v1973_v3, %v1972_v60  ;;  %v2866_v48 = vshll.u32 %v2737_v25, 16  ;;  %v1208_v3 = vld [vmem:[#allocation2 + $0x80] sm:$0xf] }
  0xd6   : > { %v11256_v21 = vrot.slane %v1350_v56, 5  ;;  %v11258_v12 = vrot.slane %v2856_v5, 5  ;;  %v1977_v46 = vrot.slane %v1972_v60, 4  ;;  %v11281_v41 = vunpack.c.l.b16 %v1329_v17 }
  0xd7   : > { %v1362_v56 = vrot.slane %v1360_v37, 5 }
  0xd8   : > { %v1155_v40 = vpop.f32.mrf.mxu3  ;;  %v11249_v53 = vpop.f32.mrf.mxu0  ;;  %v1357_v31 = vor.u32 %v1356_v15, %v11256_v21  ;;  %v2863_v42 = vor.u32 %v2862_v36, %v11258_v12 }
  0xd9   : > { %v11245_v44 = vadd.f32 %v1155_v40, %v967_v51  ;;  %v2850_v51 = vshll.u32 %v2735_v52, 16 }
  0xda   : > { %v1120_v57 = vpop.f32.mrf.mxu1  ;;  %v2864_v9 = vrot.slane %v2863_v42, 4 }
  0xdb   : > { %v11253_v63 = vadd.f32 %v1120_v57, %v11191_v29  ;;  %v2852_v13 = vrot.slane %v2850_v51, 5  ;;  %v1963_v29 = vsel %vm10929_vm5, %v1955_v59, %v1962_v35  ;;  %v3194_v59 = vpack.c.b16 %v3165_v0, %v3164_v54  ;;  %v11289_v57 = vld [vmem:[#allocation2 + $0x80] sm:$0xf]  ;;  %v11297_v0 = vld [vmem:[#allocation2 + $0x84] sm:$0xf] }
  0xdc   : > { %v972_v14 = vpop.f32.mrf.mxu2  ;;  %v1347_v35 = vor.u32 %v1346_v8, %v1343_v7  ;;  %v2257_v52 = vunpack.c.l.b16 %v1963_v29  ;;  %v11283_v54 = vunpack.c.l.b16 %v1339_v30  ;;  %v2001_v25 = vshrl.u32 %v11297_v0, 16 }
  0xdd   : > { %10002 = vmatmul.msk.bf16.gmra.mxu3 %vm863_vm2, %v2285_v26  ;;  %v9987_v26 = vrot.slane %v1965_v58, 11  ;;  %v2853_v40 = vor.u32 %v2852_v13, %v2849_v11  ;;  %v11293_v58 = vsel %vm10929_vm5, %v1977_v46, %v1984_v49  ;;  %v1992_v11 = vshrl.u32 %v11289_v57, 16  ;;  %v2738_v13 = vld [vmem:[#allocation2 + $0x80] sm:$0xf] }
  0xde   : > { %v1348_v6 = vrot.slane %v1347_v35, 4  ;;  %v1665_v51 = vpack.c.b16 %v11283_v54, %v11281_v41  ;;  %v2259_v16 = vunpack.c.l.b16 %v11293_v58  ;;  %v1368_v30 = vshll.u32 %v1208_v3, 16 }
  0xdf   : > { %v1976_v55 = vsel %vm10929_vm5, %v9987_v26, %v1975_v33  ;;  %v2854_v10 = vrot.slane %v2853_v40, 4  ;;  %v2871_v26 = vshrl.u32 %v2738_v13, 16  ;;  %v1987_v35 = vshrl.u32 %v1862_v20, 16 }
  0xe0   : > { %v1158_v19 = vpop.f32.mrf.mxu3  ;;  %v11270_v47 = vpop.f32.mrf.mxu0  ;;  %v11301_v7 = vunpack.c.l.b16 %v1976_v55  ;;  %v1353_v29 = vsel %vm11101_vm8, %v1348_v6, %v11256_v21  ;;  %v2874_v21 = vshll.u32 %v2738_v13, 16  ;;  %v1374_v40 = vshll.u32 %v1209_v23, 16 }
  0xe1   : > { %v11268_v38 = vadd.f32 %v1158_v19, %v970_v32  ;;  %9970 = vmatmul.msk.bf16.gmra.mxu2 %vm863_vm2, %v1664_v34  ;;  %v2256_v32 = vunpack.c.l.b16 %v1954_v22  ;;  %v1358_v22 = vrot.slane %v1357_v31, 4  ;;  %v2859_v8 = vsel %vm11101_vm8, %v2854_v10, %v11258_v12  ;;  %v2739_v12 = vld [vmem:[#allocation2 + $0x84] sm:$0xf]  ;;  %v2740_v31 = vld [vmem:[#allocation2 + $0x88] sm:$0x1] }
  0xe2   : > { %v1123_v45 = vpop.f32.mrf.mxu1  ;;  %v1365_v19 = vshrl.u32 %v1208_v3, 16  ;;  %v3166_v36 = vunpack.c.l.b16 %v2859_v8  ;;  %v2873_v37 = vrot.slane %v2871_v26, 4  ;;  %v2884_v46 = vshrl.u32 %v2739_v12, 16 }
  0xe3   : > { %14147 = vst [vmem:[#allocation4_spill] sm:$0xff] %v11268_v38  ;;  %v11279_v50 = vadd.f32 %v1123_v45, %v11216_v62  ;;  %10085 = vmatmul.msk.bf16.gmra.mxu0 %vm863_vm2, %v10661_v39  ;;  %v2868_v62 = vrot.slane %v2866_v48, 5  ;;  %v2286_v61 = vpack.c.b16 %v2257_v52, %v2256_v32  ;;  %v2880_v39 = vshll.u32 %v2739_v12, 16 }
  0xe4   : > { %v975_v34 = vpop.f32.mrf.mxu2  ;;  %v1378_v48 = vshrl.u32 %v1209_v23, 16  ;;  %v2876_v45 = vrot.slane %v2874_v21, 5  ;;  %v11322_v49 = vrot.slane %v1992_v11, 7  ;;  %v1367_v52 = vrot.slane %v1365_v19, 4  ;;  %v11342_v23 = vld [vmem:[#allocation2 + $0x98] sm:$0xf] }
  0xe5   : > { %10101 = vmatmul.msk.bf16.gmra.mxu1 %vm863_vm2, %v3194_v59  ;;  %v2869_v17 = vsel %vm11101_vm8, %v2864_v9, %v2868_v62  ;;  %v2882_v32 = vrot.slane %v2880_v39, 5  ;;  %v1370_v41 = vrot.slane %v1368_v30, 5  ;;  %v11325_v55 = vunpack.c.l.b16 %v1353_v29  ;;  %v10662_v9 = vld [vmem:[#allocation2 + $0x80] sm:$0xff]  ;;  %v1867_v19 = vld [vmem:[#allocation2 + $0x9c] sm:$0xf] }
  0xe6   : > { %v3167_v59 = vunpack.c.l.b16 %v2869_v17  ;;  %v2877_v6 = vor.u32 %v2876_v45, %v2873_v37  ;;  %v2886_v10 = vrot.slane %v2884_v46, 4  ;;  %v2003_v58 = vrot.slane %v2001_v25, 7 }
  0xe7   : > { %v11334_v8 = vrot.slane %v1374_v40, 5  ;;  %v1380_v11 = vrot.slane %v1378_v48, 4  ;;  %v11337_v17 = vrot.slane %v1987_v35, 11  ;;  %v2287_v30 = vpack.c.b16 %v2259_v16, %v11301_v7  ;;  %v1865_v40 = vld [vmem:[#allocation2 + $0x94] sm:$0x8] }
  0xe8   : > { %v1160_v60 = vpop.f32.mrf.mxu3  ;;  %v11307_v15 = vpop.f32.mrf.mxu0  ;;  %v2887_v13 = vor.u32 %v2886_v10, %v2882_v32  ;;  %v2878_v20 = vrot.slane %v2877_v6, 4  ;;  %v1999_v21 = vrot.slane %v11322_v49, 4  ;;  %v2014_v39 = vshrl.u32 %v11342_v23, 16  ;;  %v2741_v6 = vld [vmem:[#allocation2 + $0x98] sm:$0xf] }
  0xe9   : > { %v11299_v5 = vadd.f32 %v1160_v60, %v972_v14  ;;  %v1363_v14 = vsel %vm11101_vm8, %v1358_v22, %v1362_v56  ;;  %v2890_v22 = vshll.u32 %v2740_v31, 16  ;;  %v2004_v60 = vshll.u32 %v11297_v0, 16 }
  0xea   : > { %v1125_v24 = vpop.f32.mrf.mxu1  ;;  %v11329_v62 = vunpack.c.l.b16 %v1363_v14  ;;  %v1371_v14 = vor.u32 %v1370_v41, %v1367_v52  ;;  %v2883_v35 = vsel %vm11101_vm8, %v2878_v20, %v2882_v32  ;;  %v2023_v31 = vshrl.u32 %v1867_v19, 16 }
  0xeb   : > { %14148 = vst [vmem:[#allocation5_spill] sm:$0xff] %v11299_v5  ;;  %v11319_v33 = vadd.f32 %v1125_v24, %v11249_v53  ;;  %v1995_v53 = vshll.u32 %v11289_v57, 16  ;;  %v3195_v57 = vpack.c.b16 %v3167_v59, %v3166_v36  ;;  %v2888_v24 = vrot.slane %v2887_v13, 4  ;;  %v1212_v59 = vld [vmem:[#allocation2 + $0x9c] sm:$0xf] }
  0xec   : > { %v977_v42 = vpop.f32.mrf.mxu2  ;;  %v2892_v25 = vrot.slane %v2890_v22, 5  ;;  %v1666_v36 = vpack.c.b16 %v11329_v62, %v11325_v55  ;;  %v2006_v16 = vor.u32 %v2004_v60, %v2003_v58  ;;  %v1372_v48 = vrot.slane %v1371_v14, 4  ;;  %v2742_v60 = vld [vmem:[#allocation2 + $0x9c] sm:$0xf] }
  0xed   : > { %10003 = vmatmul.msk.bf16.gmra.mxu3 %vm863_vm2, %v2286_v61  ;;  %v1210_v61 = vld [vmem:[#allocation2 + $0x88] sm:$0x1]  ;;  %v1398_v41 = vshll.u32 %v1212_v59, 16  ;;  %v2009_v32 = vshrl.u32 %v1865_v40, 16  ;;  %v2016_v58 = vrot.slane %v2014_v39, 7  ;;  %v2026_v13 = vshll.u32 %v1867_v19, 16 }
  0xee   : > { %v1384_v12 = vshll.u32 %v1210_v61, 16  ;;  %v2893_v46 = vsel %vm11101_vm8, %v2888_v24, %v2892_v25  ;;  %v2904_v14 = vshll.u32 %v2742_v60, 16  ;;  %v2908_v19 = vshrl.u32 %v2742_v60, 16 }
  0xef   : > { %v11372_v24 = vrot.slane %v1398_v41, 5  ;;  %v9989_v40 = vrot.slane %v2009_v32, 11 }
  0xf0   : > { %v1163_v54 = vpop.f32.mrf.mxu3  ;;  %v11332_v3 = vpop.f32.mrf.mxu0  ;;  %v1386_v45 = vrot.slane %v1384_v12, 5  ;;  %v2910_v41 = vrot.slane %v2908_v19, 4  ;;  %v1215_v19 = vld [vmem:[#allocation2 + $0xb4] sm:$0xf] }
  0xf1   : > { %v11327_v56 = vadd.f32 %v1163_v54, %v975_v34  ;;  %9971 = vmatmul.msk.bf16.gmra.mxu2 %vm863_vm2, %v1665_v51  ;;  %v11340_v34 = vor.u32 %v1995_v53, %v11322_v49  ;;  %v1211_v51 = vld [vmem:[#allocation2 + $0x98] sm:$0xf]  ;;  %v1402_v54 = vshrl.u32 %v1212_v59, 16  ;;  %v11374_v59 = vrot.slane %v2904_v14, 5  ;;  %v11408_v14 = vld [vmem:[#allocation2 + $0xb0] sm:$0xf] }
  0xf2   : > { %v1128_v29 = vpop.f32.mrf.mxu1  ;;  %v1389_v49 = vshrl.u32 %v1211_v51, 16  ;;  %v1392_v52 = vshll.u32 %v1211_v51, 16 }
  0xf3   : > { %14149 = vst [vmem:[#allocation6_spill] sm:$0xff] %v11327_v56  ;;  %v11345_v0 = vadd.f32 %v1128_v29, %v11270_v47  ;;  %10086 = vmatmul.msk.bf16.gmra.mxu0 %vm863_vm2, %v10662_v9  ;;  %v1381_v47 = vor.u32 %v1380_v11, %v11334_v8  ;;  %v1998_v7 = vsel %vm10929_vm5, %v11337_v17, %v11340_v34  ;;  %v3168_v9 = vunpack.c.l.b16 %v2883_v35 }
  0xf4   : > { %v980_v26 = vpop.f32.mrf.mxu2  ;;  %v2025_v11 = vrot.slane %v2023_v31, 7  ;;  %v2895_v29 = vshrl.u32 %v2741_v6, 16  ;;  %v3169_v17 = vunpack.c.l.b16 %v2893_v46  ;;  %v2898_v34 = vshll.u32 %v2741_v6, 16  ;;  %v2743_v31 = vld [vmem:[#allocation2 + $0xa0] sm:$0x1]  ;;  %v10663_v6 = vld [vmem:[#allocation2 + $0x98] sm:$0xff] }
  0xf5   : > { %10102 = vmatmul.msk.bf16.gmra.mxu1 %vm863_vm2, %v3195_v57  ;;  %v1382_v22 = vrot.slane %v1381_v47, 4  ;;  %v2017_v57 = vshll.u32 %v11342_v23, 16  ;;  %v1391_v20 = vrot.slane %v1389_v49, 4  ;;  %v1394_v12 = vrot.slane %v1392_v52, 5  ;;  %v1213_v47 = vld [vmem:[#allocation2 + $0xa0] sm:$0x1] }
  0xf6   : > { %v1404_v25 = vrot.slane %v1402_v54, 4  ;;  %v2897_v39 = vrot.slane %v2895_v29, 4  ;;  %v2900_v23 = vrot.slane %v2898_v34, 5  ;;  %v1377_v35 = vsel %vm11101_vm8, %v1372_v48, %v11334_v8 }
  0xf7   : > { %v2019_v46 = vor.u32 %v2017_v57, %v2016_v58  ;;  %v2021_v49 = vrot.slane %v2016_v58, 4  ;;  %v2028_v52 = vor.u32 %v2026_v13, %v2025_v11  ;;  %v3196_v60 = vpack.c.b16 %v3169_v17, %v3168_v9 }
  0xf8   : > { %v1165_v37 = vpop.f32.mrf.mxu3  ;;  %v11365_v10 = vpop.f32.mrf.mxu0  ;;  %v1405_v8 = vor.u32 %v1404_v25, %v11372_v24  ;;  %v2901_v48 = vor.u32 %v2900_v23, %v2897_v39  ;;  %v11396_v57 = vunpack.c.l.b16 %v1377_v35  ;;  %v1214_v23 = vld [vmem:[#allocation2 + $0xb0] sm:$0xf] }
  0xf9   : > { %v11363_v53 = vadd.f32 %v1165_v37, %v977_v42  ;;  %v2020_v13 = vsel %vm10929_vm5, %v9989_v40, %v2019_v46  ;;  %v11405_v55 = vsel %vm10929_vm5, %v2021_v49, %v2028_v52  ;;  %v2036_v40 = vshrl.u32 %v11408_v14, 16  ;;  %v1868_v52 = vld [vmem:[#allocation2 + $0xac] sm:$0x8] }
  0xfa   : > { %v1130_v61 = vpop.f32.mrf.mxu1  ;;  %v2902_v29 = vrot.slane %v2901_v48, 4  ;;  %v11414_v39 = vunpack.c.l.b16 %v2020_v13  ;;  %v2263_v35 = vunpack.c.l.b16 %v11405_v55 }
  0xfb   : > { %14150 = vst [vmem:[#allocation7_spill] sm:$0xff] %v11363_v53  ;;  %v11369_v42 = vadd.f32 %v1130_v61, %v11307_v15  ;;  %v2007_v15 = vsel %vm10929_vm5, %v1999_v21, %v2006_v16  ;;  %v1395_v61 = vor.u32 %v1394_v12, %v1391_v20  ;;  %v1408_v21 = vshll.u32 %v1213_v47, 16  ;;  %v11410_v20 = vld [vmem:[#allocation2 + $0xb4] sm:$0xf] }
  0xfc   : > { %v982_v51 = vpop.f32.mrf.mxu2  ;;  %v2261_v9 = vunpack.c.l.b16 %v2007_v15  ;;  %v2907_v49 = vsel %vm11101_vm8, %v2902_v29, %v11374_v59 }
  0xfd   : > { %10004 = vmatmul.msk.bf16.gmra.mxu3 %vm863_vm2, %v2287_v30  ;;  %v1387_v30 = vsel %vm11101_vm8, %v1382_v22, %v1386_v45  ;;  %v2911_v45 = vor.u32 %v2910_v41, %v11374_v59  ;;  %v2914_v22 = vshll.u32 %v2743_v31, 16  ;;  %v1396_v62 = vrot.slane %v1395_v61, 4  ;;  %v2744_v31 = vld [vmem:[#allocation2 + $0xb0] sm:$0xf] }
  0xfe   : > { %v11398_v11 = vunpack.c.l.b16 %v1387_v30  ;;  %v2045_v41 = vshrl.u32 %v11410_v20, 16  ;;  %v1416_v61 = vshll.u32 %v1214_v23, 16  ;;  %v3170_v59 = vunpack.c.l.b16 %v2907_v49 }
  0xff   : > { %v2912_v17 = vrot.slane %v2911_v45, 4  ;;  %v2916_v34 = vrot.slane %v2914_v22, 5  ;;  %v1401_v30 = vsel %vm11101_vm8, %v1396_v62, %v11372_v24  ;;  %v1426_v45 = vshrl.u32 %v1215_v19, 16 }
 0x100   : > { %v1168_v37 = vpop.f32.mrf.mxu3  ;;  %v11385_v16 = vpop.f32.mrf.mxu0  ;;  %v1667_v47 = vpack.c.b16 %v11398_v11, %v11396_v57  ;;  %v2922_v22 = vshll.u32 %v2744_v31, 16  ;;  %v2746_v57 = vld [vmem:[#allocation2 + $0xb8] sm:$0x1] }
 0x101   : > { %v11383_v54 = vadd.f32 %v1168_v37, %v980_v26  ;;  %9972 = vmatmul.msk.bf16.gmra.mxu2 %vm863_vm2, %v1666_v36  ;;  %v2260_v26 = vunpack.c.l.b16 %v1998_v7  ;;  %v1410_v36 = vrot.slane %v1408_v21, 5  ;;  %v1422_v21 = vshll.u32 %v1215_v19, 16  ;;  %v1216_v19 = vld [vmem:[#allocation2 + $0xb8] sm:$0x1] }
 0x102   : > { %v1133_v32 = vpop.f32.mrf.mxu1 }
 0x103   : > { %14151 = vst [vmem:[#allocation8_spill] sm:$0xff] %v11383_v54  ;;  %v11394_v58 = vadd.f32 %v1133_v32, %v11332_v3  ;;  %10087 = vmatmul.msk.bf16.gmra.mxu0 %vm863_vm2, %v10663_v6  ;;  %v1406_v3 = vrot.slane %v1405_v8, 4  ;;  %v2288_v25 = vpack.c.b16 %v2261_v9, %v2260_v26  ;;  %v2745_v6 = vld [vmem:[#allocation2 + $0xb4] sm:$0xf]  ;;  %v2919_v8 = vshrl.u32 %v2744_v31, 16 }
 0x104   : > { %v985_v7 = vpop.f32.mrf.mxu2  ;;  %v2928_v32 = vshll.u32 %v2745_v6, 16  ;;  %v2031_v26 = vshrl.u32 %v1868_v52, 16  ;;  %v11437_v9 = vrot.slane %v2036_v40, 7  ;;  %v2932_v29 = vshrl.u32 %v2745_v6, 16 }
 0x105   : > { %10103 = vmatmul.msk.bf16.gmra.mxu1 %vm863_vm2, %v3196_v60  ;;  %v1411_v46 = vsel %vm11101_vm8, %v1406_v3, %v1410_v36  ;;  %v1413_v60 = vshrl.u32 %v1214_v23, 16  ;;  %v2921_v11 = vrot.slane %v2919_v8, 4  ;;  %v2924_v36 = vrot.slane %v2922_v22, 5 }
 0x106   : > { %v2930_v3 = vrot.slane %v2928_v32, 5  ;;  %v2934_v49 = vrot.slane %v2932_v29, 4  ;;  %v2938_v40 = vshll.u32 %v2746_v57, 16  ;;  %v11444_v8 = vunpack.c.l.b16 %v1401_v30 }
 0x107   : > { %v2925_v31 = vor.u32 %v2924_v36, %v2921_v11  ;;  %v2047_v6 = vrot.slane %v2045_v41, 7  ;;  %v1432_v30 = vshll.u32 %v1216_v19, 16 }
 0x108   : > { %v1170_v12 = vpop.f32.mrf.mxu3  ;;  %v11423_v37 = vpop.f32.mrf.mxu0  ;;  %v2940_v11 = vrot.slane %v2938_v40, 5 }
 0x109   : > { %v11416_v15 = vadd.f32 %v1170_v12, %v982_v51  ;;  %v2917_v51 = vsel %vm11101_vm8, %v2912_v17, %v2916_v34  ;;  %v2039_v17 = vshll.u32 %v11408_v14, 16  ;;  %v1418_v34 = vrot.slane %v1416_v61, 5 }
 0x10a   : > { %v1135_v24 = vpop.f32.mrf.mxu1  ;;  %v3171_v62 = vunpack.c.l.b16 %v2917_v51  ;;  %v11440_v12 = vrot.slane %v1422_v21, 5  ;;  %v11446_v51 = vunpack.c.l.b16 %v1411_v46  ;;  %v2048_v61 = vshll.u32 %v11410_v20, 16  ;;  %v11457_v46 = vld [vmem:[#allocation2 + $0xc8] sm:$0xf]  ;;  %v11463_v20 = vld [vmem:[#allocation2 + $0xcc] sm:$0xf] }
 0x10b   : > { %14152 = vst [vmem:[#allocation9_spill] sm:$0xff] %v11416_v15  ;;  %v11434_v48 = vadd.f32 %v1135_v24, %v11365_v10  ;;  %v1415_v10 = vrot.slane %v1413_v60, 4  ;;  %v10664_v24 = vld [vmem:[#allocation2 + $0xb0] sm:$0xff]  ;;  %v11450_v60 = vrot.slane %v2031_v26, 11  ;;  %v2935_v21 = vor.u32 %v2934_v49, %v2930_v3 }
 0x10c   : > { %v987_v13 = vpop.f32.mrf.mxu2  ;;  %v3197_v14 = vpack.c.b16 %v3171_v62, %v3170_v59  ;;  %v2926_v57 = vrot.slane %v2925_v31, 4  ;;  %v2289_v62 = vpack.c.b16 %v2263_v35, %v11414_v39  ;;  %v2058_v29 = vshrl.u32 %v11457_v46, 16  ;;  %v1871_v39 = vld [vmem:[#allocation2 + $0xc4] sm:$0x8] }
 0x10d   : > { %10005 = vmatmul.msk.bf16.gmra.mxu3 %vm863_vm2, %v2288_v25  ;;  %v1428_v25 = vrot.slane %v1426_v45, 4  ;;  %v1419_v32 = vor.u32 %v1418_v34, %v1415_v10  ;;  %v2936_v26 = vrot.slane %v2935_v21, 4  ;;  %v1218_v10 = vld [vmem:[#allocation2 + $0xcc] sm:$0xf]  ;;  %v2067_v35 = vshrl.u32 %v11463_v20, 16 }
 0x10e   : > { %v2931_v55 = vsel %vm11101_vm8, %v2926_v57, %v2930_v3  ;;  %v1446_v21 = vshll.u32 %v1218_v10, 16  ;;  %v2053_v3 = vshrl.u32 %v1871_v39, 16  ;;  %v2748_v57 = vld [vmem:[#allocation2 + $0xcc] sm:$0xf] }
 0x10f   : > { %v1429_v59 = vor.u32 %v1428_v25, %v11440_v12  ;;  %v1420_v25 = vrot.slane %v1419_v32, 4  ;;  %v2941_v49 = vsel %vm11101_vm8, %v2936_v26, %v2940_v11  ;;  %v2061_v32 = vshll.u32 %v11457_v46, 16 }
 0x110   : > { %v1173_v23 = vpop.f32.mrf.mxu3  ;;  %v11448_v22 = vpop.f32.mrf.mxu0  ;;  %v3173_v11 = vunpack.c.l.b16 %v2941_v49  ;;  %v1219_v49 = vld [vmem:[#allocation2 + $0xd0] sm:$0x1] }
 0x111   : > { %v11442_v52 = vadd.f32 %v1173_v23, %v985_v7  ;;  %9973 = vmatmul.msk.bf16.gmra.mxu2 %vm863_vm2, %v1667_v47  ;;  %v11455_v7 = vor.u32 %v2039_v17, %v11437_v9  ;;  %v1217_v17 = vld [vmem:[#allocation2 + $0xc8] sm:$0xf]  ;;  %v2050_v23 = vor.u32 %v2048_v61, %v2047_v6  ;;  %v1430_v31 = vrot.slane %v1429_v59, 4 }
 0x112   : > { %v1138_v45 = vpop.f32.mrf.mxu1  ;;  %v3172_v61 = vunpack.c.l.b16 %v2931_v55  ;;  %v2070_v59 = vshll.u32 %v11463_v20, 16 }
 0x113   : > { %14153 = vst [vmem:[#allocation10_spill] sm:$0xff] %v11442_v52  ;;  %v11460_v41 = vadd.f32 %v1138_v45, %v11385_v16  ;;  %10088 = vmatmul.msk.bf16.gmra.mxu0 %vm863_vm2, %v10664_v24  ;;  %v2043_v16 = vrot.slane %v11437_v9, 4  ;;  %v2042_v34 = vsel %vm10929_vm5, %v11450_v60, %v11455_v7  ;;  %v1434_v9 = vrot.slane %v1432_v30, 5  ;;  %v2747_v60 = vld [vmem:[#allocation2 + $0xc8] sm:$0xf] }
 0x114   : > { %v990_v47 = vpop.f32.mrf.mxu2  ;;  %v1437_v24 = vshrl.u32 %v1217_v17, 16  ;;  %v2060_v45 = vrot.slane %v2058_v29, 7  ;;  %v1450_v7 = vshrl.u32 %v1218_v10, 16  ;;  %v2069_v30 = vrot.slane %v2067_v35, 7 }
 0x115   : > { %10104 = vmatmul.msk.bf16.gmra.mxu1 %vm863_vm2, %v3197_v14  ;;  %v1440_v14 = vshll.u32 %v1217_v17, 16  ;;  %v2943_v26 = vshrl.u32 %v2747_v60, 16  ;;  %v2946_v17 = vshll.u32 %v2747_v60, 16  ;;  %v11493_v29 = vrot.slane %v1446_v21, 5 }
 0x116   : > { %v1439_v55 = vrot.slane %v1437_v24, 4  ;;  %v2956_v52 = vshrl.u32 %v2748_v57, 16  ;;  %v2051_v20 = vsel %vm10929_vm5, %v2043_v16, %v2050_v23  ;;  %v2749_v24 = vld [vmem:[#allocation2 + $0xd0] sm:$0x1]  ;;  %v2063_v21 = vor.u32 %v2061_v32, %v2060_v45 }
 0x117   : > { %v1442_v39 = vrot.slane %v1440_v14, 5  ;;  %v2945_v10 = vrot.slane %v2943_v26, 4  ;;  %v2948_v46 = vrot.slane %v2946_v17, 5  ;;  %v2065_v60 = vrot.slane %v2060_v45, 4 }
 0x118   : > { %v1175_v19 = vpop.f32.mrf.mxu3  ;;  %v11485_v6 = vpop.f32.mrf.mxu0  ;;  %v2958_v26 = vrot.slane %v2956_v52, 4  ;;  %v2072_v16 = vor.u32 %v2070_v59, %v2069_v30  ;;  %v2264_v52 = vunpack.c.l.b16 %v2042_v34 }
 0x119   : > { %v11483_v40 = vadd.f32 %v1175_v19, %v987_v13  ;;  %v2952_v19 = vshll.u32 %v2748_v57, 16  ;;  %v10665_v57 = vld [vmem:[#allocation2 + $0xc8] sm:$0xff]  ;;  %v1443_v23 = vor.u32 %v1442_v39, %v1439_v55 }
 0x11a   : > { %v1140_v2 = vpop.f32.mrf.mxu1 }
 0x11b   : > { %14154 = vst [vmem:[#allocation11_spill] sm:$0xff] %v11483_v40  ;;  %v11490_v13 = vadd.f32 %v1140_v2, %v11423_v37  ;;  %v1452_v40 = vrot.slane %v1450_v7, 4  ;;  %v2954_v35 = vrot.slane %v2952_v19, 5  ;;  %v1425_v2 = vsel %vm11101_vm8, %v1420_v25, %v11440_v12 }
 0x11c   : > { %v992_v36 = vpop.f32.mrf.mxu2  ;;  %v1435_v37 = vsel %vm11101_vm8, %v1430_v31, %v1434_v9  ;;  %v2949_v7 = vor.u32 %v2948_v46, %v2945_v10  ;;  %v3198_v19 = vpack.c.b16 %v3173_v11, %v3172_v61  ;;  %v1456_v25 = vshll.u32 %v1219_v49, 16 }
 0x11d   : > { %10006 = vmatmul.msk.bf16.gmra.mxu3 %vm863_vm2, %v2289_v62  ;;  %v9991_v62 = vrot.slane %v2053_v3, 11  ;;  %v1453_v12 = vor.u32 %v1452_v40, %v11493_v29  ;;  %v2959_v31 = vor.u32 %v2958_v26, %v2954_v35  ;;  %v2962_v9 = vshll.u32 %v2749_v24, 16  ;;  %v11518_v40 = vld [vmem:[#allocation2 + $0xe0] sm:$0xf]  ;;  %v1874_v24 = vld [vmem:[#allocation2 + $0xdc] sm:$0x8] }
 0x11e   : > { %v14156_v3 = vpack.c.b16 %v11446_v51, %v11444_v8  ;;  %v2265_v61 = vunpack.c.l.b16 %v2051_v20  ;;  %v11514_v30 = vunpack.c.l.b16 %v1425_v2  ;;  %v11516_v59 = vunpack.c.l.b16 %v1435_v37  ;;  %v11530_v20 = vld [vmem:[#allocation2 + $0xe4] sm:$0xf]  ;;  %v2750_v26 = vld [vmem:[#allocation2 + $0xe0] sm:$0xf] }
 0x11f   : > { %v2064_v8 = vsel %vm10929_vm5, %v9991_v62, %v2063_v21  ;;  %v11525_v51 = vsel %vm10929_vm5, %v2065_v60, %v2072_v16  ;;  %v1444_v34 = vrot.slane %v1443_v23, 4  ;;  %v1458_v55 = vrot.slane %v1456_v25, 5  ;;  %v2751_v25 = vld [vmem:[#allocation2 + $0xe4] sm:$0xf] }
 0x120   : > { %v1178_v14 = vpop.f32.mrf.mxu3  ;;  %v11504_v15 = vpop.f32.mrf.mxu0  ;;  %v2960_v39 = vrot.slane %v2959_v31, 4  ;;  %v2964_v10 = vrot.slane %v2962_v9, 5  ;;  %v2080_v2 = vshrl.u32 %v11518_v40, 16  ;;  %v2290_v62 = vpack.c.b16 %v2265_v61, %v2264_v52 }
 0x121   : > { %v11502_v17 = vadd.f32 %v1178_v14, %v990_v47  ;;  %9974 = vmatmul.msk.bf16.gmra.mxu2 %vm863_vm2, %v14156_v3  ;;  %v2950_v47 = vrot.slane %v2949_v7, 4  ;;  %v1669_v49 = vpack.c.b16 %v11516_v59, %v11514_v30  ;;  %v1220_v14 = vld [vmem:[#allocation2 + $0xe0] sm:$0xf]  ;;  %v11537_v60 = vunpack.c.l.b16 %v2064_v8  ;;  %v1222_v7 = vld [vmem:[#allocation2 + $0xe8] sm:$0x1] }
 0x122   : > { %v1143_v45 = vpop.f32.mrf.mxu1  ;;  %v2965_v16 = vsel %vm11101_vm8, %v2960_v39, %v2964_v10  ;;  %v2075_v9 = vshrl.u32 %v1874_v24, 16  ;;  %v11550_v3 = vrot.slane %v2080_v2, 7  ;;  %v2970_v61 = vshll.u32 %v2750_v26, 16 }
 0x123   : > { %14155 = vst [vmem:[#allocation12_spill] sm:$0xff] %v11502_v17  ;;  %v11512_v32 = vadd.f32 %v1143_v45, %v11448_v22  ;;  %10089 = vmatmul.msk.bf16.gmra.mxu0 %vm863_vm2, %v10665_v57  ;;  %v1454_v22 = vrot.slane %v1453_v12, 4  ;;  %v2955_v46 = vsel %vm11101_vm8, %v2950_v47, %v2954_v35  ;;  %v1449_v35 = vsel %vm11101_vm8, %v1444_v34, %v11493_v29  ;;  %v1221_v12 = vld [vmem:[#allocation2 + $0xe4] sm:$0xf] }
 0x124   : > { %v995_v11 = vpop.f32.mrf.mxu2  ;;  %v3174_v23 = vunpack.c.l.b16 %v2955_v46  ;;  %v1461_v45 = vshrl.u32 %v1220_v14, 16  ;;  %v2967_v29 = vshrl.u32 %v2750_v26, 16  ;;  %v1464_v47 = vshll.u32 %v1220_v14, 16 }
 0x125   : > { %10105 = vmatmul.msk.bf16.gmra.mxu1 %vm863_vm2, %v3198_v19  ;;  %v1459_v19 = vsel %vm11101_vm8, %v1454_v22, %v1458_v55  ;;  %v2976_v30 = vshll.u32 %v2751_v25, 16  ;;  %v3175_v59 = vunpack.c.l.b16 %v2965_v16  ;;  %v2083_v8 = vshll.u32 %v11518_v40, 16  ;;  %v2752_v22 = vld [vmem:[#allocation2 + $0xe8] sm:$0x1] }
 0x126   : > { %v1470_v34 = vshll.u32 %v1221_v12, 16  ;;  %v2969_v55 = vrot.slane %v2967_v29, 4  ;;  %v1474_v10 = vshrl.u32 %v1221_v12, 16  ;;  %v2972_v46 = vrot.slane %v2970_v61, 5  ;;  %v10666_v29 = vld [vmem:[#allocation2 + $0xe0] sm:$0xff] }
 0x127   : > { %v2978_v2 = vrot.slane %v2976_v30, 5  ;;  %v11557_v24 = vunpack.c.l.b16 %v1449_v35  ;;  %v2092_v14 = vshll.u32 %v11530_v20, 16  ;;  %v1463_v26 = vrot.slane %v1461_v45, 4 }
 0x128   : > { %v1180_v37 = vpop.f32.mrf.mxu3  ;;  %v11543_v57 = vpop.f32.mrf.mxu0  ;;  %v2973_v16 = vor.u32 %v2972_v46, %v2969_v55  ;;  %v2986_v40 = vshll.u32 %v2752_v22, 16  ;;  %v11562_v54 = vunpack.c.l.b16 %v1459_v19  ;;  %v11564_v12 = vrot.slane %v2075_v9, 11 }
 0x129   : > { %v11535_v21 = vadd.f32 %v1180_v37, %v992_v36  ;;  %v2089_v36 = vshrl.u32 %v11530_v20, 16  ;;  %v2980_v37 = vshrl.u32 %v2751_v25, 16  ;;  %v11567_v35 = vor.u32 %v2083_v8, %v11550_v3 }
 0x12a   : > { %v1145_v31 = vpop.f32.mrf.mxu1  ;;  %v3199_v20 = vpack.c.b16 %v3175_v59, %v3174_v23  ;;  %v11571_v25 = vrot.slane %v1470_v34, 5  ;;  %v1476_v45 = vrot.slane %v1474_v10, 4  ;;  %v1480_v19 = vshll.u32 %v1222_v7, 16  ;;  %v1223_v7 = vld [vmem:[#allocation2 + $0xf8] sm:$0xf] }
 0x12b   : > { %14157 = vst [vmem:[#allocation13_spill] sm:$0xff] %v11535_v21  ;;  %v11553_v52 = vadd.f32 %v1145_v31, %v11485_v6  ;;  %v2091_v6 = vrot.slane %v2089_v36, 7  ;;  %v2982_v21 = vrot.slane %v2980_v37, 4  ;;  %v2974_v22 = vrot.slane %v2973_v16, 4  ;;  %v1878_v37 = vld [vmem:[#allocation2 + $0xf8] sm:$0xf] }
 0x12c   : > { %v997_v39 = vpop.f32.mrf.mxu2  ;;  %v2988_v46 = vrot.slane %v2986_v40, 5  ;;  %v1224_v59 = vld [vmem:[#allocation2 + $0xfc] sm:$0xf]  ;;  %v1877_v16 = vld [vmem:[#allocation2 + $0xf4] sm:$0x8] }
 0x12d   : > { %10007 = vmatmul.msk.bf16.gmra.mxu3 %vm863_vm2, %v2290_v62  ;;  %v1466_v62 = vrot.slane %v1464_v47, 5  ;;  %v2983_v47 = vor.u32 %v2982_v21, %v2978_v2  ;;  %v2094_v30 = vor.u32 %v2092_v14, %v2091_v6  ;;  %v14159_v21 = vunpack.c.l.b16 %v11525_v51  ;;  %v11592_v6 = vld [vmem:[#allocation2 + $0xfc] sm:$0xf] }
 0x12e   : > { %v2979_v10 = vsel %vm11101_vm8, %v2974_v22, %v2978_v2  ;;  %v2102_v51 = vshrl.u32 %v1878_v37, 16  ;;  %v2753_v2 = vld [vmem:[#allocation2 + $0xf8] sm:$0xf] }
 0x12f   : > { %v1467_v8 = vor.u32 %v1466_v62, %v1463_v26  ;;  %v2984_v55 = vrot.slane %v2983_v47, 4  ;;  %v3176_v22 = vunpack.c.l.b16 %v2979_v10 }
 0x130   : > { %v1183_v31 = vpop.f32.mrf.mxu3  ;;  %v11569_v36 = vpop.f32.mrf.mxu0  ;;  %v11605_v34 = vrot.slane %v2102_v51, 7 }
 0x131   : > { %v11560_v17 = vadd.f32 %v1183_v31, %v995_v11  ;;  %9975 = vmatmul.msk.bf16.gmra.mxu2 %vm863_vm2, %v1669_v49  ;;  %v2087_v11 = vrot.slane %v11550_v3, 4  ;;  %v2291_v49 = vpack.c.b16 %v14159_v21, %v11537_v60  ;;  %v1477_v3 = vor.u32 %v1476_v45, %v11571_v25 }
 0x132   : > { %v1148_v61 = vpop.f32.mrf.mxu1  ;;  %v1468_v26 = vrot.slane %v1467_v8, 4  ;;  %v1482_v31 = vrot.slane %v1480_v19, 5  ;;  %v2989_v62 = vsel %vm11101_vm8, %v2984_v55, %v2988_v46  ;;  %v1494_v45 = vshll.u32 %v1224_v59, 16 }
 0x133   : > { %14158 = vst [vmem:[#allocation14_spill] sm:$0xff] %v11560_v17  ;;  %v11576_v9 = vadd.f32 %v1148_v61, %v11504_v15  ;;  %10090 = vmatmul.msk.bf16.gmra.mxu0 %vm863_vm2, %v10666_v29  ;;  %v11596_v14 = vsel %vm10929_vm5, %v2087_v11, %v2094_v30  ;;  %v1485_v29 = vshrl.u32 %v1223_v7, 16  ;;  %v1478_v61 = vrot.slane %v1477_v3, 4  ;;  %v2754_v30 = vld [vmem:[#allocation2 + $0xfc] sm:$0xf] }
 0x134   : > { %v1000_v23 = vpop.f32.mrf.mxu2  ;;  %v2111_v21 = vshrl.u32 %v11592_v6, 16  ;;  %v1498_v11 = vshrl.u32 %v1224_v59, 16  ;;  %v2097_v19 = vshrl.u32 %v1877_v16, 16  ;;  %v2105_v55 = vshll.u32 %v1878_v37, 16  ;;  %v10262_v3 = vld [vmem:[%s14138_s3 + $0x4] sm:$0xf] }
 0x135   : > { %10106 = vmatmul.msk.bf16.gmra.mxu1 %vm863_vm2, %v3199_v20  ;;  %v1488_v20 = vshll.u32 %v1223_v7, 16  ;;  %v2991_v46 = vshrl.u32 %v2753_v2, 16  ;;  %v3177_v7 = vunpack.c.l.b16 %v2989_v62  ;;  %v3000_v15 = vshll.u32 %v2754_v30, 16  ;;  %v2755_v17 = vld [vmem:[#allocation2 + $0x100] sm:$0x1] }
 0x136   : > { %v1487_v59 = vrot.slane %v1485_v29, 4  ;;  %v11614_v16 = vrot.slane %v1494_v45, 5  ;;  %v5664_v37 = vsel %vm5662_vm9, %v10262_v3, 0  ;;  %v9993_v53 = vrot.slane %v2097_v19, 11 }
 0x137   : > { %v1490_v10 = vrot.slane %v1488_v20, 5  ;;  %5673 = vmatpush.bf16.msra.mxu1 %v5664_v37  ;;  %v11622_v29 = vrot.slane %v3000_v15, 5  ;;  %v3004_v20 = vshrl.u32 %v2754_v30, 16  ;;  %v2107_v3 = vor.u32 %v2105_v55, %v11605_v34 }
 0x138   : > { %v1185_v60 = vpop.f32.mrf.mxu3  ;;  %v11602_v47 = vpop.f32.mrf.mxu0  ;;  %v2113_v56 = vrot.slane %v2111_v21, 7  ;;  %v3010_v30 = vshll.u32 %v2755_v17, 16  ;;  %v14162_v19 = vpack.c.b16 %v11562_v54, %v11557_v24  ;;  %v2109_v54 = vrot.slane %v11605_v34, 4 }
 0x139   : > { %v11600_v40 = vadd.f32 %v1185_v60, %v997_v39  ;;  %v2994_v60 = vshll.u32 %v2753_v2, 16  ;;  %v1483_v2 = vsel %vm11101_vm8, %v1478_v61, %v1482_v31  ;;  %v1491_v5 = vor.u32 %v1490_v10, %v1487_v59 }
 0x13a   : > { %v1150_v8 = vpop.f32.mrf.mxu1  ;;  %v3200_v31 = vpack.c.b16 %v3177_v7, %v3176_v22  ;;  %v2269_v22 = vunpack.c.l.b16 %v11596_v14  ;;  %v11646_v17 = vunpack.c.l.b16 %v1483_v2  ;;  %v2108_v24 = vsel %vm10929_vm5, %v9993_v53, %v2107_v3  ;;  %v1882_v53 = vld [vmem:[#allocation2 + $0x114] sm:$0xf]  ;;  %v1226_v2 = vld [vmem:[#allocation2 + $0x110] sm:$0xf] }
 0x13b   : > { %14160 = vst [vmem:[#allocation15_spill] sm:$0xff] %v11600_v40  ;;  %v11608_v39 = vadd.f32 %v1150_v8, %v11543_v57  ;;  %v1225_v40 = vld [vmem:[#allocation2 + $0x100] sm:$0x1]  ;;  %v1500_v57 = vrot.slane %v1498_v11, 4  ;;  %v2993_v8 = vrot.slane %v2991_v46, 4  ;;  %v2996_v62 = vrot.slane %v2994_v60, 5 }
 0x13c   : > { %v1002_v51 = vpop.f32.mrf.mxu2  ;;  %v2114_v11 = vshll.u32 %v11592_v6, 16  ;;  %v10667_v60 = vld [vmem:[#allocation2 + $0xf8] sm:$0xff]  ;;  %v11670_v3 = vunpack.c.l.b16 %v2108_v24 }
 0x13d   : > { %10008 = vmatmul.msk.bf16.gmra.mxu3 %vm863_vm2, %v2291_v49  ;;  %v1473_v49 = vsel %vm11101_vm8, %v1468_v26, %v11571_v25  ;;  %v1504_v25 = vshll.u32 %v1225_v40, 16  ;;  %v3006_v26 = vrot.slane %v3004_v20, 4  ;;  %v1501_v15 = vor.u32 %v1500_v57, %v11614_v16 }
 0x13e   : > { %v2997_v61 = vor.u32 %v2996_v62, %v2993_v8  ;;  %v11644_v55 = vunpack.c.l.b16 %v1473_v49  ;;  %v2116_v7 = vor.u32 %v2114_v11, %v2113_v56  ;;  %v3012_v57 = vrot.slane %v3010_v30, 5  ;;  %v11660_v8 = vld [vmem:[#allocation2 + $0x110] sm:$0xf]  ;;  %v1880_v56 = vld [vmem:[#allocation2 + $0x10c] sm:$0x8] }
 0x13f   : > { %v3007_v21 = vor.u32 %v3006_v26, %v11622_v29  ;;  %v11657_v14 = vrot.slane %v1501_v15, 4  ;;  %v2756_v11 = vld [vmem:[#allocation2 + $0x110] sm:$0xf]  ;;  %v1227_v15 = vld [vmem:[#allocation2 + $0x114] sm:$0xf]  ;;  %v2119_v30 = vshrl.u32 %v1880_v56, 16 }
 0x140   : > { %v1188_v45 = vpop.f32.mrf.mxu3  ;;  %v11628_v38 = vpop.f32.mrf.mxu0  ;;  %v2998_v10 = vrot.slane %v2997_v61, 4  ;;  %v2757_v61 = vld [vmem:[#allocation2 + $0x114] sm:$0xf]  ;;  %v1518_v24 = vshll.u32 %v1227_v15, 16  ;;  %v2127_v56 = vshll.u32 %v11660_v8, 16 }
 0x141   : > { %v11626_v46 = vadd.f32 %v1188_v45, %v1000_v23  ;;  %9976 = vmatmul.msk.bf16.gmra.mxu2 %vm863_vm2, %v14162_v19  ;;  %v14163_v23 = vsel %vm10929_vm5, %v11564_v12, %v11567_v35  ;;  %v11652_v12 = vrot.slane %v1491_v5, 4  ;;  %v11654_v35 = vrot.slane %v1504_v25, 5 }
 0x142   : > { %v2268_v6 = vunpack.c.l.b16 %v14163_v23  ;;  %v11640_v40 = vpop.f32.mrf.mxu1  ;;  %v3008_v37 = vrot.slane %v3007_v21, 4  ;;  %v1671_v5 = vpack.c.b16 %v11646_v17, %v11644_v55  ;;  %v11668_v45 = vsel %vm10929_vm5, %v2109_v54, %v2116_v7 }
 0x143   : > { %14161 = vst [vmem:[#allocation16_spill] sm:$0xff] %v11626_v46  ;;  %10091 = vmatmul.msk.bf16.gmra.mxu0 %vm863_vm2, %v10667_v60  ;;  %v3003_v25 = vsel %vm11101_vm8, %v2998_v10, %v11622_v29  ;;  %v2133_v19 = vshrl.u32 %v1882_v53, 16  ;;  %v1509_v23 = vshrl.u32 %v1226_v2, 16  ;;  %v3015_v21 = vshrl.u32 %v2756_v11, 16  ;;  %v10668_v46 = vld [vmem:[#allocation2 + $0x110] sm:$0xff] }
 0x144   : > { %v1738_v59 = vpop.f32.mrf.mxu2  ;;  %v2292_v49 = vpack.c.b16 %v2269_v22, %v2268_v6  ;;  %v3013_v26 = vsel %vm11101_vm8, %v3008_v37, %v3012_v57  ;;  %v1512_v6 = vshll.u32 %v1226_v2, 16  ;;  %v3018_v22 = vshll.u32 %v2756_v11, 16 }
 0x145   : > { %10107 = vmatmul.msk.bf16.gmra.mxu1 %vm863_vm2, %v3200_v31  ;;  %v1818_v34 = vadd.f32 %v1738_v59, %v11170_v4  ;;  %v1497_v4 = vsel %vm11101_vm8, %v11652_v12, %v11614_v16  ;;  %v2124_v31 = vshrl.u32 %v11660_v8, 16  ;;  %v3024_v55 = vshll.u32 %v2757_v61, 16 }
 0x146   : > { %v3028_v17 = vshrl.u32 %v2757_v61, 16  ;;  %v3178_v29 = vunpack.c.l.b16 %v3003_v25  ;;  %v3179_v54 = vunpack.c.l.b16 %v3013_v26  ;;  %v1522_v7 = vshrl.u32 %v1227_v15, 16 }
 0x147   : > { %v3017_v59 = vrot.slane %v3015_v21, 4  ;;  %v11691_v10 = vrot.slane %v3024_v55, 5  ;;  %v2135_v2 = vrot.slane %v2133_v19, 7  ;;  %v2136_v61 = vshll.u32 %v1882_v53, 16 }
 0x148   : > { %v1190_v62 = vpop.f32.mrf.mxu3  ;;  %v11676_v60 = vpop.f32.mrf.mxu0  ;;  %v3030_v37 = vrot.slane %v3028_v17, 4  ;;  %v1514_v25 = vrot.slane %v1512_v6, 5  ;;  %v2271_v15 = vunpack.c.l.b16 %v11668_v45  ;;  %v11699_v17 = vunpack.c.l.b16 %v1497_v4 }
 0x149   : > { %v11664_v20 = vadd.f32 %v1190_v62, %v1002_v51  ;;  %v1507_v51 = vsel %vm11101_vm8, %v11657_v14, %v11654_v35  ;;  %v2758_v35 = vld [vmem:[#allocation2 + $0x118] sm:$0x1]  ;;  %v3020_v14 = vrot.slane %v3018_v22, 5  ;;  %v2126_v62 = vrot.slane %v2124_v31, 7 }
 0x14a   : > { %v11688_v16 = vpop.f32.mrf.mxu1  ;;  %v3031_v21 = vor.u32 %v3030_v37, %v11691_v10  ;;  %v3034_v22 = vshll.u32 %v2758_v35, 16  ;;  %v1228_v31 = vld [vmem:[#allocation2 + $0x118] sm:$0x1]  ;;  %v11701_v8 = vrot.slane %v1518_v24, 5  ;;  %v1524_v19 = vrot.slane %v1522_v7, 4 }
 0x14b   : > { %14164 = vst [vmem:[#allocation17_spill] sm:$0xff] %v11664_v20  ;;  %v3021_v26 = vor.u32 %v3020_v14, %v3017_v59  ;;  %v11711_v6 = vor.u32 %v2127_v56, %v2126_v62  ;;  %v2138_v4 = vor.u32 %v2136_v61, %v2135_v2  ;;  %v1229_v7 = vld [vmem:[#allocation2 + $0x128] sm:$0xf]  ;;  %v2293_v14 = vpack.c.b16 %v2271_v15, %v11670_v3  ;;  %v11729_v37 = vld [vmem:[#allocation2 + $0x12c] sm:$0xf] }
 0x14c   : > { %v1740_v12 = vpop.f32.mrf.mxu2  ;;  %v3032_v24 = vrot.slane %v3031_v21, 4  ;;  %v1883_v3 = vld [vmem:[#allocation2 + $0x124] sm:$0x8]  ;;  %v1533_v15 = vshrl.u32 %v1229_v7, 16  ;;  %v2759_v21 = vld [vmem:[#allocation2 + $0x128] sm:$0xf] }
 0x14d   : > { %10009 = vmatmul.msk.bf16.gmra.mxu3 %vm863_vm2, %v2292_v49  ;;  %v1819_v57 = vadd.f32 %v1740_v12, %v11203_v43  ;;  %v1511_v49 = vrot.slane %v1509_v23, 4  ;;  %v3201_v43 = vpack.c.b16 %v3179_v54, %v3178_v29  ;;  %v11709_v23 = vrot.slane %v2119_v30, 11 }
 0x14e   : > { %v2131_v12 = vrot.slane %v2126_v62, 4  ;;  %v3022_v29 = vrot.slane %v3021_v26, 4  ;;  %v1525_v30 = vor.u32 %v1524_v19, %v11701_v8  ;;  %v1230_v62 = vld [vmem:[#allocation2 + $0x12c] sm:$0xf] }
 0x14f   : > { %v1515_v35 = vor.u32 %v1514_v25, %v1511_v49  ;;  %v1542_v19 = vshll.u32 %v1230_v62, 16 }
 0x150   : > { %v2360_v11 = vpop.f32.mrf.mxu3  ;;  %v11697_v55 = vpop.f32.mrf.mxu0  ;;  %v11733_v2 = vsel %vm10929_vm5, %v2131_v12, %v2138_v4  ;;  %v1546_v4 = vshrl.u32 %v1230_v62, 16 }
 0x151   : > { %v2440_v20 = vadd.f32 %v2360_v11, %v1818_v34  ;;  %9977 = vmatmul.msk.bf16.gmra.mxu2 %vm863_vm2, %v1671_v5  ;;  %v11705_v34 = vunpack.c.l.b16 %v1507_v51  ;;  %v1528_v5 = vshll.u32 %v1228_v31, 16  ;;  %v11735_v11 = vrot.slane %v1515_v35, 4 }
 0x152   : > { %v11707_v45 = vpop.f32.mrf.mxu1  ;;  %v1536_v31 = vshll.u32 %v1229_v7, 16 }
 0x153   : > { %v2694_v53 = vadd.f32 %v11569_v36, %v2440_v20  ;;  %10092 = vmatmul.msk.bf16.gmra.mxu0 %vm863_vm2, %v10668_v46  ;;  %v3036_v36 = vrot.slane %v3034_v22, 5  ;;  %v11717_v20 = vld [vmem:[#allocation2 + $0x128] sm:$0xf]  ;;  %v1530_v25 = vrot.slane %v1528_v5, 5  ;;  %v3039_v5 = vshrl.u32 %v2759_v21, 16 }
 0x154   : > { %v1743_v51 = vpop.f32.mrf.mxu2  ;;  %v2146_v61 = vshrl.u32 %v11717_v20, 16 }
 0x155   : > { %v11714_v54 = vadd.f32 %v11640_v40, %v2694_v53  ;;  %10108 = vmatmul.msk.bf16.gmra.mxu1 %vm863_vm2, %v3201_v43  ;;  %v1820_v59 = vadd.f32 %v1743_v51, %v11228_v18  ;;  %v1672_v40 = vpack.c.b16 %v11705_v34, %v11699_v17  ;;  %v3027_v18 = vsel %vm11101_vm8, %v3022_v29, %v11691_v10  ;;  %v2760_v53 = vld [vmem:[#allocation2 + $0x12c] sm:$0xf] }
 0x156   : > { %v3037_v26 = vsel %vm11101_vm8, %v3032_v24, %v3036_v36  ;;  %v1526_v17 = vrot.slane %v1525_v30, 4  ;;  %v2155_v43 = vshrl.u32 %v11729_v37, 16  ;;  %v3180_v12 = vunpack.c.l.b16 %v3027_v18  ;;  %v2761_v18 = vld [vmem:[#allocation2 + $0x130] sm:$0x1] }
 0x157   : > { %14165 = vst [vmem:[#allocation18_spill] sm:$0xff] %v11714_v54  ;;  %v3181_v35 = vunpack.c.l.b16 %v3037_v26  ;;  %v11749_v29 = vrot.slane %v2146_v61, 7  ;;  %v3042_v24 = vshll.u32 %v2759_v21, 16  ;;  %v2149_v51 = vshll.u32 %v11717_v20, 16 }
 0x158   : > { %v2362_v56 = vpop.f32.mrf.mxu3  ;;  %v11743_v22 = vpop.f32.mrf.mxu0  ;;  %v1535_v30 = vrot.slane %v1533_v15, 4  ;;  %v3048_v7 = vshll.u32 %v2760_v53, 16  ;;  %v3041_v62 = vrot.slane %v3039_v5, 4  ;;  %v1548_v26 = vrot.slane %v1546_v4, 4 }
 0x159   : > { %v2441_v49 = vadd.f32 %v2362_v56, %v1819_v57  ;;  %v2141_v57 = vshrl.u32 %v1883_v3, 16  ;;  %v1538_v56 = vrot.slane %v1536_v31, 5  ;;  %v3044_v3 = vrot.slane %v3042_v24, 5  ;;  %v10669_v24 = vld [vmem:[#allocation2 + $0x128] sm:$0xff] }
 0x15a   : > { %v11747_v34 = vpop.f32.mrf.mxu1  ;;  %v11759_v21 = vrot.slane %v3048_v7, 5  ;;  %v1521_v20 = vsel %vm11101_vm8, %v11735_v11, %v11701_v8  ;;  %v2157_v31 = vrot.slane %v2155_v43, 7  ;;  %v3058_v4 = vshll.u32 %v2761_v18, 16 }
 0x15b   : > { %v2695_v10 = vadd.f32 %v11602_v47, %v2441_v49  ;;  %v11756_v49 = vrot.slane %v1542_v19, 5  ;;  %v9995_v15 = vrot.slane %v2141_v57, 11  ;;  %v1231_v19 = vld [vmem:[#allocation2 + $0x130] sm:$0x1]  ;;  %v3045_v46 = vor.u32 %v3044_v3, %v3041_v62 }
 0x15c   : > { %v1745_v47 = vpop.f32.mrf.mxu2  ;;  %v1539_v54 = vor.u32 %v1538_v56, %v1535_v30  ;;  %v14167_v43 = vsel %vm10929_vm5, %v11709_v23, %v11711_v6  ;;  %v11783_v57 = vunpack.c.l.b16 %v1521_v20  ;;  %v3060_v30 = vrot.slane %v3058_v4, 5  ;;  %v11804_v20 = vld [vmem:[#allocation2 + $0x140] sm:$0xf] }
 0x15d   : > { %v11752_v36 = vadd.f32 %v11688_v16, %v2695_v10  ;;  %10010 = vmatmul.msk.bf16.gmra.mxu3 %vm863_vm2, %v2293_v14  ;;  %v1821_v61 = vadd.f32 %v1745_v47, %v11253_v63  ;;  %v3052_v16 = vshrl.u32 %v2760_v53, 16  ;;  %v1531_v14 = vsel %vm11101_vm8, %v1526_v17, %v1530_v25 }
 0x15e   : > { %v3202_v53 = vpack.c.b16 %v3181_v35, %v3180_v12  ;;  %v2151_v47 = vor.u32 %v2149_v51, %v11749_v29  ;;  %v1552_v25 = vshll.u32 %v1231_v19, 16  ;;  %v2272_v12 = vunpack.c.l.b16 %v14167_v43  ;;  %v1886_v43 = vld [vmem:[#allocation2 + $0x13c] sm:$0x8] }
 0x15f   : > { %14166 = vst [vmem:[#allocation19_spill] sm:$0xff] %v11752_v36  ;;  %v3054_v63 = vrot.slane %v3052_v16, 4  ;;  %v2158_v36 = vshll.u32 %v11729_v37, 16  ;;  %v2273_v37 = vunpack.c.l.b16 %v11733_v2  ;;  %v3046_v35 = vrot.slane %v3045_v46, 4  ;;  %v1232_v2 = vld [vmem:[#allocation2 + $0x140] sm:$0xf] }
 0x160   : > { %v2365_v10 = vpop.f32.mrf.mxu3  ;;  %v11767_v7 = vpop.f32.mrf.mxu0  ;;  %v2153_v23 = vrot.slane %v11749_v29, 4  ;;  %v11793_v18 = vrot.slane %v1539_v54, 4  ;;  %v11806_v29 = vld [vmem:[#allocation2 + $0x144] sm:$0xf] }
 0x161   : > { %v2442_v5 = vadd.f32 %v2365_v10, %v1820_v59  ;;  %9978 = vmatmul.msk.bf16.gmra.mxu2 %vm863_vm2, %v1672_v40  ;;  %v1549_v59 = vor.u32 %v1548_v26, %v11756_v49  ;;  %v3055_v17 = vor.u32 %v3054_v63, %v11759_v21  ;;  %v11785_v40 = vunpack.c.l.b16 %v1531_v14  ;;  %v2763_v63 = vld [vmem:[#allocation2 + $0x144] sm:$0xf] }
 0x162   : > { %v11773_v11 = vpop.f32.mrf.mxu1  ;;  %v2160_v6 = vor.u32 %v2158_v36, %v2157_v31  ;;  %v11800_v26 = vrot.slane %v1552_v25, 5  ;;  %v2294_v16 = vpack.c.b16 %v2273_v37, %v2272_v12  ;;  %v1557_v14 = vshrl.u32 %v1232_v2, 16 }
 0x163   : > { %v2696_v8 = vadd.f32 %v11628_v38, %v2442_v5  ;;  %10093 = vmatmul.msk.bf16.gmra.mxu0 %vm863_vm2, %v10669_v24  ;;  %v3056_v51 = vrot.slane %v3055_v17, 4  ;;  %v11798_v3 = vrot.slane %v1549_v59, 4  ;;  %v1673_v10 = vpack.c.b16 %v11785_v40, %v11783_v57  ;;  %v1233_v24 = vld [vmem:[#allocation2 + $0x144] sm:$0xf] }
 0x164   : > { %v1748_v56 = vpop.f32.mrf.mxu2  ;;  %v11817_v19 = vsel %vm10929_vm5, %v2153_v23, %v2160_v6  ;;  %v2177_v59 = vshrl.u32 %v11806_v29, 16  ;;  %v1566_v57 = vshll.u32 %v1233_v24, 16  ;;  %v3072_v40 = vshll.u32 %v2763_v63, 16 }
 0x165   : > { %v11788_v38 = vadd.f32 %v11707_v45, %v2696_v8  ;;  %10109 = vmatmul.msk.bf16.gmra.mxu1 %vm863_vm2, %v3202_v53  ;;  %v1822_v62 = vadd.f32 %v1748_v56, %v11279_v50  ;;  %v2152_v45 = vsel %vm10929_vm5, %v9995_v15, %v2151_v47  ;;  %v3051_v50 = vsel %vm11101_vm8, %v3046_v35, %v11759_v21  ;;  %v2762_v15 = vld [vmem:[#allocation2 + $0x140] sm:$0xf] }
 0x166   : > { %v3061_v36 = vsel %vm11101_vm8, %v3056_v51, %v3060_v30  ;;  %v11819_v5 = vunpack.c.l.b16 %v2152_v45  ;;  %v1560_v21 = vshll.u32 %v1232_v2, 16  ;;  %v1555_v47 = vsel %vm11101_vm8, %v11798_v3, %v11800_v26  ;;  %v2764_v2 = vld [vmem:[#allocation2 + $0x148] sm:$0x1] }
 0x167   : > { %v2168_v8 = vshrl.u32 %v11804_v20, 16  ;;  %v3182_v25 = vunpack.c.l.b16 %v3051_v50  ;;  %v3183_v17 = vunpack.c.l.b16 %v3061_v36  ;;  %v3066_v12 = vshll.u32 %v2762_v15, 16  ;;  %v10670_v36 = vld [vmem:[#allocation2 + $0x140] sm:$0xff] }
 0x168   : > { %v2367_v46 = vpop.f32.mrf.mxu3  ;;  %v11813_v31 = vpop.f32.mrf.mxu0  ;;  %v1562_v51 = vrot.slane %v1560_v21, 5  ;;  %v1570_v30 = vshrl.u32 %v1233_v24, 16  ;;  %v3074_v45 = vrot.slane %v3072_v40, 5  ;;  %v3076_v3 = vshrl.u32 %v2763_v63, 16 }
 0x169   : > { %v2443_v54 = vadd.f32 %v2367_v46, %v1821_v61  ;;  %v1545_v61 = vsel %vm11101_vm8, %v11793_v18, %v11756_v49  ;;  %v3063_v49 = vshrl.u32 %v2762_v15, 16  ;;  %v3068_v23 = vrot.slane %v3066_v12, 5 }
 0x16a   : > { %v11826_v53 = vpop.f32.mrf.mxu1  ;;  %v2163_v18 = vshrl.u32 %v1886_v43, 16  ;;  %v2170_v46 = vrot.slane %v2168_v8, 7  ;;  %v2180_v15 = vshll.u32 %v11806_v29, 16  ;;  %v3078_v24 = vrot.slane %v3076_v3, 4 }
 0x16b   : > { %v2697_v4 = vadd.f32 %v11676_v60, %v2443_v54  ;;  %v1559_v60 = vrot.slane %v1557_v14, 4  ;;  %v3065_v56 = vrot.slane %v3063_v49, 4  ;;  %v2179_v54 = vrot.slane %v2177_v59, 7 }
 0x16c   : > { %v1750_v35 = vpop.f32.mrf.mxu2  ;;  %v3203_v14 = vpack.c.b16 %v3183_v17, %v3182_v25  ;;  %v11843_v43 = vrot.slane %v1566_v57, 5  ;;  %v1572_v49 = vrot.slane %v1570_v30, 4  ;;  %v3082_v63 = vshll.u32 %v2764_v2, 16  ;;  %v1890_v57 = vld [vmem:[#allocation2 + $0x158] sm:$0xf] }
 0x16d   : > { %v11835_v37 = vadd.f32 %v11747_v34, %v2697_v4  ;;  %10011 = vmatmul.msk.bf16.gmra.mxu3 %vm863_vm2, %v2294_v16  ;;  %v1823_v6 = vadd.f32 %v1750_v35, %v11319_v33  ;;  %v2171_v34 = vshll.u32 %v11804_v20, 16  ;;  %v3069_v16 = vor.u32 %v3068_v23, %v3065_v56  ;;  %v1234_v4 = vld [vmem:[#allocation2 + $0x148] sm:$0x1]  ;;  %v11867_v23 = vld [vmem:[#allocation2 + $0x15c] sm:$0xf] }
 0x16e   : > { %v1563_v33 = vor.u32 %v1562_v51, %v1559_v60  ;;  %v2275_v8 = vunpack.c.l.b16 %v11817_v19  ;;  %v3079_v29 = vor.u32 %v3078_v24, %v3074_v45  ;;  %v11852_v25 = vunpack.c.l.b16 %v1555_v47  ;;  %v2766_v24 = vld [vmem:[#allocation2 + $0x15c] sm:$0xf] }
 0x16f   : > { %v11854_v17 = vrot.slane %v2163_v18, 11  ;;  %v2175_v12 = vrot.slane %v2170_v46, 4  ;;  %v3070_v60 = vrot.slane %v3069_v16, 4  ;;  %v1576_v19 = vshll.u32 %v1234_v4, 16 }
 0x170   : > { %v2370_v26 = vpop.f32.mrf.mxu3  ;;  %v11841_v21 = vpop.f32.mrf.mxu0  ;;  %v11863_v35 = vrot.slane %v1563_v33, 4  ;;  %v1573_v47 = vor.u32 %v1572_v49, %v11843_v43  ;;  %v3080_v51 = vrot.slane %v3079_v29, 4  ;;  %v3084_v30 = vrot.slane %v3082_v63, 5 }
 0x171   : > { %v2444_v50 = vadd.f32 %v2370_v26, %v1822_v62  ;;  %9979 = vmatmul.msk.bf16.gmra.mxu2 %vm863_vm2, %v1673_v10  ;;  %v11848_v62 = vunpack.c.l.b16 %v1545_v61  ;;  %v2182_v10 = vor.u32 %v2180_v15, %v2179_v54  ;;  %v2295_v2 = vpack.c.b16 %v2275_v8, %v11819_v5  ;;  %v2765_v5 = vld [vmem:[#allocation2 + $0x158] sm:$0xf]  ;;  %v1236_v8 = vld [vmem:[#allocation2 + $0x15c] sm:$0xf] }
 0x172   : > { %v11850_v59 = vpop.f32.mrf.mxu1  ;;  %v3075_v26 = vsel %vm11101_vm8, %v3070_v60, %v3074_v45  ;;  %v1578_v16 = vrot.slane %v1576_v19, 5  ;;  %v1569_v45 = vsel %vm11101_vm8, %v11863_v35, %v11843_v43  ;;  %v2199_v15 = vshrl.u32 %v11867_v23, 16 }
 0x173   : > { %v2698_v20 = vadd.f32 %v11697_v55, %v2444_v50  ;;  %10094 = vmatmul.msk.bf16.gmra.mxu0 %vm863_vm2, %v10670_v36  ;;  %v11860_v55 = vor.u32 %v2171_v34, %v2170_v46  ;;  %v1674_v3 = vpack.c.b16 %v11852_v25, %v11848_v62  ;;  %v1889_v46 = vld [vmem:[#allocation2 + $0x154] sm:$0x8]  ;;  %v1235_v50 = vld [vmem:[#allocation2 + $0x158] sm:$0xf]  ;;  %v3184_v49 = vunpack.c.l.b16 %v3075_v26 }
 0x174   : > { %v1753_v61 = vpop.f32.mrf.mxu2  ;;  %v2185_v63 = vshrl.u32 %v1889_v46, 16  ;;  %v2193_v62 = vshll.u32 %v1890_v57, 16  ;;  %v1581_v29 = vshrl.u32 %v1235_v50, 16  ;;  %v3087_v25 = vshrl.u32 %v2765_v5, 16  ;;  %v2767_v46 = vld [vmem:[#allocation2 + $0x160] sm:$0x1] }
 0x175   : > { %v11857_v40 = vadd.f32 %v11773_v11, %v2698_v20  ;;  %10110 = vmatmul.msk.bf16.gmra.mxu1 %vm863_vm2, %v3203_v14  ;;  %v1824_v56 = vadd.f32 %v1753_v61, %v11345_v0  ;;  %v2190_v11 = vshrl.u32 %v1890_v57, 16  ;;  %v2174_v54 = vsel %vm10929_vm5, %v11854_v17, %v11860_v55 }
 0x176   : > { %v11880_v0 = vsel %vm10929_vm5, %v2175_v12, %v2182_v10  ;;  %v3085_v14 = vsel %vm11101_vm8, %v3080_v51, %v3084_v30  ;;  %v3090_v43 = vshll.u32 %v2765_v5, 16  ;;  %v1584_v60 = vshll.u32 %v1235_v50, 16  ;;  %v10671_v50 = vld [vmem:[#allocation2 + $0x158] sm:$0xff] }
 0x177   : > { %v11894_v20 = vrot.slane %v2190_v11, 7  ;;  %v3185_v12 = vunpack.c.l.b16 %v3085_v14  ;;  %v3096_v55 = vshll.u32 %v2766_v24, 16  ;;  %v1590_v10 = vshll.u32 %v1236_v8, 16 }
 0x178   : > { %v2372_v18 = vpop.f32.mrf.mxu3  ;;  %v11882_v36 = vpop.f32.mrf.mxu0  ;;  %v1594_v19 = vshrl.u32 %v1236_v8, 16  ;;  %v3089_v61 = vrot.slane %v3087_v25, 4  ;;  %v3092_v35 = vrot.slane %v3090_v43, 5  ;;  %v3100_v30 = vshrl.u32 %v2766_v24, 16  ;;  %v256_v25 = vld [vmem:[%s10909_s6 + $0x78] sm:$0xf] }
 0x179   : > { %v2445_v34 = vadd.f32 %v2372_v18, %v1823_v6  ;;  %v1574_v6 = vrot.slane %v1573_v47, 4  ;;  %v11903_v51 = vrot.slane %v3096_v55, 5  ;;  %v9997_v11 = vrot.slane %v2185_v63, 11  ;;  %v11923_v55 = vld [vmem:[#allocation2 + $0x170] sm:$0xf] }
 0x17a   : > { %v11892_v33 = vpop.f32.mrf.mxu1  ;;  %v2195_v18 = vor.u32 %v2193_v62, %v11894_v20  ;;  %v2202_v26 = vshll.u32 %v11867_v23, 16  ;;  %v1583_v5 = vrot.slane %v1581_v29, 4  ;;  %v1586_v14 = vrot.slane %v1584_v60, 5  ;;  %375 = vst.msk [vmem:[#allocation2 + $0x188] sm:$0xf] %vm258_vm1, %v256_v25 }
 0x17b   : > { %v2699_v4 = vadd.f32 %v11743_v22, %v2445_v34  ;;  %v1579_v57 = vsel %vm11101_vm8, %v1574_v6, %v1578_v16  ;;  %v3204_v16 = vpack.c.b16 %v3185_v12, %v3184_v49  ;;  %v1237_v6 = vld [vmem:[#allocation2 + $0x160] sm:$0x1]  ;;  %v11909_v24 = vrot.slane %v1590_v10, 5 }
 0x17c   : > { %v1755_v22 = vpop.f32.mrf.mxu2  ;;  %v1596_v63 = vrot.slane %v1594_v19, 4  ;;  %v3093_v8 = vor.u32 %v3092_v35, %v3089_v61  ;;  %v3106_v29 = vshll.u32 %v2767_v46, 16  ;;  %v2276_v43 = vunpack.c.l.b16 %v2174_v54  ;;  %v1892_v46 = vld [vmem:[#allocation2 + $0x16c] sm:$0x8] }
 0x17d   : > { %v11897_v17 = vadd.f32 %v11826_v53, %v2699_v4  ;;  %10012 = vmatmul.msk.bf16.gmra.mxu3 %vm863_vm2, %v2295_v2  ;;  %v1825_v47 = vadd.f32 %v1755_v22, %v11369_v42  ;;  %v2201_v2 = vrot.slane %v2199_v15, 7  ;;  %v3102_v42 = vrot.slane %v3100_v30, 4 }
 0x17e   : > { %v2277_v49 = vunpack.c.l.b16 %v11880_v0  ;;  %v11919_v12 = vunpack.c.l.b16 %v1569_v45  ;;  %v11921_v60 = vunpack.c.l.b16 %v1579_v57  ;;  %v1587_v22 = vor.u32 %v1586_v14, %v1583_v5  ;;  %v11937_v57 = vld [vmem:[#allocation2 + $0x174] sm:$0xf]  ;;  %v2768_v5 = vld [vmem:[#allocation2 + $0x170] sm:$0xf] }
 0x17f   : > { %v3103_v62 = vor.u32 %v3102_v42, %v11903_v51  ;;  %v1600_v10 = vshll.u32 %v1237_v6, 16  ;;  %v2196_v0 = vsel %vm10929_vm5, %v9997_v11, %v2195_v18  ;;  %v1597_v45 = vor.u32 %v1596_v63, %v11909_v24  ;;  %v1239_v63 = vld [vmem:[#allocation2 + $0x174] sm:$0xf] }
 0x180   : > { %v2375_v53 = vpop.f32.mrf.mxu3  ;;  %v11907_v4 = vpop.f32.mrf.mxu0  ;;  %v3094_v19 = vrot.slane %v3093_v8, 4  ;;  %v3108_v35 = vrot.slane %v3106_v29, 5  ;;  %v2212_v30 = vshrl.u32 %v11923_v55, 16  ;;  %v11946_v18 = vrot.slane %v1587_v22, 4  ;;  %v2769_v8 = vld [vmem:[#allocation2 + $0x174] sm:$0xf] }
 0x181   : > { %v2446_v34 = vadd.f32 %v2375_v53, %v1824_v56  ;;  %9980 = vmatmul.msk.bf16.gmra.mxu2 %vm863_vm2, %v1674_v3  ;;  %v2197_v56 = vrot.slane %v11894_v20, 4  ;;  %v257_v3 = vld [vmem:[%s10909_s6 + $0x7c] sm:$0xf]  ;;  %v2204_v20 = vor.u32 %v2202_v26, %v2201_v2  ;;  %v2296_v2 = vpack.c.b16 %v2277_v49, %v2276_v43 }
 0x182   : > { %v11913_v15 = vpop.f32.mrf.mxu1  ;;  %376 = vst.msk [vmem:[#allocation2 + $0x18c] sm:$0xf] %vm258_vm1, %v257_v3  ;;  %v1675_v26 = vpack.c.b16 %v11921_v60, %v11919_v12  ;;  %v2278_v42 = vunpack.c.l.b16 %v2196_v0  ;;  %v3099_v6 = vsel %vm11101_vm8, %v3094_v19, %v11903_v51  ;;  %v2207_v29 = vshrl.u32 %v1892_v46, 16 }
 0x183   : > { %v2700_v23 = vadd.f32 %v11767_v7, %v2446_v34  ;;  %10095 = vmatmul.msk.bf16.gmra.mxu0 %vm863_vm2, %v10671_v50  ;;  %v11944_v11 = vsel %vm10929_vm5, %v2197_v56, %v2204_v20  ;;  %v1238_v50 = vld [vmem:[#allocation2 + $0x170] sm:$0xf]  ;;  %v11963_v25 = vrot.slane %v2212_v30, 7  ;;  %v3111_v12 = vshrl.u32 %v2768_v5, 16 }
 0x184   : > { %v1758_v54 = vpop.f32.mrf.mxu2  ;;  %v1605_v43 = vshrl.u32 %v1238_v50, 16  ;;  %v1608_v49 = vshll.u32 %v1238_v50, 16  ;;  %v3114_v60 = vshll.u32 %v2768_v5, 16  ;;  %v1614_v3 = vshll.u32 %v1239_v63, 16  ;;  %v2770_v50 = vld [vmem:[#allocation2 + $0x178] sm:$0x1] }
 0x185   : > { %v11928_v7 = vadd.f32 %v11850_v59, %v2700_v23  ;;  %10111 = vmatmul.msk.bf16.gmra.mxu1 %vm863_vm2, %v3204_v16  ;;  %v1826_v61 = vadd.f32 %v1758_v54, %v11394_v58  ;;  %v3104_v59 = vrot.slane %v3103_v62, 4  ;;  %v11948_v58 = vrot.slane %v1600_v10, 5 }
 0x186   : > { %v11952_v16 = vrot.slane %v1597_v45, 4  ;;  %v1618_v20 = vshrl.u32 %v1239_v63, 16  ;;  %v3186_v10 = vunpack.c.l.b16 %v3099_v6  ;;  %v3113_v0 = vrot.slane %v3111_v12, 4  ;;  %v10672_v63 = vld [vmem:[#allocation2 + $0x170] sm:$0xff] }
 0x187   : > { %v3109_v62 = vsel %vm11101_vm8, %v3104_v59, %v3108_v35  ;;  %v3116_v45 = vrot.slane %v3114_v60, 5  ;;  %v2215_v59 = vshll.u32 %v11923_v55, 16  ;;  %v3124_v30 = vshrl.u32 %v2769_v8, 16 }
 0x188   : > { %v2377_v53 = vpop.f32.mrf.mxu3  ;;  %v11950_v14 = vpop.f32.mrf.mxu0  ;;  %v3187_v54 = vunpack.c.l.b16 %v3109_v62  ;;  %v2224_v46 = vshll.u32 %v11937_v57, 16  ;;  %v11974_v6 = vrot.slane %v1614_v3, 5  ;;  %v1593_v55 = vsel %vm11101_vm8, %v11946_v18, %v11909_v24 }
 0x189   : > { %v2447_v34 = vadd.f32 %v2377_v53, %v1825_v47  ;;  %v2221_v47 = vshrl.u32 %v11937_v57, 16  ;;  %v3126_v62 = vrot.slane %v3124_v30, 4  ;;  %v1240_v57 = vld [vmem:[#allocation2 + $0x178] sm:$0x1]  ;;  %v3130_v3 = vshll.u32 %v2770_v50, 16 }
 0x18a   : > { %v11959_v56 = vpop.f32.mrf.mxu1  ;;  %v1624_v18 = vshll.u32 %v1240_v57, 16  ;;  %v4258_v30 = vld [vmem:[#allocation2 + $0x3c] sm:$0xf] }
 0x18b   : > { %v2701_v23 = vadd.f32 %v11813_v31, %v2447_v34  ;;  %v3120_v31 = vshll.u32 %v2769_v8, 16  ;;  %v1610_v34 = vrot.slane %v1608_v49, 5  ;;  %v3117_v8 = vor.u32 %v3116_v45, %v3113_v0 }
 0x18c   : > { %v1760_v22 = vpop.f32.mrf.mxu2  ;;  %v9998_v49 = vrot.slane %v2207_v29, 11 }
 0x18d   : > { %v11966_v51 = vadd.f32 %v11892_v33, %v2701_v23  ;;  %10013 = vmatmul.msk.bf16.gmra.mxu3 %vm863_vm2, %v2296_v2  ;;  %v1827_v19 = vadd.f32 %v1760_v22, %v11434_v48  ;;  %v11971_v35 = vrot.slane %v3120_v31, 5  ;;  %v2223_v33 = vrot.slane %v2221_v47, 7 }
 0x18e   : > { %v1607_v2 = vrot.slane %v1605_v43, 4  ;;  %v1620_v23 = vrot.slane %v1618_v20, 4  ;;  %v2279_v48 = vunpack.c.l.b16 %v11944_v11  ;;  %v3205_v47 = vpack.c.b16 %v3187_v54, %v3186_v10  ;;  %v4257_v54 = vld [vmem:[#allocation2 + $0x38] sm:$0xf] }
 0x18f   : > { %v3127_v60 = vor.u32 %v3126_v62, %v11971_v35  ;;  %v2217_v11 = vor.u32 %v2215_v59, %v11963_v25  ;;  %v2219_v20 = vrot.slane %v11963_v25, 4  ;;  %v2226_v31 = vor.u32 %v2224_v46, %v2223_v33 }
 0x190   : > { %v2380_v53 = vpop.f32.mrf.mxu3  ;;  %v11976_v12 = vpop.f32.mrf.mxu0  ;;  %v1611_v22 = vor.u32 %v1610_v34, %v1607_v2  ;;  %v2297_v10 = vpack.c.b16 %v2279_v48, %v2278_v42  ;;  %v3118_v25 = vrot.slane %v3117_v8, 4  ;;  %v3132_v59 = vrot.slane %v3130_v3, 5  ;;  %v1895_v3 = vld [vmem:[#allocation2 + $0x184] sm:$0x8] }
 0x191   : > { %v2448_v5 = vadd.f32 %v2380_v53, %v1826_v61  ;;  %9981 = vmatmul.msk.bf16.gmra.mxu2 %vm863_vm2, %v1675_v26  ;;  %v1621_v26 = vor.u32 %v1620_v23, %v11974_v6  ;;  %v3128_v45 = vrot.slane %v3127_v60, 4  ;;  %v1626_v34 = vrot.slane %v1624_v18, 5 }
 0x192   : > { %v11985_v43 = vpop.f32.mrf.mxu1  ;;  %v1612_v46 = vrot.slane %v1611_v22, 4  ;;  %v4306_v50 = vshrl.u32 %v4257_v54, 16  ;;  %v4315_v23 = vshll.u32 %v4258_v30, 16  ;;  %v4319_v62 = vshrl.u32 %v4258_v30, 16 }
 0x193   : > { %v2702_v61 = vadd.f32 %v11841_v21, %v2448_v5  ;;  %10096 = vmatmul.msk.bf16.gmra.mxu0 %vm863_vm2, %v10672_v63  ;;  %v1603_v21 = vsel %vm11101_vm8, %v11952_v16, %v11948_v58  ;;  %v2218_v58 = vsel %vm10929_vm5, %v9998_v49, %v2217_v11  ;;  %v2227_v16 = vsel %vm10929_vm5, %v2219_v20, %v2226_v31  ;;  %v2771_v49 = vld [vmem:[#allocation2 + $0x188] sm:$0xf]  ;;  %v12025_v11 = vld [vmem:[#allocation2 + $0x18c] sm:$0xf] }
 0x194   : > { %v1763_v29 = vpop.f32.mrf.mxu2  ;;  %v1659_v33 = vunpack.c.l.b16 %v1603_v21  ;;  %v1622_v2 = vrot.slane %v1621_v26, 4  ;;  %v4309_v63 = vshll.u32 %v4257_v54, 16  ;;  %v2281_v57 = vunpack.c.l.b16 %v2227_v16  ;;  %v4259_v21 = vld [vmem:[#allocation2 + $0x40] sm:$0x1]  ;;  %v2772_v54 = vld [vmem:[#allocation2 + $0x18c] sm:$0xf] }
 0x195   : > { %v11991_v24 = vadd.f32 %v11913_v15, %v2702_v61  ;;  %10112 = vmatmul.msk.bf16.gmra.mxu1 %vm863_vm2, %v3205_v47  ;;  %v1828_v0 = vadd.f32 %v1763_v29, %v11460_v41  ;;  %v1658_v15 = vunpack.c.l.b16 %v1593_v55  ;;  %v3123_v41 = vsel %vm11101_vm8, %v3118_v25, %v11971_v35  ;;  %v12017_v61 = vld [vmem:[#allocation2 + $0x188] sm:$0xf] }
 0x196   : > { %v2280_v47 = vunpack.c.l.b16 %v2218_v58  ;;  %v1617_v35 = vsel %vm11101_vm8, %v1612_v46, %v11974_v6  ;;  %v3188_v60 = vunpack.c.l.b16 %v3123_v41  ;;  %v4308_v20 = vrot.slane %v4306_v50, 4  ;;  %v10673_v16 = vld [vmem:[#allocation2 + $0x188] sm:$0xff] }
 0x197   : > { %v1676_v8 = vpack.c.b16 %v1659_v33, %v1658_v15  ;;  %v4311_v26 = vrot.slane %v4309_v63, 5  ;;  %v12027_v18 = vrot.slane %v4315_v23, 5  ;;  %v4321_v29 = vrot.slane %v4319_v62, 4 }
 0x198   : > { %v2382_v53 = vpop.f32.mrf.mxu3  ;;  %v12005_v5 = vpop.f32.mrf.mxu0  ;;  %v12030_v25 = vpack.c.b16 %v2281_v57, %v2280_v47  ;;  %v2234_v6 = vshrl.u32 %v12017_v61, 16  ;;  %v3135_v15 = vshrl.u32 %v2771_v49, 16  ;;  %v2243_v33 = vshrl.u32 %v12025_v11, 16 }
 0x199   : > { %v2449_v42 = vadd.f32 %v2382_v53, %v1827_v19  ;;  %v3133_v19 = vsel %vm11101_vm8, %v3128_v45, %v3132_v59  ;;  %v12033_v59 = vunpack.c.l.b16 %v1617_v35  ;;  %v2229_v53 = vshrl.u32 %v1895_v3, 16 }
 0x19a   : > { %v12013_v55 = vpop.f32.mrf.mxu1  ;;  %v3189_v22 = vunpack.c.l.b16 %v3133_v19  ;;  %v4325_v46 = vshll.u32 %v4259_v21, 16  ;;  %v4312_v41 = vor.u32 %v4311_v26, %v4308_v20  ;;  %v4322_v63 = vor.u32 %v4321_v29, %v12027_v18 }
 0x19b   : > { %v12011_v48 = vadd.f32 %v11882_v36, %v2449_v42  ;;  %v1627_v36 = vsel %vm11101_vm8, %v1622_v2, %v1626_v34  ;;  %v2773_v42 = vld [vmem:[#allocation2 + $0x190] sm:$0x1]  ;;  %v3137_v2 = vrot.slane %v3135_v15, 4  ;;  %v3144_v23 = vshll.u32 %v2772_v54, 16  ;;  %v3382_v15 = vld [vmem:[#allocation2 + $0x38] sm:$0xf] }
 0x19c   : > { %v1765_v31 = vpop.f32.mrf.mxu2  ;;  %v12035_v30 = vunpack.c.l.b16 %v1627_v36  ;;  %v3206_v50 = vpack.c.b16 %v3189_v22, %v3188_v60  ;;  %v2236_v57 = vrot.slane %v2234_v6, 7  ;;  %v3148_v19 = vshrl.u32 %v2772_v54, 16  ;;  %v4261_v22 = vld [vmem:[#allocation2 + $0x54] sm:$0xf] }
 0x19d   : > { %10014 = vmatmul.msk.bf16.gmra.mxu3 %vm863_vm2, %v2297_v10  ;;  %v1829_v10 = vadd.f32 %v1765_v31, %v11490_v13  ;;  %v3138_v13 = vshll.u32 %v2771_v49, 16  ;;  %v12045_v35 = vrot.slane %v2229_v53, 11  ;;  %v2237_v49 = vshll.u32 %v12017_v61, 16 }
 0x19e   : > { %v3146_v36 = vrot.slane %v3144_v23, 5  ;;  %v3154_v3 = vshll.u32 %v2773_v42, 16  ;;  %v2245_v20 = vrot.slane %v2243_v33, 7  ;;  %v3150_v31 = vrot.slane %v3148_v19, 4  ;;  %v3383_v33 = vld [vmem:[#allocation2 + $0x3c] sm:$0xf] }
 0x19f   : > { %v2246_v26 = vshll.u32 %v12025_v11, 16  ;;  %v4313_v29 = vrot.slane %v4312_v41, 4  ;;  %v4323_v6 = vrot.slane %v4322_v63, 4  ;;  %v4327_v61 = vrot.slane %v4325_v46, 5 }
 0x1a0   : > { %v2385_v45 = vpop.f32.mrf.mxu3  ;;  %v12038_v34 = vpop.f32.mrf.mxu0  ;;  %v3156_v53 = vrot.slane %v3154_v3, 5  ;;  %v3435_v63 = vshrl.u32 %v3382_v15, 16 }
 0x1a1   : > { %v2450_v58 = vadd.f32 %v2385_v45, %v1828_v0  ;;  %9982 = vmatmul.msk.bf16.gmra.mxu2 %vm863_vm2, %v1676_v8  ;;  %v3140_v0 = vrot.slane %v3138_v13, 5  ;;  %v3151_v45 = vor.u32 %v3150_v31, %v3146_v36  ;;  %v4343_v13 = vshrl.u32 %v4261_v22, 16 }
 0x1a2   : > { %v12043_v47 = vpop.f32.mrf.mxu1  ;;  %v2248_v41 = vor.u32 %v2246_v26, %v2245_v20  ;;  %v4328_v46 = vsel %vm11101_vm8, %v4323_v6, %v4327_v61  ;;  %v4262_v26 = vld [vmem:[#allocation2 + $0x58] sm:$0x1] }
 0x1a3   : > { %v2704_v62 = vadd.f32 %v11907_v4, %v2450_v58  ;;  %10097 = vmatmul.msk.bf16.gmra.mxu0 %vm863_vm2, %v10673_v16  ;;  %v3141_v8 = vor.u32 %v3140_v0, %v3137_v2  ;;  %v4260_v4 = vld [vmem:[#allocation2 + $0x50] sm:$0xf]  ;;  %v4339_v2 = vshll.u32 %v4261_v22, 16  ;;  %v3152_v0 = vrot.slane %v3151_v45, 4 }
 0x1a4   : > { %v1768_v21 = vpop.f32.mrf.mxu2  ;;  %v4330_v16 = vshrl.u32 %v4260_v4, 16  ;;  %v4333_v42 = vshll.u32 %v4260_v4, 16  ;;  %v4345_v4 = vrot.slane %v4343_v13, 4 }
 0x1a5   : > { %v12049_v60 = vadd.f32 %v11985_v43, %v2704_v62  ;;  %10113 = vmatmul.msk.bf16.gmra.mxu1 %vm863_vm2, %v3206_v50  ;;  %v1830_v54 = vadd.f32 %v1768_v21, %v11512_v32  ;;  %v3142_v43 = vrot.slane %v3141_v8, 4  ;;  %v2239_v62 = vor.u32 %v2237_v49, %v2236_v57 }
 0x1a6   : > { %v2241_v50 = vrot.slane %v2236_v57, 4  ;;  %v4318_v32 = vsel %vm11101_vm8, %v4313_v29, %v12027_v18  ;;  %v3444_v49 = vshrl.u32 %v3383_v33, 16  ;;  %v3157_v20 = vsel %vm11101_vm8, %v3152_v0, %v3156_v53 }
 0x1a7   : > { %v3147_v57 = vsel %vm11101_vm8, %v3142_v43, %v3146_v36  ;;  %v4332_v8 = vrot.slane %v4330_v16, 4  ;;  %v4335_v31 = vrot.slane %v4333_v42, 5  ;;  %v12071_v18 = vrot.slane %v4339_v2, 5 }
 0x1a8   : > { %v2387_v58 = vpop.f32.mrf.mxu3  ;;  %v12055_v11 = vpop.f32.mrf.mxu0  ;;  %v2240_v22 = vsel %vm10929_vm5, %v12045_v35, %v2239_v62  ;;  %v4691_v21 = vunpack.c.l.b16 %v4318_v32  ;;  %v4692_v36 = vunpack.c.l.b16 %v4328_v46  ;;  %v2249_v6 = vsel %vm10929_vm5, %v2241_v50, %v2248_v41 }
 0x1a9   : > { %v2451_v23 = vadd.f32 %v2387_v58, %v1829_v10  ;;  %v3381_v10 = vld [vmem:[#allocation2 + $0x34] sm:$0x8]  ;;  %v3190_v43 = vunpack.c.l.b16 %v3147_v57  ;;  %v3191_v45 = vunpack.c.l.b16 %v3157_v20  ;;  %v3438_v58 = vshll.u32 %v3382_v15, 16  ;;  %v4263_v20 = vld [vmem:[#allocation2 + $0x68] sm:$0xf] }
 0x1aa   : > { %v12065_v3 = vpop.f32.mrf.mxu1  ;;  %v3430_v61 = vshrl.u32 %v3381_v10, 16  ;;  %v3447_v16 = vshll.u32 %v3383_v33, 16  ;;  %v4336_v42 = vor.u32 %v4335_v31, %v4332_v8  ;;  %v4346_v35 = vor.u32 %v4345_v4, %v12071_v18  ;;  %v4264_v31 = vld [vmem:[#allocation2 + $0x6c] sm:$0xf] }
 0x1ab   : > { %v12063_v19 = vadd.f32 %v11950_v14, %v2451_v23  ;;  %v1677_v14 = vpack.c.b16 %v12035_v30, %v12033_v59  ;;  %v3446_v30 = vrot.slane %v3444_v49, 7  ;;  %v4349_v2 = vshll.u32 %v4262_v26, 16  ;;  %v3385_v26 = vld [vmem:[#allocation2 + $0x50] sm:$0xf] }
 0x1ac   : > { %v1770_v29 = vpop.f32.mrf.mxu2  ;;  %v4723_v23 = vpack.c.b16 %v4692_v36, %v4691_v21  ;;  %v2282_v0 = vunpack.c.l.b16 %v2240_v22  ;;  %v2283_v50 = vunpack.c.l.b16 %v2249_v6  ;;  %v3207_v41 = vpack.c.b16 %v3191_v45, %v3190_v43 }
 0x1ad   : > { %10015 = vmatmul.msk.bf16.gmra.mxu3 %vm863_vm2, %v12030_v25  ;;  %v1831_v53 = vadd.f32 %v1770_v29, %v11553_v52  ;;  %v3437_v25 = vrot.slane %v3435_v63, 7  ;;  %v10115_v15 = vrot.slane %v3430_v61, 11  ;;  %v3449_v63 = vor.u32 %v3447_v16, %v3446_v30  ;;  %v3386_v61 = vld [vmem:[#allocation2 + $0x54] sm:$0xf] }
 0x1ae   : > { %v4337_v10 = vrot.slane %v4336_v42, 4  ;;  %v4347_v49 = vrot.slane %v4346_v35, 4  ;;  %v4351_v57 = vrot.slane %v4349_v2, 5  ;;  %v2299_v4 = vpack.c.b16 %v2283_v50, %v2282_v0  ;;  %v3384_v2 = vld [vmem:[#allocation2 + $0x4c] sm:$0x8] }
 0x1af   : > { %v3440_v33 = vor.u32 %v3438_v58, %v3437_v25  ;;  %v3442_v46 = vrot.slane %v3437_v25, 4  ;;  %v4354_v29 = vshrl.u32 %v4263_v20, 16  ;;  %v4363_v43 = vshll.u32 %v4264_v31, 16 }
 0x1b0   : > { %v2390_v59 = vpop.f32.mrf.mxu3  ;;  %v12084_v62 = vpop.f32.mrf.mxu0  ;;  %v4352_v36 = vsel %vm11101_vm8, %v4347_v49, %v4351_v57  ;;  %v4367_v45 = vshrl.u32 %v4264_v31, 16  ;;  %v3460_v49 = vshll.u32 %v3385_v26, 16 }
 0x1b1   : > { %v2452_v13 = vadd.f32 %v2390_v59, %v1830_v54  ;;  %9983 = vmatmul.msk.bf16.gmra.mxu2 %vm863_vm2, %v1677_v14  ;;  %v3441_v14 = vsel %vm10929_vm5, %v10115_v15, %v3440_v33  ;;  %v3450_v21 = vsel %vm10929_vm5, %v3442_v46, %v3449_v63  ;;  %v4694_v35 = vunpack.c.l.b16 %v4352_v36 }
 0x1b2   : > { %v12088_v32 = vpop.f32.mrf.mxu1  ;;  %v3783_v16 = vunpack.c.l.b16 %v3441_v14  ;;  %v3784_v59 = vunpack.c.l.b16 %v3450_v21  ;;  %v4365_v0 = vrot.slane %v4363_v43, 5  ;;  %v4369_v50 = vrot.slane %v4367_v45, 4  ;;  %v3388_v45 = vld [vmem:[#allocation2 + $0x68] sm:$0xf] }
 0x1b3   : > { %v2706_v52 = vadd.f32 %v11976_v12, %v2452_v13  ;;  %10230 = vmatmul.msk.bf16.vlgmr.msra.gmra.mxu0 %vm863_vm2, %v4723_v23  ;;  %v3466_v13 = vshrl.u32 %v3386_v61, 16  ;;  %v3452_v33 = vshrl.u32 %v3384_v2, 16 }
 0x1b4   : > { %v1773_v8 = vpop.f32.mrf.mxu2  ;;  %v3815_v15 = vpack.c.b16 %v3784_v59, %v3783_v16  ;;  %v4370_v14 = vor.u32 %v4369_v50, %v4365_v0  ;;  %v4266_v16 = vld [vmem:[#allocation2 + $0x80] sm:$0xf]  ;;  %v4267_v59 = vld [vmem:[#allocation2 + $0x84] sm:$0xf]  ;;  %v3479_v50 = vshrl.u32 %v3388_v45, 16 }
 0x1b5   : > { %v12091_v54 = vadd.f32 %v12043_v47, %v2706_v52  ;;  %10114 = vmatmul.msk.bf16.gmra.mxu1 %vm863_vm2, %v3207_v41  ;;  %v1832_v12 = vadd.f32 %v1773_v8, %v11576_v9  ;;  %v4342_v47 = vsel %vm11101_vm8, %v4337_v10, %v12071_v18  ;;  %v4357_v9 = vshll.u32 %v4263_v20, 16  ;;  %v4265_v52 = vld [vmem:[#allocation2 + $0x70] sm:$0x1] }
 0x1b6   : > { %v3457_v18 = vshrl.u32 %v3385_v26, 16  ;;  %v4693_v42 = vunpack.c.l.b16 %v4342_v47  ;;  %v3468_v57 = vrot.slane %v3466_v13, 7  ;;  %v3469_v20 = vshll.u32 %v3386_v61, 16  ;;  %v10674_v13 = vld [vmem:[#allocation2 + $0x38] sm:$0xff] }
 0x1b7   : > { %v4359_v23 = vrot.slane %v4357_v9, 5  ;;  %v4371_v61 = vrot.slane %v4370_v14, 4  ;;  %v3482_v14 = vshll.u32 %v3388_v45, 16 }
 0x1b8   : > { %v2392_v22 = vpop.f32.mrf.mxu3  ;;  %v12105_v25 = vpop.f32.mrf.mxu0  ;;  %v3459_v46 = vrot.slane %v3457_v18, 7  ;;  %v4724_v10 = vpack.c.b16 %v4694_v35, %v4693_v42 }
 0x1b9   : > { %v2453_v6 = vadd.f32 %v2392_v22, %v1831_v53  ;;  %v4356_v53 = vrot.slane %v4354_v29, 4 }
 0x1ba   : > { %v12110_v30 = vpop.f32.mrf.mxu1  ;;  %v3462_v36 = vor.u32 %v3460_v49, %v3459_v46  ;;  %v3464_v29 = vrot.slane %v3459_v46, 4  ;;  %v4391_v46 = vshrl.u32 %v4267_v59, 16 }
 0x1bb   : > { %v12108_v58 = vadd.f32 %v12005_v5, %v2453_v6  ;;  %v4360_v31 = vor.u32 %v4359_v23, %v4356_v53  ;;  %v3471_v6 = vor.u32 %v3469_v20, %v3468_v57 }
 0x1bc   : > { %v1775_v41 = vpop.f32.mrf.mxu2 }
 0x1bd   : > { %10016 = vmatmul.msk.bf16.gmra.mxu3 %vm863_vm2, %v2299_v4  ;;  %v1833_v5 = vadd.f32 %v1775_v41, %v11608_v39  ;;  %v4373_v4 = vshll.u32 %v4265_v52, 16  ;;  %v10116_v39 = vrot.slane %v3452_v33, 11  ;;  %v3472_v35 = vsel %vm10929_vm5, %v3464_v29, %v3471_v6  ;;  %v3387_v41 = vld [vmem:[#allocation2 + $0x64] sm:$0x8] }
 0x1be   : > { %v4378_v52 = vshrl.u32 %v4266_v16, 16  ;;  %v4387_v33 = vshll.u32 %v4267_v59, 16  ;;  %v4393_v29 = vrot.slane %v4391_v46, 4 }
 0x1bf   : > { %v4375_v9 = vrot.slane %v4373_v4, 5  ;;  %v3463_v42 = vsel %vm10929_vm5, %v10116_v39, %v3462_v36 }
 0x1c0   : > { %v2395_v63 = vpop.f32.mrf.mxu3  ;;  %v12114_v22 = vpop.f32.mrf.mxu0  ;;  %v4389_v36 = vrot.slane %v4387_v33, 5 }
 0x1c1   : > { %v2454_v8 = vadd.f32 %v2395_v63, %v1832_v12  ;;  %10132 = vmatmul.msk.bf16.vlgmr.msra.gmra.mxu2 %vm863_vm2, %v3815_v15  ;;  %v4361_v12 = vrot.slane %v4360_v31, 4  ;;  %v4376_v23 = vsel %vm11101_vm8, %v4371_v61, %v4375_v9  ;;  %v4381_v15 = vshll.u32 %v4266_v16, 16  ;;  %v4268_v9 = vld [vmem:[#allocation2 + $0x88] sm:$0x1] }
 0x1c2   : > { %v12118_v47 = vpop.f32.mrf.mxu1  ;;  %v4696_v20 = vunpack.c.l.b16 %v4376_v23  ;;  %v3481_v31 = vrot.slane %v3479_v50, 7  ;;  %v4394_v45 = vor.u32 %v4393_v29, %v4389_v36 }
 0x1c3   : > { %v2708_v21 = vadd.f32 %v12038_v34, %v2454_v8  ;;  %10231 = vmatmul.msk.bf16.gmra.mxu0 %vm863_vm2, %v4724_v10  ;;  %v4366_v53 = vsel %vm11101_vm8, %v4361_v12, %v4365_v0  ;;  %v3785_v10 = vunpack.c.l.b16 %v3463_v42  ;;  %v3474_v8 = vshrl.u32 %v3387_v41, 16 }
 0x1c4   : > { %v1778_v43 = vpop.f32.mrf.mxu2  ;;  %v4695_v0 = vunpack.c.l.b16 %v4366_v53  ;;  %v4383_v39 = vrot.slane %v4381_v15, 5  ;;  %v4395_v46 = vrot.slane %v4394_v45, 4 }
 0x1c5   : > { %v12121_v26 = vadd.f32 %v12088_v32, %v2708_v21  ;;  %v1834_v34 = vadd.f32 %v1778_v43, %v11211_v1  ;;  %v3389_v32 = vld [vmem:[#allocation2 + $0x6c] sm:$0xf]  ;;  %v4380_v21 = vrot.slane %v4378_v52, 4 }
 0x1c6   : > { %v3488_v57 = vshrl.u32 %v3389_v32, 16  ;;  %v3491_v61 = vshll.u32 %v3389_v32, 16  ;;  %v4725_v59 = vpack.c.b16 %v4696_v20, %v4695_v0  ;;  %v4269_v32 = vld [vmem:[#allocation2 + $0x98] sm:$0xf]  ;;  %v3391_v0 = vld [vmem:[#allocation2 + $0x80] sm:$0xf] }
 0x1c7   : > { %v4402_v20 = vshrl.u32 %v4269_v32, 16 }
 0x1c8   : > { %v2397_v18 = vpop.f32.mrf.mxu3  ;;  %v12133_v1 = vpop.f32.mrf.mxu0  ;;  %v3490_v12 = vrot.slane %v3488_v57, 7 }
 0x1c9   : > { %v2455_v2 = vadd.f32 %v2397_v18, %v1833_v5  ;;  %v3786_v5 = vunpack.c.l.b16 %v3472_v35  ;;  %v10117_v18 = vrot.slane %v3474_v8, 11  ;;  %v3484_v35 = vor.u32 %v3482_v14, %v3481_v31 }
 0x1ca   : > { %v12138_v49 = vpop.f32.mrf.mxu1  ;;  %v3493_v50 = vor.u32 %v3491_v61, %v3490_v12  ;;  %v4405_v8 = vshll.u32 %v4269_v32, 16 }
 0x1cb   : > { %v12136_v63 = vadd.f32 %v12055_v11, %v2455_v2  ;;  %v3816_v6 = vpack.c.b16 %v3786_v5, %v3785_v10  ;;  %v4384_v2 = vor.u32 %v4383_v39, %v4380_v21  ;;  %v3485_v15 = vsel %vm10929_vm5, %v10117_v18, %v3484_v35  ;;  %v14168_v10 = vld [vmem:[#allocation4_spill] sm:$0xff]  ;;  %v10675_v39 = vld [vmem:[#allocation2 + $0x50] sm:$0xff]  ;;  %v3390_v18 = vld [vmem:[#allocation2 + $0x7c] sm:$0x8] }
 0x1cc   : > { %v1780_v4 = vpop.f32.mrf.mxu2  ;;  %v3787_v29 = vunpack.c.l.b16 %v3485_v15  ;;  %v3504_v15 = vshll.u32 %v3391_v0, 16 }
 0x1cd   : > { %10213 = vmatmul.msk.bf16.vlgmr.msra.gmra.mxu3 %vm863_vm2, %v10674_v13  ;;  %v1835_v11 = vadd.f32 %v1780_v4, %v11245_v44  ;;  %v4397_v13 = vshll.u32 %v4268_v9, 16  ;;  %v3486_v44 = vrot.slane %v3481_v31, 4  ;;  %v4385_v33 = vrot.slane %v4384_v2, 4  ;;  %v3392_v31 = vld [vmem:[#allocation2 + $0x84] sm:$0xf] }
 0x1ce   : > { %v3510_v35 = vshrl.u32 %v3392_v31, 16  ;;  %v4407_v2 = vrot.slane %v4405_v8, 5 }
 0x1cf   : > { %v3494_v57 = vsel %vm10929_vm5, %v3486_v44, %v3493_v50  ;;  %v4390_v61 = vsel %vm11101_vm8, %v4385_v33, %v4389_v36  ;;  %v4271_v36 = vld [vmem:[#allocation2 + $0xa0] sm:$0x1] }
 0x1d0   : > { %v2400_v43 = vpop.f32.mrf.mxu3  ;;  %v12142_v42 = vpop.f32.mrf.mxu0  ;;  %v3788_v12 = vunpack.c.l.b16 %v3494_v57  ;;  %v4421_v8 = vshll.u32 %v4271_v36, 16 }
 0x1d1   : > { %v2456_v16 = vadd.f32 %v2400_v43, %v1834_v34  ;;  %10133 = vmatmul.msk.bf16.gmra.mxu2 %vm863_vm2, %v3816_v6  ;;  %v4270_v34 = vld [vmem:[#allocation2 + $0x9c] sm:$0xf]  ;;  %v3501_v43 = vshrl.u32 %v3391_v0, 16 }
 0x1d2   : > { %v12146_v23 = vpop.f32.mrf.mxu1  ;;  %v4411_v14 = vshll.u32 %v4270_v34, 16  ;;  %v4415_v4 = vshrl.u32 %v4270_v34, 16  ;;  %v3817_v32 = vpack.c.b16 %v3788_v12, %v3787_v29  ;;  %v3496_v34 = vshrl.u32 %v3390_v18, 16 }
 0x1d3   : > { %v2710_v53 = vadd.f32 %v12084_v62, %v2456_v16  ;;  %10232 = vmatmul.msk.bf16.gmra.mxu0 %vm863_vm2, %v4725_v59  ;;  %v4399_v62 = vrot.slane %v4397_v13, 5 }
 0x1d4   : > { %v1783_v52 = vpop.f32.mrf.mxu2  ;;  %v4413_v45 = vrot.slane %v4411_v14, 5  ;;  %v4417_v13 = vrot.slane %v4415_v4, 4 }
 0x1d5   : > { %v12149_v41 = vadd.f32 %v12118_v47, %v2710_v53  ;;  %v1836_v5 = vadd.f32 %v1783_v52, %v14168_v10  ;;  %v4400_v9 = vsel %vm11101_vm8, %v4395_v46, %v4399_v62  ;;  %v4697_v53 = vunpack.c.l.b16 %v4390_v61 }
 0x1d6   : > { %v4698_v44 = vunpack.c.l.b16 %v4400_v9  ;;  %v3503_v52 = vrot.slane %v3501_v43, 7  ;;  %v3512_v46 = vrot.slane %v3510_v35, 7  ;;  %v3513_v62 = vshll.u32 %v3392_v31, 16  ;;  %v3395_v35 = vld [vmem:[#allocation2 + $0x9c] sm:$0xf] }
 0x1d7   : > { %v4423_v43 = vrot.slane %v4421_v8, 5 }
 0x1d8   : > { %v2402_v47 = vpop.f32.mrf.mxu3  ;;  %v12157_v6 = vpop.f32.mrf.mxu0  ;;  %v4726_v14 = vpack.c.b16 %v4698_v44, %v4697_v53  ;;  %v3508_v0 = vrot.slane %v3503_v52, 4  ;;  %v3515_v12 = vor.u32 %v3513_v62, %v3512_v46  ;;  %v10676_v62 = vld [vmem:[#allocation2 + $0x68] sm:$0xff] }
 0x1d9   : > { %v2457_v21 = vadd.f32 %v2402_v47, %v1835_v11  ;;  %v4404_v11 = vrot.slane %v4402_v20, 4  ;;  %v4418_v20 = vor.u32 %v4417_v13, %v4413_v45  ;;  %v4273_v13 = vld [vmem:[#allocation2 + $0xb4] sm:$0xf] }
 0x1da   : > { %v12166_v59 = vpop.f32.mrf.mxu1  ;;  %v3516_v36 = vsel %vm10929_vm5, %v3508_v0, %v3515_v12 }
 0x1db   : > { %v12164_v16 = vadd.f32 %v12105_v25, %v2457_v21  ;;  %v14169_v25 = vld [vmem:[#allocation5_spill] sm:$0xff]  ;;  %v4408_v10 = vor.u32 %v4407_v2, %v4404_v11  ;;  %v10118_v21 = vrot.slane %v3496_v34, 11  ;;  %v4419_v31 = vrot.slane %v4418_v20, 4  ;;  %v4272_v11 = vld [vmem:[#allocation2 + $0xb0] sm:$0xf] }
 0x1dc   : > { %v1785_v50 = vpop.f32.mrf.mxu2  ;;  %v3393_v34 = vld [vmem:[#allocation2 + $0x94] sm:$0x8]  ;;  %v4439_v20 = vshrl.u32 %v4273_v13, 16 }
 0x1dd   : > { %10214 = vmatmul.msk.bf16.gmra.mxu3 %vm863_vm2, %v10675_v39  ;;  %v1837_v33 = vadd.f32 %v1785_v50, %v14169_v25  ;;  %v3506_v39 = vor.u32 %v3504_v15, %v3503_v52  ;;  %v4409_v9 = vrot.slane %v4408_v10, 4  ;;  %v3532_v15 = vshrl.u32 %v3395_v35, 16 }
 0x1de   : > { %v4426_v25 = vshrl.u32 %v4272_v11, 16  ;;  %v4429_v10 = vshll.u32 %v4272_v11, 16  ;;  %v3518_v0 = vshrl.u32 %v3393_v34, 16 }
 0x1df   : > { %v3507_v44 = vsel %vm10929_vm5, %v10118_v21, %v3506_v39  ;;  %v4414_v50 = vsel %vm11101_vm8, %v4409_v9, %v4413_v45 }
 0x1e0   : > { %v2405_v57 = vpop.f32.mrf.mxu3  ;;  %v12170_v4 = vpop.f32.mrf.mxu0  ;;  %v4699_v39 = vunpack.c.l.b16 %v4414_v50  ;;  %v4431_v11 = vrot.slane %v4429_v10, 5  ;;  %v10119_v50 = vrot.slane %v3518_v0, 11 }
 0x1e1   : > { %v2458_v47 = vadd.f32 %v2405_v57, %v1836_v5  ;;  %10134 = vmatmul.msk.bf16.gmra.mxu2 %vm863_vm2, %v3817_v32  ;;  %v3394_v5 = vld [vmem:[#allocation2 + $0x98] sm:$0xf]  ;;  %v4424_v32 = vsel %vm11101_vm8, %v4419_v31, %v4423_v43  ;;  %v4435_v57 = vshll.u32 %v4273_v13, 16  ;;  %v3534_v31 = vrot.slane %v3532_v15, 7 }
 0x1e2   : > { %v12174_v29 = vpop.f32.mrf.mxu1  ;;  %v3523_v52 = vshrl.u32 %v3394_v5, 16  ;;  %v3526_v9 = vshll.u32 %v3394_v5, 16  ;;  %v4428_v43 = vrot.slane %v4426_v25, 4  ;;  %v4441_v13 = vrot.slane %v4439_v20, 4 }
 0x1e3   : > { %v2712_v61 = vadd.f32 %v12114_v22, %v2458_v47  ;;  %10233 = vmatmul.msk.bf16.gmra.mxu0 %vm863_vm2, %v4726_v14  ;;  %v14171_v22 = vld [vmem:[#allocation6_spill] sm:$0xff]  ;;  %v3789_v47 = vunpack.c.l.b16 %v3507_v44  ;;  %v3790_v14 = vunpack.c.l.b16 %v3516_v36  ;;  %v4274_v44 = vld [vmem:[#allocation2 + $0xb8] sm:$0x1] }
 0x1e4   : > { %v1788_v2 = vpop.f32.mrf.mxu2  ;;  %v3525_v12 = vrot.slane %v3523_v52, 7  ;;  %v14173_v36 = vld [vmem:[#allocation7_spill] sm:$0xff]  ;;  %v4432_v15 = vor.u32 %v4431_v11, %v4428_v43  ;;  %v3398_v11 = vld [vmem:[#allocation2 + $0xb4] sm:$0xf] }
 0x1e5   : > { %v12177_v18 = vadd.f32 %v12146_v23, %v2712_v61  ;;  %v1838_v53 = vadd.f32 %v1788_v2, %v14171_v22  ;;  %v4700_v61 = vunpack.c.l.b16 %v4424_v32  ;;  %v4437_v2 = vrot.slane %v4435_v57, 5 }
 0x1e6   : > { %v3528_v32 = vor.u32 %v3526_v9, %v3525_v12  ;;  %v3530_v34 = vrot.slane %v3525_v12, 4  ;;  %v4275_v12 = vld [vmem:[#allocation2 + $0xc8] sm:$0xf]  ;;  %v4276_v9 = vld [vmem:[#allocation2 + $0xcc] sm:$0xf] }
 0x1e7   : > { %14170 = vst [vmem:[#allocation4_spill] sm:$0xff] %v12177_v18  ;;  %v4445_v18 = vshll.u32 %v4274_v44, 16 }
 0x1e8   : > { %v2407_v23 = vpop.f32.mrf.mxu3  ;;  %v12189_v8 = vpop.f32.mrf.mxu0  ;;  %v3529_v57 = vsel %vm10929_vm5, %v10119_v50, %v3528_v32  ;;  %v4453_v50 = vshll.u32 %v4275_v12, 16  ;;  %v4459_v32 = vshll.u32 %v4276_v9, 16 }
 0x1e9   : > { %v2459_v46 = vadd.f32 %v2407_v23, %v1837_v33  ;;  %v3535_v33 = vshll.u32 %v3395_v35, 16  ;;  %v3818_v23 = vpack.c.b16 %v3790_v14, %v3789_v47  ;;  %v4442_v35 = vor.u32 %v4441_v13, %v4437_v2 }
 0x1ea   : > { %v12194_v45 = vpop.f32.mrf.mxu1 }
 0x1eb   : > { %v12192_v21 = vadd.f32 %v12133_v1, %v2459_v46  ;;  %14172 = vst [vmem:[#allocation5_spill] sm:$0xff] %v12194_v45  ;;  %v4727_v46 = vpack.c.b16 %v4700_v61, %v4699_v39  ;;  %v3537_v52 = vor.u32 %v3535_v33, %v3534_v31  ;;  %v4443_v14 = vrot.slane %v4442_v35, 4  ;;  %v3397_v61 = vld [vmem:[#allocation2 + $0xb0] sm:$0xf] }
 0x1ec   : > { %v1790_v22 = vpop.f32.mrf.mxu2  ;;  %v3791_v33 = vunpack.c.l.b16 %v3529_v57 }
 0x1ed   : > { %10215 = vmatmul.msk.bf16.gmra.mxu3 %vm863_vm2, %v10676_v62  ;;  %v1839_v1 = vadd.f32 %v1790_v22, %v14173_v36  ;;  %v3538_v20 = vsel %vm10929_vm5, %v3530_v34, %v3537_v52  ;;  %v10677_v22 = vld [vmem:[#allocation2 + $0x80] sm:$0xff]  ;;  %v3545_v36 = vshrl.u32 %v3397_v61, 16  ;;  %v4463_v34 = vshrl.u32 %v4276_v9, 16 }
 0x1ee   : > { %v3792_v43 = vunpack.c.l.b16 %v3538_v20  ;;  %v3548_v9 = vshll.u32 %v3397_v61, 16 }
 0x1ef   : > { %v3547_v57 = vrot.slane %v3545_v36, 7 }
 0x1f0   : > { %v2410_v45 = vpop.f32.mrf.mxu3  ;;  %v12198_v62 = vpop.f32.mrf.mxu0 }
 0x1f1   : > { %v2460_v5 = vadd.f32 %v2410_v45, %v1838_v53  ;;  %10135 = vmatmul.msk.bf16.gmra.mxu2 %vm863_vm2, %v3818_v23  ;;  %v4433_v53 = vrot.slane %v4432_v15, 4  ;;  %v4447_v45 = vrot.slane %v4445_v18, 5  ;;  %v3396_v23 = vld [vmem:[#allocation2 + $0xac] sm:$0x8] }
 0x1f2   : > { %v3323_v10 = vpop.f32.mrf.mxu1 }
 0x1f3   : > { %v2714_v25 = vadd.f32 %v12142_v42, %v2460_v5  ;;  %10234 = vmatmul.msk.bf16.gmra.mxu0 %vm863_vm2, %v4727_v46  ;;  %v14175_v42 = vld [vmem:[#allocation8_spill] sm:$0xff]  ;;  %v4448_v44 = vsel %vm11101_vm8, %v4443_v14, %v4447_v45  ;;  %v4450_v46 = vshrl.u32 %v4275_v12, 16  ;;  %v3554_v5 = vshrl.u32 %v3398_v11, 16 }
 0x1f4   : > { %v1793_v39 = vpop.f32.mrf.mxu2  ;;  %v4702_v35 = vunpack.c.l.b16 %v4448_v44  ;;  %v4455_v14 = vrot.slane %v4453_v50, 5  ;;  %v4461_v45 = vrot.slane %v4459_v32, 5  ;;  %v3552_v50 = vrot.slane %v3547_v57, 4 }
 0x1f5   : > { %v12207_v47 = vadd.f32 %v12174_v29, %v2714_v25  ;;  %v1840_v0 = vadd.f32 %v1793_v39, %v14175_v42  ;;  %v4438_v29 = vsel %vm11101_vm8, %v4433_v53, %v4437_v2  ;;  %v3540_v25 = vshrl.u32 %v3396_v23, 16  ;;  %v14177_v42 = vld [vmem:[#allocation9_spill] sm:$0xff] }
 0x1f6   : > { %v4701_v2 = vunpack.c.l.b16 %v4438_v29  ;;  %v4452_v53 = vrot.slane %v4450_v46, 4  ;;  %v4465_v39 = vrot.slane %v4463_v34, 4  ;;  %v3550_v46 = vor.u32 %v3548_v9, %v3547_v57  ;;  %v3400_v57 = vld [vmem:[#allocation2 + $0xc8] sm:$0xf] }
 0x1f7   : > { %14174 = vst [vmem:[#allocation6_spill] sm:$0xff] %v12207_v47 }
 0x1f8   : > { %v2412_v31 = vpop.f32.mrf.mxu3  ;;  %v12215_v18 = vpop.f32.mrf.mxu0  ;;  %v4456_v29 = vor.u32 %v4455_v14, %v4452_v53  ;;  %v4466_v44 = vor.u32 %v4465_v39, %v4461_v45  ;;  %v3401_v14 = vld [vmem:[#allocation2 + $0xcc] sm:$0xf] }
 0x1f9   : > { %v2461_v13 = vadd.f32 %v2412_v31, %v1839_v1  ;;  %v3819_v1 = vpack.c.b16 %v3792_v43, %v3791_v33  ;;  %v3557_v31 = vshll.u32 %v3398_v11, 16  ;;  %v4278_v11 = vld [vmem:[#allocation2 + $0xe0] sm:$0xf] }
 0x1fa   : > { %v12220_v15 = vpop.f32.mrf.mxu1  ;;  %v4474_v39 = vshrl.u32 %v4278_v11, 16 }
 0x1fb   : > { %v12218_v52 = vadd.f32 %v12157_v6, %v2461_v13  ;;  %14176 = vst [vmem:[#allocation7_spill] sm:$0xff] %v12220_v15  ;;  %v3556_v6 = vrot.slane %v3554_v5, 7  ;;  %v4277_v13 = vld [vmem:[#allocation2 + $0xd0] sm:$0x1]  ;;  %v4728_v15 = vpack.c.b16 %v4702_v35, %v4701_v2  ;;  %v4457_v2 = vrot.slane %v4456_v29, 4 }
 0x1fc   : > { %v1795_v20 = vpop.f32.mrf.mxu2  ;;  %v4469_v36 = vshll.u32 %v4277_v13, 16  ;;  %v4467_v35 = vrot.slane %v4466_v44, 4  ;;  %v3399_v44 = vld [vmem:[#allocation2 + $0xc4] sm:$0x8] }
 0x1fd   : > { %10216 = vmatmul.msk.bf16.gmra.mxu3 %vm863_vm2, %v10677_v22  ;;  %v1841_v12 = vadd.f32 %v1795_v20, %v14177_v42  ;;  %v10120_v22 = vrot.slane %v3540_v25, 11  ;;  %v3559_v32 = vor.u32 %v3557_v31, %v3556_v6  ;;  %v14179_v20 = vld [vmem:[#allocation10_spill] sm:$0xff]  ;;  %v10678_v31 = vld [vmem:[#allocation2 + $0x98] sm:$0xff] }
 0x1fe   : > { %v4471_v25 = vrot.slane %v4469_v36, 5  ;;  %v3567_v36 = vshrl.u32 %v3400_v57, 16 }
 0x200   : > { %v2415_v33 = vpop.f32.mrf.mxu3  ;;  %v12224_v47 = vpop.f32.mrf.mxu0 }
 0x201   : > { %v2462_v43 = vadd.f32 %v2415_v33, %v1840_v0  ;;  %10136 = vmatmul.msk.bf16.gmra.mxu2 %vm863_vm2, %v3819_v1  ;;  %v4279_v0 = vld [vmem:[#allocation2 + $0xe4] sm:$0xf]  ;;  %v3560_v1 = vsel %vm10929_vm5, %v3552_v50, %v3559_v32  ;;  %v4476_v50 = vrot.slane %v4474_v39, 4  ;;  %v3579_v39 = vshll.u32 %v3401_v14, 16 }
 0x202   : > { %v3328_v5 = vpop.f32.mrf.mxu1  ;;  %v4483_v42 = vshll.u32 %v4279_v0, 16  ;;  %v4487_v9 = vshrl.u32 %v4279_v0, 16  ;;  %v3794_v33 = vunpack.c.l.b16 %v3560_v1  ;;  %v3570_v1 = vshll.u32 %v3400_v57, 16 }
 0x203   : > { %v2716_v23 = vadd.f32 %v12170_v4, %v2462_v43  ;;  %10235 = vmatmul.msk.bf16.gmra.mxu0 %vm863_vm2, %v4728_v15  ;;  %v3551_v4 = vsel %vm10929_vm5, %v10120_v22, %v3550_v46  ;;  %v4477_v15 = vshll.u32 %v4278_v11, 16  ;;  %v4462_v43 = vsel %vm11101_vm8, %v4457_v2, %v4461_v45  ;;  %v4280_v45 = vld [vmem:[#allocation2 + $0xe8] sm:$0x1] }
 0x204   : > { %v1798_v34 = vpop.f32.mrf.mxu2  ;;  %v3793_v13 = vunpack.c.l.b16 %v3551_v4  ;;  %v4472_v22 = vsel %vm11101_vm8, %v4467_v35, %v4471_v25  ;;  %v4489_v11 = vrot.slane %v4487_v9, 4  ;;  %v4703_v0 = vunpack.c.l.b16 %v4462_v43  ;;  %v14181_v25 = vld [vmem:[#allocation11_spill] sm:$0xff] }
 0x205   : > { %v12228_v61 = vadd.f32 %v3323_v10, %v2716_v23  ;;  %v1842_v53 = vadd.f32 %v1798_v34, %v14179_v20  ;;  %v3576_v23 = vshrl.u32 %v3401_v14, 16  ;;  %v4479_v32 = vrot.slane %v4477_v15, 5  ;;  %v4281_v14 = vld [vmem:[#allocation2 + $0xf8] sm:$0xf] }
 0x206   : > { %v4704_v34 = vunpack.c.l.b16 %v4472_v22  ;;  %v3820_v20 = vpack.c.b16 %v3794_v33, %v3793_v13  ;;  %v3562_v35 = vshrl.u32 %v3399_v44, 16  ;;  %v3569_v4 = vrot.slane %v3567_v36, 7 }
 0x207   : > { %14178 = vst [vmem:[#allocation8_spill] sm:$0xff] %v12228_v61  ;;  %v4480_v15 = vor.u32 %v4479_v32, %v4476_v50  ;;  %v4493_v9 = vshll.u32 %v4280_v45, 16 }
 0x208   : > { %v2417_v10 = vpop.f32.mrf.mxu3  ;;  %v12243_v46 = vpop.f32.mrf.mxu0  ;;  %v10121_v13 = vrot.slane %v3562_v35, 11  ;;  %v3572_v33 = vor.u32 %v3570_v1, %v3569_v4  ;;  %v3574_v22 = vrot.slane %v3569_v4, 4  ;;  %v4498_v35 = vshrl.u32 %v4281_v14, 16  ;;  %v10679_v4 = vld [vmem:[#allocation2 + $0xb0] sm:$0xff]  ;;  %v3404_v1 = vld [vmem:[#allocation2 + $0xe4] sm:$0xf] }
 0x209   : > { %v2463_v6 = vadd.f32 %v2417_v10, %v1841_v12  ;;  %v4485_v12 = vrot.slane %v4483_v42, 5  ;;  %v3578_v10 = vrot.slane %v3576_v23, 7  ;;  %v4481_v36 = vrot.slane %v4480_v15, 4 }
 0x20a   : > { %v4495_v23 = vrot.slane %v4493_v9, 5 }
 0x20b   : > { %v12241_v29 = vadd.f32 %v12189_v8, %v2463_v6  ;;  %v4490_v42 = vor.u32 %v4489_v11, %v4485_v12  ;;  %v3581_v44 = vor.u32 %v3579_v39, %v3578_v10  ;;  %v14184_v11 = vld [vmem:[#allocation12_spill] sm:$0xff]  ;;  %v4501_v10 = vshll.u32 %v4281_v14, 16 }
 0x20c   : > { %v1800_v2 = vpop.f32.mrf.mxu2  ;;  %v4283_v14 = vld [vmem:[#allocation2 + $0x100] sm:$0x1] }
 0x20d   : > { %14180 = vst [vmem:[#allocation9_spill] sm:$0xff] %v12241_v29  ;;  %10217 = vmatmul.msk.bf16.gmra.mxu3 %vm863_vm2, %v10678_v31  ;;  %v1843_v8 = vadd.f32 %v1800_v2, %v14181_v25  ;;  %v12247_v29 = vpop.f32.mrf.mxu1  ;;  %v4729_v31 = vpack.c.b16 %v4704_v34, %v4703_v0  ;;  %v4491_v57 = vrot.slane %v4490_v42, 4  ;;  %v3582_v34 = vsel %vm10929_vm5, %v3574_v22, %v3581_v44 }
 0x20e   : > { %14182 = vst [vmem:[#allocation10_spill] sm:$0xff] %v12247_v29  ;;  %v3598_v22 = vshrl.u32 %v3404_v1, 16  ;;  %v4500_v44 = vrot.slane %v4498_v35, 4 }
 0x20f   : > { %v4496_v45 = vsel %vm11101_vm8, %v4491_v57, %v4495_v23 }
 0x210   : > { %v2420_v6 = vpop.f32.mrf.mxu3  ;;  %v12254_v32 = vpop.f32.mrf.mxu0 }
 0x211   : > { %v2464_v61 = vadd.f32 %v2420_v6, %v1842_v53  ;;  %10137 = vmatmul.msk.bf16.gmra.mxu2 %vm863_vm2, %v3820_v20  ;;  %v4282_v53 = vld [vmem:[#allocation2 + $0xfc] sm:$0xf]  ;;  %v3403_v20 = vld [vmem:[#allocation2 + $0xe0] sm:$0xf] }
 0x212   : > { %v4507_v6 = vshll.u32 %v4282_v53, 16  ;;  %v4511_v39 = vshrl.u32 %v4282_v53, 16 }
 0x213   : > { %v2718_v43 = vadd.f32 %v12198_v62, %v2464_v61  ;;  %10236 = vmatmul.msk.bf16.gmra.mxu0 %vm863_vm2, %v4729_v31  ;;  %v3573_v61 = vsel %vm10929_vm5, %v10121_v13, %v3572_v33  ;;  %v3796_v31 = vunpack.c.l.b16 %v3582_v34  ;;  %v3402_v33 = vld [vmem:[#allocation2 + $0xdc] sm:$0x8] }
 0x214   : > { %v1803_v50 = vpop.f32.mrf.mxu2  ;;  %v3795_v9 = vunpack.c.l.b16 %v3573_v61  ;;  %v4513_v57 = vrot.slane %v4511_v39, 4 }
 0x215   : > { %v12251_v2 = vadd.f32 %v3328_v5, %v2718_v43  ;;  %v1844_v62 = vadd.f32 %v1803_v50, %v14184_v11  ;;  %v4486_v5 = vsel %vm11101_vm8, %v4481_v36, %v4485_v12  ;;  %v3333_v15 = vpop.f32.mrf.mxu1  ;;  %v3589_v43 = vshrl.u32 %v3403_v20, 16  ;;  %v14185_v50 = vld [vmem:[#allocation13_spill] sm:$0xff] }
 0x216   : > { %v4705_v13 = vunpack.c.l.b16 %v4486_v5  ;;  %v4706_v12 = vunpack.c.l.b16 %v4496_v45  ;;  %v4509_v36 = vrot.slane %v4507_v6, 5  ;;  %v3821_v11 = vpack.c.b16 %v3796_v31, %v3795_v9 }
 0x217   : > { %14183 = vst [vmem:[#allocation11_spill] sm:$0xff] %v12251_v2  ;;  %v3592_v45 = vshll.u32 %v3403_v20, 16  ;;  %v3601_v2 = vshll.u32 %v3404_v1, 16 }
 0x218   : > { %v2422_v0 = vpop.f32.mrf.mxu3  ;;  %v12270_v34 = vpop.f32.mrf.mxu0  ;;  %v4730_v5 = vpack.c.b16 %v4706_v12, %v4705_v13  ;;  %v4514_v35 = vor.u32 %v4513_v57, %v4509_v36  ;;  %v4284_v12 = vld [vmem:[#allocation2 + $0x110] sm:$0xf] }
 0x219   : > { %v2465_v25 = vadd.f32 %v2422_v0, %v1843_v8  ;;  %v4503_v8 = vrot.slane %v4501_v10, 5  ;;  %v3591_v0 = vrot.slane %v3589_v43, 7  ;;  %14186 = vst [vmem:[#allocation12_spill] sm:$0xff] %v12270_v34  ;;  %v4517_v10 = vshll.u32 %v4283_v14, 16 }
 0x21a   : > { %v4515_v1 = vrot.slane %v4514_v35, 4 }
 0x21b   : > { %v12266_v42 = vadd.f32 %v12215_v18, %v2465_v25  ;;  %v3584_v18 = vshrl.u32 %v3402_v33, 16  ;;  %v3600_v25 = vrot.slane %v3598_v22, 7  ;;  %v3594_v31 = vor.u32 %v3592_v45, %v3591_v0  ;;  %v14187_v22 = vld [vmem:[#allocation14_spill] sm:$0xff] }
 0x21c   : > { %v1805_v23 = vpop.f32.mrf.mxu2  ;;  %v3596_v43 = vrot.slane %v3591_v0, 4  ;;  %v4522_v0 = vshrl.u32 %v4284_v12, 16 }
 0x21d   : > { %10218 = vmatmul.msk.bf16.gmra.mxu3 %vm863_vm2, %v10679_v4  ;;  %v1845_v53 = vadd.f32 %v1805_v23, %v14185_v50  ;;  %v4504_v4 = vor.u32 %v4503_v8, %v4500_v44  ;;  %v12274_v39 = vpop.f32.mrf.mxu1  ;;  %v10122_v9 = vrot.slane %v3584_v18, 11  ;;  %v3603_v33 = vor.u32 %v3601_v2, %v3600_v25  ;;  %v3407_v18 = vld [vmem:[#allocation2 + $0xfc] sm:$0xf] }
 0x21e   : > { %v3623_v34 = vshll.u32 %v3407_v18, 16 }
 0x21f   : > { %v4505_v20 = vrot.slane %v4504_v4, 4  ;;  %v3595_v8 = vsel %vm10929_vm5, %v10122_v9, %v3594_v31  ;;  %v3604_v57 = vsel %vm10929_vm5, %v3596_v43, %v3603_v33  ;;  %v14188_v9 = vmov 0  }
 0x220   : > { %v2425_v61 = vpop.f32.mrf.mxu3  ;;  %v3798_v35 = vunpack.c.l.b16 %v3604_v57  ;;  %5013 = vst.msk [vmem:[#allocation3 + $0x4] sm:$0xf] %vm5011_vm10, %v14188_v9 }
 0x221   : > { %v2466_v29 = vadd.f32 %v2425_v61, %v1844_v62  ;;  %10138 = vmatmul.msk.bf16.gmra.mxu2 %vm863_vm2, %v3821_v11  ;;  %v4519_v62 = vrot.slane %v4517_v10, 5  ;;  %v4510_v14 = vsel %vm11101_vm8, %v4505_v20, %v4509_v36  ;;  %v3406_v11 = vld [vmem:[#allocation2 + $0xf8] sm:$0xf]  ;;  %v12288_v61 = vpop.f32.mrf.mxu0  ;;  %v3405_v10 = vld [vmem:[#allocation2 + $0xf4] sm:$0x8]  ;;  %v3620_v36 = vshrl.u32 %v3407_v18, 16 }
 0x222   : > { %v4707_v31 = vunpack.c.l.b16 %v4510_v14  ;;  %5015 = vst.msk [vmem:[#allocation3 + $0x1c] sm:$0xf] %vm5011_vm10, %v14188_v9  ;;  %v3614_v57 = vshll.u32 %v3406_v11, 16 }
 0x223   : > { %v2720_v6 = vadd.f32 %v12224_v47, %v2466_v29  ;;  %10237 = vmatmul.msk.bf16.gmra.mxu0 %vm863_vm2, %v4730_v5  ;;  %v4285_v47 = vld [vmem:[#allocation2 + $0x114] sm:$0xf]  ;;  %v4520_v50 = vsel %vm11101_vm8, %v4515_v1, %v4519_v62  ;;  %v4525_v5 = vshll.u32 %v4284_v12, 16  ;;  %v4524_v1 = vrot.slane %v4522_v0, 4  ;;  %5017 = vst.msk [vmem:[#allocation3 + $0x34] sm:$0xf] %vm5011_vm10, %v14188_v9 }
 0x224   : > { %v1808_v13 = vpop.f32.mrf.mxu2  ;;  %v4531_v45 = vshll.u32 %v4285_v47, 16  ;;  %v4535_v25 = vshrl.u32 %v4285_v47, 16  ;;  %v4708_v43 = vunpack.c.l.b16 %v4520_v50  ;;  %v4286_v47 = vld [vmem:[#allocation2 + $0x118] sm:$0x1]  ;;  %5019 = vst.msk [vmem:[#allocation3 + $0x4c] sm:$0xf] %vm5011_vm10, %v14188_v9 }
 0x225   : > { %v12276_v23 = vadd.f32 %v3333_v15, %v2720_v6  ;;  %v1846_v44 = vadd.f32 %v1808_v13, %v14187_v22  ;;  %v10680_v15 = vld [vmem:[#allocation2 + $0xc8] sm:$0xff]  ;;  %v3611_v6 = vshrl.u32 %v3406_v11, 16  ;;  %v3338_v20 = vpop.f32.mrf.mxu1  ;;  %v4527_v62 = vrot.slane %v4525_v5, 5  ;;  %5021 = vst.msk [vmem:[#allocation3 + $0x64] sm:$0xf] %vm5011_vm10, %v14188_v9 }
 0x226   : > { %v4533_v13 = vrot.slane %v4531_v45, 5  ;;  %v4537_v12 = vrot.slane %v4535_v25, 4  ;;  %v3606_v22 = vshrl.u32 %v3405_v10, 16  ;;  %v4731_v14 = vpack.c.b16 %v4708_v43, %v4707_v31  ;;  %5023 = vst.msk [vmem:[#allocation3 + $0x7c] sm:$0xf] %vm5011_vm10, %v14188_v9 }
 0x227   : > { %v4528_v50 = vor.u32 %v4527_v62, %v4524_v1  ;;  %v4541_v5 = vshll.u32 %v4286_v47, 16  ;;  %v14191_v1 = vld [vmem:[#allocation16_spill] sm:$0xff]  ;;  %5025 = vst.msk [vmem:[#allocation3 + $0x94] sm:$0xf] %vm5011_vm10, %v14188_v9 }
 0x228   : > { %v2427_v29 = vpop.f32.mrf.mxu3  ;;  %v4538_v0 = vor.u32 %v4537_v12, %v4533_v13  ;;  %v10123_v11 = vrot.slane %v3606_v22, 11  ;;  %v10681_v47 = vld [vmem:[#allocation2 + $0xe0] sm:$0xff]  ;;  %5027 = vst.msk [vmem:[#allocation3 + $0xac] sm:$0xf] %vm5011_vm10, %v14188_v9 }
 0x229   : > { %v2467_v2 = vadd.f32 %v2427_v29, %v1845_v53  ;;  %v3797_v53 = vunpack.c.l.b16 %v3595_v8  ;;  %v3613_v8 = vrot.slane %v3611_v6, 7  ;;  %v12304_v25 = vpop.f32.mrf.mxu0  ;;  %v4529_v6 = vrot.slane %v4528_v50, 4  ;;  %5029 = vst.msk [vmem:[#allocation3 + $0xc4] sm:$0xf] %vm5011_vm10, %v14188_v9 }
 0x22a   : > { %14189 = vst [vmem:[#allocation13_spill] sm:$0xff] %v12304_v25  ;;  %v4543_v31 = vrot.slane %v4541_v5, 5 }
 0x22b   : > { %v12291_v4 = vadd.f32 %v12243_v46, %v2467_v2  ;;  %v3822_v46 = vpack.c.b16 %v3798_v35, %v3797_v53  ;;  %v3622_v2 = vrot.slane %v3620_v36, 7  ;;  %v3616_v53 = vor.u32 %v3614_v57, %v3613_v8  ;;  %5031 = vst.msk [vmem:[#allocation3 + $0xdc] sm:$0xf] %vm5011_vm10, %v14188_v9 }
 0x22c   : > { %v1810_v33 = vpop.f32.mrf.mxu2  ;;  %v3618_v18 = vrot.slane %v3613_v8, 4  ;;  %v4539_v36 = vrot.slane %v4538_v0, 4  ;;  %5033 = vst.msk [vmem:[#allocation3 + $0xf4] sm:$0xf] %vm5011_vm10, %v14188_v9 }
 0x22d   : > { %10219 = vmatmul.msk.bf16.gmra.mxu3 %vm863_vm2, %v10680_v15  ;;  %v3625_v35 = vor.u32 %v3623_v34, %v3622_v2  ;;  %v12315_v34 = vpop.f32.mrf.mxu1  ;;  %5035 = vst.msk [vmem:[#allocation3 + $0x10c] sm:$0xf] %vm5011_vm10, %v14188_v9 }
 0x22e   : > { %5037 = vst.msk [vmem:[#allocation3 + $0x124] sm:$0xf] %vm5011_vm10, %v14188_v9 }
 0x22f   : > { %5039 = vst.msk [vmem:[#allocation3 + $0x13c] sm:$0xf] %vm5011_vm10, %v14188_v9 }
 0x230   : > { %v2430_v29 = vpop.f32.mrf.mxu3  ;;  %5041 = vst.msk [vmem:[#allocation3 + $0x154] sm:$0xf] %vm5011_vm10, %v14188_v9 }
 0x231   : > { %v2468_v15 = vadd.f32 %v2430_v29, %v1846_v44  ;;  %10139 = vmatmul.msk.bf16.gmra.mxu2 %vm863_vm2, %v3822_v46  ;;  %v3626_v46 = vsel %vm10929_vm5, %v3618_v18, %v3625_v35  ;;  %v4544_v29 = vsel %vm11101_vm8, %v4539_v36, %v4543_v31  ;;  %v14193_v35 = vld [vmem:[#allocation17_spill] sm:$0xff]  ;;  %v10682_v31 = vld [vmem:[#allocation2 + $0xf8] sm:$0xff]  ;;  %5043 = vst.msk [vmem:[#allocation3 + $0x16c] sm:$0xf] %vm5011_vm10, %v14188_v9 }
 0x232   : > { %v3800_v57 = vunpack.c.l.b16 %v3626_v46  ;;  %5045 = vst.msk [vmem:[#allocation3 + $0x184] sm:$0xf] %vm5011_vm10, %v14188_v9  ;;  %v3409_v46 = vld [vmem:[#allocation2 + $0x110] sm:$0xf] }
 0x233   : > { %v2722_v45 = vadd.f32 %v12254_v32, %v2468_v15  ;;  %10238 = vmatmul.msk.bf16.gmra.mxu0 %vm863_vm2, %v4731_v14  ;;  %v14190_v32 = vld [vmem:[#allocation15_spill] sm:$0xff]  ;;  %v4710_v15 = vunpack.c.l.b16 %v4544_v29  ;;  %v4799_v14 = vpop.f32.mrf.mxu0  ;;  %5047 = vst.msk [vmem:[#allocation3 + $0x19c] sm:$0xf] %vm5011_vm10, %v14188_v9  ;;  %v3633_v29 = vshrl.u32 %v3409_v46, 16 }
 0x234   : > { %v1813_v10 = vpop.f32.mrf.mxu2  ;;  %v1847_v43 = vadd.f32 %v1810_v33, %v14190_v32  ;;  %v4534_v33 = vsel %vm11101_vm8, %v4529_v6, %v4533_v13  ;;  %5048 = vst.msk [vmem:[#allocation3 + $0x10] sm:$0xf] %vm5011_vm10, %v14188_v9 }
 0x235   : > { %v12308_v44 = vadd.f32 %v3338_v20, %v2722_v45  ;;  %v1848_v62 = vadd.f32 %v1813_v10, %v14191_v1  ;;  %v3617_v20 = vsel %vm10929_vm5, %v10123_v11, %v3616_v53  ;;  %v4709_v2 = vunpack.c.l.b16 %v4534_v33  ;;  %v3343_v11 = vpop.f32.mrf.mxu1  ;;  %5050 = vst.msk [vmem:[#allocation3 + $0x28] sm:$0xf] %vm5011_vm10, %v14188_v9 }
 0x236   : > { %v3799_v8 = vunpack.c.l.b16 %v3617_v20  ;;  %5052 = vst.msk [vmem:[#allocation3 + $0x40] sm:$0xf] %vm5011_vm10, %v14188_v9 }
 0x237   : > { %v4732_v45 = vpack.c.b16 %v4710_v15, %v4709_v2  ;;  %v3408_v2 = vld [vmem:[#allocation2 + $0x10c] sm:$0x8]  ;;  %5054 = vst.msk [vmem:[#allocation3 + $0x58] sm:$0xf] %vm5011_vm10, %v14188_v9 }
 0x238   : > { %v2432_v12 = vpop.f32.mrf.mxu3  ;;  %v3823_v13 = vpack.c.b16 %v3800_v57, %v3799_v8  ;;  %v3628_v15 = vshrl.u32 %v3408_v2, 16  ;;  %5056 = vst.msk [vmem:[#allocation3 + $0x70] sm:$0xf] %vm5011_vm10, %v14188_v9 }
 0x239   : > { %v12323_v22 = vadd.f32 %v2432_v12, %v1847_v43  ;;  %v14194_v43 = vld [vmem:[#allocation18_spill] sm:$0xff]  ;;  %v12369_v12 = vld [vmem:[%s14137_s2] ss:$0 sm:$0xff]  ;;  %5058 = vst.msk [vmem:[#allocation3 + $0x88] sm:$0xf] %vm5011_vm10, %v14188_v9 }
 0x23a   : > { %5060 = vst.msk [vmem:[#allocation3 + $0xa0] sm:$0xf] %vm5011_vm10, %v14188_v9 }
 0x23b   : > { %v12350_v6 = vpop.f32.mrf.mxu0  ;;  %5062 = vst.msk [vmem:[#allocation3 + $0xb8] sm:$0xf] %vm5011_vm10, %v14188_v9 }
 0x23c   : > { %v1815_v0 = vpop.f32.mrf.mxu2  ;;  %5064 = vst.msk [vmem:[#allocation3 + $0xd0] sm:$0xf] %vm5011_vm10, %v14188_v9 }
 0x23d   : > { %10220 = vmatmul.msk.bf16.gmra.mxu3 %vm863_vm2, %v10681_v47  ;;  %v1849_v10 = vadd.f32 %v1815_v0, %v14193_v35  ;;  %v3410_v47 = vld [vmem:[#allocation2 + $0x114] sm:$0xf]  ;;  %5066 = vst.msk [vmem:[#allocation3 + $0xe8] sm:$0xf] %vm5011_vm10, %v14188_v9 }
 0x23e   : > { %v3642_v8 = vshrl.u32 %v3410_v47, 16  ;;  %5068 = vst.msk [vmem:[#allocation3 + $0x100] sm:$0xf] %vm5011_vm10, %v14188_v9 }
 0x23f   : > { %5070 = vst.msk [vmem:[#allocation3 + $0x118] sm:$0xf] %vm5011_vm10, %v14188_v9 }
 0x240   : > { %v2435_v50 = vpop.f32.mrf.mxu3  ;;  %v3644_v0 = vrot.slane %v3642_v8, 7  ;;  %5072 = vst.msk [vmem:[#allocation3 + $0x130] sm:$0xf] %vm5011_vm10, %v14188_v9 }
 0x241   : > { %v2470_v5 = vadd.f32 %v2435_v50, %v1848_v62  ;;  %10140 = vmatmul.msk.bf16.gmra.mxu2 %vm863_vm2, %v3823_v13  ;;  %v3635_v13 = vrot.slane %v3633_v29, 7  ;;  %v3636_v50 = vshll.u32 %v3409_v46, 16  ;;  %v4287_v46 = vld [vmem:[#allocation2 + $0x128] sm:$0xf]  ;;  %5074 = vst.msk [vmem:[#allocation3 + $0x148] sm:$0xf] %vm5011_vm10, %v14188_v9 }
 0x242   : > { %v4546_v8 = vshrl.u32 %v4287_v46, 16  ;;  %5076 = vst.msk [vmem:[#allocation3 + $0x160] sm:$0xf] %vm5011_vm10, %v14188_v9 }
 0x243   : > { %v2724_v53 = vadd.f32 %v12288_v61, %v2470_v5  ;;  %10239 = vmatmul.msk.bf16.gmra.mxu0 %vm863_vm2, %v4732_v45  ;;  %v12373_v33 = vpop.f32.mrf.mxu0  ;;  %v3638_v35 = vor.u32 %v3636_v50, %v3635_v13  ;;  %5078 = vst.msk [vmem:[#allocation3 + $0x178] sm:$0xf] %vm5011_vm10, %v14188_v9 }
 0x244   : > { %v3891_v32 = vpop.f32.mrf.mxu2  ;;  %5080 = vst.msk [vmem:[#allocation3 + $0x190] sm:$0xf] %vm5011_vm10, %v14188_v9 }
 0x245   : > { %v12344_v18 = vadd.f32 %v3343_v11, %v2724_v53  ;;  %v3971_v1 = vadd.f32 %v3891_v32, %v14194_v43  ;;  %v3645_v11 = vshll.u32 %v3410_v47, 16  ;;  %v10124_v53 = vrot.slane %v3628_v15, 11  ;;  %v4288_v47 = vld [vmem:[#allocation2 + $0x12c] sm:$0xf]  ;;  %5082 = vst.msk [vmem:[#allocation3 + $0x1a8] sm:$0xf] %vm5011_vm10, %v14188_v9 }
 0x246   : > { %v4555_v2 = vshll.u32 %v4288_v47, 16  ;;  %v4559_v15 = vshrl.u32 %v4288_v47, 16  ;;  %v10409_v47 = vld [vmem:[%s14138_s3 + $0x10] sm:$0xf]  ;;  %5086 = vst.msk [vmem:[#allocation3 + $0x8] sm:$0xf] %vm5011_vm10, %v14188_v9 }
 0x247   : > { %14192 = vst [vmem:[#allocation14_spill] sm:$0xff] %v12344_v18  ;;  %v3639_v43 = vsel %vm10929_vm5, %v10124_v53, %v3638_v35  ;;  %v4289_v53 = vld [vmem:[#allocation2 + $0x130] sm:$0x1] }
 0x248   : > { %v2437_v36 = vpop.f32.mrf.mxu3  ;;  %v4561_v35 = vrot.slane %v4559_v15, 4  ;;  %5087 = vst.msk [vmem:[#allocation3 + $0xc] sm:$0xf] %vm5011_vm10, %v14188_v9 }
 0x249   : > { %v12354_v61 = vadd.f32 %v2437_v36, %v1849_v10  ;;  %v3640_v10 = vrot.slane %v3635_v13, 4  ;;  %5093 = vst.msk [vmem:[#allocation3 + $0x1a0] sm:$0xf] %vm5011_vm10, %v14188_v9 }
 0x24a   : > { %5094 = vst.msk [vmem:[#allocation3 + $0x1a4] sm:$0xf] %vm5011_vm10, %v14188_v9 }
 0x24b   : > { %v12395_v13 = vpop.f32.mrf.mxu0  ;;  %5085 = vst.msk [vmem:[#allocation3 + $0x4] sm:$0xf] %vm5011_vm10, %v14188_v9 }
 0x24c   : > { %v3893_v5 = vpop.f32.mrf.mxu2  ;;  %5088 = vst.msk [vmem:[#allocation3 + $0x10] sm:$0xf] %vm5011_vm10, %v14188_v9 }
 0x24d   : > { %10221 = vmatmul.msk.bf16.gmra.mxu3 %vm863_vm2, %v10682_v31  ;;  %v3647_v31 = vor.u32 %v3645_v11, %v3644_v0  ;;  %v4548_v0 = vrot.slane %v4546_v8, 4  ;;  %v4557_v11 = vrot.slane %v4555_v2, 5  ;;  %v7350_v8 = vsel %vm5662_vm9, %v10409_v47, 0  ;;  %5092 = vst.msk [vmem:[#allocation3 + $0x19c] sm:$0xf] %vm5011_vm10, %v14188_v9 }
 0x24e   : > { %7359 = vmatpush.bf16.msrb.mxu1 %v7350_v8  ;;  %5095 = vst.msk [vmem:[#allocation3 + $0x1a8] sm:$0xf] %vm5011_vm10, %v14188_v9 }
 0x250   : > { %v4145_v62 = vpop.f32.mrf.mxu3 }
 0x251   : > { %v4225_v20 = vadd.f32 %v4145_v62, %v3971_v1  ;;  %v3648_v62 = vsel %vm10929_vm5, %v3640_v10, %v3647_v31 }
 0x252   : > { %v3802_v29 = vunpack.c.l.b16 %v3648_v62  ;;  %v10392_v62 = vld [vmem:[%s14138_s3 + $0xc] sm:$0xf] }
 0x253   : > { %v4879_v57 = vadd.f32 %v4799_v14, %v4225_v20  ;;  %v5530_v14 = vld [vmem:[%s14138_s3] sm:$0xf]  ;;  %v3801_v20 = vunpack.c.l.b16 %v3639_v43  ;;  %v4562_v43 = vor.u32 %v4561_v35, %v4557_v11  ;;  %v12422_v35 = vpop.f32.mrf.mxu0 }
 0x254   : > { %v5852_v32 = vsel %vm5662_vm9, %v5530_v14, 0  ;;  %v10359_v14 = vld [vmem:[%s14138_s3 + $0x8] sm:$0xf]  ;;  %v3896_v31 = vpop.f32.mrf.mxu2 }
 0x255   : > { %v4915_v45 = vadd.f32 %v12369_v12, %v4879_v57  ;;  %5861 = vmatpush.bf16.msrb.mxu2 %v5852_v32  ;;  %v4549_v57 = vshll.u32 %v4287_v46, 16  ;;  %v3824_v50 = vpack.c.b16 %v3802_v29, %v3801_v20  ;;  %v10683_v20 = vld [vmem:[#allocation2 + $0x110] sm:$0xff]  ;;  %v7096_v46 = vsel %vm5662_vm9, %v10392_v62, 0 }
 0x256   : > { %7105 = vmatpush.bf16.msrb.mxu0 %v7096_v46 }
 0x257   : > { %v4947_v36 = vmax.f32 %v4915_v45, 0.0  ;;  %v4551_v45 = vrot.slane %v4549_v57, 5  ;;  %10141 = vmatmul.msk.bf16.gmra.mxu2 %vm863_vm2, %v3824_v50  ;;  %v4563_v57 = vrot.slane %v4562_v43, 4  ;;  %v3411_v50 = vld [vmem:[#allocation2 + $0x124] sm:$0x8] }
 0x258   : > { %v4147_v32 = vpop.f32.mrf.mxu3  ;;  %v3650_v43 = vshrl.u32 %v3411_v50, 16  ;;  %v4290_v50 = vld [vmem:[#allocation2 + $0x140] sm:$0xf] }
 0x259   : > { %v4979_v1 = vpack.c.bf16 %v4947_v36, %v4947_v36  ;;  %v4552_v10 = vor.u32 %v4551_v45, %v4548_v0  ;;  %v4565_v36 = vshll.u32 %v4289_v53, 16  ;;  %v3412_v0 = vld [vmem:[#allocation2 + $0x128] sm:$0xf]  ;;  %v14195_v45 = vld [vmem:[#allocation19_spill] sm:$0xff] }
 0x25a   : > { %v3972_v53 = vadd.f32 %v3893_v5, %v14195_v45  ;;  %v3655_v62 = vshrl.u32 %v3412_v0, 16  ;;  %v10125_v45 = vrot.slane %v3650_v43, 11 }
 0x25b   : > { %5098 = vst.msk [vmem:[#allocation3 + $0x20] sm:$0xf] %vm5011_vm10, %v4979_v1  ;;  %v6474_v1 = vsel %vm5662_vm9, %v10359_v14, 0  ;;  %v4553_v29 = vrot.slane %v4552_v10, 4  ;;  %v4567_v2 = vrot.slane %v4565_v36, 5 }
 0x25c   : > { %6483 = vmatpush.bf16.msrb.mxu3 %v6474_v1  ;;  %v3413_v1 = vld [vmem:[#allocation2 + $0x12c] sm:$0xf]  ;;  %v3657_v18 = vrot.slane %v3655_v62, 7  ;;  %v12441_v62 = vpop.f32.mrf.mxu0 }
 0x25d   : > { %10222 = vmatmul.msk.bf16.gmra.mxu3 %vm863_vm2, %v10683_v20  ;;  %v4558_v15 = vsel %vm11101_vm8, %v4553_v29, %v4557_v11  ;;  %v4568_v10 = vsel %vm11101_vm8, %v4563_v57, %v4567_v2  ;;  %v3658_v20 = vshll.u32 %v3412_v0, 16  ;;  %v3664_v46 = vshrl.u32 %v3413_v1, 16  ;;  %v3898_v29 = vpop.f32.mrf.mxu2 }
 0x25e   : > { %v4711_v14 = vunpack.c.l.b16 %v4558_v15  ;;  %v4712_v36 = vunpack.c.l.b16 %v4568_v10  ;;  %v4226_v11 = vadd.f32 %v4147_v32, %v3972_v53  ;;  %v3667_v5 = vshll.u32 %v3413_v1, 16  ;;  %v4291_v53 = vld [vmem:[#allocation2 + $0x144] sm:$0xf] }
 0x25f   : > { %v3666_v25 = vrot.slane %v3664_v46, 7  ;;  %v3660_v57 = vor.u32 %v3658_v20, %v3657_v18  ;;  %v3662_v2 = vrot.slane %v3657_v18, 4  ;;  %v3973_v32 = vadd.f32 %v3896_v31, %v11788_v38  ;;  %v4292_v20 = vld [vmem:[#allocation2 + $0x148] sm:$0x1] }
 0x260   : > { %v4733_v47 = vpack.c.b16 %v4712_v36, %v4711_v14  ;;  %v4150_v8 = vpop.f32.mrf.mxu3  ;;  %v4880_v0 = vadd.f32 %v12350_v6, %v4226_v11  ;;  %v4570_v10 = vshrl.u32 %v4290_v50, 16  ;;  %v4573_v14 = vshll.u32 %v4290_v50, 16 }
 0x261   : > { %v3669_v15 = vor.u32 %v3667_v5, %v3666_v25  ;;  %v3661_v1 = vsel %vm10929_vm5, %v10125_v45, %v3660_v57  ;;  %v4579_v36 = vshll.u32 %v4291_v53, 16  ;;  %v4583_v18 = vshrl.u32 %v4291_v53, 16  ;;  %v10684_v45 = vld [vmem:[#allocation2 + $0x128] sm:$0xff]  ;;  %v3415_v53 = vld [vmem:[#allocation2 + $0x140] sm:$0xf] }
 0x262   : > { %10240 = vmatmul.msk.bf16.gmra.mxu0 %vm863_vm2, %v4733_v47  ;;  %v4227_v25 = vadd.f32 %v4150_v8, %v3973_v32  ;;  %v3803_v38 = vunpack.c.l.b16 %v3661_v1  ;;  %v4572_v6 = vrot.slane %v4570_v10, 4  ;;  %v4575_v46 = vrot.slane %v4573_v14, 5  ;;  %v3414_v32 = vld [vmem:[#allocation2 + $0x13c] sm:$0x8] }
 0x263   : > { %v3670_v43 = vsel %vm10929_vm5, %v3662_v2, %v3669_v15  ;;  %v4581_v11 = vrot.slane %v4579_v36, 5  ;;  %v3974_v5 = vadd.f32 %v3898_v29, %v11835_v37  ;;  %v4585_v57 = vrot.slane %v4583_v18, 4  ;;  %v3416_v29 = vld [vmem:[#allocation2 + $0x144] sm:$0xf] }
 0x264   : > { %v3804_v31 = vunpack.c.l.b16 %v3670_v43  ;;  %v4589_v2 = vshll.u32 %v4292_v20, 16  ;;  %v4576_v8 = vor.u32 %v4575_v46, %v4572_v6  ;;  %v4916_v10 = vadd.f32 %v12369_v12, %v4880_v0 }
 0x265   : > { %v3901_v15 = vpop.f32.mrf.mxu2  ;;  %v4881_v14 = vadd.f32 %v12373_v33, %v4227_v25  ;;  %v4586_v36 = vor.u32 %v4585_v57, %v4581_v11  ;;  %v3672_v18 = vshrl.u32 %v3414_v32, 16  ;;  %v3680_v6 = vshll.u32 %v3415_v53, 16 }
 0x266   : > { %v3825_v47 = vpack.c.b16 %v3804_v31, %v3803_v38  ;;  %v4591_v37 = vrot.slane %v4589_v2, 5  ;;  %v4577_v43 = vrot.slane %v4576_v8, 4  ;;  %v3677_v38 = vshrl.u32 %v3415_v53, 16  ;;  %v12461_v2 = vpop.f32.mrf.mxu0 }
 0x267   : > { %v3686_v0 = vshrl.u32 %v3416_v29, 16  ;;  %v3689_v20 = vshll.u32 %v3416_v29, 16  ;;  %v4587_v25 = vrot.slane %v4586_v36, 4  ;;  %v10126_v46 = vrot.slane %v3672_v18, 11 }
 0x268   : > { %v4152_v50 = vpop.f32.mrf.mxu3  ;;  %10142 = vmatmul.msk.bf16.gmra.mxu2 %vm863_vm2, %v3825_v47  ;;  %v4582_v33 = vsel %vm11101_vm8, %v4577_v43, %v4581_v11  ;;  %v4917_v47 = vadd.f32 %v12369_v12, %v4881_v14  ;;  %v3975_v32 = vadd.f32 %v3901_v15, %v11857_v40 }
 0x269   : > { %v4228_v1 = vadd.f32 %v4152_v50, %v3974_v5  ;;  %v3679_v5 = vrot.slane %v3677_v38, 7  ;;  %v4592_v11 = vsel %vm11101_vm8, %v4587_v25, %v4591_v37 }
 0x26a   : > { %v4714_v53 = vunpack.c.l.b16 %v4592_v11  ;;  %v4949_v18 = vmax.f32 %v4917_v47, 0.0 }
 0x26b   : > { %v4882_v31 = vadd.f32 %v12395_v13, %v4228_v1  ;;  %v4713_v13 = vunpack.c.l.b16 %v4582_v33  ;;  %v3682_v50 = vor.u32 %v3680_v6, %v3679_v5  ;;  %v3684_v8 = vrot.slane %v3679_v5, 4  ;;  %v4293_v6 = vld [vmem:[#allocation2 + $0x158] sm:$0xf] }
 0x26c   : > { %v4948_v1 = vmax.f32 %v4916_v10, 0.0  ;;  %v4594_v33 = vshrl.u32 %v4293_v6, 16  ;;  %v4597_v25 = vshll.u32 %v4293_v6, 16 }
 0x26d   : > { %10223 = vmatmul.msk.bf16.gmra.mxu3 %vm863_vm2, %v10684_v45  ;;  %v4918_v57 = vadd.f32 %v12369_v12, %v4882_v31  ;;  %v3688_v45 = vrot.slane %v3686_v0, 7  ;;  %v3903_v29 = vpop.f32.mrf.mxu2  ;;  %v3683_v36 = vsel %vm10929_vm5, %v10126_v46, %v3682_v50  ;;  %v4734_v38 = vpack.c.b16 %v4714_v53, %v4713_v13  ;;  %v4294_v0 = vld [vmem:[#allocation2 + $0x15c] sm:$0xf]  ;;  %v10685_v50 = vld [vmem:[#allocation2 + $0x140] sm:$0xff] }
 0x26e   : > { %v3805_v15 = vunpack.c.l.b16 %v3683_v36  ;;  %v4980_v46 = vpack.c.bf16 %v4948_v1, %v4948_v1  ;;  %v4603_v5 = vshll.u32 %v4294_v0, 16  ;;  %v4607_v47 = vshrl.u32 %v4294_v0, 16 }
 0x26f   : > { %v3691_v14 = vor.u32 %v3689_v20, %v3688_v45  ;;  %v4950_v37 = vmax.f32 %v4918_v57, 0.0  ;;  %v10690_v57 = vld [vmem:[#allocation3 + $0x8] sm:$0xff]  ;;  %v12483_v45 = vpop.f32.mrf.mxu0  ;;  %v3976_v1 = vadd.f32 %v3903_v29, %v11897_v17 }
 0x270   : > { %v4155_v43 = vpop.f32.mrf.mxu3  ;;  %v4609_v36 = vrot.slane %v4607_v47, 4  ;;  %10327 = vmatmul.msk.bf16.vlgmr.msra.gmra.mxu1 %vm5613_vm11, %v10690_v57  ;;  %5099 = vst.msk [vmem:[#allocation3 + $0x24] sm:$0xf] %vm5011_vm10, %v4980_v46 }
 0x271   : > { %v4229_v31 = vadd.f32 %v4155_v43, %v3975_v32  ;;  %v3692_v40 = vsel %vm10929_vm5, %v3684_v8, %v3691_v14  ;;  %v4596_v8 = vrot.slane %v4594_v33, 4  ;;  %v4599_v32 = vrot.slane %v4597_v25, 5  ;;  %v4295_v14 = vld [vmem:[#allocation2 + $0x160] sm:$0x1] }
 0x272   : > { %10241 = vmatmul.msk.bf16.gmra.mxu0 %vm863_vm2, %v4734_v38  ;;  %v3806_v20 = vunpack.c.l.b16 %v3692_v40  ;;  %v4982_v53 = vpack.c.bf16 %v4950_v37, %v4950_v37  ;;  %v4605_v43 = vrot.slane %v4603_v5, 5  ;;  %v4613_v40 = vshll.u32 %v4295_v14, 16 }
 0x273   : > { %v4883_v10 = vadd.f32 %v12422_v35, %v4229_v31  ;;  %v4981_v35 = vpack.c.bf16 %v4949_v18, %v4949_v18  ;;  %v4600_v31 = vor.u32 %v4599_v32, %v4596_v8  ;;  %v3419_v18 = vld [vmem:[#allocation2 + $0x15c] sm:$0xf] }
 0x274   : > { %v3826_v11 = vpack.c.b16 %v3806_v20, %v3805_v15  ;;  %v3417_v15 = vld [vmem:[#allocation2 + $0x154] sm:$0x8]  ;;  %v3418_v20 = vld [vmem:[#allocation2 + $0x158] sm:$0xf]  ;;  %v4615_v17 = vrot.slane %v4613_v40, 5 }
 0x275   : > { %v4919_v13 = vadd.f32 %v12369_v12, %v4883_v10  ;;  %v3906_v6 = vpop.f32.mrf.mxu2  ;;  %v4610_v10 = vor.u32 %v4609_v36, %v4605_v43  ;;  %v4601_v9 = vrot.slane %v4600_v31, 4  ;;  %5100 = vst.msk [vmem:[#allocation3 + $0x38] sm:$0xf] %vm5011_vm10, %v4981_v35  ;;  %v3694_v29 = vshrl.u32 %v3417_v15, 16 }
 0x276   : > { %v3699_v5 = vshrl.u32 %v3418_v20, 16  ;;  %5101 = vst.msk [vmem:[#allocation3 + $0x3c] sm:$0xf] %vm5011_vm10, %v4982_v53  ;;  %v3702_v57 = vshll.u32 %v3418_v20, 16 }
 0x277   : > { %v4951_v38 = vmax.f32 %v4919_v13, 0.0  ;;  %v4611_v25 = vrot.slane %v4610_v10, 4  ;;  %v4606_v46 = vsel %vm11101_vm8, %v4601_v9, %v4605_v43  ;;  %v3708_v13 = vshrl.u32 %v3419_v18, 16  ;;  %v12503_v53 = vpop.f32.mrf.mxu0 }
 0x278   : > { %v4157_v0 = vpop.f32.mrf.mxu3  ;;  %10143 = vmatmul.msk.bf16.gmra.mxu2 %vm863_vm2, %v3826_v11  ;;  %v4715_v8 = vunpack.c.l.b16 %v4606_v46  ;;  %v10127_v32 = vrot.slane %v3694_v29, 11  ;;  %v3701_v35 = vrot.slane %v3699_v5, 7  ;;  %v3977_v43 = vadd.f32 %v3906_v6, %v11928_v7  ;;  %v4297_v29 = vld [vmem:[#allocation2 + $0x174] sm:$0xf] }
 0x279   : > { %v4983_v37 = vpack.c.bf16 %v4951_v38, %v4951_v38  ;;  %v4230_v33 = vadd.f32 %v4157_v0, %v3976_v1  ;;  %v4616_v11 = vsel %vm11101_vm8, %v4611_v25, %v4615_v17  ;;  %v3710_v36 = vrot.slane %v3708_v13, 7  ;;  %v10691_v5 = vld [vmem:[#allocation3 + $0x20] sm:$0xff] }
 0x27a   : > { %v3704_v1 = vor.u32 %v3702_v57, %v3701_v35  ;;  %v3706_v38 = vrot.slane %v3701_v35, 4  ;;  %v4627_v46 = vshll.u32 %v4297_v29, 16  ;;  %v4631_v13 = vshrl.u32 %v4297_v29, 16 }
 0x27b   : > { %v4884_v47 = vadd.f32 %v12441_v62, %v4230_v33  ;;  %5102 = vst.msk [vmem:[#allocation3 + $0x50] sm:$0xf] %vm5011_vm10, %v4983_v37  ;;  %v4716_v62 = vunpack.c.l.b16 %v4616_v11 }
 0x27c   : > { %v3705_v20 = vsel %vm10929_vm5, %v10127_v32, %v3704_v1 }
 0x27d   : > { %10224 = vmatmul.msk.bf16.gmra.mxu3 %vm863_vm2, %v10685_v50  ;;  %v4920_v14 = vadd.f32 %v12369_v12, %v4884_v47  ;;  %v3711_v50 = vshll.u32 %v3419_v18, 16  ;;  %v4735_v40 = vpack.c.b16 %v4716_v62, %v4715_v8  ;;  %v3908_v0 = vpop.f32.mrf.mxu2  ;;  %v3807_v25 = vunpack.c.l.b16 %v3705_v20  ;;  %v4296_v18 = vld [vmem:[#allocation2 + $0x170] sm:$0xf]  ;;  %v10686_v62 = vld [vmem:[#allocation2 + $0x158] sm:$0xff] }
 0x27e   : > { %v4618_v6 = vshrl.u32 %v4296_v18, 16  ;;  %v4621_v47 = vshll.u32 %v4296_v18, 16  ;;  %v3978_v1 = vadd.f32 %v3908_v0, %v11966_v51 }
 0x27f   : > { %v4952_v31 = vmax.f32 %v4920_v14, 0.0  ;;  %v3713_v15 = vor.u32 %v3711_v50, %v3710_v36  ;;  %v12514_v8 = vpop.f32.mrf.mxu0  ;;  %v4629_v14 = vrot.slane %v4627_v46, 5  ;;  %v4298_v36 = vld [vmem:[#allocation2 + $0x178] sm:$0x1]  ;;  %v4633_v50 = vrot.slane %v4631_v13, 4 }
 0x280   : > { %v4160_v10 = vpop.f32.mrf.mxu3  ;;  %v4620_v32 = vrot.slane %v4618_v6, 4  ;;  %v4623_v35 = vrot.slane %v4621_v47, 5  ;;  %10328 = vmatmul.msk.bf16.gmra.mxu1 %vm5613_vm11, %v10691_v5 }
 0x281   : > { %v4984_v37 = vpack.c.bf16 %v4952_v31, %v4952_v31  ;;  %v4231_v33 = vadd.f32 %v4160_v10, %v3977_v43  ;;  %v3714_v9 = vsel %vm10929_vm5, %v3706_v38, %v3713_v15  ;;  %v4637_v43 = vshll.u32 %v4298_v36, 16  ;;  %v3420_v31 = vld [vmem:[#allocation2 + $0x16c] sm:$0x8] }
 0x282   : > { %v3808_v17 = vunpack.c.l.b16 %v3714_v9  ;;  %10242 = vmatmul.msk.bf16.gmra.mxu0 %vm863_vm2, %v4735_v40  ;;  %v4624_v38 = vor.u32 %v4623_v35, %v4620_v32  ;;  %v3421_v40 = vld [vmem:[#allocation2 + $0x170] sm:$0xf]  ;;  %v4634_v20 = vor.u32 %v4633_v50, %v4629_v14 }
 0x283   : > { %5103 = vst.msk [vmem:[#allocation3 + $0x54] sm:$0xf] %vm5011_vm10, %v4984_v37  ;;  %v4885_v7 = vadd.f32 %v12461_v2, %v4231_v33  ;;  %v3422_v37 = vld [vmem:[#allocation2 + $0x174] sm:$0xf]  ;;  %v3716_v33 = vshrl.u32 %v3420_v31, 16  ;;  %v3721_v9 = vshrl.u32 %v3421_v40, 16 }
 0x284   : > { %v3827_v57 = vpack.c.b16 %v3808_v17, %v3807_v25  ;;  %v3724_v25 = vshll.u32 %v3421_v40, 16  ;;  %v4625_v29 = vrot.slane %v4624_v38, 4  ;;  %v4635_v5 = vrot.slane %v4634_v20, 4 }
 0x285   : > { %v4921_v11 = vadd.f32 %v12369_v12, %v4885_v7  ;;  %v3911_v15 = vpop.f32.mrf.mxu2  ;;  %v4639_v7 = vrot.slane %v4637_v43, 5  ;;  %v10128_v51 = vrot.slane %v3716_v33, 11  ;;  %v3723_v0 = vrot.slane %v3721_v9, 7 }
 0x286   : > { %v4630_v47 = vsel %vm11101_vm8, %v4625_v29, %v4629_v14  ;;  %v3730_v46 = vshrl.u32 %v3422_v37, 16  ;;  %v3733_v13 = vshll.u32 %v3422_v37, 16 }
 0x287   : > { %v4953_v2 = vmax.f32 %v4921_v11, 0.0  ;;  %v4717_v11 = vunpack.c.l.b16 %v4630_v47  ;;  %v3726_v32 = vor.u32 %v3724_v25, %v3723_v0  ;;  %v12527_v36 = vpop.f32.mrf.mxu0  ;;  %v4299_v25 = vld [vmem:[#allocation2 + $0x188] sm:$0xf] }
 0x288   : > { %v4162_v10 = vpop.f32.mrf.mxu3  ;;  %10144 = vmatmul.msk.bf16.gmra.mxu2 %vm863_vm2, %v3827_v57  ;;  %v4640_v57 = vsel %vm11101_vm8, %v4635_v5, %v4639_v7  ;;  %v4645_v29 = vshll.u32 %v4299_v25, 16  ;;  %v3357_v7 = vadd.f32 %v11959_v56, %v12011_v48  ;;  %v3424_v56 = vld [vmem:[#allocation2 + $0x188] sm:$0xf] }
 0x289   : > { %v4985_v17 = vpack.c.bf16 %v4953_v2, %v4953_v2  ;;  %v4232_v18 = vadd.f32 %v4162_v10, %v3978_v1  ;;  %v4718_v50 = vunpack.c.l.b16 %v4640_v57  ;;  %v3728_v1 = vrot.slane %v3723_v0, 4 }
 0x28a   : > { %v3732_v2 = vrot.slane %v3730_v46, 7 }
 0x28b   : > { %5104 = vst.msk [vmem:[#allocation3 + $0x68] sm:$0xf] %vm5011_vm10, %v4985_v17  ;;  %v4886_v6 = vadd.f32 %v12483_v45, %v4232_v18  ;;  %v3727_v45 = vsel %vm10929_vm5, %v10128_v51, %v3726_v32  ;;  %v4736_v38 = vpack.c.b16 %v4718_v50, %v4717_v11  ;;  %v4300_v17 = vld [vmem:[#allocation2 + $0x18c] sm:$0xf]  ;;  %v10687_v11 = vld [vmem:[#allocation2 + $0x170] sm:$0xff] }
 0x28c   : > { %v3735_v43 = vor.u32 %v3733_v13, %v3732_v2  ;;  %v3809_v10 = vunpack.c.l.b16 %v3727_v45  ;;  %v10692_v18 = vld [vmem:[#allocation3 + $0x38] sm:$0xff]  ;;  %v4651_v5 = vshll.u32 %v4300_v17, 16  ;;  %v4655_v0 = vshrl.u32 %v4300_v17, 16  ;;  %v4301_v32 = vld [vmem:[#allocation2 + $0x190] sm:$0x1] }
 0x28d   : > { %10225 = vmatmul.msk.bf16.gmra.mxu3 %vm863_vm2, %v10686_v62  ;;  %v4922_v35 = vadd.f32 %v12369_v12, %v4886_v6  ;;  %v3979_v62 = vadd.f32 %v3911_v15, %v11991_v24  ;;  %v3913_v31 = vpop.f32.mrf.mxu2  ;;  %v4642_v15 = vshrl.u32 %v4299_v25, 16  ;;  %v4647_v13 = vrot.slane %v4645_v29, 5  ;;  %v3423_v45 = vld [vmem:[#allocation2 + $0x184] sm:$0x8] }
 0x28e   : > { %v3736_v33 = vsel %vm10929_vm5, %v3728_v1, %v3735_v43  ;;  %v4653_v57 = vrot.slane %v4651_v5, 5  ;;  %v4661_v2 = vshll.u32 %v4301_v32, 16  ;;  %v3738_v43 = vshrl.u32 %v3423_v45, 16 }
 0x28f   : > { %v4954_v14 = vmax.f32 %v4922_v35, 0.0  ;;  %v3810_v9 = vunpack.c.l.b16 %v3736_v33  ;;  %v12540_v47 = vpop.f32.mrf.mxu0  ;;  %v4644_v46 = vrot.slane %v4642_v15, 4  ;;  %v4657_v35 = vrot.slane %v4655_v0, 4 }
 0x290   : > { %v4165_v40 = vpop.f32.mrf.mxu3  ;;  %10329 = vmatmul.msk.bf16.gmra.mxu1 %vm5613_vm11, %v10692_v18  ;;  %v4663_v25 = vrot.slane %v4661_v2, 5 }
 0x291   : > { %v4986_v20 = vpack.c.bf16 %v4954_v14, %v4954_v14  ;;  %v4233_v37 = vadd.f32 %v4165_v40, %v3979_v62  ;;  %v3828_v51 = vpack.c.b16 %v3810_v9, %v3809_v10  ;;  %v4648_v1 = vor.u32 %v4647_v13, %v4644_v46 }
 0x292   : > { %10243 = vmatmul.msk.bf16.gmra.mxu0 %vm863_vm2, %v4736_v38  ;;  %v4658_v14 = vor.u32 %v4657_v35, %v4653_v57  ;;  %v3425_v38 = vld [vmem:[#allocation2 + $0x18c] sm:$0xf]  ;;  %v3743_v40 = vshrl.u32 %v3424_v56, 16  ;;  %v3746_v10 = vshll.u32 %v3424_v56, 16 }
 0x293   : > { %5105 = vst.msk [vmem:[#allocation3 + $0x6c] sm:$0xf] %vm5011_vm10, %v4986_v20  ;;  %v4887_v24 = vadd.f32 %v12503_v53, %v4233_v37  ;;  %v3980_v53 = vadd.f32 %v3913_v31, %v3357_v7  ;;  %v4649_v33 = vrot.slane %v4648_v1, 4  ;;  %v10129_v31 = vrot.slane %v3738_v43, 11 }
 0x294   : > { %v4659_v9 = vrot.slane %v4658_v14, 4  ;;  %v3745_v17 = vrot.slane %v3743_v40, 7  ;;  %v3752_v15 = vshrl.u32 %v3425_v38, 16  ;;  %v3755_v29 = vshll.u32 %v3425_v38, 16  ;;  %v6597_v38 = vld [vmem:[#allocation3 + $0x1c] sm:$0x8] }
 0x295   : > { %v4923_v6 = vadd.f32 %v12369_v12, %v4887_v24  ;;  %v3916_v48 = vpop.f32.mrf.mxu2  ;;  %v4654_v24 = vsel %vm11101_vm8, %v4649_v33, %v4653_v57 }
 0x296   : > { %v4664_v5 = vsel %vm11101_vm8, %v4659_v9, %v4663_v25  ;;  %v4719_v7 = vunpack.c.l.b16 %v4654_v24  ;;  %v3750_v13 = vrot.slane %v3745_v17, 4  ;;  %v3754_v32 = vrot.slane %v3752_v15, 7 }
 0x297   : > { %v4955_v50 = vmax.f32 %v4923_v6, 0.0  ;;  %v12552_v6 = vpop.f32.mrf.mxu0  ;;  %v4720_v46 = vunpack.c.l.b16 %v4664_v5  ;;  %v3981_v57 = vadd.f32 %v3916_v48, %v12049_v60  ;;  %v10693_v60 = vld [vmem:[#allocation3 + $0x50] sm:$0xff]  ;;  %v6646_v24 = vshrl.u32 %v6597_v38, 16 }
 0x298   : > { %v4167_v62 = vpop.f32.mrf.mxu3  ;;  %10145 = vmatmul.msk.bf16.gmra.mxu2 %vm863_vm2, %v3828_v51  ;;  %v3748_v51 = vor.u32 %v3746_v10, %v3745_v17  ;;  %v4302_v10 = vld [vmem:[#allocation2 + $0x1a0] sm:$0xf] }
 0x299   : > { %v4987_v20 = vpack.c.bf16 %v4955_v50, %v4955_v50  ;;  %v4234_v37 = vadd.f32 %v4167_v62, %v3980_v53  ;;  %v4737_v53 = vpack.c.b16 %v4720_v46, %v4719_v7  ;;  %v3757_v50 = vor.u32 %v3755_v29, %v3754_v32  ;;  %v4304_v46 = vld [vmem:[#allocation2 + $0x1a8] sm:$0x1] }
 0x29a   : > { %v4666_v33 = vshrl.u32 %v4302_v10, 16  ;;  %v4669_v9 = vshll.u32 %v4302_v10, 16 }
 0x29b   : > { %5106 = vst.msk [vmem:[#allocation3 + $0x80] sm:$0xf] %vm5011_vm10, %v4987_v20  ;;  %v4888_v18 = vadd.f32 %v12514_v8, %v4234_v37  ;;  %v3749_v8 = vsel %vm10929_vm5, %v10129_v31, %v3748_v51  ;;  %v3758_v14 = vsel %vm10929_vm5, %v3750_v13, %v3757_v50  ;;  %v4303_v20 = vld [vmem:[#allocation2 + $0x1a4] sm:$0xf]  ;;  %v12562_v37 = vld [vmem:[#allocation3 + $0x24] sm:$0xf]  ;;  %v3359_v31 = vadd.f32 %v12013_v55, %v12063_v19 }
 0x29c   : > { %v3811_v45 = vunpack.c.l.b16 %v3749_v8  ;;  %v3812_v40 = vunpack.c.l.b16 %v3758_v14  ;;  %v4675_v25 = vshll.u32 %v4303_v20, 16  ;;  %v4668_v5 = vrot.slane %v4666_v33, 4 }
 0x29d   : > { %10226 = vmatmul.msk.bf16.gmra.mxu3 %vm863_vm2, %v10687_v11  ;;  %v4924_v0 = vadd.f32 %v12369_v12, %v4888_v18  ;;  %v12556_v11 = vld [vmem:[#allocation3 + $0x20] sm:$0xf]  ;;  %v3918_v1 = vpop.f32.mrf.mxu2  ;;  %v4679_v18 = vshrl.u32 %v4303_v20, 16  ;;  %v4671_v7 = vrot.slane %v4669_v9, 5  ;;  %v6660_v32 = vshrl.u32 %v12562_v37, 16 }
 0x29e   : > { %v6651_v43 = vshrl.u32 %v12556_v11, 16  ;;  %v3829_v17 = vpack.c.b16 %v3812_v40, %v3811_v45  ;;  %v4677_v51 = vrot.slane %v4675_v25, 5  ;;  %v3982_v55 = vadd.f32 %v3918_v1, %v3359_v31 }
 0x29f   : > { %v4956_v35 = vmax.f32 %v4924_v0, 0.0  ;;  %v12570_v29 = vpop.f32.mrf.mxu0  ;;  %v10688_v0 = vld [vmem:[#allocation2 + $0x188] sm:$0xff]  ;;  %v4681_v13 = vrot.slane %v4679_v18, 4  ;;  %v4672_v8 = vor.u32 %v4671_v7, %v4668_v5  ;;  %v12577_v20 = vrot.slane %v6646_v24, 11 }
 0x2a0   : > { %v4170_v2 = vpop.f32.mrf.mxu3  ;;  %10330 = vmatmul.msk.bf16.gmra.mxu1 %vm5613_vm11, %v10693_v60  ;;  %v6662_v7 = vrot.slane %v6660_v32, 7 }
 0x2a1   : > { %v4988_v56 = vpack.c.bf16 %v4956_v35, %v4956_v35  ;;  %v4235_v62 = vadd.f32 %v4170_v2, %v3981_v57  ;;  %v4685_v57 = vshll.u32 %v4304_v46, 16  ;;  %v3426_v35 = vld [vmem:[#allocation2 + $0x19c] sm:$0x8]  ;;  %v4682_v45 = vor.u32 %v4681_v13, %v4677_v51 }
 0x2a2   : > { %10244 = vmatmul.msk.bf16.gmra.mxu0 %vm863_vm2, %v4737_v53  ;;  %v3427_v53 = vld [vmem:[#allocation2 + $0x1a0] sm:$0xf]  ;;  %v4673_v10 = vrot.slane %v4672_v8, 4  ;;  %v12589_v8 = vld [vmem:[#allocation3 + $0x3c] sm:$0xf] }
 0x2a3   : > { %5107 = vst.msk [vmem:[#allocation3 + $0x84] sm:$0xf] %vm5011_vm10, %v4988_v56  ;;  %v4889_v48 = vadd.f32 %v12527_v36, %v4235_v62  ;;  %v12572_v36 = vrot.slane %v6651_v43, 7  ;;  %v3428_v56 = vld [vmem:[#allocation2 + $0x1a4] sm:$0xf]  ;;  %v3760_v62 = vshrl.u32 %v3426_v35, 16 }
 0x2a4   : > { %v3765_v14 = vshrl.u32 %v3427_v53, 16  ;;  %v3768_v38 = vshll.u32 %v3427_v53, 16  ;;  %v4683_v1 = vrot.slane %v4682_v45, 4  ;;  %v4687_v60 = vrot.slane %v4685_v57, 5 }
 0x2a5   : > { %v4925_v15 = vadd.f32 %v12369_v12, %v4889_v48  ;;  %v3921_v50 = vpop.f32.mrf.mxu2  ;;  %v10130_v48 = vrot.slane %v3760_v62, 11  ;;  %v4678_v25 = vsel %vm11101_vm8, %v4673_v10, %v4677_v51  ;;  %v3774_v31 = vshrl.u32 %v3428_v56, 16 }
 0x2a6   : > { %v3767_v33 = vrot.slane %v3765_v14, 7  ;;  %v3777_v18 = vshll.u32 %v3428_v56, 16  ;;  %v4688_v24 = vsel %vm11101_vm8, %v4683_v1, %v4687_v60  ;;  %v6654_v57 = vshll.u32 %v12556_v11, 16  ;;  %v12596_v56 = vld [vmem:[#allocation3 + $0x38] sm:$0xf] }
 0x2a7   : > { %v4957_v19 = vmax.f32 %v4925_v15, 0.0  ;;  %v4721_v15 = vunpack.c.l.b16 %v4678_v25  ;;  %v12587_v13 = vpop.f32.mrf.mxu0  ;;  %v6663_v35 = vshll.u32 %v12562_v37, 16  ;;  %v3983_v32 = vadd.f32 %v3921_v50, %v12091_v54  ;;  %v12602_v54 = vld [vmem:[#allocation3 + $0x20] sm:$0xf] }
 0x2a8   : > { %v4172_v2 = vpop.f32.mrf.mxu3  ;;  %10146 = vmatmul.msk.bf16.gmra.mxu2 %vm863_vm2, %v3829_v17  ;;  %v5133_v17 = vld [vmem:[#allocation3 + $0x1c] sm:$0x8]  ;;  %v3770_v5 = vor.u32 %v3768_v38, %v3767_v33  ;;  %v6656_v38 = vor.u32 %v6654_v57, %v12572_v36  ;;  %v6682_v10 = vshrl.u32 %v12589_v8, 16  ;;  %v3361_v50 = vadd.f32 %v12065_v3, %v12108_v58  ;;  %v5135_v58 = vld [vmem:[#allocation3 + $0x24] sm:$0xf] }
 0x2a9   : > { %v4989_v40 = vpack.c.bf16 %v4957_v19, %v4957_v19  ;;  %v4236_v43 = vadd.f32 %v4172_v2, %v3982_v55  ;;  %v4722_v55 = vunpack.c.l.b16 %v4688_v24  ;;  %v3776_v19 = vrot.slane %v3774_v31, 7 }
 0x2aa   : > { %v3771_v51 = vsel %vm10929_vm5, %v10130_v48, %v3770_v5  ;;  %v5201_v53 = vshrl.u32 %v5133_v17, 16  ;;  %v12610_v25 = vadd.f32 %v12110_v30, %v12136_v63  ;;  %v12614_v31 = vadd.f32 %v12138_v49, %v12164_v16  ;;  %v12630_v16 = vld [vmem:[%s14137_s2] ss:$0 sm:$0xff] }
 0x2ab   : > { %5108 = vst.msk [vmem:[#allocation3 + $0x98] sm:$0xf] %vm5011_vm10, %v4989_v40  ;;  %v4890_v9 = vadd.f32 %v12540_v47, %v4236_v43  ;;  %v3772_v47 = vrot.slane %v3767_v33, 4  ;;  %v3779_v45 = vor.u32 %v3777_v18, %v3776_v19  ;;  %v6665_v40 = vor.u32 %v6663_v35, %v6662_v7  ;;  %v10694_v18 = vld [vmem:[#allocation3 + $0x68] sm:$0xff]  ;;  %v5130_v35 = vld [vmem:[#allocation3 + $0x4] sm:$0x8] }
 0x2ac   : > { %v3813_v60 = vunpack.c.l.b16 %v3771_v51  ;;  %v6658_v33 = vrot.slane %v12572_v36, 4  ;;  %v6657_v36 = vsel %vm10929_vm5, %v12577_v20, %v6656_v38  ;;  %v12624_v63 = vrot.slane %v5201_v53, 11  ;;  %v5131_v53 = vld [vmem:[#allocation3 + $0x8] sm:$0xf] }
 0x2ad   : > { %10227 = vmatmul.msk.bf16.gmra.mxu3 %vm863_vm2, %v10688_v0  ;;  %v4926_v46 = vadd.f32 %v12369_v12, %v4890_v9  ;;  %v6600_v0 = vld [vmem:[#allocation3 + $0x34] sm:$0x8]  ;;  %v4738_v12 = vpack.c.b16 %v4722_v55, %v4721_v15  ;;  %v3923_v62 = vpop.f32.mrf.mxu2  ;;  %v3780_v37 = vsel %vm10929_vm5, %v3772_v47, %v3779_v45  ;;  %v6673_v9 = vshrl.u32 %v12596_v56, 16 }
 0x2ae   : > { %v6668_v43 = vshrl.u32 %v6600_v0, 16  ;;  %v3814_v48 = vunpack.c.l.b16 %v3780_v37  ;;  %v6666_v30 = vsel %vm10929_vm5, %v6658_v33, %v6665_v40  ;;  %v5206_v49 = vshrl.u32 %v12602_v54, 16  ;;  %v10689_v0 = vld [vmem:[#allocation2 + $0x1a0] sm:$0xff] }
 0x2af   : > { %v4958_v2 = vmax.f32 %v4926_v46, 0.0  ;;  %v6684_v20 = vrot.slane %v6682_v10, 7  ;;  %v6675_v5 = vrot.slane %v6673_v9, 7  ;;  %v6676_v7 = vshll.u32 %v12596_v56, 16  ;;  %v5946_v9 = vld [vmem:[#allocation3 + $0x20] sm:$0xf] }
 0x2b0   : > { %v4175_v14 = vpop.f32.mrf.mxu3  ;;  %v3830_v24 = vpack.c.b16 %v3814_v48, %v3813_v60  ;;  %v12635_v15 = vrot.slane %v6668_v43, 11  ;;  %v6685_v46 = vshll.u32 %v12589_v8, 16  ;;  %v5215_v55 = vshrl.u32 %v5135_v58, 16  ;;  %10331 = vmatmul.msk.bf16.gmra.mxu1 %vm5613_vm11, %v10694_v18 }
 0x2b1   : > { %v4990_v1 = vpack.c.bf16 %v4958_v2, %v4958_v2  ;;  %v4237_v11 = vadd.f32 %v4175_v14, %v3983_v32  ;;  %v3984_v47 = vadd.f32 %v3923_v62, %v3361_v50  ;;  %v6999_v51 = vunpack.c.l.b16 %v6657_v36 }
 0x2b2   : > { %10245 = vmatmul.msk.bf16.gmra.mxu0 %vm863_vm2, %v4738_v12  ;;  %v7000_v57 = vunpack.c.l.b16 %v6666_v30  ;;  %v5132_v12 = vld [vmem:[#allocation3 + $0xc] sm:$0xf]  ;;  %v5179_v45 = vshrl.u32 %v5130_v35, 16  ;;  %v5184_v14 = vshrl.u32 %v5131_v53, 16  ;;  %v5187_v38 = vshll.u32 %v5131_v53, 16 }
 0x2b3   : > { %5109 = vst.msk [vmem:[#allocation3 + $0x9c] sm:$0xf] %vm5011_vm10, %v4990_v1  ;;  %v4891_v3 = vadd.f32 %v12552_v6, %v4237_v11  ;;  %v12633_v6 = vpop.f32.mrf.mxu0  ;;  %v5208_v40 = vrot.slane %v5206_v49, 7  ;;  %v5193_v43 = vshrl.u32 %v5132_v12, 16  ;;  %v6687_v10 = vor.u32 %v6685_v46, %v6684_v20  ;;  %v5947_v46 = vld [vmem:[#allocation3 + $0x24] sm:$0xf] }
 0x2b4   : > { %v10246_v62 = vrot.slane %v5179_v45, 11  ;;  %v5186_v1 = vrot.slane %v5184_v14, 7  ;;  %v5196_v11 = vshll.u32 %v5132_v12, 16  ;;  %v5217_v37 = vrot.slane %v5215_v55, 7 }
 0x2b5   : > { %v4927_v17 = vadd.f32 %v12630_v16, %v4891_v3  ;;  %v3926_v32 = vpop.f32.mrf.mxu2  ;;  %v7031_v50 = vpack.c.b16 %v7000_v57, %v6999_v51  ;;  %v5195_v48 = vrot.slane %v5193_v43, 7  ;;  %v6680_v33 = vrot.slane %v6675_v5, 4 }
 0x2b6   : > { %v5189_v18 = vor.u32 %v5187_v38, %v5186_v1  ;;  %v5191_v3 = vrot.slane %v5186_v1, 4  ;;  %v5209_v36 = vshll.u32 %v12602_v54, 16  ;;  %v5218_v30 = vshll.u32 %v5135_v58, 16 }
 0x2b7   : > { %v4959_v19 = vmax.f32 %v4927_v17, 0.0  ;;  %v6678_v20 = vor.u32 %v6676_v7, %v6675_v5  ;;  %v3985_v51 = vadd.f32 %v3926_v32, %v12121_v26  ;;  %v5213_v57 = vrot.slane %v5208_v40, 4  ;;  %v5944_v26 = vld [vmem:[#allocation3 + $0xc] sm:$0xf] }
 0x2b8   : > { %v4177_v2 = vpop.f32.mrf.mxu3  ;;  %10147 = vmatmul.msk.bf16.gmra.mxu2 %vm863_vm2, %v3830_v24  ;;  %v5198_v24 = vor.u32 %v5196_v11, %v5195_v48  ;;  %v5190_v55 = vsel %vm10929_vm5, %v10246_v62, %v5189_v18  ;;  %v6025_v12 = vshll.u32 %v5947_v46, 16  ;;  %v10695_v62 = vld [vmem:[#allocation3 + $0x80] sm:$0xff]  ;;  %v6005_v48 = vshrl.u32 %v5944_v26, 16 }
 0x2b9   : > { %v4991_v56 = vpack.c.bf16 %v4959_v19, %v4959_v19  ;;  %v4238_v8 = vadd.f32 %v4177_v2, %v3984_v47  ;;  %v5211_v47 = vor.u32 %v5209_v36, %v5208_v40  ;;  %v5220_v19 = vor.u32 %v5218_v30, %v5217_v37 }
 0x2ba   : > { %v5199_v58 = vsel %vm10929_vm5, %v5191_v3, %v5198_v24  ;;  %v5755_v5 = vunpack.c.l.b16 %v5190_v55  ;;  %v6019_v2 = vshll.u32 %v5946_v9, 16  ;;  %v6679_v38 = vsel %vm10929_vm5, %v12635_v15, %v6678_v20 }
 0x2bb   : > { %5110 = vst.msk [vmem:[#allocation3 + $0xb0] sm:$0xf] %vm5011_vm10, %v4991_v56  ;;  %v4892_v60 = vadd.f32 %v12570_v29, %v4238_v8  ;;  %v12646_v17 = vpop.f32.mrf.mxu0  ;;  %v6688_v29 = vsel %vm10929_vm5, %v6680_v33, %v6687_v10  ;;  %v5756_v7 = vunpack.c.l.b16 %v5199_v58  ;;  %v5943_v8 = vld [vmem:[#allocation3 + $0x8] sm:$0xf]  ;;  %v5212_v32 = vsel %vm10929_vm5, %v12624_v63, %v5211_v47 }
 0x2bc   : > { %v7002_v56 = vunpack.c.l.b16 %v6688_v29  ;;  %v5221_v40 = vsel %vm10929_vm5, %v5213_v57, %v5220_v19  ;;  %v6029_v10 = vshrl.u32 %v5947_v46, 16  ;;  %v5992_v1 = vshrl.u32 %v5943_v8, 16  ;;  %v6605_v46 = vld [vmem:[#allocation3 + $0x54] sm:$0xf] }
 0x2bd   : > { %10228 = vmatmul.msk.bf16.gmra.mxu3 %vm863_vm2, %v10689_v0  ;;  %v4928_v49 = vadd.f32 %v12630_v16, %v4892_v60  ;;  %v6016_v0 = vshrl.u32 %v5946_v9, 16  ;;  %v3928_v35 = vpop.f32.mrf.mxu2  ;;  %v5995_v11 = vshll.u32 %v5943_v8, 16  ;;  %v6001_v37 = vshll.u32 %v5944_v26, 16 }
 0x2be   : > { %v5787_v60 = vpack.c.b16 %v5756_v7, %v5755_v5  ;;  %v12668_v33 = vrot.slane %v6019_v2, 5  ;;  %v12670_v63 = vrot.slane %v6025_v12, 5  ;;  %v5994_v3 = vrot.slane %v5992_v1, 4 }
 0x2bf   : > { %v4960_v54 = vmax.f32 %v4928_v49, 0.0  ;;  %v12663_v43 = vrot.slane %v6016_v0, 4  ;;  %v5997_v36 = vrot.slane %v5995_v11, 5  ;;  %v6003_v30 = vrot.slane %v6001_v37, 5  ;;  %v6604_v49 = vld [vmem:[#allocation3 + $0x50] sm:$0xf] }
 0x2c0   : > { %v4180_v53 = vpop.f32.mrf.mxu3  ;;  %v6007_v24 = vrot.slane %v6005_v48, 4  ;;  %v5758_v20 = vunpack.c.l.b16 %v5221_v40  ;;  %v6031_v29 = vrot.slane %v6029_v10, 4  ;;  %10332 = vmatmul.msk.bf16.gmra.mxu1 %vm5613_vm11, %v10695_v62  ;;  %v3986_v55 = vadd.f32 %v3928_v35, %v12610_v25  ;;  %v5137_v40 = vld [vmem:[#allocation3 + $0x38] sm:$0xf] }
 0x2c1   : > { %v4992_v45 = vpack.c.bf16 %v4960_v54, %v4960_v54  ;;  %v4239_v14 = vadd.f32 %v4180_v53, %v3985_v51  ;;  %v5998_v19 = vor.u32 %v5997_v36, %v5994_v3  ;;  %v5948_v51 = vld [vmem:[#allocation3 + $0x28] sm:$0x1]  ;;  %v5757_v5 = vunpack.c.l.b16 %v5212_v32  ;;  %v5136_v36 = vld [vmem:[#allocation3 + $0x34] sm:$0x8] }
 0x2c2   : > { %10393 = vmatmul.msk.bf16.vlgmr.msrb.gmra.mxu0 %vm5613_vm11, %v7031_v50  ;;  %v5945_v50 = vld [vmem:[#allocation3 + $0x10] sm:$0x1]  ;;  %v6008_v57 = vor.u32 %v6007_v24, %v6003_v30  ;;  %v6695_v7 = vshrl.u32 %v6604_v49, 16  ;;  %v6032_v25 = vor.u32 %v6031_v29, %v12670_v63  ;;  %v6035_v35 = vshll.u32 %v5948_v51, 16 }
 0x2c3   : > { %5111 = vst.msk [vmem:[#allocation3 + $0xb4] sm:$0xf] %vm5011_vm10, %v4992_v45  ;;  %v4893_v15 = vadd.f32 %v12587_v13, %v4239_v14  ;;  %v12673_v18 = vpop.f32.mrf.mxu0  ;;  %v7001_v13 = vunpack.c.l.b16 %v6679_v38  ;;  %v6011_v0 = vshll.u32 %v5945_v50, 16  ;;  %v5999_v45 = vrot.slane %v5998_v19, 4  ;;  %v6603_v14 = vld [vmem:[#allocation3 + $0x4c] sm:$0x8] }
 0x2c4   : > { %v6704_v38 = vshrl.u32 %v6605_v46, 16  ;;  %v6009_v8 = vrot.slane %v6008_v57, 4  ;;  %v12683_v32 = vpack.c.b16 %v5758_v20, %v5757_v5  ;;  %v6022_v62 = vor.u32 %v12668_v33, %v12663_v43 }
 0x2c5   : > { %v4929_v9 = vadd.f32 %v12630_v16, %v4893_v15  ;;  %v3931_v54 = vpop.f32.mrf.mxu2  ;;  %v7032_v53 = vpack.c.b16 %v7002_v56, %v7001_v13  ;;  %v6013_v26 = vrot.slane %v6011_v0, 5  ;;  %v6004_v56 = vsel %vm11101_vm8, %v5999_v45, %v6003_v30  ;;  %v5138_v15 = vld [vmem:[#allocation3 + $0x3c] sm:$0xf] }
 0x2c6   : > { %v6377_v11 = vunpack.c.l.b16 %v6004_v56  ;;  %v6690_v37 = vshrl.u32 %v6603_v14, 16  ;;  %v6706_v3 = vrot.slane %v6704_v38, 7  ;;  %v5228_v30 = vshrl.u32 %v5137_v40, 16  ;;  %v10696_v38 = vld [vmem:[#allocation3 + $0x98] sm:$0xff] }
 0x2c7   : > { %v4961_v47 = vmax.f32 %v4929_v9, 0.0  ;;  %v6014_v1 = vsel %vm11101_vm8, %v6009_v8, %v6013_v26  ;;  %v6033_v50 = vrot.slane %v6032_v25, 4  ;;  %v6037_v24 = vrot.slane %v6035_v35, 5 }
 0x2c8   : > { %v4182_v58 = vpop.f32.mrf.mxu3  ;;  %10343 = vmatmul.msk.bf16.vlgmr.msrb.gmra.mxu2 %vm5613_vm11, %v5787_v60  ;;  %v6697_v60 = vrot.slane %v6695_v7, 7  ;;  %v6698_v13 = vshll.u32 %v6604_v49, 16  ;;  %v5237_v20 = vshrl.u32 %v5138_v15, 16  ;;  %v3987_v43 = vadd.f32 %v3931_v54, %v12149_v41  ;;  %v5950_v49 = vld [vmem:[#allocation3 + $0x3c] sm:$0xf] }
 0x2c9   : > { %v4993_v2 = vpack.c.bf16 %v4961_v47, %v4961_v47  ;;  %v4240_v12 = vadd.f32 %v4182_v58, %v3986_v55  ;;  %v6707_v55 = vshll.u32 %v6605_v46, 16  ;;  %v5949_v47 = vld [vmem:[#allocation3 + $0x38] sm:$0xf]  ;;  %v6023_v51 = vrot.slane %v6022_v62, 4 }
 0x2ca   : > { %v10378_v58 = vrot.slane %v6690_v37, 11  ;;  %v6700_v57 = vor.u32 %v6698_v13, %v6697_v60  ;;  %v5223_v5 = vshrl.u32 %v5136_v36, 16  ;;  %v5230_v45 = vrot.slane %v5228_v30, 7  ;;  %v6607_v13 = vld [vmem:[#allocation3 + $0x68] sm:$0xf] }
 0x2cb   : > { %5112 = vst.msk [vmem:[#allocation3 + $0xc8] sm:$0xf] %vm5011_vm10, %v4993_v2  ;;  %v4894_v10 = vadd.f32 %v12633_v6, %v4240_v12  ;;  %v12690_v9 = vpop.f32.mrf.mxu0  ;;  %v6378_v6 = vunpack.c.l.b16 %v6014_v1  ;;  %v6709_v12 = vor.u32 %v6707_v55, %v6706_v3  ;;  %v6028_v41 = vsel %vm11101_vm8, %v6023_v51, %v12670_v63 }
 0x2cc   : > { %v5239_v54 = vrot.slane %v5237_v20, 7  ;;  %v6040_v46 = vshrl.u32 %v5949_v47, 16  ;;  %v6043_v14 = vshll.u32 %v5949_v47, 16  ;;  %v6038_v26 = vsel %vm11101_vm8, %v6033_v50, %v6037_v24  ;;  %v5951_v24 = vld [vmem:[#allocation3 + $0x40] sm:$0x1] }
 0x2cd   : > { %v4930_v48 = vadd.f32 %v12630_v16, %v4894_v10  ;;  %v6409_v29 = vpack.c.b16 %v6378_v6, %v6377_v11  ;;  %v3933_v19 = vpop.f32.mrf.mxu2  ;;  %v6702_v25 = vrot.slane %v6697_v60, 4  ;;  %v5231_v35 = vshll.u32 %v5137_v40, 16  ;;  %v6608_v40 = vld [vmem:[#allocation3 + $0x6c] sm:$0xf]  ;;  %v6606_v47 = vld [vmem:[#allocation3 + $0x64] sm:$0x8] }
 0x2ce   : > { %v6701_v10 = vsel %vm10929_vm5, %v10378_v58, %v6700_v57  ;;  %v5240_v56 = vshll.u32 %v5138_v15, 16  ;;  %v6049_v63 = vshll.u32 %v5950_v49, 16  ;;  %v6053_v62 = vshrl.u32 %v5950_v49, 16 }
 0x2cf   : > { %v4962_v33 = vmax.f32 %v4930_v48, 0.0  ;;  %10360 = vmatmul.msk.bf16.vlgmr.msrb.gmra.mxu3 %vm5613_vm11, %v6409_v29  ;;  %v10248_v37 = vrot.slane %v5223_v5, 11  ;;  %v6379_v48 = vunpack.c.l.b16 %v6028_v41  ;;  %v6042_v3 = vrot.slane %v6040_v46, 4  ;;  %v5141_v41 = vld [vmem:[#allocation3 + $0x54] sm:$0xf] }
 0x2d0   : > { %v4185_v0 = vpop.f32.mrf.mxu3  ;;  %v5242_v6 = vor.u32 %v5240_v56, %v5239_v54  ;;  %v6045_v60 = vrot.slane %v6043_v14, 5  ;;  %10333 = vmatmul.msk.bf16.gmra.mxu1 %vm5613_vm11, %v10696_v38  ;;  %v3988_v15 = vadd.f32 %v3933_v19, %v12614_v31  ;;  %v6380_v30 = vunpack.c.l.b16 %v6038_v26 }
 0x2d1   : > { %v4994_v7 = vpack.c.bf16 %v4962_v33, %v4962_v33  ;;  %v4241_v2 = vadd.f32 %v4185_v0, %v3987_v43  ;;  %v7003_v50 = vunpack.c.l.b16 %v6701_v10  ;;  %v5235_v33 = vrot.slane %v5230_v45, 4 }
 0x2d2   : > { %10394 = vmatmul.msk.bf16.gmra.mxu0 %vm5613_vm11, %v7032_v53  ;;  %v6710_v53 = vsel %vm10929_vm5, %v6702_v25, %v6709_v12  ;;  %v12711_v29 = vrot.slane %v6049_v63, 5  ;;  %v6055_v55 = vrot.slane %v6053_v62, 4  ;;  %v6726_v19 = vshrl.u32 %v6608_v40, 16  ;;  %v5140_v12 = vld [vmem:[#allocation3 + $0x50] sm:$0xf] }
 0x2d3   : > { %5113 = vst.msk [vmem:[#allocation3 + $0xcc] sm:$0xf] %vm5011_vm10, %v4994_v7  ;;  %v4895_v8 = vadd.f32 %v12646_v17, %v4241_v2  ;;  %v12705_v11 = vpop.f32.mrf.mxu0  ;;  %v5233_v17 = vor.u32 %v5231_v35, %v5230_v45  ;;  %v7004_v43 = vunpack.c.l.b16 %v6710_v53  ;;  %v5243_v57 = vsel %vm10929_vm5, %v5235_v33, %v5242_v6  ;;  %v5139_v35 = vld [vmem:[#allocation3 + $0x4c] sm:$0x8]  ;;  %v14196_v62 = vld [vmem:[#allocation4_spill] sm:$0xff] }
 0x2d4   : > { %v6046_v5 = vor.u32 %v6045_v60, %v6042_v3  ;;  %v6059_v7 = vshll.u32 %v5951_v24, 16  ;;  %v6717_v2 = vshrl.u32 %v6607_v13, 16  ;;  %v3367_v45 = vadd.f32 %v12166_v59, %v12192_v21 }
 0x2d5   : > { %v4931_v1 = vadd.f32 %v12630_v16, %v4895_v8  ;;  %v5234_v31 = vsel %vm10929_vm5, %v10248_v37, %v5233_v17  ;;  %v6712_v49 = vshrl.u32 %v6606_v47, 16  ;;  %v6410_v54 = vpack.c.b16 %v6380_v30, %v6379_v48  ;;  %v5952_v48 = vld [vmem:[#allocation3 + $0x50] sm:$0xf]  ;;  %v5953_v30 = vld [vmem:[#allocation3 + $0x54] sm:$0xf] }
 0x2d6   : > { %v7033_v46 = vpack.c.b16 %v7004_v43, %v7003_v50  ;;  %v5759_v14 = vunpack.c.l.b16 %v5234_v31  ;;  %v6056_v38 = vor.u32 %v6055_v55, %v12711_v29  ;;  %v5760_v26 = vunpack.c.l.b16 %v5243_v57  ;;  %v10697_v31 = vld [vmem:[#allocation3 + $0xb0] sm:$0xff] }
 0x2d7   : > { %v4963_v36 = vmax.f32 %v4931_v1, 0.0  ;;  %v6728_v25 = vrot.slane %v6726_v19, 7  ;;  %v5250_v10 = vshrl.u32 %v5140_v12, 16  ;;  %v6047_v56 = vrot.slane %v6046_v5, 4 }
 0x2d8   : > { %v4187_v20 = vpop.f32.mrf.mxu3  ;;  %10344 = vmatmul.msk.bf16.gmra.mxu2 %vm5613_vm11, %v12683_v32  ;;  %v6061_v63 = vrot.slane %v6059_v7, 5  ;;  %v6719_v59 = vrot.slane %v6717_v2, 7  ;;  %v5259_v21 = vshrl.u32 %v5141_v41, 16  ;;  %v10379_v37 = vrot.slane %v6712_v49, 11 }
 0x2d9   : > { %v4995_v0 = vpack.c.bf16 %v4963_v36, %v4963_v36  ;;  %v4242_v51 = vadd.f32 %v4187_v20, %v3988_v15  ;;  %v6729_v17 = vshll.u32 %v6608_v40, 16  ;;  %v6057_v3 = vrot.slane %v6056_v38, 4 }
 0x2da   : > { %v3936_v58 = vpop.f32.mrf.mxu2  ;;  %v6720_v60 = vshll.u32 %v6607_v13, 16  ;;  %v5245_v15 = vshrl.u32 %v5139_v35, 16  ;;  %v5253_v36 = vshll.u32 %v5140_v12, 16  ;;  %v5252_v43 = vrot.slane %v5250_v10, 7  ;;  %v6609_v10 = vld [vmem:[#allocation3 + $0x7c] sm:$0x8] }
 0x2db   : > { %5114 = vst.msk [vmem:[#allocation3 + $0xe0] sm:$0xf] %vm5011_vm10, %v4995_v0  ;;  %v4896_v32 = vadd.f32 %v12673_v18, %v4242_v51  ;;  %v3989_v1 = vadd.f32 %v3936_v58, %v14196_v62  ;;  %v6731_v20 = vor.u32 %v6729_v17, %v6728_v25  ;;  %v5261_v47 = vrot.slane %v5259_v21, 7 }
 0x2dc   : > { %v6722_v55 = vor.u32 %v6720_v60, %v6719_v59  ;;  %v6064_v0 = vshrl.u32 %v5952_v48, 16  ;;  %v6067_v51 = vshll.u32 %v5952_v48, 16  ;;  %v6724_v13 = vrot.slane %v6719_v59, 4  ;;  %v6611_v48 = vld [vmem:[#allocation3 + $0x84] sm:$0xf] }
 0x2dd   : > { %v4932_v8 = vadd.f32 %v12630_v16, %v4896_v32  ;;  %v6073_v19 = vshll.u32 %v5953_v30, 16  ;;  %v6077_v58 = vshrl.u32 %v5953_v30, 16  ;;  %v5789_v57 = vpack.c.b16 %v5760_v26, %v5759_v14  ;;  %v5954_v14 = vld [vmem:[#allocation3 + $0x58] sm:$0x1]  ;;  %v5144_v30 = vld [vmem:[#allocation3 + $0x6c] sm:$0xf] }
 0x2de   : > { %v6052_v5 = vsel %vm11101_vm8, %v6047_v56, %v12711_v29  ;;  %v6062_v7 = vsel %vm11101_vm8, %v6057_v3, %v6061_v63  ;;  %v5262_v2 = vshll.u32 %v5141_v41, 16  ;;  %v6732_v32 = vsel %vm10929_vm5, %v6724_v13, %v6731_v20 }
 0x2df   : > { %v4964_v18 = vmax.f32 %v4932_v8, 0.0  ;;  %v12726_v53 = vpop.f32.mrf.mxu0  ;;  %10361 = vmatmul.msk.bf16.gmra.mxu3 %vm5613_vm11, %v6410_v54  ;;  %v10249_v49 = vrot.slane %v5245_v15, 11  ;;  %v5255_v54 = vor.u32 %v5253_v36, %v5252_v43  ;;  %v6066_v38 = vrot.slane %v6064_v0, 4 }
 0x2e0   : > { %v4190_v6 = vpop.f32.mrf.mxu3  ;;  %v6069_v8 = vrot.slane %v6067_v51, 5  ;;  %10334 = vmatmul.msk.bf16.gmra.mxu1 %vm5613_vm11, %v10697_v31  ;;  %v12745_v41 = vrot.slane %v6073_v19, 5  ;;  %v6079_v35 = vrot.slane %v6077_v58, 4  ;;  %v6381_v63 = vunpack.c.l.b16 %v6052_v5 }
 0x2e1   : > { %v4996_v50 = vpack.c.bf16 %v4964_v18, %v4964_v18  ;;  %v4243_v24 = vadd.f32 %v4190_v6, %v3989_v1  ;;  %v6382_v59 = vunpack.c.l.b16 %v6062_v7  ;;  %v7006_v21 = vunpack.c.l.b16 %v6732_v32  ;;  %v6610_v1 = vld [vmem:[#allocation3 + $0x80] sm:$0xf]  ;;  %v5143_v6 = vld [vmem:[#allocation3 + $0x68] sm:$0xf] }
 0x2e2   : > { %v3938_v33 = vpop.f32.mrf.mxu2  ;;  %10395 = vmatmul.msk.bf16.gmra.mxu0 %vm5613_vm11, %v7033_v46  ;;  %v5264_v46 = vor.u32 %v5262_v2, %v5261_v47  ;;  %v5257_v62 = vrot.slane %v5252_v43, 4  ;;  %v6070_v60 = vor.u32 %v6069_v8, %v6066_v38  ;;  %v6083_v15 = vshll.u32 %v5954_v14, 16  ;;  %v12759_v47 = vpop.f32.mrf.mxu1 }
 0x2e3   : > { %5115 = vst.msk [vmem:[#allocation3 + $0xe4] sm:$0xf] %vm5011_vm10, %v4996_v50  ;;  %v4897_v40 = vadd.f32 %v12690_v9, %v4243_v24  ;;  %v6723_v9 = vsel %vm10929_vm5, %v10379_v37, %v6722_v55  ;;  %v3990_v29 = vadd.f32 %v3938_v33, %v3367_v45  ;;  %v5256_v45 = vsel %vm10929_vm5, %v10249_v49, %v5255_v54  ;;  %v14197_v50 = vld [vmem:[#allocation5_spill] sm:$0xff]  ;;  %v5142_v55 = vld [vmem:[#allocation3 + $0x64] sm:$0x8] }
 0x2e4   : > { %v7005_v17 = vunpack.c.l.b16 %v6723_v9  ;;  %v5265_v3 = vsel %vm10929_vm5, %v5257_v62, %v5264_v46  ;;  %v6734_v36 = vshrl.u32 %v6609_v10, 16  ;;  %v12754_v24 = vadd.f32 %v14197_v50, %v12218_v52  ;;  %v5956_v46 = vld [vmem:[#allocation3 + $0x6c] sm:$0xf] }
 0x2e5   : > { %v4933_v12 = vadd.f32 %v12630_v16, %v4897_v40  ;;  %v6080_v43 = vor.u32 %v6079_v35, %v12745_v41  ;;  %v6739_v33 = vshrl.u32 %v6610_v1, 16  ;;  %v6411_v51 = vpack.c.b16 %v6382_v59, %v6381_v63 }
 0x2e6   : > { %v7034_v31 = vpack.c.b16 %v7006_v21, %v7005_v17  ;;  %v6748_v40 = vshrl.u32 %v6611_v48, 16  ;;  %v5272_v13 = vshrl.u32 %v5143_v6, 16  ;;  %v5761_v58 = vunpack.c.l.b16 %v5256_v45  ;;  %v5955_v21 = vld [vmem:[#allocation3 + $0x68] sm:$0xf] }
 0x2e7   : > { %v4965_v26 = vmax.f32 %v4933_v12, 0.0  ;;  %v12743_v25 = vpop.f32.mrf.mxu0  ;;  %v5762_v52 = vunpack.c.l.b16 %v5265_v3  ;;  %v6071_v5 = vrot.slane %v6070_v60, 4  ;;  %v6085_v7 = vrot.slane %v6083_v15, 5  ;;  %v14198_v12 = vld [vmem:[#allocation6_spill] sm:$0xff]  ;;  %v10698_v45 = vld [vmem:[#allocation3 + $0xc8] sm:$0xff] }
 0x2e8   : > { %v4192_v56 = vpop.f32.mrf.mxu3  ;;  %10345 = vmatmul.msk.bf16.gmra.mxu2 %vm5613_vm11, %v5789_v57  ;;  %v5281_v57 = vshrl.u32 %v5144_v30, 16  ;;  %v12762_v2 = vrot.slane %v6734_v36, 11  ;;  %v6081_v54 = vrot.slane %v6080_v43, 4  ;;  %v6741_v9 = vrot.slane %v6739_v33, 7 }
 0x2e9   : > { %v4997_v18 = vpack.c.bf16 %v4965_v26, %v4965_v26  ;;  %v4244_v37 = vadd.f32 %v4192_v56, %v3990_v29  ;;  %v6076_v8 = vsel %vm11101_vm8, %v6071_v5, %v12745_v41  ;;  %v6742_v29 = vshll.u32 %v6610_v1, 16 }
 0x2ea   : > { %v6750_v26 = vrot.slane %v6748_v40, 7  ;;  %v5274_v35 = vrot.slane %v5272_v13, 7  ;;  %v6751_v63 = vshll.u32 %v6611_v48, 16  ;;  %v5283_v59 = vrot.slane %v5281_v57, 7  ;;  %v6614_v13 = vld [vmem:[#allocation3 + $0x9c] sm:$0xf] }
 0x2eb   : > { %5116 = vst.msk [vmem:[#allocation3 + $0xf8] sm:$0xf] %vm5011_vm10, %v4997_v18  ;;  %v4898_v20 = vadd.f32 %v12705_v11, %v4244_v37  ;;  %v3941_v0 = vpop.f32.mrf.mxu2  ;;  %v5267_v11 = vshrl.u32 %v5142_v55, 16  ;;  %v5275_v18 = vshll.u32 %v5143_v6, 16  ;;  %v6097_v37 = vshll.u32 %v5956_v46, 16 }
 0x2ec   : > { %v3991_v32 = vadd.f32 %v3941_v0, %v14198_v12  ;;  %v6101_v17 = vshrl.u32 %v5956_v46, 16  ;;  %v6086_v1 = vsel %vm11101_vm8, %v6081_v54, %v6085_v7  ;;  %v6744_v3 = vor.u32 %v6742_v29, %v6741_v9  ;;  %v5957_v7 = vld [vmem:[#allocation3 + $0x70] sm:$0x1]  ;;  %v6612_v29 = vld [vmem:[#allocation3 + $0x94] sm:$0x8] }
 0x2ed   : > { %v4934_v19 = vadd.f32 %v12630_v16, %v4898_v20  ;;  %v10250_v62 = vrot.slane %v5267_v11, 11  ;;  %v5284_v60 = vshll.u32 %v5144_v30, 16  ;;  %v12776_v15 = vpop.f32.mrf.mxu1  ;;  %v6753_v36 = vor.u32 %v6751_v63, %v6750_v26 }
 0x2ee   : > { %v5277_v50 = vor.u32 %v5275_v18, %v5274_v35  ;;  %v6088_v6 = vshrl.u32 %v5955_v21, 16  ;;  %v6091_v20 = vshll.u32 %v5955_v21, 16  ;;  %v5790_v33 = vpack.c.b16 %v5762_v52, %v5761_v58  ;;  %v6613_v58 = vld [vmem:[#allocation3 + $0x98] sm:$0xf] }
 0x2ef   : > { %v4966_v49 = vmax.f32 %v4934_v19, 0.0  ;;  %v12765_v14 = vpop.f32.mrf.mxu0  ;;  %10362 = vmatmul.msk.bf16.gmra.mxu3 %vm5613_vm11, %v6411_v51  ;;  %v6383_v55 = vunpack.c.l.b16 %v6076_v8  ;;  %v5286_v0 = vor.u32 %v5284_v60, %v5283_v59  ;;  %v6384_v51 = vunpack.c.l.b16 %v6086_v1 }
 0x2f0   : > { %v4195_v38 = vpop.f32.mrf.mxu3  ;;  %v6103_v40 = vrot.slane %v6101_v17, 4  ;;  %10335 = vmatmul.msk.bf16.gmra.mxu1 %vm5613_vm11, %v10698_v45  ;;  %v6745_v57 = vsel %vm10929_vm5, %v12762_v2, %v6744_v3  ;;  %v5279_v5 = vrot.slane %v5274_v35, 4  ;;  %v6093_v54 = vrot.slane %v6091_v20, 5  ;;  %v5147_v17 = vld [vmem:[#allocation3 + $0x84] sm:$0xf] }
 0x2f1   : > { %v4998_v10 = vpack.c.bf16 %v4966_v49, %v4966_v49  ;;  %v4245_v56 = vadd.f32 %v4195_v38, %v3991_v32  ;;  %v5278_v32 = vsel %vm10929_vm5, %v10250_v62, %v5277_v50  ;;  %v6090_v49 = vrot.slane %v6088_v6, 4 }
 0x2f2   : > { %10396 = vmatmul.msk.bf16.gmra.mxu0 %vm5613_vm11, %v7034_v31  ;;  %v6746_v31 = vrot.slane %v6741_v9, 4  ;;  %v5287_v2 = vsel %vm10929_vm5, %v5279_v5, %v5286_v0  ;;  %v6770_v46 = vshrl.u32 %v6614_v13, 16  ;;  %v6107_v8 = vshll.u32 %v5957_v7, 16  ;;  %v14200_v0 = vld [vmem:[#allocation9_spill] sm:$0xff] }
 0x2f3   : > { %5117 = vst.msk [vmem:[#allocation3 + $0xfc] sm:$0xf] %vm5011_vm10, %v4998_v10  ;;  %v4899_v41 = vadd.f32 %v12726_v53, %v4245_v56  ;;  %v3943_v48 = vpop.f32.mrf.mxu2  ;;  %v12779_v53 = vrot.slane %v6097_v37, 5  ;;  %v6761_v26 = vshrl.u32 %v6613_v58, 16  ;;  %v6412_v10 = vpack.c.b16 %v6384_v51, %v6383_v55  ;;  %v5146_v56 = vld [vmem:[#allocation3 + $0x80] sm:$0xf] }
 0x2f4   : > { %v3992_v30 = vadd.f32 %v3943_v48, %v12754_v24  ;;  %v6754_v12 = vsel %vm10929_vm5, %v6746_v31, %v6753_v36  ;;  %v7007_v21 = vunpack.c.l.b16 %v6745_v57  ;;  %v5763_v18 = vunpack.c.l.b16 %v5278_v32  ;;  %v14201_v51 = vld [vmem:[#allocation7_spill] sm:$0xff] }
 0x2f5   : > { %v4935_v43 = vadd.f32 %v12630_v16, %v4899_v41  ;;  %v6104_v38 = vor.u32 %v6103_v40, %v12779_v53  ;;  %v12798_v63 = vpop.f32.mrf.mxu1  ;;  %v7008_v62 = vunpack.c.l.b16 %v6754_v12  ;;  %v5764_v37 = vunpack.c.l.b16 %v5287_v2  ;;  %v5959_v2 = vld [vmem:[#allocation3 + $0x84] sm:$0xf] }
 0x2f6   : > { %v6094_v41 = vor.u32 %v6093_v54, %v6090_v49  ;;  %v6756_v1 = vshrl.u32 %v6612_v29, 16  ;;  %v6772_v3 = vrot.slane %v6770_v46, 7  ;;  %v6109_v48 = vrot.slane %v6107_v8, 5  ;;  %v5958_v49 = vld [vmem:[#allocation3 + $0x80] sm:$0xf] }
 0x2f7   : > { %v4967_v19 = vmax.f32 %v4935_v43, 0.0  ;;  %v12786_v52 = vpop.f32.mrf.mxu0  ;;  %v6105_v60 = vrot.slane %v6104_v38, 4  ;;  %v6763_v36 = vrot.slane %v6761_v26, 7  ;;  %v5294_v50 = vshrl.u32 %v5146_v56, 16  ;;  %v10699_v46 = vld [vmem:[#allocation3 + $0xe0] sm:$0xff] }
 0x2f8   : > { %v4197_v11 = vpop.f32.mrf.mxu3  ;;  %10346 = vmatmul.msk.bf16.gmra.mxu2 %vm5613_vm11, %v5790_v33  ;;  %v6773_v43 = vshll.u32 %v6614_v13, 16  ;;  %v5145_v33 = vld [vmem:[#allocation3 + $0x7c] sm:$0x8]  ;;  %v5303_v55 = vshrl.u32 %v5147_v17, 16  ;;  %v3371_v31 = vadd.f32 %v14201_v51, %v14200_v0  ;;  %v5791_v57 = vpack.c.b16 %v5764_v37, %v5763_v18  ;;  %v6615_v0 = vld [vmem:[#allocation3 + $0xac] sm:$0x8] }
 0x2f9   : > { %v4999_v24 = vpack.c.bf16 %v4967_v19, %v4967_v19  ;;  %v4246_v9 = vadd.f32 %v4197_v11, %v3992_v30  ;;  %v7035_v30 = vpack.c.b16 %v7008_v62, %v7007_v21  ;;  %v6764_v5 = vshll.u32 %v6613_v58, 16 }
 0x2fa   : > { %v6095_v12 = vrot.slane %v6094_v41, 4  ;;  %v6775_v32 = vor.u32 %v6773_v43, %v6772_v3  ;;  %v10381_v54 = vrot.slane %v6756_v1, 11  ;;  %v6110_v58 = vsel %vm11101_vm8, %v6105_v60, %v6109_v48 }
 0x2fb   : > { %5118 = vst.msk [vmem:[#allocation3 + $0x110] sm:$0xf] %vm5011_vm10, %v4999_v24  ;;  %v4900_v35 = vadd.f32 %v12743_v25, %v4246_v9  ;;  %v3946_v59 = vpop.f32.mrf.mxu2  ;;  %v14199_v25 = vld [vmem:[#allocation8_spill] sm:$0xff]  ;;  %v6766_v13 = vor.u32 %v6764_v5, %v6763_v36  ;;  %v5289_v24 = vshrl.u32 %v5145_v33, 16  ;;  %v5296_v9 = vrot.slane %v5294_v50, 7 }
 0x2fc   : > { %v3993_v6 = vadd.f32 %v3946_v59, %v14199_v25  ;;  %v6768_v8 = vrot.slane %v6763_v36, 4  ;;  %v5305_v29 = vrot.slane %v5303_v55, 7  ;;  %v5306_v59 = vshll.u32 %v5147_v17, 16  ;;  %v5960_v50 = vld [vmem:[#allocation3 + $0x88] sm:$0x1] }
 0x2fd   : > { %v4936_v45 = vadd.f32 %v12630_v16, %v4900_v35  ;;  %v12812_v26 = vpop.f32.mrf.mxu1  ;;  %v6112_v21 = vshrl.u32 %v5958_v49, 16  ;;  %v6115_v62 = vshll.u32 %v5958_v49, 16  ;;  %v6125_v41 = vshrl.u32 %v5959_v2, 16  ;;  %v6617_v25 = vld [vmem:[#allocation3 + $0xb4] sm:$0xf] }
 0x2fe   : > { %v6776_v37 = vsel %vm10929_vm5, %v6768_v8, %v6775_v32  ;;  %v6386_v1 = vunpack.c.l.b16 %v6110_v58  ;;  %v10251_v3 = vrot.slane %v5289_v24, 11  ;;  %v6767_v48 = vsel %vm10929_vm5, %v10381_v54, %v6766_v13  ;;  %v6616_v5 = vld [vmem:[#allocation3 + $0xb0] sm:$0xf]  ;;  %v5149_v24 = vld [vmem:[#allocation3 + $0x98] sm:$0xf] }
 0x2ff   : > { %v4968_v20 = vmax.f32 %v4936_v45, 0.0  ;;  %v12804_v40 = vpop.f32.mrf.mxu0  ;;  %10363 = vmatmul.msk.bf16.gmra.mxu3 %vm5613_vm11, %v6412_v10  ;;  %v5297_v10 = vshll.u32 %v5146_v56, 16  ;;  %v6121_v45 = vshll.u32 %v5959_v2, 16  ;;  %v5308_v36 = vor.u32 %v5306_v59, %v5305_v29  ;;  %v5150_v59 = vld [vmem:[#allocation3 + $0x9c] sm:$0xf] }
 0x300   : > { %v4200_v19 = vpop.f32.mrf.mxu3  ;;  %10336 = vmatmul.msk.bf16.gmra.mxu1 %vm5613_vm11, %v10699_v46  ;;  %v7010_v43 = vunpack.c.l.b16 %v6776_v37  ;;  %v5301_v33 = vrot.slane %v5296_v9, 4  ;;  %v6114_v55 = vrot.slane %v6112_v21, 4  ;;  %v6792_v32 = vshrl.u32 %v6617_v25, 16  ;;  %v5148_v37 = vld [vmem:[#allocation3 + $0x94] sm:$0x8] }
 0x301   : > { %v5000_v7 = vpack.c.bf16 %v4968_v20, %v4968_v20  ;;  %v4247_v11 = vadd.f32 %v4200_v19, %v3993_v6  ;;  %v5299_v60 = vor.u32 %v5297_v10, %v5296_v9  ;;  %v6127_v19 = vrot.slane %v6125_v41, 4  ;;  %v14202_v9 = vld [vmem:[#allocation10_spill] sm:$0xff]  ;;  %v14203_v41 = vld [vmem:[#allocation11_spill] sm:$0xff] }
 0x302   : > { %10397 = vmatmul.msk.bf16.gmra.mxu0 %vm5613_vm11, %v7035_v30  ;;  %v5309_v54 = vsel %vm10929_vm5, %v5301_v33, %v5308_v36  ;;  %v6131_v13 = vshll.u32 %v5960_v50, 16  ;;  %v3373_v2 = vadd.f32 %v14202_v9, %v12266_v42  ;;  %v6783_v8 = vshrl.u32 %v6616_v5, 16  ;;  %v5961_v50 = vld [vmem:[#allocation3 + $0x98] sm:$0xf] }
 0x303   : > { %5119 = vst.msk [vmem:[#allocation3 + $0x114] sm:$0xf] %vm5011_vm10, %v5000_v7  ;;  %v4901_v38 = vadd.f32 %v12765_v14, %v4247_v11  ;;  %v3948_v35 = vpop.f32.mrf.mxu2  ;;  %v6100_v14 = vsel %vm11101_vm8, %v6095_v12, %v12779_v53  ;;  %v6117_v53 = vrot.slane %v6115_v62, 5  ;;  %v7009_v11 = vunpack.c.l.b16 %v6767_v48 }
 0x304   : > { %v3994_v56 = vadd.f32 %v3948_v35, %v3371_v31  ;;  %v12826_v31 = vrot.slane %v6121_v45, 5  ;;  %v6385_v7 = vunpack.c.l.b16 %v6100_v14  ;;  %v5300_v12 = vsel %vm10929_vm5, %v10251_v3, %v5299_v60 }
 0x305   : > { %v4937_v18 = vadd.f32 %v12630_v16, %v4901_v38  ;;  %v12836_v46 = vpop.f32.mrf.mxu1  ;;  %v6118_v58 = vor.u32 %v6117_v53, %v6114_v55  ;;  %v7036_v10 = vpack.c.b16 %v7010_v43, %v7009_v11  ;;  %v5765_v21 = vunpack.c.l.b16 %v5300_v12 }
 0x306   : > { %v6413_v35 = vpack.c.b16 %v6386_v1, %v6385_v7  ;;  %v5766_v62 = vunpack.c.l.b16 %v5309_v54  ;;  %v5316_v45 = vshrl.u32 %v5149_v24, 16  ;;  %v6133_v3 = vrot.slane %v6131_v13, 5  ;;  %v10700_v7 = vld [vmem:[#allocation3 + $0xf8] sm:$0xff] }
 0x307   : > { %v4969_v17 = vmax.f32 %v4937_v18, 0.0  ;;  %v12823_v6 = vpop.f32.mrf.mxu0  ;;  %v6794_v18 = vrot.slane %v6792_v32, 7  ;;  %v6785_v1 = vrot.slane %v6783_v8, 7  ;;  %v6795_v48 = vshll.u32 %v6617_v25, 16 }
 0x308   : > { %v4202_v20 = vpop.f32.mrf.mxu3  ;;  %10347 = vmatmul.msk.bf16.gmra.mxu2 %vm5613_vm11, %v5791_v57  ;;  %v6778_v57 = vshrl.u32 %v6615_v0, 16  ;;  %v5325_v36 = vshrl.u32 %v5150_v59, 16  ;;  %v5311_v55 = vshrl.u32 %v5148_v37, 16  ;;  %v5792_v53 = vpack.c.b16 %v5766_v62, %v5765_v21  ;;  %v6620_v37 = vld [vmem:[#allocation3 + $0xcc] sm:$0xf] }
 0x309   : > { %v5001_v51 = vpack.c.bf16 %v4969_v17, %v4969_v17  ;;  %v4248_v30 = vadd.f32 %v4202_v20, %v3994_v56  ;;  %v6786_v0 = vshll.u32 %v6616_v5, 16  ;;  %v6136_v12 = vshrl.u32 %v5961_v50, 16 }
 0x30a   : > { %v12841_v60 = vrot.slane %v6778_v57, 11  ;;  %v6139_v32 = vshll.u32 %v5961_v50, 16  ;;  %v6790_v13 = vrot.slane %v6785_v1, 4  ;;  %v5319_v57 = vshll.u32 %v5149_v24, 16  ;;  %v12875_v50 = vld [vmem:[#allocation3 + $0xc8] sm:$0xf] }
 0x30b   : > { %5120 = vst.msk [vmem:[#allocation3 + $0x128] sm:$0xf] %vm5011_vm10, %v5001_v51  ;;  %v4902_v49 = vadd.f32 %v12786_v52, %v4248_v30  ;;  %v3951_v38 = vpop.f32.mrf.mxu2  ;;  %v6128_v52 = vor.u32 %v6127_v19, %v12826_v31  ;;  %v6797_v51 = vor.u32 %v6795_v48, %v6794_v18  ;;  %v5318_v30 = vrot.slane %v5316_v45, 7  ;;  %v5962_v19 = vld [vmem:[#allocation3 + $0x9c] sm:$0xf] }
 0x30c   : > { %v3995_v14 = vadd.f32 %v3951_v38, %v14203_v41  ;;  %v6788_v5 = vor.u32 %v6786_v0, %v6785_v1  ;;  %v5327_v9 = vrot.slane %v5325_v36, 7  ;;  %v12857_v38 = vld [vmem:[%s14137_s2] ss:$0 sm:$0xff]  ;;  %v5328_v8 = vshll.u32 %v5150_v59, 16  ;;  %v5963_v48 = vld [vmem:[#allocation3 + $0xa0] sm:$0x1] }
 0x30d   : > { %v4938_v29 = vadd.f32 %v12630_v16, %v4902_v49  ;;  %v6119_v16 = vrot.slane %v6118_v58, 4  ;;  %v6129_v33 = vrot.slane %v6128_v52, 4  ;;  %v12852_v49 = vpop.f32.mrf.mxu1  ;;  %v6149_v52 = vshrl.u32 %v5962_v19, 16  ;;  %v6618_v36 = vld [vmem:[#allocation3 + $0xc4] sm:$0x8] }
 0x30e   : > { %v6138_v62 = vrot.slane %v6136_v12, 4  ;;  %v6141_v18 = vrot.slane %v6139_v32, 5  ;;  %v12867_v45 = vadd.f32 %v12274_v39, %v12291_v4  ;;  %v5323_v39 = vrot.slane %v5318_v30, 4 }
 0x30f   : > { %v4970_v42 = vmax.f32 %v4938_v29, 0.0  ;;  %v12843_v56 = vpop.f32.mrf.mxu0  ;;  %10364 = vmatmul.msk.bf16.gmra.mxu3 %vm5613_vm11, %v6413_v35  ;;  %v6124_v11 = vsel %vm11101_vm8, %v6119_v16, %v12826_v31  ;;  %v6134_v58 = vsel %vm11101_vm8, %v6129_v33, %v6133_v3  ;;  %v10252_v31 = vrot.slane %v5311_v55, 11  ;;  %v5153_v33 = vld [vmem:[#allocation3 + $0xb4] sm:$0xf] }
 0x310   : > { %v4205_v17 = vpop.f32.mrf.mxu3  ;;  %v6798_v29 = vsel %vm10929_vm5, %v6790_v13, %v6797_v51  ;;  %v5321_v35 = vor.u32 %v5319_v57, %v5318_v30  ;;  %10337 = vmatmul.msk.bf16.gmra.mxu1 %vm5613_vm11, %v10700_v7  ;;  %v5330_v3 = vor.u32 %v5328_v8, %v5327_v9  ;;  %v6388_v16 = vunpack.c.l.b16 %v6134_v58  ;;  %v5152_v51 = vld [vmem:[#allocation3 + $0xb0] sm:$0xf] }
 0x311   : > { %v5002_v20 = vpack.c.bf16 %v4970_v42, %v4970_v42  ;;  %v4249_v43 = vadd.f32 %v4205_v17, %v3995_v14  ;;  %v6387_v14 = vunpack.c.l.b16 %v6124_v11  ;;  %v6789_v42 = vsel %vm10929_vm5, %v12841_v60, %v6788_v5 }
 0x312   : > { %10398 = vmatmul.msk.bf16.gmra.mxu0 %vm5613_vm11, %v7036_v10  ;;  %v6145_v10 = vshll.u32 %v5962_v19, 16  ;;  %v7012_v1 = vunpack.c.l.b16 %v6798_v29  ;;  %v7011_v55 = vunpack.c.l.b16 %v6789_v42  ;;  %v6142_v0 = vor.u32 %v6141_v18, %v6138_v62 }
 0x313   : > { %5121 = vst.msk [vmem:[#allocation3 + $0x12c] sm:$0xf] %vm5011_vm10, %v5002_v20  ;;  %v4903_v25 = vadd.f32 %v12804_v40, %v4249_v43  ;;  %v3953_v54 = vpop.f32.mrf.mxu2  ;;  %v6151_v20 = vrot.slane %v6149_v52, 4  ;;  %v6814_v43 = vshrl.u32 %v6620_v37, 16  ;;  %v5331_v30 = vsel %vm10929_vm5, %v5323_v39, %v5330_v3 }
 0x314   : > { %v3996_v24 = vadd.f32 %v3953_v54, %v3373_v2  ;;  %v12877_v4 = vrot.slane %v6145_v10, 5  ;;  %v6800_v11 = vshrl.u32 %v6618_v36, 16  ;;  %v6805_v12 = vshrl.u32 %v12875_v50, 16 }
 0x315   : > { %v4939_v40 = vadd.f32 %v12857_v38, %v4903_v25  ;;  %v12883_v19 = vpop.f32.mrf.mxu1  ;;  %v6155_v25 = vshll.u32 %v5963_v48, 16  ;;  %v6414_v54 = vpack.c.b16 %v6388_v16, %v6387_v14  ;;  %v5347_v5 = vshrl.u32 %v5153_v33, 16  ;;  %v10701_v48 = vld [vmem:[#allocation3 + $0x110] sm:$0xff] }
 0x316   : > { %v6152_v57 = vor.u32 %v6151_v20, %v12877_v4  ;;  %v6816_v9 = vrot.slane %v6814_v43, 7  ;;  %v5338_v58 = vshrl.u32 %v5152_v51, 16  ;;  %v5768_v29 = vunpack.c.l.b16 %v5331_v30 }
 0x317   : > { %v4971_v21 = vmax.f32 %v4939_v40, 0.0  ;;  %v12869_v41 = vpop.f32.mrf.mxu0  ;;  %v5151_v40 = vld [vmem:[#allocation3 + $0xac] sm:$0x8]  ;;  %v6807_v62 = vrot.slane %v6805_v12, 7  ;;  %v6817_v18 = vshll.u32 %v6620_v37, 16  ;;  %v5349_v3 = vrot.slane %v5347_v5, 7 }
 0x318   : > { %v4207_v59 = vpop.f32.mrf.mxu3  ;;  %10348 = vmatmul.msk.bf16.gmra.mxu2 %vm5613_vm11, %v5792_v53  ;;  %v5322_v53 = vsel %vm10929_vm5, %v10252_v31, %v5321_v35  ;;  %v6143_v35 = vrot.slane %v6142_v0, 4  ;;  %v5333_v42 = vshrl.u32 %v5151_v40, 16  ;;  %v5350_v20 = vshll.u32 %v5153_v33, 16 }
 0x319   : > { %v5003_v17 = vpack.c.bf16 %v4971_v21, %v4971_v21  ;;  %v4250_v2 = vadd.f32 %v4207_v59, %v3996_v24  ;;  %v5767_v13 = vunpack.c.l.b16 %v5322_v53  ;;  %v6157_v24 = vrot.slane %v6155_v25, 5  ;;  %v5965_v53 = vld [vmem:[#allocation3 + $0xb4] sm:$0xf] }
 0x31a   : > { %v12893_v21 = vrot.slane %v6800_v11, 11  ;;  %v6819_v16 = vor.u32 %v6817_v18, %v6816_v9  ;;  %v6148_v39 = vsel %vm11101_vm8, %v6143_v35, %v12877_v4  ;;  %v10253_v11 = vrot.slane %v5333_v42, 11  ;;  %v5966_v18 = vld [vmem:[#allocation3 + $0xb8] sm:$0x1] }
 0x31b   : > { %5122 = vst.msk [vmem:[#allocation3 + $0x140] sm:$0xf] %vm5011_vm10, %v5003_v17  ;;  %v4904_v60 = vadd.f32 %v12823_v6, %v4250_v2  ;;  %v3956_v7 = vpop.f32.mrf.mxu2  ;;  %v7037_v6 = vpack.c.b16 %v7012_v1, %v7011_v55  ;;  %v5964_v17 = vld [vmem:[#allocation3 + $0xb0] sm:$0xf]  ;;  %v6153_v2 = vrot.slane %v6152_v57, 4  ;;  %v5340_v1 = vrot.slane %v5338_v58, 7 }
 0x31c   : > { %v3997_v31 = vadd.f32 %v3956_v7, %v12276_v23  ;;  %v6808_v23 = vshll.u32 %v12875_v50, 16  ;;  %v5793_v37 = vpack.c.b16 %v5768_v29, %v5767_v13  ;;  %v6812_v55 = vrot.slane %v6807_v62, 4  ;;  %v14204_v13 = vld [vmem:[#allocation12_spill] sm:$0xff] }
 0x31d   : > { %v4940_v32 = vadd.f32 %v12857_v38, %v4904_v60  ;;  %v12903_v43 = vpop.f32.mrf.mxu1  ;;  %v5341_v50 = vshll.u32 %v5152_v51, 16  ;;  %v6160_v0 = vshrl.u32 %v5964_v17, 16  ;;  %v6163_v7 = vshll.u32 %v5964_v17, 16 }
 0x31e   : > { %v6810_v25 = vor.u32 %v6808_v23, %v6807_v62  ;;  %v5352_v12 = vor.u32 %v5350_v20, %v5349_v3  ;;  %v6820_v4 = vsel %vm10929_vm5, %v6812_v55, %v6819_v16  ;;  %v6173_v5 = vshrl.u32 %v5965_v53, 16  ;;  %v5156_v55 = vld [vmem:[#allocation3 + $0xcc] sm:$0xf] }
 0x31f   : > { %v4972_v8 = vmax.f32 %v4940_v32, 0.0  ;;  %v12891_v10 = vpop.f32.mrf.mxu0  ;;  %10365 = vmatmul.msk.bf16.gmra.mxu3 %vm5613_vm11, %v6414_v54  ;;  %v5343_v33 = vor.u32 %v5341_v50, %v5340_v1  ;;  %v5345_v32 = vrot.slane %v5340_v1, 4  ;;  %v2723_v57 = vadd.f32 %v14204_v13, %v12323_v22 }
 0x320   : > { %v4210_v52 = vpop.f32.mrf.mxu3  ;;  %10338 = vmatmul.msk.bf16.gmra.mxu1 %vm5613_vm11, %v10701_v48  ;;  %v6162_v58 = vrot.slane %v6160_v0, 4  ;;  %v6811_v35 = vsel %vm10929_vm5, %v12893_v21, %v6810_v25  ;;  %v7014_v22 = vunpack.c.l.b16 %v6820_v4  ;;  %v6175_v17 = vrot.slane %v6173_v5, 4  ;;  %v6622_v21 = vld [vmem:[#allocation3 + $0xe0] sm:$0xf] }
 0x321   : > { %v5004_v59 = vpack.c.bf16 %v4972_v8, %v4972_v8  ;;  %v4251_v14 = vadd.f32 %v4210_v52, %v3997_v31  ;;  %v6165_v31 = vrot.slane %v6163_v7, 5  ;;  %v6623_v52 = vld [vmem:[#allocation3 + $0xe4] sm:$0xf]  ;;  %v5344_v42 = vsel %vm10929_vm5, %v10253_v11, %v5343_v33 }
 0x322   : > { %10399 = vmatmul.msk.bf16.gmra.mxu0 %vm5613_vm11, %v7037_v6  ;;  %v6169_v6 = vshll.u32 %v5965_v53, 16  ;;  %v7013_v16 = vunpack.c.l.b16 %v6811_v35  ;;  %v5769_v0 = vunpack.c.l.b16 %v5344_v42  ;;  %v6827_v7 = vshrl.u32 %v6622_v21, 16  ;;  %v10702_v35 = vld [vmem:[#allocation3 + $0x128] sm:$0xff] }
 0x323   : > { %5123 = vst.msk [vmem:[#allocation3 + $0x144] sm:$0xf] %vm5011_vm10, %v5004_v59  ;;  %v4905_v36 = vadd.f32 %v12843_v56, %v4251_v14  ;;  %v3958_v60 = vpop.f32.mrf.mxu2  ;;  %v6158_v56 = vsel %vm11101_vm8, %v6153_v2, %v6157_v24  ;;  %v6389_v24 = vunpack.c.l.b16 %v6148_v39  ;;  %v6621_v59 = vld [vmem:[#allocation3 + $0xdc] sm:$0x8]  ;;  %v6166_v48 = vor.u32 %v6165_v31, %v6162_v58 }
 0x324   : > { %v3998_v51 = vadd.f32 %v3958_v60, %v12867_v45  ;;  %v5353_v45 = vsel %vm10929_vm5, %v5345_v32, %v5352_v12  ;;  %v6390_v62 = vunpack.c.l.b16 %v6158_v56  ;;  %v12926_v3 = vrot.slane %v6169_v6, 5  ;;  %v5154_v12 = vld [vmem:[#allocation3 + $0xc4] sm:$0x8] }
 0x325   : > { %v4941_v30 = vadd.f32 %v12857_v38, %v4905_v36  ;;  %v12928_v2 = vpop.f32.mrf.mxu1  ;;  %v5770_v1 = vunpack.c.l.b16 %v5353_v45  ;;  %v6836_v36 = vshrl.u32 %v6623_v52, 16  ;;  %v3377_v39 = vadd.f32 %v12315_v34, %v2723_v57 }
 0x326   : > { %v6822_v60 = vshrl.u32 %v6621_v59, 16  ;;  %v6415_v50 = vpack.c.b16 %v6390_v62, %v6389_v24  ;;  %v7038_v53 = vpack.c.b16 %v7014_v22, %v7013_v16  ;;  %v6176_v11 = vor.u32 %v6175_v17, %v12926_v3 }
 0x327   : > { %v4973_v54 = vmax.f32 %v4941_v30, 0.0  ;;  %v12914_v9 = vpop.f32.mrf.mxu0  ;;  %v5794_v34 = vpack.c.b16 %v5770_v1, %v5769_v0  ;;  %v12936_v32 = vrot.slane %v6166_v48, 4  ;;  %v6830_v58 = vshll.u32 %v6622_v21, 16 }
 0x328   : > { %v4212_v40 = vpop.f32.mrf.mxu3  ;;  %10349 = vmatmul.msk.bf16.gmra.mxu2 %vm5613_vm11, %v5793_v37  ;;  %v5155_v37 = vld [vmem:[#allocation3 + $0xc8] sm:$0xf]  ;;  %v10384_v57 = vrot.slane %v6822_v60, 11  ;;  %v6839_v31 = vshll.u32 %v6623_v52, 16  ;;  %v6177_v62 = vrot.slane %v6176_v11, 4 }
 0x329   : > { %v5005_v8 = vpack.c.bf16 %v4973_v54, %v4973_v54  ;;  %v4252_v29 = vadd.f32 %v4212_v40, %v3998_v51  ;;  %v5360_v56 = vshrl.u32 %v5155_v37, 16  ;;  %v6838_v51 = vrot.slane %v6836_v36, 7 }
 0x32a   : > { %v5369_v54 = vshrl.u32 %v5156_v55, 16  ;;  %v6829_v40 = vrot.slane %v6827_v7, 7  ;;  %v6172_v24 = vsel %vm11101_vm8, %v12936_v32, %v12926_v3 }
 0x32b   : > { %5124 = vst.msk [vmem:[#allocation3 + $0x158] sm:$0xf] %vm5011_vm10, %v5005_v8  ;;  %v4906_v14 = vadd.f32 %v12869_v41, %v4252_v29  ;;  %v3961_v23 = vpop.f32.mrf.mxu2  ;;  %v6179_v41 = vshll.u32 %v5966_v18, 16  ;;  %v5355_v8 = vshrl.u32 %v5154_v12, 16  ;;  %v5968_v29 = vld [vmem:[#allocation3 + $0xcc] sm:$0xf]  ;;  %v6841_v52 = vor.u32 %v6839_v31, %v6838_v51 }
 0x32c   : > { %v3999_v30 = vadd.f32 %v3961_v23, %v12308_v44  ;;  %v5967_v44 = vld [vmem:[#allocation3 + $0xc8] sm:$0xf]  ;;  %v5362_v22 = vrot.slane %v5360_v56, 7  ;;  %v5363_v23 = vshll.u32 %v5155_v37, 16  ;;  %v6193_v16 = vshll.u32 %v5968_v29, 16 }
 0x32d   : > { %v4942_v20 = vadd.f32 %v12857_v38, %v4906_v14  ;;  %v6181_v13 = vrot.slane %v6179_v41, 5  ;;  %v12946_v18 = vpop.f32.mrf.mxu1  ;;  %v5371_v14 = vrot.slane %v5369_v54, 7  ;;  %v6184_v42 = vshrl.u32 %v5967_v44, 16  ;;  %v5969_v12 = vld [vmem:[#allocation3 + $0xd0] sm:$0x1] }
 0x32e   : > { %v6187_v17 = vshll.u32 %v5967_v44, 16  ;;  %v6197_v1 = vshrl.u32 %v5968_v29, 16  ;;  %v6834_v48 = vrot.slane %v6829_v40, 4  ;;  %v10254_v36 = vrot.slane %v5355_v8, 11  ;;  %v6624_v29 = vld [vmem:[#allocation3 + $0xf4] sm:$0x8] }
 0x32f   : > { %v4974_v25 = vmax.f32 %v4942_v20, 0.0  ;;  %v12934_v4 = vpop.f32.mrf.mxu0  ;;  %10366 = vmatmul.msk.bf16.gmra.mxu3 %vm5613_vm11, %v6415_v50  ;;  %v5372_v20 = vshll.u32 %v5156_v55, 16  ;;  %v6182_v60 = vsel %vm11101_vm8, %v6177_v62, %v6181_v13  ;;  %v5365_v50 = vor.u32 %v5363_v23, %v5362_v22 }
 0x330   : > { %v4215_v33 = vpop.f32.mrf.mxu3  ;;  %10339 = vmatmul.msk.bf16.gmra.mxu1 %vm5613_vm11, %v10702_v35  ;;  %v6842_v37 = vsel %vm10929_vm5, %v6834_v48, %v6841_v52  ;;  %v6199_v56 = vrot.slane %v6197_v1, 4  ;;  %v6392_v32 = vunpack.c.l.b16 %v6182_v60  ;;  %v5367_v13 = vrot.slane %v5362_v22, 4  ;;  %v5159_v48 = vld [vmem:[#allocation3 + $0xe4] sm:$0xf] }
 0x331   : > { %v5006_v6 = vpack.c.bf16 %v4974_v25, %v4974_v25  ;;  %v4253_v5 = vadd.f32 %v4215_v33, %v3999_v30  ;;  %v5374_v7 = vor.u32 %v5372_v20, %v5371_v14  ;;  %v6186_v30 = vrot.slane %v6184_v42, 4  ;;  %v6625_v33 = vld [vmem:[#allocation3 + $0xf8] sm:$0xf] }
 0x332   : > { %10400 = vmatmul.msk.bf16.gmra.mxu0 %vm5613_vm11, %v7038_v53  ;;  %v6189_v25 = vrot.slane %v6187_v17, 5  ;;  %v6203_v8 = vshll.u32 %v5969_v12, 16  ;;  %v6849_v35 = vshrl.u32 %v6625_v33, 16  ;;  %v5157_v17 = vld [vmem:[#allocation3 + $0xdc] sm:$0x8]  ;;  %v6844_v1 = vshrl.u32 %v6624_v29, 16 }
 0x333   : > { %5125 = vst.msk [vmem:[#allocation3 + $0x15c] sm:$0xf] %vm5011_vm10, %v5006_v6  ;;  %v4907_v45 = vadd.f32 %v12891_v10, %v4253_v5  ;;  %v3963_v59 = vpop.f32.mrf.mxu2  ;;  %v6832_v10 = vor.u32 %v6830_v58, %v6829_v40  ;;  %v7016_v6 = vunpack.c.l.b16 %v6842_v37  ;;  %v5366_v5 = vsel %vm10929_vm5, %v10254_v36, %v5365_v50  ;;  %v5971_v29 = vld [vmem:[#allocation3 + $0xe4] sm:$0xf] }
 0x334   : > { %v4000_v3 = vadd.f32 %v3963_v59, %v3377_v39  ;;  %v12957_v39 = vrot.slane %v6193_v16, 5  ;;  %v6391_v58 = vunpack.c.l.b16 %v6172_v24  ;;  %v6190_v31 = vor.u32 %v6189_v25, %v6186_v30  ;;  %v14205_v59 = vld [vmem:[#allocation13_spill] sm:$0xff]  ;;  %v14206_v24 = vld [vmem:[#allocation14_spill] sm:$0xff] }
 0x335   : > { %v4943_v21 = vadd.f32 %v12857_v38, %v4907_v45  ;;  %v6833_v51 = vsel %vm10929_vm5, %v10384_v57, %v6832_v10  ;;  %v12965_v44 = vpop.f32.mrf.mxu1  ;;  %v2725_v22 = vadd.f32 %v14205_v59, %v12354_v61  ;;  %v5771_v14 = vunpack.c.l.b16 %v5366_v5  ;;  %v5158_v10 = vld [vmem:[#allocation3 + $0xe0] sm:$0xf] }
 0x336   : > { %v7015_v45 = vunpack.c.l.b16 %v6833_v51  ;;  %v6200_v62 = vor.u32 %v6199_v56, %v12957_v39  ;;  %v6416_v52 = vpack.c.b16 %v6392_v32, %v6391_v58  ;;  %v6205_v60 = vrot.slane %v6203_v8, 5  ;;  %v10703_v56 = vld [vmem:[#allocation3 + $0x140] sm:$0xff] }
 0x337   : > { %v4975_v41 = vmax.f32 %v4943_v21, 0.0  ;;  %v12952_v53 = vpop.f32.mrf.mxu0  ;;  %v6851_v50 = vrot.slane %v6849_v35, 7  ;;  %v6852_v30 = vshll.u32 %v6625_v33, 16  ;;  %v3379_v12 = vadd.f32 %v12759_v47, %v2725_v22  ;;  %v5970_v47 = vld [vmem:[#allocation3 + $0xe0] sm:$0xf] }
 0x338   : > { %v4217_v0 = vpop.f32.mrf.mxu3  ;;  %10350 = vmatmul.msk.bf16.gmra.mxu2 %vm5613_vm11, %v5794_v34  ;;  %v6626_v34 = vld [vmem:[#allocation3 + $0xfc] sm:$0xf]  ;;  %v7039_v16 = vpack.c.b16 %v7016_v6, %v7015_v45  ;;  %v6201_v37 = vrot.slane %v6200_v62, 4  ;;  %v10385_v51 = vrot.slane %v6844_v1, 11  ;;  %v5385_v45 = vshll.u32 %v5158_v10, 16 }
 0x339   : > { %v5007_v11 = vpack.c.bf16 %v4975_v41, %v4975_v41  ;;  %v4254_v55 = vadd.f32 %v4217_v0, %v4000_v3  ;;  %v6858_v42 = vshrl.u32 %v6626_v34, 16  ;;  %v12976_v41 = vrot.slane %v6190_v31, 4 }
 0x33a   : > { %v6206_v31 = vsel %vm11101_vm8, %v6201_v37, %v6205_v60  ;;  %v6856_v8 = vrot.slane %v6851_v50, 4  ;;  %v6208_v59 = vshrl.u32 %v5970_v47, 16  ;;  %v6211_v22 = vshll.u32 %v5970_v47, 16  ;;  %v6629_v37 = vld [vmem:[#allocation3 + $0x114] sm:$0xf] }
 0x33b   : > { %5126 = vst.msk [vmem:[#allocation3 + $0x170] sm:$0xf] %vm5011_vm10, %v5007_v11  ;;  %v4908_v54 = vadd.f32 %v12914_v9, %v4254_v55  ;;  %v3966_v40 = vpop.f32.mrf.mxu2  ;;  %v5375_v9 = vsel %vm10929_vm5, %v5367_v13, %v5374_v7  ;;  %v5377_v7 = vshrl.u32 %v5157_v17, 16  ;;  %v6860_v25 = vrot.slane %v6858_v42, 7 }
 0x33c   : > { %v4001_v21 = vadd.f32 %v3966_v40, %v14206_v24  ;;  %v5772_v3 = vunpack.c.l.b16 %v5375_v9  ;;  %v5382_v11 = vshrl.u32 %v5158_v10, 16  ;;  %v5391_v55 = vshrl.u32 %v5159_v48, 16 }
 0x33d   : > { %v4944_v57 = vadd.f32 %v12857_v38, %v4908_v54  ;;  %v12983_v54 = vpop.f32.mrf.mxu1  ;;  %v6196_v33 = vsel %vm11101_vm8, %v12976_v41, %v12957_v39  ;;  %v6854_v13 = vor.u32 %v6852_v30, %v6851_v50  ;;  %v6861_v40 = vshll.u32 %v6626_v34, 16  ;;  %v10490_v34 = vld [vmem:[%s14138_s3 + $0x14] sm:$0xf]  ;;  %v5972_v50 = vld [vmem:[#allocation3 + $0xe8] sm:$0x1] }
 0x33e   : > { %v5795_v5 = vpack.c.b16 %v5772_v3, %v5771_v14  ;;  %v5393_v9 = vrot.slane %v5391_v55, 7  ;;  %v8004_v42 = vsel %vm5662_vm9, %v10490_v34, 0  ;;  %v5394_v17 = vshll.u32 %v5159_v48, 16 }
 0x33f   : > { %v4976_v23 = vmax.f32 %v4944_v57, 0.0  ;;  %v12974_v36 = vpop.f32.mrf.mxu0  ;;  %10367 = vmatmul.msk.bf16.gmra.mxu3 %vm5613_vm11, %v6416_v52  ;;  %v6863_v35 = vor.u32 %v6861_v40, %v6860_v25  ;;  %v5384_v57 = vrot.slane %v5382_v11, 7  ;;  %v6217_v24 = vshll.u32 %v5971_v29, 16  ;;  %8013 = vmatpush.bf16.msra.mxu2 %v8004_v42  ;;  %v10523_v11 = vld [vmem:[%s14138_s3 + $0x18] sm:$0xf] }
 0x340   : > { %v4220_v20 = vpop.f32.mrf.mxu3  ;;  %10340 = vmatmul.msk.bf16.gmra.mxu1 %vm5613_vm11, %v10703_v56  ;;  %v6394_v1 = vunpack.c.l.b16 %v6206_v31  ;;  %v6855_v10 = vsel %vm10929_vm5, %v10385_v51, %v6854_v13  ;;  %v5396_v60 = vor.u32 %v5394_v17, %v5393_v9  ;;  %v6393_v25 = vunpack.c.l.b16 %v6196_v33  ;;  %v13015_v56 = vld [vmem:[#allocation3 + $0x110] sm:$0xf]  ;;  %v13028_v9 = vld [vmem:[#allocation3 + $0xf8] sm:$0xf]  ;;  %v5974_v42 = vld [vmem:[#allocation3 + $0xfc] sm:$0xf] }
 0x341   : > { %v5008_v61 = vpack.c.bf16 %v4976_v23, %v4976_v23  ;;  %v4255_v0 = vadd.f32 %v4220_v20, %v4001_v21  ;;  %v6221_v21 = vshrl.u32 %v5971_v29, 16  ;;  %v6864_v20 = vsel %vm10929_vm5, %v6856_v8, %v6863_v35 }
 0x342   : > { %10401 = vmatmul.msk.bf16.gmra.mxu0 %vm5613_vm11, %v7039_v16  ;;  %v5387_v3 = vor.u32 %v5385_v45, %v5384_v57  ;;  %v5389_v41 = vrot.slane %v5384_v57, 4  ;;  %v13013_v55 = vrot.slane %v6217_v24, 5  ;;  %v7017_v51 = vunpack.c.l.b16 %v6855_v10 }
 0x343   : > { %5127 = vst.msk [vmem:[#allocation3 + $0x174] sm:$0xf] %vm5011_vm10, %v5008_v61  ;;  %v4909_v32 = vadd.f32 %v12934_v4, %v4255_v0  ;;  %v3968_v6 = vpop.f32.mrf.mxu2  ;;  %v12992_v4 = vrot.slane %v5377_v7, 11  ;;  %v6210_v61 = vrot.slane %v6208_v59, 4  ;;  %v6213_v0 = vrot.slane %v6211_v22, 5  ;;  %v10704_v59 = vld [vmem:[#allocation3 + $0x158] sm:$0xff] }
 0x344   : > { %v4002_v62 = vadd.f32 %v3968_v6, %v3379_v12  ;;  %v6223_v12 = vrot.slane %v6221_v21, 4  ;;  %v8627_v6 = vsel %vm5662_vm9, %v10523_v11, 0  ;;  %v6417_v13 = vpack.c.b16 %v6394_v1, %v6393_v25  ;;  %v5160_v25 = vld [vmem:[#allocation3 + $0xf4] sm:$0x8] }
 0x345   : > { %v4945_v58 = vadd.f32 %v12857_v38, %v4909_v32  ;;  %v13008_v7 = vpop.f32.mrf.mxu1  ;;  %8636 = vmatpush.bf16.msra.mxu3 %v8627_v6  ;;  %v5388_v33 = vsel %vm10929_vm5, %v12992_v4, %v5387_v3  ;;  %v5397_v40 = vsel %vm10929_vm5, %v5389_v41, %v5396_v60  ;;  %v6880_v47 = vshrl.u32 %v6629_v37, 16 }
 0x346   : > { %v6214_v8 = vor.u32 %v6213_v0, %v6210_v61  ;;  %v6227_v29 = vshll.u32 %v5972_v50, 16  ;;  %v6224_v57 = vor.u32 %v6223_v12, %v13013_v55  ;;  %v5773_v22 = vunpack.c.l.b16 %v5388_v33 }
 0x347   : > { %v4977_v39 = vmax.f32 %v4945_v58, 0.0  ;;  %v12998_v52 = vpop.f32.mrf.mxu0  ;;  %v5162_v58 = vld [vmem:[#allocation3 + $0xfc] sm:$0xf]  ;;  %v6883_v60 = vshll.u32 %v6629_v37, 16  ;;  %v6874_v0 = vshll.u32 %v13015_v56, 16 }
 0x348   : > { %v4222_v14 = vpop.f32.mrf.mxu3  ;;  %10351 = vmatmul.msk.bf16.gmra.mxu2 %vm5613_vm11, %v5795_v5  ;;  %v6627_v5 = vld [vmem:[#allocation3 + $0x10c] sm:$0x8]  ;;  %v5413_v34 = vshrl.u32 %v5162_v58, 16  ;;  %v6215_v17 = vrot.slane %v6214_v8, 4  ;;  %v6229_v24 = vrot.slane %v6227_v29, 5  ;;  %v6225_v3 = vrot.slane %v6224_v57, 4 }
 0x349   : > { %v5009_v23 = vpack.c.bf16 %v4977_v39, %v4977_v39  ;;  %v4256_v16 = vadd.f32 %v4222_v14, %v4002_v62  ;;  %v6866_v45 = vshrl.u32 %v6627_v5, 16  ;;  %v5774_v39 = vunpack.c.l.b16 %v5397_v40 }
 0x34a   : > { %v6882_v14 = vrot.slane %v6880_v47, 7  ;;  %v5415_v11 = vrot.slane %v5413_v34, 7  ;;  %v6220_v37 = vsel %vm11101_vm8, %v6215_v17, %v13013_v55  ;;  %v5416_v5 = vshll.u32 %v5162_v58, 16  ;;  %v5975_v34 = vld [vmem:[#allocation3 + $0x100] sm:$0x1] }
 0x34b   : > { %5128 = vst.msk [vmem:[#allocation3 + $0x188] sm:$0xf] %vm5011_vm10, %v5009_v23  ;;  %v4910_v48 = vadd.f32 %v12952_v53, %v4256_v16  ;;  %v5863_v30 = vpop.f32.mrf.mxu2  ;;  %v7018_v53 = vunpack.c.l.b16 %v6864_v20  ;;  %v5404_v23 = vshrl.u32 %v13028_v9, 16  ;;  %v10540_v20 = vld [vmem:[%s14138_s3 + $0x1c] sm:$0xf]  ;;  %v10386_v41 = vrot.slane %v6866_v45, 11 }
 0x34c   : > { %v5864_v1 = vadd.f32 %v5863_v30, %v12776_v15  ;;  %v8881_v61 = vsel %vm5662_vm9, %v10540_v20, 0  ;;  %v6885_v15 = vor.u32 %v6883_v60, %v6882_v14  ;;  %v5973_v30 = vld [vmem:[#allocation3 + $0xf8] sm:$0xf]  ;;  %v6230_v33 = vsel %vm11101_vm8, %v6225_v3, %v6229_v24  ;;  %v6631_v60 = vld [vmem:[#allocation3 + $0x128] sm:$0xf] }
 0x34d   : > { %v4946_v32 = vadd.f32 %v12857_v38, %v4910_v48  ;;  %v6871_v38 = vshrl.u32 %v13015_v56, 16  ;;  %v7040_v4 = vpack.c.b16 %v7018_v53, %v7017_v51  ;;  %v13034_v16 = vpop.f32.mrf.mxu1  ;;  %v5796_v48 = vpack.c.b16 %v5774_v39, %v5773_v22  ;;  %8890 = vmatpush.bf16.msra.mxu0 %v8881_v61  ;;  %v10621_v53 = vld [vmem:[%s14138_s3 + $0x20] sm:$0xf] }
 0x34e   : > { %v6245_v51 = vshrl.u32 %v5974_v42, 16  ;;  %v5406_v6 = vrot.slane %v5404_v23, 7  ;;  %v9535_v40 = vsel %vm5662_vm9, %v10621_v53, 0  ;;  %v5418_v55 = vor.u32 %v5416_v5, %v5415_v11  ;;  %v6630_v53 = vld [vmem:[#allocation3 + $0x124] sm:$0x8] }
 0x34f   : > { %v4978_v31 = vmax.f32 %v4946_v32, 0.0  ;;  %v13025_v35 = vpop.f32.mrf.mxu0  ;;  %10368 = vmatmul.msk.bf16.gmra.mxu3 %vm5613_vm11, %v6417_v13  ;;  %v6873_v21 = vrot.slane %v6871_v38, 7  ;;  %v6241_v32 = vshll.u32 %v5974_v42, 16  ;;  %9544 = vmatpush.bf16.msra.mxu1 %v9535_v40  ;;  %v6232_v8 = vshrl.u32 %v5973_v30, 16 }
 0x350   : > { %10341 = vmatmul.msk.bf16.gmra.mxu1 %vm5613_vm11, %v10704_v59  ;;  %v6235_v29 = vshll.u32 %v5973_v30, 16  ;;  %v5407_v58 = vshll.u32 %v13028_v9, 16  ;;  %v6247_v45 = vrot.slane %v6245_v51, 4  ;;  %v5411_v39 = vrot.slane %v5406_v6, 4  ;;  %v6632_v59 = vld [vmem:[#allocation3 + $0x12c] sm:$0xf] }
 0x351   : > { %v5010_v62 = vpack.c.bf16 %v4978_v31, %v4978_v31  ;;  %v6878_v56 = vrot.slane %v6873_v21, 4  ;;  %v6876_v47 = vor.u32 %v6874_v0, %v6873_v21  ;;  %v5399_v31 = vshrl.u32 %v5160_v25, 16  ;;  %v5165_v25 = vld [vmem:[#allocation3 + $0x114] sm:$0xf]  ;;  %v5164_v30 = vld [vmem:[#allocation3 + $0x110] sm:$0xf] }
 0x352   : > { %10402 = vmatmul.msk.bf16.gmra.mxu0 %vm5613_vm11, %v7040_v4  ;;  %v6485_v50 = vpop.f32.mrf.mxu3  ;;  %v13060_v57 = vrot.slane %v6241_v32, 5  ;;  %v6396_v4 = vunpack.c.l.b16 %v6230_v33  ;;  %v5409_v21 = vor.u32 %v5407_v58, %v5406_v6  ;;  %v6234_v20 = vrot.slane %v6232_v8, 4  ;;  %v5163_v33 = vld [vmem:[#allocation3 + $0x10c] sm:$0x8] }
 0x353   : > { %5129 = vst.msk [vmem:[#allocation3 + $0x18c] sm:$0xf] %vm5011_vm10, %v5010_v62  ;;  %v5865_v10 = vpop.f32.mrf.mxu2  ;;  %v13042_v12 = vadd.f32 %v6485_v50, %v5864_v1  ;;  %v6886_v38 = vsel %vm10929_vm5, %v6878_v56, %v6885_v15  ;;  %v6395_v62 = vunpack.c.l.b16 %v6220_v37  ;;  %v6877_v17 = vsel %vm10929_vm5, %v10386_v41, %v6876_v47  ;;  %v10705_v47 = vld [vmem:[#allocation3 + $0x170] sm:$0xff] }
 0x354   : > { %v5866_v14 = vadd.f32 %v5865_v10, %v12798_v63  ;;  %v10256_v24 = vrot.slane %v5399_v31, 11  ;;  %v7020_v9 = vunpack.c.l.b16 %v6886_v38  ;;  %v5419_v1 = vsel %vm10929_vm5, %v5411_v39, %v5418_v55 }
 0x355   : > { %v13062_v22 = vpop.f32.mrf.mxu1  ;;  %v6237_v3 = vrot.slane %v6235_v29, 5  ;;  %v6251_v61 = vshll.u32 %v5975_v34, 16  ;;  %v6902_v63 = vshrl.u32 %v6632_v59, 16  ;;  %v6418_v10 = vpack.c.b16 %v6396_v4, %v6395_v62  ;;  %v5977_v4 = vld [vmem:[#allocation3 + $0x114] sm:$0xf] }
 0x356   : > { %v7019_v0 = vunpack.c.l.b16 %v6877_v17  ;;  %v5410_v11 = vsel %vm10929_vm5, %v10256_v24, %v5409_v21  ;;  %v6893_v15 = vshrl.u32 %v6631_v60, 16  ;;  %v5776_v51 = vunpack.c.l.b16 %v5419_v1 }
 0x357   : > { %v13051_v13 = vpop.f32.mrf.mxu0  ;;  %v6238_v37 = vor.u32 %v6237_v3, %v6234_v20  ;;  %v6253_v6 = vrot.slane %v6251_v61, 5  ;;  %v6904_v5 = vrot.slane %v6902_v63, 7  ;;  %v5435_v40 = vshrl.u32 %v5165_v25, 16  ;;  %v5976_v20 = vld [vmem:[#allocation3 + $0x110] sm:$0xf] }
 0x358   : > { %10352 = vmatmul.msk.bf16.gmra.mxu2 %vm5613_vm11, %v5796_v48  ;;  %v6248_v48 = vor.u32 %v6247_v45, %v13060_v57  ;;  %v7041_v32 = vpack.c.b16 %v7020_v9, %v7019_v0  ;;  %v5775_v31 = vunpack.c.l.b16 %v5410_v11  ;;  %v5426_v55 = vshrl.u32 %v5164_v30, 16 }
 0x359   : > { %v6888_v58 = vshrl.u32 %v6630_v53, 16  ;;  %v6895_v45 = vrot.slane %v6893_v15, 7  ;;  %v6905_v62 = vshll.u32 %v6632_v59, 16  ;;  %v6896_v17 = vshll.u32 %v6631_v60, 16 }
 0x35a   : > { %v6487_v23 = vpop.f32.mrf.mxu3  ;;  %v6249_v56 = vrot.slane %v6248_v48, 4  ;;  %v5797_v34 = vpack.c.b16 %v5776_v51, %v5775_v31  ;;  %v5421_v24 = vshrl.u32 %v5163_v33, 16  ;;  %v5437_v1 = vrot.slane %v5435_v40, 7  ;;  %v6635_v33 = vld [vmem:[#allocation3 + $0x144] sm:$0xf] }
 0x35b   : > { %v5868_v42 = vpop.f32.mrf.mxu2  ;;  %v13069_v50 = vadd.f32 %v6487_v23, %v5866_v14  ;;  %v6239_v14 = vrot.slane %v6238_v37, 4  ;;  %v6907_v9 = vor.u32 %v6905_v62, %v6904_v5  ;;  %v5428_v59 = vrot.slane %v5426_v55, 7  ;;  %v5978_v55 = vld [vmem:[#allocation3 + $0x118] sm:$0x1] }
 0x35c   : > { %v5869_v29 = vadd.f32 %v5868_v42, %v12812_v26  ;;  %v6254_v23 = vsel %vm11101_vm8, %v6249_v56, %v6253_v6  ;;  %v6265_v42 = vshll.u32 %v5977_v4, 16  ;;  %v6269_v3 = vshrl.u32 %v5977_v4, 16  ;;  %v6634_v4 = vld [vmem:[#allocation3 + $0x140] sm:$0xf] }
 0x35d   : > { %v13078_v8 = vpop.f32.mrf.mxu1  ;;  %v6244_v26 = vsel %vm11101_vm8, %v6239_v14, %v13060_v57  ;;  %v10387_v60 = vrot.slane %v6888_v58, 11  ;;  %v6898_v61 = vor.u32 %v6896_v17, %v6895_v45  ;;  %v6900_v63 = vrot.slane %v6895_v45, 4 }
 0x35e   : > { %v6398_v0 = vunpack.c.l.b16 %v6254_v23  ;;  %v5429_v11 = vshll.u32 %v5164_v30, 16  ;;  %v6256_v15 = vshrl.u32 %v5976_v20, 16  ;;  %v6259_v57 = vshll.u32 %v5976_v20, 16 }
 0x35f   : > { %v13072_v41 = vpop.f32.mrf.mxu0  ;;  %10369 = vmatmul.msk.bf16.gmra.mxu3 %vm5613_vm11, %v6418_v10  ;;  %v5438_v10 = vshll.u32 %v5165_v25, 16  ;;  %v6908_v51 = vsel %vm10929_vm5, %v6900_v63, %v6907_v9  ;;  %v10257_v53 = vrot.slane %v5421_v24, 11  ;;  %v13094_v6 = vrot.slane %v6265_v42, 5 }
 0x360   : > { %10342 = vmatmul.msk.bf16.gmra.mxu1 %vm5613_vm11, %v10705_v47  ;;  %v5431_v56 = vor.u32 %v5429_v11, %v5428_v59  ;;  %v6271_v5 = vrot.slane %v6269_v3, 4  ;;  %v6899_v30 = vsel %vm10929_vm5, %v10387_v60, %v6898_v61  ;;  %v5433_v31 = vrot.slane %v5428_v59, 4  ;;  %v5167_v3 = vld [vmem:[#allocation3 + $0x128] sm:$0xf] }
 0x361   : > { %v5440_v37 = vor.u32 %v5438_v10, %v5437_v1  ;;  %v7022_v45 = vunpack.c.l.b16 %v6908_v51  ;;  %v6258_v62 = vrot.slane %v6256_v15, 4  ;;  %v6261_v14 = vrot.slane %v6259_v57, 5  ;;  %v6633_v1 = vld [vmem:[#allocation3 + $0x13c] sm:$0x8]  ;;  %v5166_v15 = vld [vmem:[#allocation3 + $0x124] sm:$0x8] }
 0x362   : > { %10403 = vmatmul.msk.bf16.gmra.mxu0 %vm5613_vm11, %v7041_v32  ;;  %v6490_v39 = vpop.f32.mrf.mxu3  ;;  %v6397_v32 = vunpack.c.l.b16 %v6244_v26  ;;  %v6924_v17 = vshrl.u32 %v6635_v33, 16  ;;  %v7021_v24 = vunpack.c.l.b16 %v6899_v30  ;;  %v6275_v23 = vshll.u32 %v5978_v55, 16  ;;  %v5168_v26 = vld [vmem:[#allocation3 + $0x12c] sm:$0xf]  ;;  %v10706_v30 = vld [vmem:[#allocation3 + $0x20] sm:$0xff] }
 0x363   : > { %v5870_v38 = vpop.f32.mrf.mxu2  ;;  %v13081_v21 = vadd.f32 %v6490_v39, %v5869_v29  ;;  %v6915_v20 = vshrl.u32 %v6634_v4, 16  ;;  %v6262_v61 = vor.u32 %v6261_v14, %v6258_v62  ;;  %v6910_v11 = vshrl.u32 %v6633_v1, 16  ;;  %v5979_v14 = vld [vmem:[#allocation3 + $0x128] sm:$0xf] }
 0x364   : > { %v5871_v25 = vadd.f32 %v5870_v38, %v12836_v46  ;;  %v6419_v58 = vpack.c.b16 %v6398_v0, %v6397_v32  ;;  %v5432_v46 = vsel %vm10929_vm5, %v10257_v53, %v5431_v56  ;;  %v6272_v38 = vor.u32 %v6271_v5, %v13094_v6 }
 0x365   : > { %v13096_v40 = vpop.f32.mrf.mxu1  ;;  %v7042_v59 = vpack.c.b16 %v7022_v45, %v7021_v24  ;;  %v5777_v60 = vunpack.c.l.b16 %v5432_v46  ;;  %v6926_v63 = vrot.slane %v6924_v17, 7  ;;  %v6277_v0 = vrot.slane %v6275_v23, 5 }
 0x366   : > { %v6273_v10 = vrot.slane %v6272_v38, 4  ;;  %v5457_v32 = vshrl.u32 %v5168_v26, 16  ;;  %v6917_v53 = vrot.slane %v6915_v20, 7  ;;  %v6927_v56 = vshll.u32 %v6635_v33, 16 }
 0x367   : > { %v13089_v48 = vpop.f32.mrf.mxu0  ;;  %v5448_v5 = vshrl.u32 %v5167_v3, 16  ;;  %v6263_v45 = vrot.slane %v6262_v61, 4  ;;  %v10388_v46 = vrot.slane %v6910_v11, 11  ;;  %v5460_v20 = vshll.u32 %v5168_v26, 16 }
 0x368   : > { %10353 = vmatmul.msk.bf16.gmra.mxu2 %vm5613_vm11, %v5797_v34  ;;  %v5441_v34 = vsel %vm10929_vm5, %v5433_v31, %v5440_v37  ;;  %v6929_v62 = vor.u32 %v6927_v56, %v6926_v63  ;;  %v6922_v23 = vrot.slane %v6917_v53, 4  ;;  %v5451_v63 = vshll.u32 %v5167_v3, 16 }
 0x369   : > { %v5778_v42 = vunpack.c.l.b16 %v5441_v34  ;;  %v5443_v34 = vshrl.u32 %v5166_v15, 16  ;;  %v6268_v1 = vsel %vm11101_vm8, %v6263_v45, %v13094_v6  ;;  %v6637_v45 = vld [vmem:[#allocation3 + $0x158] sm:$0xf] }
 0x36a   : > { %v6492_v29 = vpop.f32.mrf.mxu3  ;;  %v6930_v61 = vsel %vm10929_vm5, %v6922_v23, %v6929_v62  ;;  %v6399_v6 = vunpack.c.l.b16 %v6268_v1 }
 0x36b   : > { %v5873_v47 = vpop.f32.mrf.mxu2  ;;  %v13101_v39 = vadd.f32 %v6492_v29, %v5871_v25  ;;  %v5980_v25 = vld [vmem:[#allocation3 + $0x12c] sm:$0xf]  ;;  %v5798_v55 = vpack.c.b16 %v5778_v42, %v5777_v60  ;;  %v6918_v29 = vshll.u32 %v6634_v4, 16  ;;  %v5450_v4 = vrot.slane %v5448_v5, 7 }
 0x36c   : > { %v5874_v37 = vadd.f32 %v5873_v47, %v12852_v49  ;;  %v6278_v49 = vsel %vm11101_vm8, %v6273_v10, %v6277_v0  ;;  %v5459_v47 = vrot.slane %v5457_v32, 7  ;;  %v6289_v17 = vshll.u32 %v5980_v25, 16  ;;  %v6638_v32 = vld [vmem:[#allocation3 + $0x15c] sm:$0xf] }
 0x36d   : > { %v13112_v51 = vpop.f32.mrf.mxu1  ;;  %v6293_v33 = vshrl.u32 %v5980_v25, 16  ;;  %v6920_v38 = vor.u32 %v6918_v29, %v6917_v53  ;;  %v6283_v42 = vshll.u32 %v5979_v14, 16  ;;  %v6400_v60 = vunpack.c.l.b16 %v6278_v49  ;;  %v5981_v25 = vld [vmem:[#allocation3 + $0x130] sm:$0x1] }
 0x36e   : > { %v10258_v10 = vrot.slane %v5443_v34, 11  ;;  %v5462_v0 = vor.u32 %v5460_v20, %v5459_v47  ;;  %v13128_v11 = vrot.slane %v6289_v17, 5  ;;  %v5453_v5 = vor.u32 %v5451_v63, %v5450_v4  ;;  %v5171_v17 = vld [vmem:[#allocation3 + $0x144] sm:$0xf]  ;;  %v5170_v20 = vld [vmem:[#allocation3 + $0x140] sm:$0xf] }
 0x36f   : > { %v13108_v9 = vpop.f32.mrf.mxu0  ;;  %10370 = vmatmul.msk.bf16.gmra.mxu3 %vm5613_vm11, %v6419_v58  ;;  %v6295_v15 = vrot.slane %v6293_v33, 4  ;;  %v6921_v26 = vsel %vm10929_vm5, %v10388_v46, %v6920_v38  ;;  %v5455_v3 = vrot.slane %v5450_v4, 4  ;;  %v6285_v29 = vrot.slane %v6283_v42, 5  ;;  %v6636_v46 = vld [vmem:[#allocation3 + $0x154] sm:$0x8] }
 0x370   : > { %10474 = vmatmul.msk.bf16.vlgmr.msrb.gmra.mxu1 %vm5613_vm11, %v10706_v30  ;;  %v6420_v34 = vpack.c.b16 %v6400_v60, %v6399_v6  ;;  %v7023_v49 = vunpack.c.l.b16 %v6921_v26  ;;  %v6299_v47 = vshll.u32 %v5981_v25, 16  ;;  %v5454_v33 = vsel %vm10929_vm5, %v10258_v10, %v5453_v5  ;;  %v5169_v60 = vld [vmem:[#allocation3 + $0x13c] sm:$0x8] }
 0x371   : > { %v6937_v38 = vshrl.u32 %v6637_v45, 16  ;;  %v5779_v63 = vunpack.c.l.b16 %v5454_v33  ;;  %v6949_v25 = vshll.u32 %v6638_v32, 16  ;;  %v5982_v33 = vld [vmem:[#allocation3 + $0x140] sm:$0xf] }
 0x372   : > { %10404 = vmatmul.msk.bf16.gmra.mxu0 %vm5613_vm11, %v7042_v59  ;;  %v6495_v31 = vpop.f32.mrf.mxu3  ;;  %v6280_v59 = vshrl.u32 %v5979_v14, 16  ;;  %v6946_v14 = vshrl.u32 %v6638_v32, 16 }
 0x373   : > { %v5875_v57 = vpop.f32.mrf.mxu2  ;;  %v13115_v58 = vadd.f32 %v6495_v31, %v5874_v37  ;;  %v7024_v31 = vunpack.c.l.b16 %v6930_v61  ;;  %v5479_v61 = vshrl.u32 %v5171_v17, 16  ;;  %v6939_v5 = vrot.slane %v6937_v38, 7 }
 0x374   : > { %v5876_v53 = vadd.f32 %v5875_v57, %v12883_v19  ;;  %v5463_v19 = vsel %vm10929_vm5, %v5455_v3, %v5462_v0  ;;  %v6296_v57 = vor.u32 %v6295_v15, %v13128_v11  ;;  %v6948_v42 = vrot.slane %v6946_v14, 7  ;;  %v10707_v3 = vld [vmem:[#allocation3 + $0x38] sm:$0xff] }
 0x375   : > { %v13130_v37 = vpop.f32.mrf.mxu1  ;;  %v7043_v4 = vpack.c.b16 %v7024_v31, %v7023_v49  ;;  %v6301_v15 = vrot.slane %v6299_v47, 5  ;;  %v5983_v31 = vld [vmem:[#allocation3 + $0x144] sm:$0xf]  ;;  %v5465_v14 = vshrl.u32 %v5169_v60, 16  ;;  %v5481_v47 = vrot.slane %v5479_v61, 7 }
 0x376   : > { %v6297_v0 = vrot.slane %v6296_v57, 4  ;;  %v6951_v57 = vor.u32 %v6949_v25, %v6948_v42  ;;  %v6313_v32 = vshll.u32 %v5983_v31, 16  ;;  %v6307_v60 = vshll.u32 %v5982_v33, 16 }
 0x377   : > { %v13120_v24 = vpop.f32.mrf.mxu0  ;;  %v5473_v61 = vshll.u32 %v5170_v20, 16 }
 0x378   : > { %14207 = vst [vmem:[#allocation15_spill] sm:$0xff] %v13120_v24  ;;  %10354 = vmatmul.msk.bf16.gmra.mxu2 %vm5613_vm11, %v5798_v55  ;;  %v6282_v55 = vrot.slane %v6280_v59, 4  ;;  %v5780_v59 = vunpack.c.l.b16 %v5463_v19  ;;  %v5985_v24 = vld [vmem:[#allocation3 + $0x158] sm:$0xf] }
 0x37a   : > { %v6497_v30 = vpop.f32.mrf.mxu3  ;;  %v6286_v1 = vor.u32 %v6285_v29, %v6282_v55  ;;  %v5799_v19 = vpack.c.b16 %v5780_v59, %v5779_v63 }
 0x37b   : > { %v5878_v56 = vpop.f32.mrf.mxu2  ;;  %v13135_v62 = vadd.f32 %v6497_v30, %v5876_v53  ;;  %v6932_v53 = vshrl.u32 %v6636_v46, 16  ;;  %v5470_v30 = vshrl.u32 %v5170_v20, 16  ;;  %v6317_v46 = vshrl.u32 %v5983_v31, 16  ;;  %v5984_v20 = vld [vmem:[#allocation3 + $0x148] sm:$0x1] }
 0x37c   : > { %v5879_v6 = vadd.f32 %v5878_v56, %v12903_v43  ;;  %v6287_v29 = vrot.slane %v6286_v1, 4  ;;  %v6302_v43 = vsel %vm11101_vm8, %v6297_v0, %v6301_v15  ;;  %v5482_v1 = vshll.u32 %v5171_v17, 16 }
 0x37d   : > { %v13146_v10 = vpop.f32.mrf.mxu1  ;;  %v10389_v56 = vrot.slane %v6932_v53, 11  ;;  %v6402_v15 = vunpack.c.l.b16 %v6302_v43  ;;  %v10259_v53 = vrot.slane %v5465_v14, 11  ;;  %v6319_v17 = vrot.slane %v6317_v46, 4 }
 0x37e   : > { %v6292_v59 = vsel %vm11101_vm8, %v6287_v29, %v13128_v11  ;;  %v5484_v63 = vor.u32 %v5482_v1, %v5481_v47  ;;  %v6309_v14 = vrot.slane %v6307_v60, 5  ;;  %v6640_v47 = vld [vmem:[#allocation3 + $0x170] sm:$0xf]  ;;  %v5173_v1 = vld [vmem:[#allocation3 + $0x158] sm:$0xf] }
 0x37f   : > { %v13142_v23 = vpop.f32.mrf.mxu0  ;;  %10371 = vmatmul.msk.bf16.gmra.mxu3 %vm5613_vm11, %v6420_v34  ;;  %v6940_v34 = vshll.u32 %v6637_v45, 16  ;;  %v6304_v45 = vshrl.u32 %v5982_v33, 16 }
 0x380   : > { %14208 = vst [vmem:[#allocation16_spill] sm:$0xff] %v13142_v23  ;;  %10475 = vmatmul.msk.bf16.gmra.mxu1 %vm5613_vm11, %v10707_v3  ;;  %v5472_v23 = vrot.slane %v5470_v30, 7 }
 0x381   : > { %v6942_v38 = vor.u32 %v6940_v34, %v6939_v5  ;;  %v6401_v34 = vunpack.c.l.b16 %v6292_v59 }
 0x382   : > { %10405 = vmatmul.msk.bf16.gmra.mxu0 %vm5613_vm11, %v7043_v4  ;;  %v6500_v55 = vpop.f32.mrf.mxu3  ;;  %v6944_v4 = vrot.slane %v6939_v5, 4  ;;  %v6641_v5 = vld [vmem:[#allocation3 + $0x174] sm:$0xf]  ;;  %v5475_v3 = vor.u32 %v5473_v61, %v5472_v23 }
 0x383   : > { %v5880_v26 = vpop.f32.mrf.mxu2  ;;  %v13149_v49 = vadd.f32 %v6500_v55, %v5879_v6  ;;  %v13162_v6 = vrot.slane %v6313_v32, 5  ;;  %v6943_v11 = vsel %vm10929_vm5, %v10389_v56, %v6942_v38  ;;  %v5477_v55 = vrot.slane %v5472_v23, 4  ;;  %v5174_v38 = vld [vmem:[#allocation3 + $0x15c] sm:$0xf] }
 0x384   : > { %v6952_v42 = vsel %vm10929_vm5, %v6944_v4, %v6951_v57  ;;  %v5881_v30 = vadd.f32 %v5880_v26, %v12928_v2  ;;  %v6306_v57 = vrot.slane %v6304_v45, 4  ;;  %v6968_v32 = vshrl.u32 %v6641_v5, 16 }
 0x385   : > { %v13164_v25 = vpop.f32.mrf.mxu1  ;;  %v5485_v43 = vsel %vm10929_vm5, %v5477_v55, %v5484_v63  ;;  %v6421_v2 = vpack.c.b16 %v6402_v15, %v6401_v34  ;;  %v7025_v26 = vunpack.c.l.b16 %v6943_v11  ;;  %v6320_v46 = vor.u32 %v6319_v17, %v13162_v6  ;;  %v5172_v63 = vld [vmem:[#allocation3 + $0x154] sm:$0x8] }
 0x386   : > { %v6323_v56 = vshll.u32 %v5984_v20, 16  ;;  %v5476_v23 = vsel %vm10929_vm5, %v10259_v53, %v5475_v3  ;;  %v6959_v4 = vshrl.u32 %v6640_v47, 16  ;;  %v5782_v60 = vunpack.c.l.b16 %v5485_v43  ;;  %v5986_v43 = vld [vmem:[#allocation3 + $0x15c] sm:$0xf] }
 0x387   : > { %v13160_v0 = vpop.f32.mrf.mxu0  ;;  %v6310_v59 = vor.u32 %v6309_v14, %v6306_v57  ;;  %v6970_v61 = vrot.slane %v6968_v32, 7  ;;  %v5781_v15 = vunpack.c.l.b16 %v5476_v23  ;;  %v6321_v17 = vrot.slane %v6320_v46, 4  ;;  %v10708_v57 = vld [vmem:[#allocation3 + $0x50] sm:$0xff] }
 0x388   : > { %10355 = vmatmul.msk.bf16.gmra.mxu2 %vm5613_vm11, %v5799_v19  ;;  %14209 = vst [vmem:[#allocation17_spill] sm:$0xff] %v13160_v0  ;;  %v7026_v19 = vunpack.c.l.b16 %v6952_v42  ;;  %v6639_v42 = vld [vmem:[#allocation3 + $0x16c] sm:$0x8]  ;;  %v6325_v11 = vrot.slane %v6323_v56, 5  ;;  %v5492_v55 = vshrl.u32 %v5173_v1, 16  ;;  %v6961_v34 = vrot.slane %v6959_v4, 7 }
 0x389   : > { %v6962_v46 = vshll.u32 %v6640_v47, 16  ;;  %v6341_v4 = vshrl.u32 %v5986_v43, 16 }
 0x38a   : > { %v6502_v29 = vpop.f32.mrf.mxu3  ;;  %v7044_v45 = vpack.c.b16 %v7026_v19, %v7025_v26  ;;  %v6971_v19 = vshll.u32 %v6641_v5, 16  ;;  %v6311_v26 = vrot.slane %v6310_v59, 4  ;;  %v5494_v5 = vrot.slane %v5492_v55, 7 }
 0x38b   : > { %v5883_v31 = vpop.f32.mrf.mxu2  ;;  %v13169_v33 = vadd.f32 %v6502_v29, %v5881_v30  ;;  %v5501_v30 = vshrl.u32 %v5174_v38, 16  ;;  %v6954_v29 = vshrl.u32 %v6639_v42, 16  ;;  %v6328_v59 = vshrl.u32 %v5985_v24, 16 }
 0x38c   : > { %v5884_v53 = vadd.f32 %v5883_v31, %v12946_v18  ;;  %v6973_v56 = vor.u32 %v6971_v19, %v6970_v61  ;;  %v6326_v18 = vsel %vm11101_vm8, %v6321_v17, %v6325_v11  ;;  %v6337_v31 = vshll.u32 %v5986_v43, 16 }
 0x38d   : > { %14210 = vst [vmem:[#allocation18_spill] sm:$0xff] %v13169_v33  ;;  %v13178_v20 = vpop.f32.mrf.mxu1  ;;  %v5503_v0 = vrot.slane %v5501_v30, 7  ;;  %v10390_v42 = vrot.slane %v6954_v29, 11  ;;  %v6966_v33 = vrot.slane %v6961_v34, 4  ;;  %v6316_v47 = vsel %vm11101_vm8, %v6311_v26, %v13162_v6  ;;  %v6644_v29 = vld [vmem:[#allocation3 + $0x18c] sm:$0xf] }
 0x38e   : > { %v5495_v30 = vshll.u32 %v5173_v1, 16  ;;  %v6404_v17 = vunpack.c.l.b16 %v6326_v18  ;;  %v13194_v55 = vrot.slane %v6337_v31, 5  ;;  %v5499_v43 = vrot.slane %v5494_v5, 4  ;;  %v6643_v26 = vld [vmem:[#allocation3 + $0x188] sm:$0xf] }
 0x38f   : > { %10372 = vmatmul.msk.bf16.gmra.mxu3 %vm5613_vm11, %v6421_v2  ;;  %v13181_v14 = vpop.f32.mrf.mxu0  ;;  %v5800_v2 = vpack.c.b16 %v5782_v60, %v5781_v15  ;;  %v5504_v60 = vshll.u32 %v5174_v38, 16  ;;  %v6974_v61 = vsel %vm10929_vm5, %v6966_v33, %v6973_v56  ;;  %v6403_v1 = vunpack.c.l.b16 %v6316_v47 }
 0x390   : > { %14211 = vst [vmem:[#allocation19_spill] sm:$0xff] %v13181_v14  ;;  %10476 = vmatmul.msk.bf16.gmra.mxu1 %vm5613_vm11, %v10708_v57  ;;  %v6964_v14 = vor.u32 %v6962_v46, %v6961_v34  ;;  %v5497_v6 = vor.u32 %v5495_v30, %v5494_v5  ;;  %v5987_v57 = vld [vmem:[#allocation3 + $0x160] sm:$0x1]  ;;  %v6990_v56 = vshrl.u32 %v6644_v29, 16 }
 0x391   : > { %v5506_v15 = vor.u32 %v5504_v60, %v5503_v0  ;;  %v7028_v0 = vunpack.c.l.b16 %v6974_v61  ;;  %v6347_v31 = vshll.u32 %v5987_v57, 16  ;;  %v6981_v60 = vshrl.u32 %v6643_v26, 16  ;;  %v6642_v61 = vld [vmem:[#allocation3 + $0x184] sm:$0x8] }
 0x392   : > { %10406 = vmatmul.msk.bf16.gmra.mxu0 %vm5613_vm11, %v7044_v45  ;;  %v6505_v32 = vpop.f32.mrf.mxu3  ;;  %v5487_v45 = vshrl.u32 %v5172_v63, 16  ;;  %v6331_v63 = vshll.u32 %v5985_v24, 16  ;;  %v6965_v19 = vsel %vm10929_vm5, %v10390_v42, %v6964_v14  ;;  %v6422_v14 = vpack.c.b16 %v6404_v17, %v6403_v1 }
 0x393   : > { %v5885_v3 = vpop.f32.mrf.mxu2  ;;  %v13183_v23 = vadd.f32 %v6505_v32, %v5884_v53  ;;  %v6343_v53 = vrot.slane %v6341_v4, 4  ;;  %v6330_v32 = vrot.slane %v6328_v59, 4  ;;  %v5507_v46 = vsel %vm10929_vm5, %v5499_v43, %v5506_v15  ;;  %v5177_v4 = vld [vmem:[#allocation3 + $0x174] sm:$0xf] }
 0x394   : > { %v10260_v11 = vrot.slane %v5487_v45, 11  ;;  %v5886_v34 = vadd.f32 %v5885_v3, %v12965_v44  ;;  %v13205_v44 = vld [vmem:[#allocation3 + $0x170] sm:$0xf]  ;;  %v7027_v18 = vunpack.c.l.b16 %v6965_v19  ;;  %v6992_v15 = vrot.slane %v6990_v56, 7 }
 0x395   : > { %v13196_v38 = vpop.f32.mrf.mxu1  ;;  %v6344_v5 = vor.u32 %v6343_v53, %v13194_v55  ;;  %v5514_v30 = vshrl.u32 %v13205_v44, 16  ;;  %v6349_v19 = vrot.slane %v6347_v31, 5  ;;  %v6976_v57 = vshrl.u32 %v6642_v61, 16 }
 0x396   : > { %v5498_v42 = vsel %vm10929_vm5, %v10260_v11, %v5497_v6  ;;  %v7045_v59 = vpack.c.b16 %v7028_v0, %v7027_v18  ;;  %v6993_v1 = vshll.u32 %v6644_v29, 16  ;;  %v5989_v0 = vld [vmem:[#allocation3 + $0x174] sm:$0xf] }
 0x397   : > { %v13207_v3 = vpop.f32.mrf.mxu0  ;;  %v5783_v17 = vunpack.c.l.b16 %v5498_v42  ;;  %v6345_v53 = vrot.slane %v6344_v5, 4  ;;  %v5516_v56 = vrot.slane %v5514_v30, 7  ;;  %v5175_v5 = vld [vmem:[#allocation3 + $0x16c] sm:$0x8]  ;;  %v5988_v30 = vld [vmem:[#allocation3 + $0x170] sm:$0xf] }
 0x398   : > { %10356 = vmatmul.msk.bf16.gmra.mxu2 %vm5613_vm11, %v5800_v2  ;;  %v6333_v2 = vrot.slane %v6331_v63, 5  ;;  %14212 = vst [vmem:[#allocation4_spill] sm:$0xff] %v13207_v3  ;;  %v5784_v63 = vunpack.c.l.b16 %v5507_v46  ;;  %v6995_v42 = vor.u32 %v6993_v1, %v6992_v15  ;;  %v5509_v15 = vshrl.u32 %v5175_v5, 16 }
 0x399   : > { %v6350_v29 = vsel %vm11101_vm8, %v6345_v53, %v6349_v19  ;;  %v6352_v19 = vshrl.u32 %v5988_v30, 16 }
 0x39a   : > { %v6507_v33 = vpop.f32.mrf.mxu3  ;;  %v6334_v47 = vor.u32 %v6333_v2, %v6330_v32  ;;  %v10709_v32 = vld [vmem:[#allocation3 + $0x68] sm:$0xff]  ;;  %v5801_v46 = vpack.c.b16 %v5784_v63, %v5783_v17  ;;  %v10391_v63 = vrot.slane %v6976_v57, 11  ;;  %v6365_v17 = vshrl.u32 %v5989_v0, 16 }
 0x39b   : > { %v5888_v24 = vpop.f32.mrf.mxu2  ;;  %v13201_v45 = vadd.f32 %v6507_v33, %v5886_v34  ;;  %v5523_v34 = vshrl.u32 %v5177_v4, 16  ;;  %v6983_v33 = vrot.slane %v6981_v60, 7  ;;  %v6361_v60 = vshll.u32 %v5989_v0, 16 }
 0x39c   : > { %v5889_v11 = vadd.f32 %v5888_v24, %v12983_v54  ;;  %v5526_v24 = vshll.u32 %v5177_v4, 16  ;;  %v5521_v4 = vrot.slane %v5516_v56, 4  ;;  %v6355_v57 = vshll.u32 %v5988_v30, 16 }
 0x39d   : > { %v13215_v43 = vpop.f32.mrf.mxu1  ;;  %v5525_v31 = vrot.slane %v5523_v34, 7  ;;  %v6988_v61 = vrot.slane %v6983_v33, 4  ;;  %v6406_v34 = vunpack.c.l.b16 %v6350_v29  ;;  %v10261_v29 = vrot.slane %v5509_v15, 11 }
 0x39f   : > { %10373 = vmatmul.msk.bf16.gmra.mxu3 %vm5613_vm11, %v6422_v14  ;;  %v6335_v14 = vrot.slane %v6334_v47, 4  ;;  %v5528_v1 = vor.u32 %v5526_v24, %v5525_v31 }
 0x3a0   : > { %10477 = vmatmul.msk.bf16.gmra.mxu1 %vm5613_vm11, %v10709_v32 }
 0x3a1   : > { %v6340_v54 = vsel %vm11101_vm8, %v6335_v14, %v13194_v55  ;;  %v5517_v55 = vshll.u32 %v13205_v44, 16  ;;  %v6363_v14 = vrot.slane %v6361_v60, 5  ;;  %v7474_v44 = vld [vmem:[#allocation3 + $0x24] sm:$0xf] }
 0x3a2   : > { %10407 = vmatmul.msk.bf16.gmra.mxu0 %vm5613_vm11, %v7045_v59  ;;  %v6510_v2 = vpop.f32.mrf.mxu3  ;;  %v6984_v59 = vshll.u32 %v6643_v26, 16  ;;  %v13226_v26 = vpop.f32.mrf.mxu0  ;;  %v6405_v53 = vunpack.c.l.b16 %v6340_v54  ;;  %v7535_v60 = vshrl.u32 %v7474_v44, 16 }
 0x3a3   : > { %v5890_v6 = vpop.f32.mrf.mxu2  ;;  %v13218_v18 = vadd.f32 %v6510_v2, %v5889_v11  ;;  %14213 = vst [vmem:[#allocation5_spill] sm:$0xff] %v13226_v26  ;;  %v6996_v11 = vsel %vm10929_vm5, %v6988_v61, %v6995_v42  ;;  %v5519_v24 = vor.u32 %v5517_v55, %v5516_v56  ;;  %v5529_v61 = vsel %vm10929_vm5, %v5521_v4, %v5528_v1 }
 0x3a4   : > { %v6986_v47 = vor.u32 %v6984_v59, %v6983_v33  ;;  %v5891_v33 = vadd.f32 %v5890_v6, %v13008_v7  ;;  %v6367_v59 = vrot.slane %v6365_v17, 4  ;;  %v7030_v42 = vunpack.c.l.b16 %v6996_v11 }
 0x3a5   : > { %v13232_v32 = vpop.f32.mrf.mxu1  ;;  %v6423_v54 = vpack.c.b16 %v6406_v34, %v6405_v53  ;;  %v6354_v7 = vrot.slane %v6352_v19, 4  ;;  %v6357_v6 = vrot.slane %v6355_v57, 5  ;;  %v5520_v15 = vsel %vm10929_vm5, %v10261_v29, %v5519_v24  ;;  %v7475_v29 = vld [vmem:[#allocation3 + $0x28] sm:$0x1] }
 0x3a6   : > { %v6987_v2 = vsel %vm10929_vm5, %v10391_v63, %v6986_v47  ;;  %v6368_v3 = vor.u32 %v6367_v59, %v6363_v14  ;;  %v7473_v63 = vld [vmem:[#allocation3 + $0x20] sm:$0xf]  ;;  %v7531_v47 = vshll.u32 %v7474_v44, 16  ;;  %v5786_v11 = vunpack.c.l.b16 %v5529_v61 }
 0x3a7   : > { %v7029_v30 = vunpack.c.l.b16 %v6987_v2  ;;  %v6358_v56 = vor.u32 %v6357_v6, %v6354_v7  ;;  %v7522_v1 = vshrl.u32 %v7473_v63, 16  ;;  %v7525_v53 = vshll.u32 %v7473_v63, 16  ;;  %v10710_v59 = vld [vmem:[#allocation3 + $0x80] sm:$0xff] }
 0x3a8   : > { %10357 = vmatmul.msk.bf16.gmra.mxu2 %vm5613_vm11, %v5801_v46  ;;  %v5990_v46 = vld [vmem:[#allocation3 + $0x178] sm:$0x1]  ;;  %v7533_v2 = vrot.slane %v7531_v47, 5 }
 0x3a9   : > { %v6371_v26 = vshll.u32 %v5990_v46, 16  ;;  %v7046_v17 = vpack.c.b16 %v7030_v42, %v7029_v30  ;;  %v7537_v46 = vrot.slane %v7535_v60, 4  ;;  %v5785_v42 = vunpack.c.l.b16 %v5520_v15  ;;  %v8129_v47 = vld [vmem:[#allocation3 + $0x38] sm:$0xf] }
 0x3aa   : > { %v6512_v5 = vpop.f32.mrf.mxu3  ;;  %v13244_v34 = vpop.f32.mrf.mxu0  ;;  %v7527_v24 = vrot.slane %v7525_v53, 5  ;;  %v6359_v61 = vrot.slane %v6358_v56, 4 }
 0x3ab   : > { %v5893_v0 = vpop.f32.mrf.mxu2  ;;  %v13237_v31 = vadd.f32 %v6512_v5, %v5891_v33  ;;  %v6373_v55 = vrot.slane %v6371_v26, 5  ;;  %v6369_v33 = vrot.slane %v6368_v3, 4  ;;  %v7524_v26 = vrot.slane %v7522_v1, 4  ;;  %v8130_v3 = vld [vmem:[#allocation3 + $0x3c] sm:$0xf] }
 0x3ac   : > { %v5894_v19 = vadd.f32 %v5893_v0, %v13034_v16  ;;  %v7538_v16 = vor.u32 %v7537_v46, %v7533_v2  ;;  %v7541_v0 = vshll.u32 %v7475_v29, 16  ;;  %v6364_v7 = vsel %vm11101_vm8, %v6359_v61, %v6363_v14 }
 0x3ad   : > { %v13247_v4 = vpop.f32.mrf.mxu1  ;;  %v6374_v30 = vsel %vm11101_vm8, %v6369_v33, %v6373_v55  ;;  %v7528_v63 = vor.u32 %v7527_v24, %v7524_v26  ;;  %v8191_v1 = vshrl.u32 %v8130_v3, 16  ;;  %v7477_v33 = vld [vmem:[#allocation3 + $0x3c] sm:$0xf] }
 0x3ae   : > { %v6408_v6 = vunpack.c.l.b16 %v6374_v30  ;;  %v7543_v56 = vrot.slane %v7541_v0, 5  ;;  %v7559_v26 = vshrl.u32 %v7477_v33, 16  ;;  %v10722_v24 = vld [vmem:[#allocation3 + $0x38] sm:$0xff]  ;;  %v8194_v0 = vshll.u32 %v8130_v3, 16 }
 0x3af   : > { %10374 = vmatmul.msk.bf16.gmra.mxu3 %vm5613_vm11, %v6423_v54  ;;  %v5802_v54 = vpack.c.b16 %v5786_v11, %v5785_v42  ;;  %v7539_v11 = vrot.slane %v7538_v16, 4  ;;  %v8128_v42 = vld [vmem:[#allocation3 + $0x34] sm:$0x8] }
 0x3b0   : > { %10478 = vmatmul.msk.bf16.gmra.mxu1 %vm5613_vm11, %v10710_v59  ;;  %v8182_v59 = vshrl.u32 %v8129_v47, 16  ;;  %v8177_v30 = vshrl.u32 %v8128_v42, 16 }
 0x3b1   : > { %v7544_v29 = vsel %vm11101_vm8, %v7539_v11, %v7543_v56 }
 0x3b2   : > { %10408 = vmatmul.msk.bf16.gmra.mxu0 %vm5613_vm11, %v7046_v17  ;;  %v6515_v5 = vpop.f32.mrf.mxu3  ;;  %v13261_v55 = vpop.f32.mrf.mxu0  ;;  %v8184_v16 = vrot.slane %v8182_v59, 7  ;;  %v7478_v59 = vld [vmem:[#allocation3 + $0x40] sm:$0x1]  ;;  %v10507_v42 = vrot.slane %v8177_v30, 11 }
 0x3b3   : > { %v5895_v57 = vpop.f32.mrf.mxu2  ;;  %v13250_v44 = vadd.f32 %v6515_v5, %v5894_v19  ;;  %14214 = vst [vmem:[#allocation6_spill] sm:$0xff] %v13261_v55  ;;  %v6407_v19 = vunpack.c.l.b16 %v6364_v7  ;;  %v7529_v5 = vrot.slane %v7528_v63, 4  ;;  %v7908_v7 = vunpack.c.l.b16 %v7544_v29  ;;  %v10712_v55 = vld [vmem:[#allocation3 + $0xb0] sm:$0xff] }
 0x3b4   : > { %v5896_v17 = vadd.f32 %v5895_v57, %v13062_v22  ;;  %v7476_v22 = vld [vmem:[#allocation3 + $0x38] sm:$0xf]  ;;  %v7555_v57 = vshll.u32 %v7477_v33, 16  ;;  %v7561_v33 = vrot.slane %v7559_v26, 4  ;;  %v7565_v26 = vshll.u32 %v7478_v59, 16 }
 0x3b5   : > { %v13258_v60 = vpop.f32.mrf.mxu1  ;;  %v6424_v14 = vpack.c.b16 %v6408_v6, %v6407_v19  ;;  %v7534_v61 = vsel %vm11101_vm8, %v7529_v5, %v7533_v2  ;;  %v8185_v6 = vshll.u32 %v8129_v47, 16  ;;  %v7546_v63 = vshrl.u32 %v7476_v22, 16 }
 0x3b6   : > { %v13274_v19 = vrot.slane %v7555_v57, 5  ;;  %v7907_v5 = vunpack.c.l.b16 %v7534_v61  ;;  %v8189_v47 = vrot.slane %v8184_v16, 4  ;;  %v8133_v61 = vld [vmem:[#allocation3 + $0x54] sm:$0xf] }
 0x3b7   : > { %v8187_v29 = vor.u32 %v8185_v6, %v8184_v16  ;;  %v8132_v6 = vld [vmem:[#allocation3 + $0x50] sm:$0xf] }
 0x3b8   : > { %10358 = vmatmul.msk.bf16.gmra.mxu2 %vm5613_vm11, %v5802_v54  ;;  %v8193_v54 = vrot.slane %v8191_v1, 7  ;;  %v7562_v57 = vor.u32 %v7561_v33, %v13274_v19 }
 0x3b9   : > { %v8188_v30 = vsel %vm10929_vm5, %v10507_v42, %v8187_v29  ;;  %v8131_v42 = vld [vmem:[#allocation3 + $0x4c] sm:$0x8] }
 0x3ba   : > { %v6517_v53 = vpop.f32.mrf.mxu3  ;;  %v8530_v33 = vunpack.c.l.b16 %v8188_v30  ;;  %v8199_v30 = vshrl.u32 %v8131_v42, 16 }
 0x3bb   : > { %v5898_v15 = vpop.f32.mrf.mxu2  ;;  %v13263_v46 = vadd.f32 %v6517_v53, %v5896_v17  ;;  %v7549_v17 = vshll.u32 %v7476_v22, 16  ;;  %v8196_v53 = vor.u32 %v8194_v0, %v8193_v54  ;;  %v13279_v22 = vpop.f32.mrf.mxu0 }
 0x3bc   : > { %v5899_v56 = vadd.f32 %v5898_v15, %v13078_v8  ;;  %14216 = vst [vmem:[#allocation9_spill] sm:$0xff] %v13279_v22  ;;  %v7548_v8 = vrot.slane %v7546_v63, 4  ;;  %v10508_v42 = vrot.slane %v8199_v30, 11 }
 0x3bd   : > { %v13271_v11 = vpop.f32.mrf.mxu1  ;;  %v7551_v15 = vrot.slane %v7549_v17, 5  ;;  %v8197_v54 = vsel %vm10929_vm5, %v8189_v47, %v8196_v53  ;;  %v7563_v17 = vrot.slane %v7562_v57, 4  ;;  %v8213_v53 = vshrl.u32 %v8133_v61, 16  ;;  %v10723_v57 = vld [vmem:[#allocation3 + $0x50] sm:$0xff] }
 0x3be   : > { %v8531_v16 = vunpack.c.l.b16 %v8197_v54  ;;  %v8204_v47 = vshrl.u32 %v8132_v6, 16 }
 0x3bf   : > { %10375 = vmatmul.msk.bf16.gmra.mxu3 %vm5613_vm11, %v6424_v14  ;;  %v10711_v14 = vld [vmem:[#allocation3 + $0x98] sm:$0xff]  ;;  %v7552_v0 = vor.u32 %v7551_v15, %v7548_v8  ;;  %v8215_v8 = vrot.slane %v8213_v53, 7  ;;  %v7479_v15 = vld [vmem:[#allocation3 + $0x50] sm:$0xf] }
 0x3c0   : > { %10479 = vmatmul.msk.bf16.gmra.mxu1 %vm5613_vm11, %v10711_v14  ;;  %v7567_v14 = vrot.slane %v7565_v26, 5  ;;  %v7573_v53 = vshll.u32 %v7479_v15, 16 }
 0x3c1   : > { %v7553_v22 = vrot.slane %v7552_v0, 4  ;;  %v8216_v0 = vshll.u32 %v8133_v61, 16 }
 0x3c2   : > { %10605 = vmatmul.msk.bf16.vlgmr.msra.gmra.mxu0 %vm5613_vm11, %v10722_v24  ;;  %v6520_v2 = vpop.f32.mrf.mxu3  ;;  %v7939_v24 = vpack.c.b16 %v7908_v7, %v7907_v5  ;;  %v7480_v5 = vld [vmem:[#allocation3 + $0x54] sm:$0xf]  ;;  %v7568_v29 = vsel %vm11101_vm8, %v7563_v17, %v7567_v14  ;;  %v8207_v17 = vshll.u32 %v8132_v6, 16  ;;  %v7570_v14 = vshrl.u32 %v7479_v15, 16 }
 0x3c3   : > { %v5900_v1 = vpop.f32.mrf.mxu2  ;;  %v13276_v3 = vadd.f32 %v6520_v2, %v5899_v56  ;;  %v7579_v54 = vshll.u32 %v7480_v5, 16  ;;  %v7558_v26 = vsel %vm11101_vm8, %v7553_v22, %v13274_v19 }
 0x3c4   : > { %v5901_v7 = vadd.f32 %v5900_v1, %v13096_v40  ;;  %v7583_v40 = vshrl.u32 %v7480_v5, 16  ;;  %v13294_v1 = vpop.f32.mrf.mxu0  ;;  %v7909_v22 = vunpack.c.l.b16 %v7558_v26 }
 0x3c5   : > { %14215 = vst [vmem:[#allocation8_spill] sm:$0xff] %v13276_v3  ;;  %v13287_v56 = vpop.f32.mrf.mxu1  ;;  %v7575_v3 = vrot.slane %v7573_v53, 5 }
 0x3c6   : > { %14218 = vst [vmem:[#allocation10_spill] sm:$0xff] %v13294_v1  ;;  %v13304_v1 = vrot.slane %v7579_v54, 5  ;;  %v8136_v54 = vld [vmem:[#allocation3 + $0x6c] sm:$0xf] }
 0x3c8   : > { %10491 = vmatmul.msk.bf16.vlgmr.msra.gmra.mxu2 %vm5613_vm11, %v7939_v24  ;;  %v8562_v24 = vpack.c.b16 %v8531_v16, %v8530_v33  ;;  %v8206_v16 = vrot.slane %v8204_v47, 7  ;;  %v7481_v47 = vld [vmem:[#allocation3 + $0x58] sm:$0x1] }
 0x3ca   : > { %v6522_v2 = vpop.f32.mrf.mxu3  ;;  %v8211_v6 = vrot.slane %v8206_v16, 4 }
 0x3cb   : > { %v5903_v63 = vpop.f32.mrf.mxu2  ;;  %v13290_v59 = vadd.f32 %v6522_v2, %v5901_v7  ;;  %v7910_v7 = vunpack.c.l.b16 %v7568_v29  ;;  %v8209_v29 = vor.u32 %v8207_v17, %v8206_v16 }
 0x3cc   : > { %v5904_v33 = vadd.f32 %v5903_v63, %v13112_v51  ;;  %v13315_v26 = vpop.f32.mrf.mxu0 }
 0x3cd   : > { %14217 = vst [vmem:[#allocation7_spill] sm:$0xff] %v13290_v59  ;;  %v13301_v2 = vpop.f32.mrf.mxu1  ;;  %v7585_v59 = vrot.slane %v7583_v40, 4  ;;  %v7940_v15 = vpack.c.b16 %v7910_v7, %v7909_v22  ;;  %v8210_v40 = vsel %vm10929_vm5, %v10508_v42, %v8209_v29 }
 0x3ce   : > { %14219 = vst [vmem:[#allocation11_spill] sm:$0xff] %v13315_v26 }
 0x3cf   : > { %10524 = vmatmul.msk.bf16.vlgmr.msra.gmra.mxu3 %vm5613_vm11, %v8562_v24  ;;  %v8218_v24 = vor.u32 %v8216_v0, %v8215_v8  ;;  %v7586_v63 = vor.u32 %v7585_v59, %v13304_v1  ;;  %v7589_v8 = vshll.u32 %v7481_v47, 16  ;;  %v8235_v59 = vshrl.u32 %v8136_v54, 16 }
 0x3d0   : > { %10480 = vmatmul.msk.bf16.gmra.mxu1 %vm5613_vm11, %v10712_v55  ;;  %v8135_v55 = vld [vmem:[#allocation3 + $0x68] sm:$0xf] }
 0x3d1   : > { %v8219_v51 = vsel %vm10929_vm5, %v8211_v6, %v8218_v24  ;;  %v7591_v53 = vrot.slane %v7589_v8, 5  ;;  %v8532_v24 = vunpack.c.l.b16 %v8210_v40  ;;  %v8226_v47 = vshrl.u32 %v8135_v55, 16  ;;  %v8134_v6 = vld [vmem:[#allocation3 + $0x64] sm:$0x8] }
 0x3d2   : > { %10606 = vmatmul.msk.bf16.gmra.mxu0 %vm5613_vm11, %v10723_v57  ;;  %v6525_v19 = vpop.f32.mrf.mxu3  ;;  %v7572_v57 = vrot.slane %v7570_v14, 4  ;;  %v8533_v30 = vunpack.c.l.b16 %v8219_v51  ;;  %v7587_v14 = vrot.slane %v7586_v63, 4  ;;  %v8221_v8 = vshrl.u32 %v8134_v6, 16 }
 0x3d3   : > { %v5905_v5 = vpop.f32.mrf.mxu2  ;;  %v13306_v61 = vadd.f32 %v6525_v19, %v5904_v33  ;;  %v7483_v19 = vld [vmem:[#allocation3 + $0x6c] sm:$0xf]  ;;  %v8228_v40 = vrot.slane %v8226_v47, 7 }
 0x3d4   : > { %v7576_v16 = vor.u32 %v7575_v3, %v7572_v57  ;;  %v5906_v7 = vadd.f32 %v5905_v5, %v13130_v37  ;;  %v8563_v42 = vpack.c.b16 %v8533_v30, %v8532_v24  ;;  %v7592_v3 = vsel %vm11101_vm8, %v7587_v14, %v7591_v53  ;;  %v7482_v57 = vld [vmem:[#allocation3 + $0x68] sm:$0xf] }
 0x3d5   : > { %v13317_v0 = vpop.f32.mrf.mxu1  ;;  %v7603_v51 = vshll.u32 %v7483_v19, 16  ;;  %v7607_v37 = vshrl.u32 %v7483_v19, 16  ;;  %v10724_v5 = vld [vmem:[#allocation3 + $0x68] sm:$0xff]  ;;  %v7912_v30 = vunpack.c.l.b16 %v7592_v3  ;;  %v7597_v14 = vshll.u32 %v7482_v57, 16 }
 0x3d6   : > { %v7577_v29 = vrot.slane %v7576_v16, 4  ;;  %v8229_v16 = vshll.u32 %v8135_v55, 16  ;;  %v10509_v55 = vrot.slane %v8221_v8, 11 }
 0x3d7   : > { %v7609_v26 = vrot.slane %v7607_v37, 4 }
 0x3d8   : > { %10492 = vmatmul.msk.bf16.gmra.mxu2 %vm5613_vm11, %v7940_v15  ;;  %v8237_v15 = vrot.slane %v8235_v59, 7  ;;  %v7582_v63 = vsel %vm11101_vm8, %v7577_v29, %v13304_v1  ;;  %v10713_v1 = vld [vmem:[#allocation3 + $0xc8] sm:$0xff]  ;;  %v7484_v29 = vld [vmem:[#allocation3 + $0x70] sm:$0x1]  ;;  %v8231_v3 = vor.u32 %v8229_v16, %v8228_v40 }
 0x3d9   : > { %v7613_v37 = vshll.u32 %v7484_v29, 16 }
 0x3da   : > { %v6527_v33 = vpop.f32.mrf.mxu3 }
 0x3db   : > { %v5908_v17 = vpop.f32.mrf.mxu2  ;;  %v13320_v22 = vadd.f32 %v6527_v33, %v5906_v7  ;;  %v8238_v7 = vshll.u32 %v8136_v54, 16  ;;  %v7594_v33 = vshrl.u32 %v7482_v57, 16  ;;  %v7911_v54 = vunpack.c.l.b16 %v7582_v63  ;;  %v8139_v63 = vld [vmem:[#allocation3 + $0x84] sm:$0xf] }
 0x3dc   : > { %v5909_v59 = vadd.f32 %v5908_v17, %v13146_v10  ;;  %v8233_v57 = vrot.slane %v8228_v40, 4  ;;  %v7599_v17 = vrot.slane %v7597_v14, 5  ;;  %v8138_v40 = vld [vmem:[#allocation3 + $0x80] sm:$0xf] }
 0x3dd   : > { %14220 = vst [vmem:[#allocation12_spill] sm:$0xff] %v13320_v22  ;;  %v13329_v53 = vpop.f32.mrf.mxu1  ;;  %v8240_v19 = vor.u32 %v8238_v7, %v8237_v15  ;;  %v13334_v22 = vpop.f32.mrf.mxu0  ;;  %v7596_v10 = vrot.slane %v7594_v33, 4  ;;  %v8232_v7 = vsel %vm10929_vm5, %v10509_v55, %v8231_v3 }
 0x3de   : > { %14221 = vst [vmem:[#allocation13_spill] sm:$0xff] %v13334_v22 }
 0x3df   : > { %10525 = vmatmul.msk.bf16.gmra.mxu3 %vm5613_vm11, %v8563_v42  ;;  %v13332_v42 = vrot.slane %v7603_v51, 5  ;;  %v8241_v15 = vsel %vm10929_vm5, %v8233_v57, %v8240_v19  ;;  %v7600_v16 = vor.u32 %v7599_v17, %v7596_v10  ;;  %v8257_v19 = vshrl.u32 %v8139_v63, 16  ;;  %v8137_v57 = vld [vmem:[#allocation3 + $0x7c] sm:$0x8] }
 0x3e0   : > { %10481 = vmatmul.msk.bf16.gmra.mxu1 %vm5613_vm11, %v10713_v1  ;;  %v8535_v8 = vunpack.c.l.b16 %v8241_v15  ;;  %v7615_v1 = vrot.slane %v7613_v37, 5  ;;  %v8243_v37 = vshrl.u32 %v8137_v57, 16 }
 0x3e1   : > { %v7610_v51 = vor.u32 %v7609_v26, %v13332_v42  ;;  %v8534_v26 = vunpack.c.l.b16 %v8232_v7  ;;  %v7601_v3 = vrot.slane %v7600_v16, 4  ;;  %v8259_v17 = vrot.slane %v8257_v19, 7 }
 0x3e2   : > { %10607 = vmatmul.msk.bf16.gmra.mxu0 %vm5613_vm11, %v10724_v5  ;;  %v6530_v47 = vpop.f32.mrf.mxu3  ;;  %v7941_v5 = vpack.c.b16 %v7912_v30, %v7911_v54  ;;  %v7486_v54 = vld [vmem:[#allocation3 + $0x84] sm:$0xf] }
 0x3e3   : > { %v5910_v24 = vpop.f32.mrf.mxu2  ;;  %v13336_v6 = vadd.f32 %v6530_v47, %v5909_v59  ;;  %v7611_v14 = vrot.slane %v7610_v51, 4  ;;  %v8564_v55 = vpack.c.b16 %v8535_v8, %v8534_v26  ;;  %v7631_v15 = vshrl.u32 %v7486_v54, 16  ;;  %v10725_v51 = vld [vmem:[#allocation3 + $0x80] sm:$0xff] }
 0x3e4   : > { %v5911_v30 = vadd.f32 %v5910_v24, %v13164_v25  ;;  %v7485_v25 = vld [vmem:[#allocation3 + $0x80] sm:$0xf]  ;;  %v7627_v24 = vshll.u32 %v7486_v54, 16  ;;  %v7606_v7 = vsel %vm11101_vm8, %v7601_v3, %v13332_v42  ;;  %v7187_v8 = vadd.f32 %v12974_v36, %v13042_v12  ;;  %v7487_v3 = vld [vmem:[#allocation3 + $0x88] sm:$0x1] }
 0x3e5   : > { %v13345_v59 = vpop.f32.mrf.mxu1  ;;  %v13350_v22 = vpop.f32.mrf.mxu0  ;;  %v7616_v10 = vsel %vm11101_vm8, %v7611_v14, %v7615_v1  ;;  %v7618_v14 = vshrl.u32 %v7485_v25, 16  ;;  %v7621_v1 = vshll.u32 %v7485_v25, 16  ;;  %v10510_v12 = vrot.slane %v8243_v37, 11 }
 0x3e6   : > { %14223 = vst [vmem:[#allocation20_spill] sm:$0xff] %v13350_v22  ;;  %v8260_v22 = vshll.u32 %v8139_v63, 16  ;;  %v7914_v16 = vunpack.c.l.b16 %v7616_v10 }
 0x3e8   : > { %10493 = vmatmul.msk.bf16.gmra.mxu2 %vm5613_vm11, %v7941_v5  ;;  %v8248_v5 = vshrl.u32 %v8138_v40, 16  ;;  %v8262_v57 = vor.u32 %v8260_v22, %v8259_v17 }
 0x3ea   : > { %v6532_v47 = vpop.f32.mrf.mxu3 }
 0x3eb   : > { %v5913_v33 = vpop.f32.mrf.mxu2  ;;  %v13348_v29 = vadd.f32 %v6532_v47, %v5911_v30  ;;  %v8250_v30 = vrot.slane %v8248_v5, 7  ;;  %v8251_v47 = vshll.u32 %v8138_v40, 16  ;;  %v10714_v40 = vld [vmem:[#allocation3 + $0xe0] sm:$0xff]  ;;  %v7913_v5 = vunpack.c.l.b16 %v7606_v7  ;;  %v8142_v7 = vld [vmem:[#allocation3 + $0x9c] sm:$0xf] }
 0x3ec   : > { %v5914_v26 = vadd.f32 %v5913_v33, %v13178_v20  ;;  %v7620_v20 = vrot.slane %v7618_v14, 4  ;;  %v7623_v33 = vrot.slane %v7621_v1, 5 }
 0x3ed   : > { %14222 = vst [vmem:[#allocation14_spill] sm:$0xff] %v13348_v29  ;;  %v7361_v19 = vpop.f32.mrf.mxu1  ;;  %v7633_v29 = vrot.slane %v7631_v15, 4  ;;  %v8253_v10 = vor.u32 %v8251_v47, %v8250_v30  ;;  %v7942_v25 = vpack.c.b16 %v7914_v16, %v7913_v5  ;;  %v13372_v15 = vpop.f32.mrf.mxu0  ;;  %v8141_v16 = vld [vmem:[#allocation3 + $0x98] sm:$0xf] }
 0x3ee   : > { %v13364_v42 = vadd.f32 %v7361_v19, %v7187_v8  ;;  %v7624_v8 = vor.u32 %v7623_v33, %v7620_v20 }
 0x3ef   : > { %10526 = vmatmul.msk.bf16.gmra.mxu3 %vm5613_vm11, %v8564_v55  ;;  %v13362_v55 = vrot.slane %v7627_v24, 5  ;;  %v7637_v24 = vshll.u32 %v7487_v3, 16  ;;  %v8254_v37 = vsel %vm10929_vm5, %v10510_v12, %v8253_v10  ;;  %v7489_v3 = vld [vmem:[#allocation3 + $0x9c] sm:$0xf]  ;;  %v8270_v12 = vshrl.u32 %v8141_v16, 16 }
 0x3f0   : > { %10482 = vmatmul.msk.bf16.gmra.mxu1 %vm5613_vm11, %v10714_v40  ;;  %v8536_v5 = vunpack.c.l.b16 %v8254_v37  ;;  %v7655_v33 = vshrl.u32 %v7489_v3, 16 }
 0x3f1   : > { %v7634_v17 = vor.u32 %v7633_v29, %v13362_v55  ;;  %v8272_v37 = vrot.slane %v8270_v12, 7 }
 0x3f2   : > { %10608 = vmatmul.msk.bf16.gmra.mxu0 %vm5613_vm11, %v10725_v51  ;;  %v6535_v63 = vpop.f32.mrf.mxu3  ;;  %v8255_v51 = vrot.slane %v8250_v30, 4  ;;  %v7188_v30 = vadd.f32 %v12998_v52, %v13069_v50  ;;  %v7625_v52 = vrot.slane %v7624_v8, 4  ;;  %v8140_v50 = vld [vmem:[#allocation3 + $0x94] sm:$0x8]  ;;  %v7657_v12 = vrot.slane %v7655_v33, 4 }
 0x3f3   : > { %v5915_v54 = vpop.f32.mrf.mxu2  ;;  %v13366_v36 = vadd.f32 %v6535_v63, %v5914_v26  ;;  %v7635_v29 = vrot.slane %v7634_v17, 4  ;;  %v7639_v26 = vrot.slane %v7637_v24, 5  ;;  %v8265_v24 = vshrl.u32 %v8140_v50, 16  ;;  %v7490_v50 = vld [vmem:[#allocation3 + $0xa0] sm:$0x1] }
 0x3f4   : > { %v8263_v22 = vsel %vm10929_vm5, %v8255_v51, %v8262_v57  ;;  %v5916_v1 = vadd.f32 %v5915_v54, %v13196_v38  ;;  %v8279_v57 = vshrl.u32 %v8142_v7, 16  ;;  %v7488_v38 = vld [vmem:[#allocation3 + $0x98] sm:$0xf]  ;;  %v7651_v54 = vshll.u32 %v7489_v3, 16 }
 0x3f5   : > { %v8537_v47 = vunpack.c.l.b16 %v8263_v22  ;;  %v7363_v14 = vpop.f32.mrf.mxu1  ;;  %v10726_v22 = vld [vmem:[#allocation3 + $0x98] sm:$0xff]  ;;  %v7630_v17 = vsel %vm11101_vm8, %v7625_v52, %v13362_v55  ;;  %v13390_v8 = vpop.f32.mrf.mxu0  ;;  %v7661_v33 = vshll.u32 %v7490_v50, 16  ;;  %v7492_v50 = vld [vmem:[#allocation3 + $0xb4] sm:$0xf] }
 0x3f6   : > { %v13380_v40 = vadd.f32 %v7363_v14, %v7188_v30  ;;  %v8281_v20 = vrot.slane %v8279_v57, 7  ;;  %v8273_v30 = vshll.u32 %v8141_v16, 16  ;;  %v7189_v14 = vadd.f32 %v13025_v35, %v13081_v21 }
 0x3f7   : > { %v8565_v10 = vpack.c.b16 %v8537_v47, %v8536_v5  ;;  %v8282_v47 = vshll.u32 %v8142_v7, 16  ;;  %v13396_v55 = vrot.slane %v7651_v54, 5  ;;  %v10715_v7 = vld [vmem:[#allocation3 + $0xf8] sm:$0xff]  ;;  %v7915_v52 = vunpack.c.l.b16 %v7630_v17  ;;  %v8145_v17 = vld [vmem:[#allocation3 + $0xb4] sm:$0xf] }
 0x3f8   : > { %10494 = vmatmul.msk.bf16.gmra.mxu2 %vm5613_vm11, %v7942_v25  ;;  %v7640_v25 = vsel %vm11101_vm8, %v7635_v29, %v7639_v26  ;;  %v7642_v29 = vshrl.u32 %v7488_v38, 16  ;;  %v7645_v26 = vshll.u32 %v7488_v38, 16  ;;  %v10511_v21 = vrot.slane %v8265_v24, 11 }
 0x3f9   : > { %v8284_v3 = vor.u32 %v8282_v47, %v8281_v20  ;;  %v7658_v54 = vor.u32 %v7657_v12, %v13396_v55  ;;  %v7190_v24 = vadd.f32 %v13051_v13, %v13101_v39 }
 0x3fa   : > { %v6537_v63 = vpop.f32.mrf.mxu3 }
 0x3fb   : > { %v5918_v19 = vpop.f32.mrf.mxu2  ;;  %v13382_v51 = vadd.f32 %v6537_v63, %v5916_v1  ;;  %v7916_v1 = vunpack.c.l.b16 %v7640_v25  ;;  %v8275_v25 = vor.u32 %v8273_v30, %v8272_v37 }
 0x3fc   : > { %v5919_v63 = vadd.f32 %v5918_v19, %v13215_v43  ;;  %v7644_v43 = vrot.slane %v7642_v29, 4  ;;  %v7647_v19 = vrot.slane %v7645_v26, 5 }
 0x3fd   : > { %v7366_v57 = vpop.f32.mrf.mxu1  ;;  %v7943_v38 = vpack.c.b16 %v7916_v1, %v7915_v52  ;;  %v8276_v47 = vsel %vm10929_vm5, %v10511_v21, %v8275_v25  ;;  %v13412_v12 = vpop.f32.mrf.mxu0 }
 0x3fe   : > { %v13398_v16 = vadd.f32 %v7366_v57, %v7189_v14  ;;  %v7648_v30 = vor.u32 %v7647_v19, %v7644_v43  ;;  %v8144_v14 = vld [vmem:[#allocation3 + $0xb0] sm:$0xf]  ;;  %v7659_v57 = vrot.slane %v7658_v54, 4  ;;  %v8538_v52 = vunpack.c.l.b16 %v8276_v47 }
 0x3ff   : > { %10527 = vmatmul.msk.bf16.gmra.mxu3 %vm5613_vm11, %v8565_v10  ;;  %v8292_v13 = vshrl.u32 %v8144_v14, 16  ;;  %v7675_v43 = vshll.u32 %v7492_v50, 16  ;;  %v7679_v19 = vshrl.u32 %v7492_v50, 16 }
 0x400   : > { %10483 = vmatmul.msk.bf16.gmra.mxu1 %vm5613_vm11, %v10715_v7  ;;  %v7649_v25 = vrot.slane %v7648_v30, 4  ;;  %v7191_v30 = vadd.f32 %v13072_v41, %v13115_v58 }
 0x401   : > { %v8294_v47 = vrot.slane %v8292_v13, 7  ;;  %v13428_v50 = vrot.slane %v7675_v43, 5 }
 0x402   : > { %10609 = vmatmul.msk.bf16.gmra.mxu0 %vm5613_vm11, %v10726_v22  ;;  %v6540_v10 = vpop.f32.mrf.mxu3  ;;  %v8277_v22 = vrot.slane %v8272_v37, 4  ;;  %v7654_v54 = vsel %vm11101_vm8, %v7649_v25, %v13396_v55  ;;  %v7681_v55 = vrot.slane %v7679_v19, 4  ;;  %v7493_v25 = vld [vmem:[#allocation3 + $0xb8] sm:$0x1] }
 0x403   : > { %v5920_v5 = vpop.f32.mrf.mxu2  ;;  %v13400_v35 = vadd.f32 %v6540_v10, %v5919_v63  ;;  %v7663_v63 = vrot.slane %v7661_v33, 5  ;;  %v7917_v13 = vunpack.c.l.b16 %v7654_v54  ;;  %v8148_v54 = vld [vmem:[#allocation3 + $0xcc] sm:$0xf] }
 0x404   : > { %v8285_v20 = vsel %vm10929_vm5, %v8277_v22, %v8284_v3  ;;  %v5921_v29 = vadd.f32 %v5920_v5, %v13232_v32  ;;  %v8301_v3 = vshrl.u32 %v8145_v17, 16  ;;  %v8143_v22 = vld [vmem:[#allocation3 + $0xac] sm:$0x8]  ;;  %v7682_v19 = vor.u32 %v7681_v55, %v13428_v50 }
 0x405   : > { %v8539_v37 = vunpack.c.l.b16 %v8285_v20  ;;  %v7368_v1 = vpop.f32.mrf.mxu1  ;;  %v7664_v32 = vsel %vm11101_vm8, %v7659_v57, %v7663_v63  ;;  %v10727_v20 = vld [vmem:[#allocation3 + $0xb0] sm:$0xff]  ;;  %v8287_v33 = vshrl.u32 %v8143_v22, 16 }
 0x406   : > { %v13414_v7 = vadd.f32 %v7368_v1, %v7190_v24  ;;  %v8303_v5 = vrot.slane %v8301_v3, 7  ;;  %v8295_v24 = vshll.u32 %v8144_v14, 16  ;;  %v7918_v1 = vunpack.c.l.b16 %v7664_v32  ;;  %v10716_v14 = vld [vmem:[#allocation3 + $0x110] sm:$0xff] }
 0x407   : > { %v8566_v39 = vpack.c.b16 %v8539_v37, %v8538_v52  ;;  %v8304_v37 = vshll.u32 %v8145_v17, 16  ;;  %v10512_v58 = vrot.slane %v8287_v33, 11  ;;  %v8299_v32 = vrot.slane %v8294_v47, 4 }
 0x408   : > { %10495 = vmatmul.msk.bf16.gmra.mxu2 %vm5613_vm11, %v7943_v38  ;;  %v7491_v38 = vld [vmem:[#allocation3 + $0xb0] sm:$0xf]  ;;  %v8297_v22 = vor.u32 %v8295_v24, %v8294_v47  ;;  %v7192_v47 = vadd.f32 %v13089_v48, %v13135_v62  ;;  %v8146_v62 = vld [vmem:[#allocation3 + $0xc4] sm:$0x8] }
 0x409   : > { %v7669_v57 = vshll.u32 %v7491_v38, 16  ;;  %v8306_v52 = vor.u32 %v8304_v37, %v8303_v5 }
 0x40a   : > { %v6542_v10 = vpop.f32.mrf.mxu3  ;;  %v8298_v33 = vsel %vm10929_vm5, %v10512_v58, %v8297_v22 }
 0x40b   : > { %v5923_v26 = vpop.f32.mrf.mxu2  ;;  %v13416_v21 = vadd.f32 %v6542_v10, %v5921_v29  ;;  %v7666_v29 = vshrl.u32 %v7491_v38, 16  ;;  %v13434_v38 = vpop.f32.mrf.mxu0  ;;  %v7671_v5 = vrot.slane %v7669_v57, 5  ;;  %v8307_v43 = vsel %vm10929_vm5, %v8299_v32, %v8306_v52 }
 0x40c   : > { %v5924_v3 = vadd.f32 %v5923_v26, %v13247_v4  ;;  %v7944_v4 = vpack.c.b16 %v7918_v1, %v7917_v13  ;;  %v8541_v24 = vunpack.c.l.b16 %v8307_v43  ;;  %v8323_v52 = vshrl.u32 %v8148_v54, 16  ;;  %v7495_v13 = vld [vmem:[#allocation3 + $0xcc] sm:$0xf] }
 0x40d   : > { %v7371_v63 = vpop.f32.mrf.mxu1  ;;  %v7668_v26 = vrot.slane %v7666_v29, 4  ;;  %v10728_v43 = vld [vmem:[#allocation3 + $0xc8] sm:$0xff] }
 0x40f   : > { %10528 = vmatmul.msk.bf16.gmra.mxu3 %vm5613_vm11, %v8566_v39  ;;  %v13430_v39 = vadd.f32 %v7371_v63, %v7191_v30  ;;  %v7672_v37 = vor.u32 %v7671_v5, %v7668_v26  ;;  %v8147_v30 = vld [vmem:[#allocation3 + $0xc8] sm:$0xf]  ;;  %v7683_v63 = vrot.slane %v7682_v19, 4  ;;  %v7703_v26 = vshrl.u32 %v7495_v13, 16 }
 0x410   : > { %10484 = vmatmul.msk.bf16.gmra.mxu1 %vm5613_vm11, %v10716_v14  ;;  %v8314_v58 = vshrl.u32 %v8147_v30, 16 }
 0x411   : > { %v7673_v48 = vrot.slane %v7672_v37, 4  ;;  %v7193_v37 = vadd.f32 %v13108_v9, %v13149_v49 }
 0x412   : > { %10610 = vmatmul.msk.bf16.gmra.mxu0 %vm5613_vm11, %v10727_v20  ;;  %v6545_v17 = vpop.f32.mrf.mxu3  ;;  %v7685_v20 = vshll.u32 %v7493_v25, 16 }
 0x413   : > { %v5925_v10 = vpop.f32.mrf.mxu2  ;;  %v13432_v41 = vadd.f32 %v6545_v17, %v5924_v3  ;;  %v8540_v17 = vunpack.c.l.b16 %v8298_v33  ;;  %v13452_v5 = vpop.f32.mrf.mxu0  ;;  %v7678_v19 = vsel %vm11101_vm8, %v7673_v48, %v13428_v50  ;;  %v8316_v33 = vrot.slane %v8314_v58, 7  ;;  %v7496_v48 = vld [vmem:[#allocation3 + $0xd0] sm:$0x1] }
 0x414   : > { %v5926_v29 = vadd.f32 %v5925_v10, %v13258_v60  ;;  %v7687_v3 = vrot.slane %v7685_v20, 5  ;;  %v7494_v60 = vld [vmem:[#allocation3 + $0xc8] sm:$0xf]  ;;  %v7699_v10 = vshll.u32 %v7495_v13, 16  ;;  %v8309_v20 = vshrl.u32 %v8146_v62, 16 }
 0x415   : > { %v7373_v1 = vpop.f32.mrf.mxu1  ;;  %v8567_v22 = vpack.c.b16 %v8541_v24, %v8540_v17  ;;  %v8326_v24 = vshll.u32 %v8148_v54, 16  ;;  %v7705_v50 = vrot.slane %v7703_v26, 4  ;;  %v7919_v58 = vunpack.c.l.b16 %v7678_v19 }
 0x416   : > { %v13446_v55 = vadd.f32 %v7373_v1, %v7192_v47  ;;  %v7688_v32 = vsel %vm11101_vm8, %v7683_v63, %v7687_v3  ;;  %v8317_v47 = vshll.u32 %v8147_v30, 16  ;;  %v7693_v63 = vshll.u32 %v7494_v60, 16  ;;  %v10717_v30 = vld [vmem:[#allocation3 + $0x128] sm:$0xff] }
 0x417   : > { %v7920_v1 = vunpack.c.l.b16 %v7688_v32  ;;  %v13462_v13 = vrot.slane %v7699_v10, 5  ;;  %v10513_v49 = vrot.slane %v8309_v20, 11  ;;  %v8321_v32 = vrot.slane %v8316_v33, 4 }
 0x418   : > { %10496 = vmatmul.msk.bf16.gmra.mxu2 %vm5613_vm11, %v7944_v4  ;;  %v8325_v4 = vrot.slane %v8323_v52, 7  ;;  %v8319_v62 = vor.u32 %v8317_v47, %v8316_v33  ;;  %v7709_v26 = vshll.u32 %v7496_v48, 16  ;;  %v14224_v33 = vld [vmem:[#allocation18_spill] sm:$0xff]  ;;  %v14225_v47 = vld [vmem:[#allocation15_spill] sm:$0xff] }
 0x419   : > { %v7706_v10 = vor.u32 %v7705_v50, %v13462_v13 }
 0x41a   : > { %v6547_v14 = vpop.f32.mrf.mxu3  ;;  %v8328_v17 = vor.u32 %v8326_v24, %v8325_v4  ;;  %v8320_v19 = vsel %vm10929_vm5, %v10513_v49, %v8319_v62  ;;  %v7194_v24 = vadd.f32 %v14225_v47, %v14224_v33  ;;  %v7711_v50 = vrot.slane %v7709_v26, 5  ;;  %v7498_v49 = vld [vmem:[#allocation3 + $0xe4] sm:$0xf] }
 0x41b   : > { %v5928_v57 = vpop.f32.mrf.mxu2  ;;  %v13448_v25 = vadd.f32 %v6547_v14, %v5926_v29  ;;  %v7690_v29 = vshrl.u32 %v7494_v60, 16  ;;  %v7945_v60 = vpack.c.b16 %v7920_v1, %v7919_v58  ;;  %v13475_v20 = vpop.f32.mrf.mxu0  ;;  %v8542_v48 = vunpack.c.l.b16 %v8320_v19  ;;  %v10729_v26 = vld [vmem:[#allocation3 + $0xe0] sm:$0xff] }
 0x41c   : > { %v5929_v52 = vadd.f32 %v5928_v57, %v13271_v11  ;;  %v7695_v57 = vrot.slane %v7693_v63, 5  ;;  %v8329_v4 = vsel %vm10929_vm5, %v8321_v32, %v8328_v17  ;;  %v7707_v17 = vrot.slane %v7706_v10, 4 }
 0x41d   : > { %v7376_v3 = vpop.f32.mrf.mxu1  ;;  %v7692_v11 = vrot.slane %v7690_v29, 4  ;;  %v8150_v29 = vld [vmem:[#allocation3 + $0xe0] sm:$0xf]  ;;  %v7727_v10 = vshrl.u32 %v7498_v49, 16 }
 0x41e   : > { %v8336_v32 = vshrl.u32 %v8150_v29, 16 }
 0x41f   : > { %10529 = vmatmul.msk.bf16.gmra.mxu3 %vm5613_vm11, %v8567_v22  ;;  %v13464_v22 = vadd.f32 %v7376_v3, %v7193_v37  ;;  %v8543_v37 = vunpack.c.l.b16 %v8329_v4  ;;  %v7696_v1 = vor.u32 %v7695_v57, %v7692_v11  ;;  %v8149_v4 = vld [vmem:[#allocation3 + $0xdc] sm:$0x8]  ;;  %v7712_v11 = vsel %vm11101_vm8, %v7707_v17, %v7711_v50 }
 0x420   : > { %10485 = vmatmul.msk.bf16.gmra.mxu1 %vm5613_vm11, %v10717_v30  ;;  %v8331_v47 = vshrl.u32 %v8149_v4, 16  ;;  %v7922_v17 = vunpack.c.l.b16 %v7712_v11  ;;  %v7499_v4 = vld [vmem:[#allocation3 + $0xe8] sm:$0x1] }
 0x421   : > { %v7697_v33 = vrot.slane %v7696_v1, 4  ;;  %v14227_v1 = vld [vmem:[#allocation16_spill] sm:$0xff] }
 0x422   : > { %10611 = vmatmul.msk.bf16.gmra.mxu0 %vm5613_vm11, %v10728_v43  ;;  %v6550_v54 = vpop.f32.mrf.mxu3  ;;  %v8151_v43 = vld [vmem:[#allocation3 + $0xe4] sm:$0xf]  ;;  %v10514_v11 = vrot.slane %v8331_v47, 11  ;;  %v14229_v47 = vld [vmem:[#allocation17_spill] sm:$0xff] }
 0x423   : > { %v5930_v14 = vpop.f32.mrf.mxu2  ;;  %v13466_v9 = vadd.f32 %v6550_v54, %v5929_v52  ;;  %v8345_v30 = vshrl.u32 %v8151_v43, 16  ;;  %v7702_v19 = vsel %vm11101_vm8, %v7697_v33, %v13462_v13  ;;  %v7729_v13 = vrot.slane %v7727_v10, 4  ;;  %v13496_v33 = vpop.f32.mrf.mxu0 }
 0x424   : > { %v5931_v3 = vadd.f32 %v5930_v14, %v13287_v56  ;;  %v7497_v56 = vld [vmem:[#allocation3 + $0xe0] sm:$0xf]  ;;  %v7723_v14 = vshll.u32 %v7498_v49, 16 }
 0x425   : > { %v7378_v63 = vpop.f32.mrf.mxu1  ;;  %v8347_v57 = vrot.slane %v8345_v30, 7  ;;  %v7714_v50 = vshrl.u32 %v7497_v56, 16  ;;  %v7717_v30 = vshll.u32 %v7497_v56, 16 }
 0x426   : > { %v13480_v54 = vadd.f32 %v7378_v63, %v7194_v24  ;;  %v8338_v24 = vrot.slane %v8336_v32, 7  ;;  %v8339_v63 = vshll.u32 %v8150_v29, 16 }
 0x428   : > { %10497 = vmatmul.msk.bf16.gmra.mxu2 %vm5613_vm11, %v7945_v60  ;;  %v8568_v60 = vpack.c.b16 %v8543_v37, %v8542_v48  ;;  %v8348_v37 = vshll.u32 %v8151_v43, 16  ;;  %v10718_v43 = vld [vmem:[#allocation3 + $0x140] sm:$0xff]  ;;  %v8341_v56 = vor.u32 %v8339_v63, %v8338_v24 }
 0x42a   : > { %v6552_v58 = vpop.f32.mrf.mxu3 }
 0x42b   : > { %v5933_v52 = vpop.f32.mrf.mxu2  ;;  %v13482_v62 = vadd.f32 %v6552_v58, %v5931_v3  ;;  %v7195_v3 = vadd.f32 %v14227_v1, %v13183_v23  ;;  %v7921_v23 = vunpack.c.l.b16 %v7702_v19  ;;  %v8343_v1 = vrot.slane %v8338_v24, 4  ;;  %v8154_v19 = vld [vmem:[#allocation3 + $0xfc] sm:$0xf] }
 0x42c   : > { %v5934_v48 = vadd.f32 %v5933_v52, %v13301_v2  ;;  %v7716_v52 = vrot.slane %v7714_v50, 4  ;;  %v7196_v24 = vadd.f32 %v14229_v47, %v13201_v45  ;;  %v10730_v47 = vld [vmem:[#allocation3 + $0xf8] sm:$0xff] }
 0x42d   : > { %14226 = vst [vmem:[#allocation18_spill] sm:$0xff] %v13482_v62  ;;  %v7381_v58 = vpop.f32.mrf.mxu1  ;;  %v13494_v62 = vrot.slane %v7723_v14, 5  ;;  %v7946_v2 = vpack.c.b16 %v7922_v17, %v7921_v23  ;;  %v8153_v17 = vld [vmem:[#allocation3 + $0xf8] sm:$0xf] }
 0x42e   : > { %v13498_v29 = vadd.f32 %v7381_v58, %v7195_v3  ;;  %v8342_v3 = vsel %vm10929_vm5, %v10514_v11, %v8341_v56  ;;  %v8358_v11 = vshrl.u32 %v8153_v17, 16  ;;  %v13516_v56 = vpop.f32.mrf.mxu0 }
 0x42f   : > { %10530 = vmatmul.msk.bf16.gmra.mxu3 %vm5613_vm11, %v8568_v60  ;;  %v8350_v60 = vor.u32 %v8348_v37, %v8347_v57  ;;  %v7719_v57 = vrot.slane %v7717_v30, 5  ;;  %v7730_v10 = vor.u32 %v7729_v13, %v13494_v62  ;;  %v7733_v37 = vshll.u32 %v7499_v4, 16 }
 0x430   : > { %14228 = vst [vmem:[#allocation15_spill] sm:$0xff] %v13498_v29  ;;  %10486 = vmatmul.msk.bf16.gmra.mxu1 %vm5613_vm11, %v10718_v43  ;;  %v8367_v13 = vshrl.u32 %v8154_v19, 16  ;;  %v8544_v4 = vunpack.c.l.b16 %v8342_v3 }
 0x431   : > { %v8351_v14 = vsel %vm10929_vm5, %v8343_v1, %v8350_v60  ;;  %v7720_v58 = vor.u32 %v7719_v57, %v7716_v52  ;;  %v7731_v60 = vrot.slane %v7730_v10, 4  ;;  %v7735_v43 = vrot.slane %v7733_v37, 5  ;;  %v7501_v1 = vld [vmem:[#allocation3 + $0xfc] sm:$0xf]  ;;  %v8152_v57 = vld [vmem:[#allocation3 + $0xf4] sm:$0x8] }
 0x432   : > { %10612 = vmatmul.msk.bf16.gmra.mxu0 %vm5613_vm11, %v10729_v26  ;;  %v6555_v32 = vpop.f32.mrf.mxu3  ;;  %v8545_v63 = vunpack.c.l.b16 %v8351_v14  ;;  %v7500_v14 = vld [vmem:[#allocation3 + $0xf8] sm:$0xf]  ;;  %v7747_v10 = vshll.u32 %v7501_v1, 16  ;;  %v7751_v37 = vshrl.u32 %v7501_v1, 16 }
 0x433   : > { %v5935_v49 = vpop.f32.mrf.mxu2  ;;  %v13500_v26 = vadd.f32 %v6555_v32, %v5934_v48  ;;  %v7721_v52 = vrot.slane %v7720_v58, 4  ;;  %v9004_v58 = vld [vmem:[#allocation3 + $0x38] sm:$0xf] }
 0x434   : > { %v5936_v30 = vadd.f32 %v5935_v49, %v13317_v0  ;;  %v8569_v45 = vpack.c.b16 %v8545_v63, %v8544_v4  ;;  %v7736_v0 = vsel %vm11101_vm8, %v7731_v60, %v7735_v43  ;;  %v8369_v49 = vrot.slane %v8367_v13, 7 }
 0x435   : > { %v7383_v50 = vpop.f32.mrf.mxu1  ;;  %v7726_v3 = vsel %vm11101_vm8, %v7721_v52, %v13494_v62  ;;  %v8370_v63 = vshll.u32 %v8154_v19, 16  ;;  %v7924_v60 = vunpack.c.l.b16 %v7736_v0  ;;  %v7738_v43 = vshrl.u32 %v7500_v14, 16  ;;  %v10719_v19 = vld [vmem:[#allocation3 + $0x158] sm:$0xff] }
 0x436   : > { %v13512_v32 = vadd.f32 %v7383_v50, %v7196_v24  ;;  %v8353_v24 = vshrl.u32 %v8152_v57, 16  ;;  %v8360_v50 = vrot.slane %v8358_v11, 7  ;;  %v7741_v13 = vshll.u32 %v7500_v14, 16  ;;  %v7502_v57 = vld [vmem:[#allocation3 + $0x100] sm:$0x1] }
 0x437   : > { %v8372_v29 = vor.u32 %v8370_v63, %v8369_v49  ;;  %v7753_v62 = vrot.slane %v7751_v37, 4  ;;  %v7923_v52 = vunpack.c.l.b16 %v7726_v3  ;;  %v13538_v3 = vpop.f32.mrf.mxu0 }
 0x438   : > { %10498 = vmatmul.msk.bf16.gmra.mxu2 %vm5613_vm11, %v7946_v2  ;;  %14230 = vst [vmem:[#allocation16_spill] sm:$0xff] %v13512_v32  ;;  %v10515_v0 = vrot.slane %v8353_v24, 11  ;;  %v8365_v14 = vrot.slane %v8360_v50, 4  ;;  %v7743_v49 = vrot.slane %v7741_v13, 5 }
 0x43a   : > { %v6557_v23 = vpop.f32.mrf.mxu3  ;;  %v8373_v37 = vsel %vm10929_vm5, %v8365_v14, %v8372_v29  ;;  %v8156_v29 = vld [vmem:[#allocation3 + $0x110] sm:$0xf] }
 0x43b   : > { %v5938_v48 = vpop.f32.mrf.mxu2  ;;  %v13514_v2 = vadd.f32 %v6557_v23, %v5936_v30  ;;  %v8361_v30 = vshll.u32 %v8153_v17, 16  ;;  %v14232_v23 = vld [vmem:[#allocation19_spill] sm:$0xff] }
 0x43c   : > { %v7197_v4 = vadd.f32 %v14232_v23, %v13218_v18  ;;  %v9053_v18 = vshrl.u32 %v9004_v58, 16 }
 0x43d   : > { %14231 = vst [vmem:[#allocation17_spill] sm:$0xff] %v13514_v2  ;;  %v7386_v1 = vpop.f32.mrf.mxu1  ;;  %v13528_v2 = vrot.slane %v7747_v10, 5  ;;  %v9056_v10 = vshll.u32 %v9004_v58, 16 }
 0x43e   : > { %v13530_v11 = vadd.f32 %v7386_v1, %v7197_v4  ;;  %v7757_v4 = vshll.u32 %v7502_v57, 16  ;;  %v8157_v1 = vld [vmem:[#allocation3 + $0x114] sm:$0xf] }
 0x43f   : > { %10531 = vmatmul.msk.bf16.gmra.mxu3 %vm5613_vm11, %v8569_v45  ;;  %v5939_v45 = vadd.f32 %v5938_v48, %v13329_v53  ;;  %v7947_v53 = vpack.c.b16 %v7924_v60, %v7923_v52  ;;  %v7740_v48 = vrot.slane %v7738_v43, 4  ;;  %v7754_v63 = vor.u32 %v7753_v62, %v13528_v2  ;;  %v14235_v60 = vld [vmem:[#allocation4_spill] sm:$0xff] }
 0x440   : > { %14233 = vst [vmem:[#allocation19_spill] sm:$0xff] %v13530_v11  ;;  %10487 = vmatmul.msk.bf16.gmra.mxu1 %vm5613_vm11, %v10719_v19  ;;  %v7198_v58 = vadd.f32 %v14235_v60, %v13237_v31  ;;  %v8547_v43 = vunpack.c.l.b16 %v8373_v37  ;;  %v7759_v57 = vrot.slane %v7757_v4, 5  ;;  %v8389_v14 = vshrl.u32 %v8157_v1, 16  ;;  %v7504_v31 = vld [vmem:[#allocation3 + $0x114] sm:$0xf] }
 0x441   : > { %v7744_v13 = vor.u32 %v7743_v49, %v7740_v48  ;;  %v7755_v52 = vrot.slane %v7754_v63, 4  ;;  %v8380_v48 = vshrl.u32 %v8156_v29, 16  ;;  %v8155_v60 = vld [vmem:[#allocation3 + $0x10c] sm:$0x8]  ;;  %v7503_v63 = vld [vmem:[#allocation3 + $0x110] sm:$0xf] }
 0x442   : > { %10613 = vmatmul.msk.bf16.gmra.mxu0 %vm5613_vm11, %v10730_v47  ;;  %v6560_v17 = vpop.f32.mrf.mxu3  ;;  %v8363_v47 = vor.u32 %v8361_v30, %v8360_v50  ;;  %v9005_v50 = vld [vmem:[#allocation3 + $0x3c] sm:$0xf]  ;;  %v13543_v30 = vrot.slane %v9053_v18, 4  ;;  %v7771_v4 = vshll.u32 %v7504_v31, 16 }
 0x443   : > { %v5940_v32 = vpop.f32.mrf.mxu2  ;;  %v13532_v23 = vadd.f32 %v6560_v17, %v5939_v45  ;;  %v13547_v45 = vrot.slane %v9056_v10, 5  ;;  %v9062_v11 = vshll.u32 %v9005_v50, 16  ;;  %v7745_v10 = vrot.slane %v7744_v13, 4 }
 0x444   : > { %v8364_v24 = vsel %vm10929_vm5, %v10515_v0, %v8363_v47  ;;  %v5941_v19 = vadd.f32 %v5940_v32, %v13345_v59  ;;  %v7760_v59 = vsel %vm11101_vm8, %v7755_v52, %v7759_v57  ;;  %v8391_v32 = vrot.slane %v8389_v14, 7  ;;  %v13565_v57 = vpop.f32.mrf.mxu0  ;;  %v14239_v14 = vld [vmem:[#allocation5_spill] sm:$0xff] }
 0x445   : > { %14234 = vst [vmem:[#allocation21_spill] sm:$0xff] %v13532_v23  ;;  %v7388_v62 = vpop.f32.mrf.mxu1  ;;  %v8546_v47 = vunpack.c.l.b16 %v8364_v24  ;;  %v9059_v24 = vor.u32 %v13547_v45, %v13543_v30  ;;  %v8375_v13 = vshrl.u32 %v8155_v60, 16  ;;  %v8392_v52 = vshll.u32 %v8157_v1, 16  ;;  %v10720_v1 = vld [vmem:[#allocation3 + $0x170] sm:$0xff] }
 0x446   : > { %14238 = vst [vmem:[#allocation23_spill] sm:$0xff] %v13565_v57  ;;  %v7765_v30 = vshll.u32 %v7503_v63, 16 }
 0x447   : > { %v8570_v49 = vpack.c.b16 %v8547_v43, %v8546_v47  ;;  %v7750_v43 = vsel %vm11101_vm8, %v7745_v10, %v13528_v2  ;;  %v7926_v47 = vunpack.c.l.b16 %v7760_v59 }
 0x448   : > { %10499 = vmatmul.msk.bf16.gmra.mxu2 %vm5613_vm11, %v7947_v53  ;;  %v13550_v53 = vadd.f32 %v7388_v62, %v7198_v58  ;;  %v7775_v58 = vshrl.u32 %v7504_v31, 16  ;;  %v13560_v62 = vrot.slane %v9062_v11, 5  ;;  %v7762_v31 = vshrl.u32 %v7503_v63, 16 }
 0x449   : > { %v10516_v63 = vrot.slane %v8375_v13, 11 }
 0x44a   : > { %14236 = vst [vmem:[#allocation4_spill] sm:$0xff] %v13550_v53  ;;  %v6562_v0 = vpop.f32.mrf.mxu3  ;;  %v9006_v53 = vld [vmem:[#allocation3 + $0x40] sm:$0x1]  ;;  %v7777_v2 = vrot.slane %v7775_v58, 4  ;;  %v7767_v58 = vrot.slane %v7765_v30, 5 }
 0x44b   : > { %v8015_v17 = vpop.f32.mrf.mxu2  ;;  %v13553_v37 = vadd.f32 %v6562_v0, %v5941_v19  ;;  %v9066_v19 = vshrl.u32 %v9005_v50, 16  ;;  %v7199_v0 = vadd.f32 %v14239_v14, %v13250_v44  ;;  %v8383_v50 = vshll.u32 %v8156_v29, 16  ;;  %v8159_v30 = vld [vmem:[#allocation3 + $0x128] sm:$0xf] }
 0x44c   : > { %v8095_v18 = vadd.f32 %v8015_v17, %v13364_v42  ;;  %v10731_v42 = vld [vmem:[#allocation3 + $0x110] sm:$0xff]  ;;  %v8382_v17 = vrot.slane %v8380_v48, 7  ;;  %v7925_v44 = vunpack.c.l.b16 %v7750_v43 }
 0x44d   : > { %14237 = vst [vmem:[#allocation22_spill] sm:$0xff] %v13553_v37  ;;  %v7391_v11 = vpop.f32.mrf.mxu1  ;;  %v13570_v37 = vrot.slane %v7771_v4, 5  ;;  %v9068_v14 = vrot.slane %v9066_v19, 4  ;;  %v7764_v4 = vrot.slane %v7762_v31, 4  ;;  %v8160_v19 = vld [vmem:[#allocation3 + $0x12c] sm:$0xf] }
 0x44e   : > { %v13572_v48 = vadd.f32 %v7391_v11, %v7199_v0  ;;  %v8385_v23 = vor.u32 %v8383_v50, %v8382_v17  ;;  %v8387_v57 = vrot.slane %v8382_v17, 4  ;;  %v7948_v29 = vpack.c.b16 %v7926_v47, %v7925_v44  ;;  %v9007_v43 = vld [vmem:[#allocation3 + $0x50] sm:$0xf] }
 0x44f   : > { %10532 = vmatmul.msk.bf16.gmra.mxu3 %vm5613_vm11, %v8570_v49  ;;  %v8394_v49 = vor.u32 %v8392_v52, %v8391_v32  ;;  %v9072_v32 = vshll.u32 %v9006_v53, 16  ;;  %v13585_v17 = vrot.slane %v9059_v24, 4  ;;  %v7200_v53 = vadd.f32 %v13244_v34, %v13263_v46  ;;  %v7507_v46 = vld [vmem:[#allocation3 + $0x12c] sm:$0xf] }
 0x450   : > { %14240 = vst [vmem:[#allocation5_spill] sm:$0xff] %v13572_v48  ;;  %10488 = vmatmul.msk.bf16.gmra.mxu1 %vm5613_vm11, %v10720_v1  ;;  %v8386_v13 = vsel %vm10929_vm5, %v10516_v63, %v8385_v23  ;;  %v9077_v1 = vshrl.u32 %v9007_v43, 16  ;;  %v8402_v63 = vshrl.u32 %v8159_v30, 16 }
 0x451   : > { %v8395_v52 = vsel %vm10929_vm5, %v8387_v57, %v8394_v49  ;;  %v13589_v31 = vrot.slane %v9072_v32, 5  ;;  %v7768_v57 = vor.u32 %v7767_v58, %v7764_v4  ;;  %v9065_v4 = vsel %vm11101_vm8, %v13585_v17, %v13560_v62 }
 0x452   : > { %10614 = vmatmul.msk.bf16.gmra.mxu0 %vm5613_vm11, %v10731_v42  ;;  %v8638_v60 = vpop.f32.mrf.mxu3  ;;  %v7505_v42 = vld [vmem:[#allocation3 + $0x118] sm:$0x1]  ;;  %v8549_v47 = vunpack.c.l.b16 %v8395_v52  ;;  %v8158_v52 = vld [vmem:[#allocation3 + $0x124] sm:$0x8] }
 0x453   : > { %v8017_v45 = vpop.f32.mrf.mxu2  ;;  %v13575_v59 = vadd.f32 %v8638_v60, %v8095_v18  ;;  %v7781_v0 = vshll.u32 %v7505_v42, 16  ;;  %v9069_v18 = vor.u32 %v9068_v14, %v13560_v62  ;;  %v13591_v60 = vpop.f32.mrf.mxu0  ;;  %v8548_v14 = vunpack.c.l.b16 %v8386_v13  ;;  %v7506_v13 = vld [vmem:[#allocation3 + $0x128] sm:$0xf] }
 0x454   : > { %v8096_v10 = vadd.f32 %v8017_v45, %v13380_v40  ;;  %v7778_v40 = vor.u32 %v7777_v2, %v13570_v37  ;;  %v8411_v2 = vshrl.u32 %v8160_v19, 16  ;;  %v7769_v58 = vrot.slane %v7768_v57, 4 }
 0x455   : > { %14241 = vst [vmem:[#allocation24_spill] sm:$0xff] %v13575_v59  ;;  %v7393_v11 = vpop.f32.mrf.mxu1  ;;  %v7783_v49 = vrot.slane %v7781_v0, 5  ;;  %v9070_v34 = vrot.slane %v9069_v18, 4  ;;  %v8571_v32 = vpack.c.b16 %v8549_v47, %v8548_v14  ;;  %v7795_v18 = vshll.u32 %v7507_v46, 16  ;;  %v10732_v47 = vld [vmem:[#allocation3 + $0x128] sm:$0xff] }
 0x456   : > { %v7779_v50 = vrot.slane %v7778_v40, 4  ;;  %v13593_v44 = vadd.f32 %v7393_v11, %v7200_v53  ;;  %v9080_v40 = vshll.u32 %v9007_v43, 16  ;;  %v8413_v0 = vrot.slane %v8411_v2, 7  ;;  %v14245_v2 = vld [vmem:[#allocation6_spill] sm:$0xff] }
 0x457   : > { %v7799_v53 = vshrl.u32 %v7507_v46, 16  ;;  %v13608_v11 = vrot.slane %v9077_v1, 4  ;;  %v7774_v43 = vsel %vm11101_vm8, %v7769_v58, %v13570_v37  ;;  %v8397_v57 = vshrl.u32 %v8158_v52, 16  ;;  %v10721_v37 = vld [vmem:[#allocation3 + $0x188] sm:$0xff] }
 0x458   : > { %10500 = vmatmul.msk.bf16.gmra.mxu2 %vm5613_vm11, %v7948_v29  ;;  %14242 = vst [vmem:[#allocation25_spill] sm:$0xff] %v13593_v44  ;;  %v9008_v29 = vld [vmem:[#allocation3 + $0x54] sm:$0xf]  ;;  %v7786_v46 = vshrl.u32 %v7506_v13, 16  ;;  %v7927_v58 = vunpack.c.l.b16 %v7774_v43  ;;  %v9082_v52 = vrot.slane %v9080_v40, 5 }
 0x459   : > { %v9086_v62 = vshll.u32 %v9008_v29, 16  ;;  %v9090_v17 = vshrl.u32 %v9008_v29, 16  ;;  %v13616_v29 = vrot.slane %v7795_v18, 5  ;;  %v7801_v48 = vrot.slane %v7799_v53, 4 }
 0x45a   : > { %v8640_v24 = vpop.f32.mrf.mxu3  ;;  %v7788_v18 = vrot.slane %v7786_v46, 4  ;;  %v14248_v46 = vld [vmem:[#allocation9_spill] sm:$0xff] }
 0x45b   : > { %v8020_v45 = vpop.f32.mrf.mxu2  ;;  %v13596_v42 = vadd.f32 %v8640_v24, %v8096_v10  ;;  %v9075_v10 = vsel %vm11101_vm8, %v9070_v34, %v13589_v31  ;;  %v7789_v31 = vshll.u32 %v7506_v13, 16  ;;  %v13623_v59 = vpop.f32.mrf.mxu0  ;;  %v9092_v43 = vrot.slane %v9090_v17, 4 }
 0x45c   : > { %v8097_v23 = vadd.f32 %v8020_v45, %v13398_v16  ;;  %v7784_v16 = vsel %vm11101_vm8, %v7779_v50, %v7783_v49  ;;  %v8404_v45 = vrot.slane %v8402_v63, 7  ;;  %v8414_v50 = vshll.u32 %v8160_v19, 16  ;;  %v14244_v49 = vld [vmem:[#allocation8_spill] sm:$0xff] }
 0x45d   : > { %14243 = vst [vmem:[#allocation26_spill] sm:$0xff] %v13596_v42  ;;  %v7201_v24 = vadd.f32 %v14245_v2, %v14244_v49  ;;  %v7928_v14 = vunpack.c.l.b16 %v7784_v16  ;;  %v7396_v34 = vpop.f32.mrf.mxu1  ;;  %v7508_v49 = vld [vmem:[#allocation3 + $0x130] sm:$0x1]  ;;  %v10517_v16 = vrot.slane %v8397_v57, 11  ;;  %v7791_v53 = vrot.slane %v7789_v31, 5 }
 0x45e   : > { %v8416_v44 = vor.u32 %v8414_v50, %v8413_v0  ;;  %v8409_v2 = vrot.slane %v8404_v45, 4  ;;  %v13626_v0 = vrot.slane %v9086_v62, 5  ;;  %v7802_v40 = vor.u32 %v7801_v48, %v13616_v29  ;;  %v8163_v57 = vld [vmem:[#allocation3 + $0x144] sm:$0xf]  ;;  %v8162_v48 = vld [vmem:[#allocation3 + $0x140] sm:$0xf] }
 0x45f   : > { %10533 = vmatmul.msk.bf16.gmra.mxu3 %vm5613_vm11, %v8571_v32  ;;  %v8405_v32 = vshll.u32 %v8159_v30, 16  ;;  %v13618_v42 = vadd.f32 %v7396_v34, %v7201_v24  ;;  %v7949_v30 = vpack.c.b16 %v7928_v14, %v7927_v58  ;;  %v13634_v50 = vunpack.c.l.b16 %v9075_v10  ;;  %v9009_v24 = vld [vmem:[#allocation3 + $0x58] sm:$0x1]  ;;  %v14247_v14 = vld [vmem:[#allocation7_spill] sm:$0xff] }
 0x460   : > { %10489 = vmatmul.msk.bf16.gmra.mxu1 %vm5613_vm11, %v10721_v37  ;;  %v7202_v31 = vadd.f32 %v14248_v46, %v14247_v14  ;;  %v7792_v17 = vor.u32 %v7791_v53, %v7788_v18  ;;  %v9093_v37 = vor.u32 %v9092_v43, %v13626_v0  ;;  %v8433_v10 = vshrl.u32 %v8163_v57, 16  ;;  %v7509_v46 = vld [vmem:[#allocation3 + $0x140] sm:$0xf] }
 0x461   : > { %14246 = vst [vmem:[#allocation8_spill] sm:$0xff] %v13618_v42  ;;  %v8407_v13 = vor.u32 %v8405_v32, %v8404_v45  ;;  %v13632_v45 = vunpack.c.l.b16 %v9065_v4  ;;  %v7803_v4 = vrot.slane %v7802_v40, 4  ;;  %v8161_v40 = vld [vmem:[#allocation3 + $0x13c] sm:$0x8] }
 0x462   : > { %10615 = vmatmul.msk.bf16.gmra.mxu0 %vm5613_vm11, %v10732_v47  ;;  %v8643_v63 = vpop.f32.mrf.mxu3  ;;  %v7793_v43 = vrot.slane %v7792_v17, 4  ;;  %v8435_v14 = vrot.slane %v8433_v10, 7 }
 0x463   : > { %v8022_v1 = vpop.f32.mrf.mxu2  ;;  %v13621_v47 = vadd.f32 %v8643_v63, %v8097_v23  ;;  %v7805_v23 = vshll.u32 %v7508_v49, 16  ;;  %v8408_v62 = vsel %vm10929_vm5, %v10517_v16, %v8407_v13  ;;  %v9470_v18 = vpack.c.b16 %v13634_v50, %v13632_v45 }
 0x464   : > { %v8098_v19 = vadd.f32 %v8022_v1, %v13414_v7  ;;  %v8417_v7 = vsel %vm10929_vm5, %v8409_v2, %v8416_v44  ;;  %v9083_v44 = vor.u32 %v9082_v52, %v13608_v11  ;;  %v8550_v13 = vunpack.c.l.b16 %v8408_v62  ;;  %v9010_v52 = vld [vmem:[#allocation3 + $0x68] sm:$0xf]  ;;  %v13651_v62 = vpop.f32.mrf.mxu0 }
 0x465   : > { %v8551_v34 = vunpack.c.l.b16 %v8417_v7  ;;  %v7398_v1 = vpop.f32.mrf.mxu1  ;;  %v7807_v63 = vrot.slane %v7805_v23, 5  ;;  %v9096_v2 = vshll.u32 %v9009_v24, 16  ;;  %v8424_v11 = vshrl.u32 %v8162_v48, 16 }
 0x466   : > { %v13642_v58 = vadd.f32 %v7398_v1, %v7202_v31  ;;  %v9094_v24 = vrot.slane %v9093_v37, 4  ;;  %v9101_v45 = vshrl.u32 %v9010_v52, 16  ;;  %v7798_v50 = vsel %vm11101_vm8, %v7793_v43, %v13616_v29  ;;  %v9011_v43 = vld [vmem:[#allocation3 + $0x6c] sm:$0xf] }
 0x467   : > { %v8572_v53 = vpack.c.b16 %v8551_v34, %v8550_v13  ;;  %v7808_v23 = vsel %vm11101_vm8, %v7803_v4, %v7807_v63  ;;  %v9098_v1 = vrot.slane %v9096_v2, 5  ;;  %v8419_v34 = vshrl.u32 %v8161_v40, 16  ;;  %v14251_v63 = vld [vmem:[#allocation10_spill] sm:$0xff]  ;;  %v7511_v40 = vld [vmem:[#allocation3 + $0x148] sm:$0x1] }
 0x468   : > { %10501 = vmatmul.msk.bf16.gmra.mxu2 %vm5613_vm11, %v7949_v30  ;;  %14249 = vst [vmem:[#allocation6_spill] sm:$0xff] %v13642_v58  ;;  %v7510_v30 = vld [vmem:[#allocation3 + $0x144] sm:$0xf]  ;;  %v8426_v17 = vrot.slane %v8424_v11, 7  ;;  %v8436_v4 = vshll.u32 %v8163_v57, 16  ;;  %v7203_v10 = vadd.f32 %v14251_v63, %v13306_v61  ;;  %v7810_v13 = vshrl.u32 %v7509_v46, 16 }
 0x469   : > { %v7823_v31 = vshrl.u32 %v7510_v30, 16  ;;  %v8427_v2 = vshll.u32 %v8162_v48, 16  ;;  %v7929_v11 = vunpack.c.l.b16 %v7798_v50  ;;  %v9104_v61 = vshll.u32 %v9010_v52, 16 }
 0x46a   : > { %v8645_v16 = vpop.f32.mrf.mxu3  ;;  %v8431_v63 = vrot.slane %v8426_v17, 4  ;;  %v9099_v48 = vsel %vm11101_vm8, %v9094_v24, %v9098_v1  ;;  %v9110_v50 = vshll.u32 %v9011_v43, 16 }
 0x46b   : > { %v8025_v32 = vpop.f32.mrf.mxu2  ;;  %v13645_v7 = vadd.f32 %v8645_v16, %v8098_v19  ;;  %v13654_v19 = vrot.slane %v9083_v44, 4  ;;  %v7930_v16 = vunpack.c.l.b16 %v7808_v23  ;;  %v7813_v44 = vshll.u32 %v7509_v46, 16 }
 0x46c   : > { %v8099_v49 = vadd.f32 %v8025_v32, %v13430_v39  ;;  %v7819_v39 = vshll.u32 %v7510_v30, 16  ;;  %v10733_v32 = vld [vmem:[#allocation3 + $0x140] sm:$0xff]  ;;  %v7825_v42 = vrot.slane %v7823_v31, 4  ;;  %v10518_v23 = vrot.slane %v8419_v34, 11  ;;  %v8166_v34 = vld [vmem:[#allocation3 + $0x15c] sm:$0xf] }
 0x46d   : > { %14250 = vst [vmem:[#allocation7_spill] sm:$0xff] %v13645_v7  ;;  %v7401_v30 = vpop.f32.mrf.mxu1  ;;  %v8429_v46 = vor.u32 %v8427_v2, %v8426_v17  ;;  %v7815_v31 = vrot.slane %v7813_v44, 5  ;;  %v13680_v24 = vunpack.c.l.b16 %v9099_v48  ;;  %v13684_v17 = vrot.slane %v9101_v45, 4  ;;  %v8165_v2 = vld [vmem:[#allocation3 + $0x158] sm:$0xf] }
 0x46e   : > { %v13662_v58 = vrot.slane %v7819_v39, 5  ;;  %v13664_v7 = vadd.f32 %v7401_v30, %v7203_v10  ;;  %v7812_v39 = vrot.slane %v7810_v13, 4  ;;  %v13686_v10 = vpop.f32.mrf.mxu0  ;;  %v13690_v30 = vrot.slane %v9104_v61, 5  ;;  %v7513_v48 = vld [vmem:[#allocation3 + $0x15c] sm:$0xf] }
 0x46f   : > { %10534 = vmatmul.msk.bf16.gmra.mxu3 %vm5613_vm11, %v8572_v53  ;;  %v8438_v53 = vor.u32 %v8436_v4, %v8435_v14  ;;  %v7950_v14 = vpack.c.b16 %v7930_v16, %v7929_v11  ;;  %v7829_v4 = vshll.u32 %v7511_v40, 16  ;;  %v8430_v1 = vsel %vm10929_vm5, %v10518_v23, %v8429_v46  ;;  %v14253_v16 = vld [vmem:[#allocation11_spill] sm:$0xff] }
 0x470   : > { %10622 = vmatmul.msk.bf16.vlgmr.msra.gmra.mxu1 %vm5613_vm11, %v9470_v18  ;;  %v7826_v52 = vor.u32 %v7825_v42, %v13662_v58  ;;  %v9089_v18 = vsel %vm11101_vm8, %v13654_v19, %v13626_v0  ;;  %v14252_v42 = vld [vmem:[#allocation12_spill] sm:$0xff]  ;;  %v13692_v0 = vrot.slane %v9110_v50, 5  ;;  %v8552_v46 = vunpack.c.l.b16 %v8430_v1 }
 0x471   : > { %v7204_v13 = vadd.f32 %v14253_v16, %v14252_v42  ;;  %v7831_v11 = vrot.slane %v7829_v4, 5  ;;  %v8446_v61 = vshrl.u32 %v8165_v2, 16  ;;  %v8164_v42 = vld [vmem:[#allocation3 + $0x154] sm:$0x8]  ;;  %v7512_v4 = vld [vmem:[#allocation3 + $0x158] sm:$0xf] }
 0x472   : > { %10616 = vmatmul.msk.bf16.gmra.mxu0 %vm5613_vm11, %v10733_v32  ;;  %v8648_v57 = vpop.f32.mrf.mxu3  ;;  %v7827_v19 = vrot.slane %v7826_v52, 4  ;;  %v7843_v16 = vshll.u32 %v7513_v48, 16  ;;  %v9012_v1 = vld [vmem:[#allocation3 + $0x70] sm:$0x1] }
 0x473   : > { %v8027_v37 = vpop.f32.mrf.mxu2  ;;  %v13667_v32 = vadd.f32 %v8648_v57, %v8099_v49  ;;  %v9114_v49 = vshrl.u32 %v9011_v43, 16  ;;  %v8455_v43 = vshrl.u32 %v8166_v34, 16 }
 0x474   : > { %v8100_v29 = vadd.f32 %v8027_v37, %v13446_v55  ;;  %v8439_v55 = vsel %vm10929_vm5, %v8431_v63, %v8438_v53  ;;  %v7816_v37 = vor.u32 %v7815_v31, %v7812_v39  ;;  %v9440_v39 = vunpack.c.l.b16 %v9089_v18  ;;  %v10734_v18 = vld [vmem:[#allocation3 + $0x158] sm:$0xff] }
 0x475   : > { %v8553_v44 = vunpack.c.l.b16 %v8439_v55  ;;  %v7403_v53 = vpop.f32.mrf.mxu1  ;;  %v9116_v63 = vrot.slane %v9114_v49, 4  ;;  %v7832_v50 = vsel %vm11101_vm8, %v7827_v19, %v7831_v11  ;;  %v8457_v52 = vrot.slane %v8455_v43, 7  ;;  %v14255_v19 = vld [vmem:[#allocation13_spill] sm:$0xff] }
 0x476   : > { %v13694_v40 = vadd.f32 %v7403_v53, %v7204_v13  ;;  %v7817_v55 = vrot.slane %v7816_v37, 4  ;;  %v7847_v13 = vshrl.u32 %v7513_v48, 16  ;;  %v8441_v37 = vshrl.u32 %v8164_v42, 16  ;;  %v9013_v48 = vld [vmem:[#allocation3 + $0x80] sm:$0xf] }
 0x477   : > { %v8573_v31 = vpack.c.b16 %v8553_v44, %v8552_v46  ;;  %v9117_v49 = vor.u32 %v9116_v63, %v13692_v0  ;;  %v8448_v53 = vrot.slane %v8446_v61, 7  ;;  %v7205_v11 = vadd.f32 %v14255_v19, %v13336_v6 }
 0x478   : > { %10502 = vmatmul.msk.bf16.gmra.mxu2 %vm5613_vm11, %v7950_v14  ;;  %14254 = vst [vmem:[#allocation9_spill] sm:$0xff] %v13694_v40  ;;  %v7822_v44 = vsel %vm11101_vm8, %v7817_v55, %v13662_v58  ;;  %v7834_v43 = vshrl.u32 %v7512_v4, 16  ;;  %v8449_v46 = vshll.u32 %v8165_v2, 16  ;;  %v13714_v58 = vpop.f32.mrf.mxu0 }
 0x479   : > { %v7931_v42 = vunpack.c.l.b16 %v7822_v44  ;;  %v8453_v2 = vrot.slane %v8448_v53, 4  ;;  %v9128_v44 = vshll.u32 %v9013_v48, 16 }
 0x47a   : > { %v8650_v23 = vpop.f32.mrf.mxu3  ;;  %v8451_v19 = vor.u32 %v8449_v46, %v8448_v53  ;;  %v9118_v53 = vrot.slane %v9117_v49, 4 }
 0x47b   : > { %v8030_v57 = vpop.f32.mrf.mxu2  ;;  %v13697_v14 = vadd.f32 %v8650_v23, %v8100_v29  ;;  %v9107_v29 = vor.u32 %v13690_v30, %v13684_v17  ;;  %v7837_v23 = vshll.u32 %v7512_v4, 16  ;;  %v10519_v4 = vrot.slane %v8441_v37, 11  ;;  %v8169_v37 = vld [vmem:[#allocation3 + $0x174] sm:$0xf] }
 0x47c   : > { %v8101_v45 = vadd.f32 %v8030_v57, %v13464_v22  ;;  %v9471_v22 = vpack.c.b16 %v13680_v24, %v9440_v39  ;;  %v8458_v57 = vshll.u32 %v8166_v34, 16  ;;  %v7932_v24 = vunpack.c.l.b16 %v7832_v50  ;;  %v7514_v50 = vld [vmem:[#allocation3 + $0x160] sm:$0x1] }
 0x47d   : > { %v7406_v17 = vpop.f32.mrf.mxu1  ;;  %v13712_v39 = vrot.slane %v7843_v16, 5  ;;  %v9120_v34 = vshll.u32 %v9012_v1, 16  ;;  %v9125_v16 = vshrl.u32 %v9013_v48, 16  ;;  %v9108_v40 = vrot.slane %v9107_v29, 4 }
 0x47e   : > { %v8460_v63 = vor.u32 %v8458_v57, %v8457_v52  ;;  %v13716_v61 = vadd.f32 %v7406_v17, %v7205_v11  ;;  %v7951_v52 = vpack.c.b16 %v7932_v24, %v7931_v42  ;;  %v7839_v57 = vrot.slane %v7837_v23, 5  ;;  %v14258_v23 = vld [vmem:[#allocation20_spill] sm:$0xff] }
 0x47f   : > { %10535 = vmatmul.msk.bf16.gmra.mxu3 %vm5613_vm11, %v8573_v31  ;;  %v7849_v31 = vrot.slane %v7847_v13, 4  ;;  %v7836_v13 = vrot.slane %v7834_v43, 4  ;;  %v7853_v11 = vshll.u32 %v7514_v50, 16  ;;  %v9122_v24 = vrot.slane %v9120_v34, 5  ;;  %v14257_v43 = vld [vmem:[#allocation14_spill] sm:$0xff] }
 0x480   : > { %14256 = vst [vmem:[#allocation10_spill] sm:$0xff] %v13716_v61  ;;  %10623 = vmatmul.msk.bf16.gmra.mxu1 %vm5613_vm11, %v9471_v22  ;;  %v8461_v1 = vsel %vm10929_vm5, %v8453_v2, %v8460_v63  ;;  %v9113_v22 = vsel %vm11101_vm8, %v9108_v40, %v13692_v0  ;;  %v8452_v29 = vsel %vm10929_vm5, %v10519_v4, %v8451_v19  ;;  %v9127_v46 = vrot.slane %v9125_v16, 4  ;;  %v7516_v61 = vld [vmem:[#allocation3 + $0x174] sm:$0xf] }
 0x481   : > { %v7206_v17 = vadd.f32 %v14258_v23, %v14257_v43  ;;  %v7840_v63 = vor.u32 %v7839_v57, %v7836_v13  ;;  %v7855_v50 = vrot.slane %v7853_v11, 5  ;;  %v8477_v2 = vshrl.u32 %v8169_v37, 16  ;;  %v13739_v13 = vpop.f32.mrf.mxu0  ;;  %v8167_v11 = vld [vmem:[#allocation3 + $0x16c] sm:$0x8] }
 0x482   : > { %10617 = vmatmul.msk.bf16.gmra.mxu0 %vm5613_vm11, %v10734_v18  ;;  %v8653_v55 = vpop.f32.mrf.mxu3  ;;  %v8554_v40 = vunpack.c.l.b16 %v8452_v29  ;;  %v9130_v49 = vrot.slane %v9128_v44, 5  ;;  %v9123_v4 = vsel %vm11101_vm8, %v9118_v53, %v9122_v24  ;;  %v9442_v57 = vunpack.c.l.b16 %v9113_v22  ;;  %v7515_v29 = vld [vmem:[#allocation3 + $0x170] sm:$0xf] }
 0x483   : > { %v8032_v30 = vpop.f32.mrf.mxu2  ;;  %v13719_v18 = vadd.f32 %v8653_v55, %v8101_v45  ;;  %v9014_v45 = vld [vmem:[#allocation3 + $0x84] sm:$0xf]  ;;  %v8479_v23 = vrot.slane %v8477_v2, 7  ;;  %v7867_v44 = vshll.u32 %v7516_v61, 16  ;;  %v7861_v2 = vshll.u32 %v7515_v29, 16 }
 0x484   : > { %v8102_v6 = vadd.f32 %v8032_v30, %v13480_v54  ;;  %v7850_v54 = vor.u32 %v7849_v31, %v13712_v39  ;;  %v8555_v30 = vunpack.c.l.b16 %v8461_v1  ;;  %v8168_v31 = vld [vmem:[#allocation3 + $0x170] sm:$0xf]  ;;  %v9134_v42 = vshll.u32 %v9014_v45, 16 }
 0x485   : > { %v7408_v55 = vpop.f32.mrf.mxu1  ;;  %v9138_v34 = vshrl.u32 %v9014_v45, 16  ;;  %v8468_v16 = vshrl.u32 %v8168_v31, 16  ;;  %v7871_v45 = vshrl.u32 %v7516_v61, 16  ;;  %v9131_v53 = vor.u32 %v9130_v49, %v9127_v46 }
 0x486   : > { %v7851_v48 = vrot.slane %v7850_v54, 4  ;;  %v8574_v1 = vpack.c.b16 %v8555_v30, %v8554_v40  ;;  %v7841_v54 = vrot.slane %v7840_v63, 4  ;;  %v8463_v30 = vshrl.u32 %v8167_v11, 16 }
 0x487   : > { %v9140_v24 = vrot.slane %v9138_v34, 4  ;;  %v8470_v63 = vrot.slane %v8468_v16, 7  ;;  %v8480_v40 = vshll.u32 %v8169_v37, 16  ;;  %v13750_v34 = vrot.slane %v7867_v44, 5  ;;  %v7517_v37 = vld [vmem:[#allocation3 + $0x178] sm:$0x1] }
 0x488   : > { %10503 = vmatmul.msk.bf16.gmra.mxu2 %vm5613_vm11, %v7951_v52  ;;  %v13733_v52 = vadd.f32 %v7408_v55, %v7206_v17  ;;  %v7856_v43 = vsel %vm11101_vm8, %v7851_v48, %v7855_v50  ;;  %v9443_v17 = vunpack.c.l.b16 %v9123_v4  ;;  %v10735_v55 = vld [vmem:[#allocation3 + $0x170] sm:$0xff]  ;;  %v7846_v22 = vsel %vm11101_vm8, %v7841_v54, %v13712_v39  ;;  %v9016_v44 = vld [vmem:[#allocation3 + $0x98] sm:$0xf] }
 0x489   : > { %v7207_v48 = vadd.f32 %v13372_v15, %v13366_v36  ;;  %v7934_v61 = vunpack.c.l.b16 %v7856_v43  ;;  %v7858_v50 = vshrl.u32 %v7515_v29, 16  ;;  %v8482_v49 = vor.u32 %v8480_v40, %v8479_v23 }
 0x48a   : > { %14259 = vst [vmem:[#allocation12_spill] sm:$0xff] %v13733_v52  ;;  %v8655_v0 = vpop.f32.mrf.mxu3  ;;  %v7873_v4 = vrot.slane %v7871_v45, 4  ;;  %v9472_v39 = vpack.c.b16 %v9443_v17, %v9442_v57  ;;  %v7933_v16 = vunpack.c.l.b16 %v7846_v22  ;;  %v10520_v52 = vrot.slane %v8463_v30, 11  ;;  %v13758_v17 = vpop.f32.mrf.mxu0 }
 0x48b   : > { %v13737_v19 = vadd.f32 %v8655_v0, %v8102_v6  ;;  %v9136_v6 = vrot.slane %v9134_v42, 5  ;;  %v9015_v0 = vld [vmem:[#allocation3 + $0x88] sm:$0x1]  ;;  %v8471_v42 = vshll.u32 %v8168_v31, 16  ;;  %v8475_v15 = vrot.slane %v8470_v63, 4 }
 0x48c   : > { %v9144_v54 = vshll.u32 %v9015_v0, 16  ;;  %v7952_v43 = vpack.c.b16 %v7934_v61, %v7933_v16  ;;  %v7860_v29 = vrot.slane %v7858_v50, 4  ;;  %v9132_v31 = vrot.slane %v9131_v53, 4 }
 0x48d   : > { %v7411_v46 = vpop.f32.mrf.mxu1  ;;  %v9141_v11 = vor.u32 %v9140_v24, %v9136_v6  ;;  %v8473_v36 = vor.u32 %v8471_v42, %v8470_v63  ;;  %v8483_v23 = vsel %vm10929_vm5, %v8475_v15, %v8482_v49  ;;  %v7874_v45 = vor.u32 %v7873_v4, %v13750_v34  ;;  %v8172_v24 = vld [vmem:[#allocation3 + $0x18c] sm:$0xf]  ;;  %v9017_v63 = vld [vmem:[#allocation3 + $0x9c] sm:$0xf] }
 0x48e   : > { %v7877_v57 = vshll.u32 %v7517_v37, 16  ;;  %v9137_v0 = vsel %vm11101_vm8, %v9132_v31, %v9136_v6  ;;  %v9146_v30 = vrot.slane %v9144_v54, 5  ;;  %v7208_v40 = vadd.f32 %v13390_v8, %v13382_v51 }
 0x48f   : > { %10536 = vmatmul.msk.bf16.gmra.mxu3 %vm5613_vm11, %v8574_v1  ;;  %v13752_v1 = vadd.f32 %v7411_v46, %v7207_v48  ;;  %v9142_v22 = vrot.slane %v9141_v11, 4  ;;  %v8474_v53 = vsel %vm10929_vm5, %v10520_v52, %v8473_v36  ;;  %v8557_v48 = vunpack.c.l.b16 %v8483_v23  ;;  %v7519_v11 = vld [vmem:[#allocation3 + $0x18c] sm:$0xf]  ;;  %v7518_v23 = vld [vmem:[#allocation3 + $0x188] sm:$0xf] }
 0x490   : > { %10624 = vmatmul.msk.bf16.gmra.mxu1 %vm5613_vm11, %v9472_v39  ;;  %v9149_v61 = vshrl.u32 %v9016_v44, 16  ;;  %v9152_v42 = vshll.u32 %v9016_v44, 16  ;;  %v7875_v49 = vrot.slane %v7874_v45, 4  ;;  %v7879_v4 = vrot.slane %v7877_v57, 5 }
 0x491   : > { %v8499_v39 = vshrl.u32 %v8172_v24, 16  ;;  %v8556_v6 = vunpack.c.l.b16 %v8474_v53  ;;  %v9158_v54 = vshll.u32 %v9017_v63, 16  ;;  %v9162_v37 = vshrl.u32 %v9017_v63, 16 }
 0x492   : > { %10618 = vmatmul.msk.bf16.gmra.mxu0 %vm5613_vm11, %v10735_v55  ;;  %v7863_v55 = vrot.slane %v7861_v2, 5  ;;  %v8171_v2 = vld [vmem:[#allocation3 + $0x188] sm:$0xf]  ;;  %v9147_v52 = vsel %vm11101_vm8, %v9142_v22, %v9146_v30  ;;  %v9444_v51 = vunpack.c.l.b16 %v9137_v0  ;;  %v9151_v15 = vrot.slane %v9149_v61, 4  ;;  %v9018_v0 = vld [vmem:[#allocation3 + $0xa0] sm:$0x1] }
 0x493   : > { %v8490_v36 = vshrl.u32 %v8171_v2, 16  ;;  %v8575_v8 = vpack.c.b16 %v8557_v48, %v8556_v6  ;;  %v8501_v31 = vrot.slane %v8499_v39, 7  ;;  %v7891_v44 = vshll.u32 %v7519_v11, 16  ;;  %v10736_v30 = vld [vmem:[#allocation3 + $0x188] sm:$0xff] }
 0x494   : > { %v7864_v50 = vor.u32 %v7863_v55, %v7860_v29  ;;  %v8170_v29 = vld [vmem:[#allocation3 + $0x184] sm:$0x8]  ;;  %v7880_v55 = vsel %vm11101_vm8, %v7875_v49, %v7879_v4  ;;  %v7895_v45 = vshrl.u32 %v7519_v11, 16  ;;  %v9445_v57 = vunpack.c.l.b16 %v9147_v52 }
 0x495   : > { %v7413_v46 = vpop.f32.mrf.mxu1  ;;  %v9154_v53 = vrot.slane %v9152_v42, 5  ;;  %v13774_v63 = vrot.slane %v9158_v54, 5  ;;  %v9164_v22 = vrot.slane %v9162_v37, 4  ;;  %v8485_v48 = vshrl.u32 %v8170_v29, 16 }
 0x496   : > { %v13767_v16 = vadd.f32 %v7413_v46, %v7208_v40  ;;  %v8492_v61 = vrot.slane %v8490_v36, 7  ;;  %v13779_v46 = vpop.f32.mrf.mxu0  ;;  %v7209_v49 = vadd.f32 %v13412_v12, %v13400_v35  ;;  %v7936_v42 = vunpack.c.l.b16 %v7880_v55 }
 0x497   : > { %v8493_v4 = vshll.u32 %v8171_v2, 16  ;;  %v7882_v39 = vshrl.u32 %v7518_v23, 16  ;;  %v7885_v37 = vshll.u32 %v7518_v23, 16  ;;  %v7893_v11 = vrot.slane %v7891_v44, 5 }
 0x498   : > { %10504 = vmatmul.msk.bf16.gmra.mxu2 %vm5613_vm11, %v7952_v43  ;;  %14260 = vst [vmem:[#allocation11_spill] sm:$0xff] %v13767_v16  ;;  %v7865_v43 = vrot.slane %v7864_v50, 4  ;;  %v8502_v50 = vshll.u32 %v8172_v24, 16  ;;  %v7897_v52 = vrot.slane %v7895_v45, 4  ;;  %v9168_v36 = vshll.u32 %v9018_v0, 16 }
 0x499   : > { %v9165_v29 = vor.u32 %v9164_v22, %v13774_v63  ;;  %v10521_v16 = vrot.slane %v8485_v48, 11  ;;  %v8495_v35 = vor.u32 %v8493_v4, %v8492_v61  ;;  %v8497_v12 = vrot.slane %v8492_v61, 4  ;;  %v9020_v48 = vld [vmem:[#allocation3 + $0xb4] sm:$0xf] }
 0x49a   : > { %v7870_v40 = vsel %vm11101_vm8, %v7865_v43, %v13750_v34  ;;  %v8504_v54 = vor.u32 %v8502_v50, %v8501_v31  ;;  %v9473_v34 = vpack.c.b16 %v9445_v57, %v9444_v51  ;;  %v7520_v43 = vld [vmem:[#allocation3 + $0x190] sm:$0x1]  ;;  %v7884_v55 = vrot.slane %v7882_v39, 4 }
 0x49b   : > { %v7935_v24 = vunpack.c.l.b16 %v7870_v40  ;;  %v7887_v23 = vrot.slane %v7885_v37, 5  ;;  %v7898_v44 = vor.u32 %v7897_v52, %v7893_v11  ;;  %v7901_v45 = vshll.u32 %v7520_v43, 16  ;;  %v9019_v50 = vld [vmem:[#allocation3 + $0xb0] sm:$0xf]  ;;  %v9021_v43 = vld [vmem:[#allocation3 + $0xb8] sm:$0x1] }
 0x49c   : > { %v8505_v31 = vsel %vm10929_vm5, %v8497_v12, %v8504_v54  ;;  %v9155_v51 = vor.u32 %v9154_v53, %v9151_v15  ;;  %v9166_v57 = vrot.slane %v9165_v29, 4  ;;  %v8496_v22 = vsel %vm10929_vm5, %v10521_v16, %v8495_v35 }
 0x49d   : > { %v7416_v6 = vpop.f32.mrf.mxu1  ;;  %v7953_v2 = vpack.c.b16 %v7936_v42, %v7935_v24  ;;  %v7210_v0 = vadd.f32 %v13434_v38, %v13416_v21  ;;  %v8559_v40 = vunpack.c.l.b16 %v8505_v31  ;;  %v7899_v42 = vrot.slane %v7898_v44, 4 }
 0x49e   : > { %v7903_v4 = vrot.slane %v7901_v45, 5  ;;  %v9156_v54 = vrot.slane %v9155_v51, 4  ;;  %v9182_v53 = vshll.u32 %v9020_v48, 16  ;;  %v9186_v37 = vshrl.u32 %v9020_v48, 16  ;;  %v13809_v51 = vpop.f32.mrf.mxu0  ;;  %v8175_v48 = vld [vmem:[#allocation3 + $0x1a4] sm:$0xf] }
 0x49f   : > { %10537 = vmatmul.msk.bf16.gmra.mxu3 %vm5613_vm11, %v8575_v8  ;;  %v13784_v8 = vadd.f32 %v7416_v6, %v7209_v49  ;;  %v7888_v49 = vor.u32 %v7887_v23, %v7884_v55  ;;  %v8558_v6 = vunpack.c.l.b16 %v8496_v22  ;;  %v9173_v52 = vshrl.u32 %v9019_v50, 16 }
 0x4a0   : > { %10625 = vmatmul.msk.bf16.gmra.mxu1 %vm5613_vm11, %v9473_v34  ;;  %v9161_v21 = vsel %vm11101_vm8, %v9156_v54, %v13774_v63  ;;  %v9176_v38 = vshll.u32 %v9019_v50, 16  ;;  %v9184_v29 = vrot.slane %v9182_v53, 5  ;;  %v9188_v35 = vrot.slane %v9186_v37, 4 }
 0x4a1   : > { %v8576_v16 = vpack.c.b16 %v8559_v40, %v8558_v6  ;;  %v7889_v34 = vrot.slane %v7888_v49, 4  ;;  %v9446_v55 = vunpack.c.l.b16 %v9161_v21  ;;  %v9175_v23 = vrot.slane %v9173_v52, 4  ;;  %v8174_v40 = vld [vmem:[#allocation3 + $0x1a0] sm:$0xf] }
 0x4a2   : > { %10619 = vmatmul.msk.bf16.gmra.mxu0 %vm5613_vm11, %v10736_v30  ;;  %v9170_v30 = vrot.slane %v9168_v36, 5  ;;  %v7904_v36 = vsel %vm11101_vm8, %v7899_v42, %v7903_v4  ;;  %v9178_v44 = vrot.slane %v9176_v38, 5  ;;  %v9192_v45 = vshll.u32 %v9021_v43, 16 }
 0x4a3   : > { %v7894_v12 = vsel %vm11101_vm8, %v7889_v34, %v7893_v11  ;;  %v7938_v31 = vunpack.c.l.b16 %v7904_v36  ;;  %v8512_v50 = vshrl.u32 %v8174_v40, 16  ;;  %v8515_v49 = vshll.u32 %v8174_v40, 16  ;;  %v9023_v34 = vld [vmem:[#allocation3 + $0xcc] sm:$0xf] }
 0x4a4   : > { %v9171_v15 = vsel %vm11101_vm8, %v9166_v57, %v9170_v30  ;;  %v7937_v22 = vunpack.c.l.b16 %v7894_v12  ;;  %v8524_v42 = vshll.u32 %v8175_v48, 16  ;;  %v9179_v54 = vor.u32 %v9178_v44, %v9175_v23  ;;  %v9022_v44 = vld [vmem:[#allocation3 + $0xc8] sm:$0xf] }
 0x4a5   : > { %v7418_v61 = vpop.f32.mrf.mxu1  ;;  %v9447_v24 = vunpack.c.l.b16 %v9171_v15  ;;  %v8514_v6 = vrot.slane %v8512_v50, 7  ;;  %v9194_v37 = vrot.slane %v9192_v45, 5  ;;  %v7212_v21 = vadd.f32 %v13475_v20, %v13448_v25  ;;  %v9024_v50 = vld [vmem:[#allocation3 + $0xd0] sm:$0x1] }
 0x4a6   : > { %v13795_v39 = vadd.f32 %v7418_v61, %v7210_v0  ;;  %v8173_v0 = vld [vmem:[#allocation3 + $0x19c] sm:$0x8]  ;;  %v9189_v61 = vor.u32 %v9188_v35, %v9184_v29  ;;  %v9180_v35 = vrot.slane %v9179_v54, 4  ;;  %v9206_v23 = vshll.u32 %v9023_v34, 16  ;;  %v13825_v20 = vpop.f32.mrf.mxu0 }
 0x4a7   : > { %v9474_v30 = vpack.c.b16 %v9447_v24, %v9446_v55  ;;  %v8507_v11 = vshrl.u32 %v8173_v0, 16  ;;  %v8519_v52 = vrot.slane %v8514_v6, 4  ;;  %v10737_v55 = vld [vmem:[#allocation3 + $0x1a0] sm:$0xff]  ;;  %v9210_v25 = vshrl.u32 %v9023_v34, 16 }
 0x4a8   : > { %10505 = vmatmul.msk.bf16.gmra.mxu2 %vm5613_vm11, %v7953_v2  ;;  %v7211_v2 = vadd.f32 %v13452_v5, %v13432_v41  ;;  %v7954_v41 = vpack.c.b16 %v7938_v31, %v7937_v22  ;;  %v8521_v5 = vshrl.u32 %v8175_v48, 16  ;;  %v9190_v53 = vrot.slane %v9189_v61, 4 }
 0x4a9   : > { %v10522_v4 = vrot.slane %v8507_v11, 11  ;;  %v9185_v45 = vsel %vm11101_vm8, %v9180_v35, %v9184_v29  ;;  %v9197_v27 = vshrl.u32 %v9022_v44, 16  ;;  %v9200_v0 = vshll.u32 %v9022_v44, 16 }
 0x4aa   : > { %v8523_v15 = vrot.slane %v8521_v5, 7  ;;  %v9195_v31 = vsel %vm11101_vm8, %v9190_v53, %v9194_v37  ;;  %v9208_v40 = vrot.slane %v9206_v23, 5  ;;  %v9212_v48 = vrot.slane %v9210_v25, 4  ;;  %v14261_v37 = vld [vmem:[#allocation18_spill] sm:$0xff]  ;;  %v9027_v25 = vld [vmem:[#allocation3 + $0xe8] sm:$0x1] }
 0x4ab   : > { %v9449_v22 = vunpack.c.l.b16 %v9195_v31  ;;  %v7213_v61 = vadd.f32 %v13496_v33, %v13466_v9  ;;  %v9448_v11 = vunpack.c.l.b16 %v9185_v45 }
 0x4ac   : > { %v8526_v38 = vor.u32 %v8524_v42, %v8523_v15  ;;  %v9199_v42 = vrot.slane %v9197_v27, 4  ;;  %v9213_v29 = vor.u32 %v9212_v48, %v9208_v40  ;;  %v9240_v48 = vshll.u32 %v9027_v25, 16 }
 0x4ad   : > { %v7421_v63 = vpop.f32.mrf.mxu1  ;;  %v9475_v5 = vpack.c.b16 %v9449_v22, %v9448_v11 }
 0x4ae   : > { %v13811_v57 = vadd.f32 %v7421_v63, %v7211_v2  ;;  %v8527_v12 = vsel %vm10929_vm5, %v8519_v52, %v8526_v38  ;;  %v9214_v15 = vrot.slane %v9213_v29, 4  ;;  %v9026_v52 = vld [vmem:[#allocation3 + $0xe4] sm:$0xf]  ;;  %v9242_v11 = vrot.slane %v9240_v48, 5 }
 0x4af   : > { %10538 = vmatmul.msk.bf16.gmra.mxu3 %vm5613_vm11, %v8576_v16  ;;  %v8517_v16 = vor.u32 %v8515_v49, %v8514_v6  ;;  %v8561_v63 = vunpack.c.l.b16 %v8527_v12  ;;  %v9216_v6 = vshll.u32 %v9024_v50, 16  ;;  %v9230_v34 = vshll.u32 %v9026_v52, 16  ;;  %v14262_v50 = vld [vmem:[#allocation17_spill] sm:$0xff] }
 0x4b0   : > { %10626 = vmatmul.msk.bf16.gmra.mxu1 %vm5613_vm11, %v9474_v30 }
 0x4b1   : > { %v8518_v24 = vsel %vm10929_vm5, %v10522_v4, %v8517_v16  ;;  %v9202_v4 = vrot.slane %v9200_v0, 5  ;;  %v9218_v53 = vrot.slane %v9216_v6, 5  ;;  %v7214_v16 = vadd.f32 %v13516_v56, %v14261_v37 }
 0x4b2   : > { %v8560_v2 = vunpack.c.l.b16 %v8518_v24  ;;  %10620 = vmatmul.msk.bf16.gmra.mxu0 %vm5613_vm11, %v10737_v55  ;;  %v9025_v24 = vld [vmem:[#allocation3 + $0xe0] sm:$0xf]  ;;  %v9232_v31 = vrot.slane %v9230_v34, 5  ;;  %v7215_v56 = vadd.f32 %v13538_v3, %v13500_v26 }
 0x4b3   : > { %v9203_v54 = vor.u32 %v9202_v4, %v9199_v42  ;;  %v9219_v38 = vsel %vm11101_vm8, %v9214_v15, %v9218_v53  ;;  %v9224_v55 = vshll.u32 %v9025_v24, 16  ;;  %v9029_v42 = vld [vmem:[#allocation3 + $0xfc] sm:$0xf]  ;;  %v9028_v15 = vld [vmem:[#allocation3 + $0xf8] sm:$0xf] }
 0x4b4   : > { %v8577_v30 = vpack.c.b16 %v8561_v63, %v8560_v2  ;;  %v9451_v12 = vunpack.c.l.b16 %v9219_v38  ;;  %v9221_v2 = vshrl.u32 %v9025_v24, 16  ;;  %v9254_v6 = vshll.u32 %v9029_v42, 16  ;;  %v14264_v38 = vld [vmem:[#allocation21_spill] sm:$0xff]  ;;  %v9030_v24 = vld [vmem:[#allocation3 + $0x100] sm:$0x1] }
 0x4b5   : > { %v7423_v36 = vpop.f32.mrf.mxu1  ;;  %v9226_v27 = vrot.slane %v9224_v55, 5  ;;  %v7217_v34 = vadd.f32 %v13591_v60, %v14264_v38 }
 0x4b6   : > { %v13819_v43 = vadd.f32 %v7423_v36, %v7212_v21  ;;  %v9204_v21 = vrot.slane %v9203_v54, 4  ;;  %v9234_v36 = vshrl.u32 %v9026_v52, 16  ;;  %v9223_v22 = vrot.slane %v9221_v2, 4 }
 0x4b7   : > { %v9258_v54 = vshrl.u32 %v9029_v42, 16  ;;  %v9248_v52 = vshll.u32 %v9028_v15, 16 }
 0x4b8   : > { %10506 = vmatmul.msk.bf16.gmra.mxu2 %vm5613_vm11, %v7954_v41  ;;  %v9209_v35 = vsel %vm11101_vm8, %v9204_v21, %v9208_v40  ;;  %v9236_v63 = vrot.slane %v9234_v36, 4  ;;  %v9227_v40 = vor.u32 %v9226_v27, %v9223_v22  ;;  %v9032_v27 = vld [vmem:[#allocation3 + $0x114] sm:$0xf] }
 0x4b9   : > { %v9450_v23 = vunpack.c.l.b16 %v9209_v35  ;;  %v9260_v21 = vrot.slane %v9258_v54, 4  ;;  %v13875_v54 = vld [vmem:[%s14139_s4] ss:$0 sm:$0xff] }
 0x4ba   : > { %v9237_v0 = vor.u32 %v9236_v63, %v9232_v31  ;;  %v9228_v4 = vrot.slane %v9227_v40, 4  ;;  %v9250_v63 = vrot.slane %v9248_v52, 5 }
 0x4bc   : > { %v9233_v53 = vsel %vm11101_vm8, %v9228_v4, %v9232_v31 }
 0x4bd   : > { %v7426_v49 = vpop.f32.mrf.mxu1  ;;  %v9452_v36 = vunpack.c.l.b16 %v9233_v53  ;;  %v9033_v53 = vld [vmem:[#allocation3 + $0x118] sm:$0x1] }
 0x4be   : > { %v13833_v41 = vadd.f32 %v7426_v49, %v7213_v61  ;;  %v9238_v61 = vrot.slane %v9237_v0, 4  ;;  %v14263_v49 = vld [vmem:[#allocation23_spill] sm:$0xff] }
 0x4bf   : > { %10539 = vmatmul.msk.bf16.gmra.mxu3 %vm5613_vm11, %v8577_v30  ;;  %v9476_v30 = vpack.c.b16 %v9451_v12, %v9450_v23  ;;  %v9264_v23 = vshll.u32 %v9030_v24, 16 }
 0x4c0   : > { %10627 = vmatmul.msk.bf16.gmra.mxu1 %vm5613_vm11, %v9475_v5  ;;  %v7216_v5 = vadd.f32 %v14263_v49, %v14262_v50  ;;  %v9243_v29 = vsel %vm11101_vm8, %v9238_v61, %v9242_v11  ;;  %v9278_v61 = vshll.u32 %v9032_v27, 16  ;;  %v9282_v11 = vshrl.u32 %v9032_v27, 16  ;;  %v9031_v50 = vld [vmem:[#allocation3 + $0x110] sm:$0xf] }
 0x4c1   : > { %v9453_v37 = vunpack.c.l.b16 %v9243_v29  ;;  %v9269_v42 = vshrl.u32 %v9031_v50, 16  ;;  %v14266_v29 = vld [vmem:[#allocation24_spill] sm:$0xff] }
 0x4c2   : > { %v9280_v4 = vrot.slane %v9278_v61, 5  ;;  %v9034_v61 = vld [vmem:[#allocation3 + $0x128] sm:$0xf] }
 0x4c3   : > { %v9477_v2 = vpack.c.b16 %v9453_v37, %v9452_v36 }
 0x4c5   : > { %v7428_v9 = vpop.f32.mrf.mxu1 }
 0x4c6   : > { %v13838_v33 = vadd.f32 %v7428_v9, %v7214_v16  ;;  %v9245_v16 = vshrl.u32 %v9028_v15, 16  ;;  %v9256_v9 = vrot.slane %v9254_v6, 5  ;;  %v8972_v6 = vadd.f32 %v13651_v62, %v14266_v29 }
 0x4c7   : > { %v8974_v29 = vadd.f32 %v13714_v58, %v13621_v47 }
 0x4c8   : > { %v9247_v55 = vrot.slane %v9245_v16, 4 }
 0x4ca   : > { %v9251_v31 = vor.u32 %v9250_v63, %v9247_v55  ;;  %v14267_v63 = vld [vmem:[#allocation26_spill] sm:$0xff] }
 0x4cc   : > { %v9252_v48 = vrot.slane %v9251_v31, 4  ;;  %v13888_v31 = vpop.f32.mrf.mxu2 }
 0x4cd   : > { %v7431_v44 = vpop.f32.mrf.mxu1 }
 0x4ce   : > { %v13846_v45 = vadd.f32 %v7431_v44, %v7215_v56  ;;  %v9261_v56 = vor.u32 %v9260_v21, %v9256_v9  ;;  %v9266_v44 = vrot.slane %v9264_v23, 5  ;;  %v9257_v49 = vsel %vm11101_vm8, %v9252_v48, %v9256_v9  ;;  %v9035_v23 = vld [vmem:[#allocation3 + $0x12c] sm:$0xf] }
 0x4cf   : > { %v9454_v15 = vunpack.c.l.b16 %v9257_v49  ;;  %v9271_v9 = vrot.slane %v9269_v42, 4  ;;  %v9306_v48 = vshrl.u32 %v9035_v23, 16  ;;  %v9293_v49 = vshrl.u32 %v9034_v61, 16 }
 0x4d0   : > { %10628 = vmatmul.msk.bf16.gmra.mxu1 %vm5613_vm11, %v9476_v30  ;;  %v9262_v25 = vrot.slane %v9261_v56, 4  ;;  %v14265_v30 = vld [vmem:[#allocation22_spill] sm:$0xff]  ;;  %v8973_v56 = vadd.f32 %v13686_v10, %v14267_v63 }
 0x4d1   : > { %v7218_v22 = vadd.f32 %v13623_v59, %v14265_v30  ;;  %v9284_v59 = vrot.slane %v9282_v11, 4  ;;  %v13892_v30 = vpop.f32.mrf.mxu3 }
 0x4d2   : > { %v9267_v40 = vsel %vm11101_vm8, %v9262_v25, %v9266_v44 }
 0x4d3   : > { %v9285_v38 = vor.u32 %v9284_v59, %v9280_v4 }
 0x4d5   : > { %v7433_v26 = vpop.f32.mrf.mxu1 }
 0x4d6   : > { %v13851_v3 = vadd.f32 %v7433_v26, %v7216_v5  ;;  %v9455_v5 = vunpack.c.l.b16 %v9267_v40  ;;  %v9272_v26 = vshll.u32 %v9031_v50, 16 }
 0x4d8   : > { %v9478_v52 = vpack.c.b16 %v9455_v5, %v9454_v15  ;;  %v9274_v21 = vrot.slane %v9272_v26, 5  ;;  %v9296_v5 = vshll.u32 %v9034_v61, 16  ;;  %v9308_v26 = vrot.slane %v9306_v48, 4  ;;  %v9036_v15 = vld [vmem:[#allocation3 + $0x130] sm:$0x1] }
 0x4d9   : > { %v13909_v47 = vpop.f32.mrf.mxu3  ;;  %v9037_v61 = vld [vmem:[#allocation3 + $0x140] sm:$0xf] }
 0x4da   : > { %v9275_v62 = vor.u32 %v9274_v21, %v9271_v9  ;;  %v9295_v9 = vrot.slane %v9293_v49, 4  ;;  %v9298_v21 = vrot.slane %v9296_v5, 5  ;;  %v9317_v5 = vshrl.u32 %v9037_v61, 16 }
 0x4dd   : > { %v7436_v35 = vpop.f32.mrf.mxu1 }
 0x4de   : > { %v13859_v12 = vadd.f32 %v7436_v35, %v7217_v34  ;;  %v9288_v34 = vshll.u32 %v9033_v53, 16  ;;  %v9286_v35 = vrot.slane %v9285_v38, 4  ;;  %v13901_v53 = vpop.f32.mrf.mxu0 }
 0x4e0   : > { %10629 = vmatmul.msk.bf16.gmra.mxu1 %vm5613_vm11, %v9477_v2  ;;  %v9290_v2 = vrot.slane %v9288_v34, 5  ;;  %v9312_v34 = vshll.u32 %v9036_v15, 16  ;;  %v8976_v15 = vadd.f32 %v13758_v17, %v13667_v32 }
 0x4e1   : > { %v13924_v49 = vpop.f32.mrf.mxu3 }
 0x4e2   : > { %v9291_v27 = vsel %vm11101_vm8, %v9286_v35, %v9290_v2  ;;  %v9314_v35 = vrot.slane %v9312_v34, 5 }
 0x4e3   : > { %v9457_v50 = vunpack.c.l.b16 %v9291_v27 }
 0x4e5   : > { %v7438_v60 = vpop.f32.mrf.mxu1 }
 0x4e6   : > { %v13864_v0 = vadd.f32 %v7438_v60, %v7218_v22  ;;  %v9276_v22 = vrot.slane %v9275_v62, 4  ;;  %v9302_v60 = vshll.u32 %v9035_v23, 16 }
 0x4e8   : > { %v9281_v10 = vsel %vm11101_vm8, %v9276_v22, %v9280_v4  ;;  %v9304_v42 = vrot.slane %v9302_v60, 5  ;;  %v13905_v4 = vpop.f32.mrf.mxu2 }
 0x4ea   : > { %v9309_v38 = vor.u32 %v9308_v26, %v9304_v42  ;;  %v9320_v26 = vshll.u32 %v9037_v61, 16 }
 0x4ec   : > { %v9310_v62 = vrot.slane %v9309_v38, 4  ;;  %v9322_v38 = vrot.slane %v9320_v26, 5 }
 0x4ed   : > { %v9546_v37 = vpop.f32.mrf.mxu1 }
 0x4ee   : > { %v9626_v16 = vadd.f32 %v9546_v37, %v8972_v6  ;;  %v9456_v6 = vunpack.c.l.b16 %v9281_v10  ;;  %v9315_v27 = vsel %vm11101_vm8, %v9310_v62, %v9314_v35 }
 0x4f0   : > { %v9662_v36 = vadd.f32 %v13875_v54, %v9626_v16  ;;  %10630 = vmatmul.msk.bf16.gmra.mxu1 %vm5613_vm11, %v9478_v52  ;;  %v9479_v52 = vpack.c.b16 %v9457_v50, %v9456_v6  ;;  %v13920_v10 = vpop.f32.mrf.mxu2  ;;  %v9459_v50 = vunpack.c.l.b16 %v9315_v27 }
 0x4f2   : > { %v9694_v24 = vmax.f32 %v9662_v36, 0.0 }
 0x4f4   : > { %v9726_v55 = vpack.c.bf16 %v9694_v24, %v9694_v24  ;;  %v9299_v24 = vor.u32 %v9298_v21, %v9295_v9 }
 0x4f5   : > { %v9548_v25 = vpop.f32.mrf.mxu1 }
 0x4f6   : > { %9758 = vst.msk [vmem:[%s13884_s25] sm:$0xf] %vm5011_vm10, %v9726_v55  ;;  %v9627_v44 = vadd.f32 %v9548_v25, %v8973_v56  ;;  %v14268_v55 = vld [vmem:[#allocation7_spill] sm:$0xff]  ;;  %v9038_v56 = vld [vmem:[#allocation3 + $0x144] sm:$0xf]  ;;  %v9300_v22 = vrot.slane %v9299_v24, 4 }
 0x4f7   : > { %v8975_v63 = vadd.f32 %v13739_v13, %v14268_v55  ;;  %v9326_v60 = vshll.u32 %v9038_v56, 16  ;;  %v9330_v48 = vshrl.u32 %v9038_v56, 16  ;;  %v9041_v56 = vld [vmem:[#allocation3 + $0x15c] sm:$0xf] }
 0x4f8   : > { %v9663_v40 = vadd.f32 %v13875_v54, %v9627_v44  ;;  %v13915_v44 = vpop.f32.mrf.mxu0  ;;  %v9305_v13 = vsel %vm11101_vm8, %v9300_v22, %v9304_v42  ;;  %v9319_v42 = vrot.slane %v9317_v5, 4  ;;  %v13934_v32 = vpop.f32.mrf.mxu2 }
 0x4fa   : > { %v9695_v11 = vmax.f32 %v9663_v40, 0.0  ;;  %v9323_v17 = vor.u32 %v9322_v38, %v9319_v42 }
 0x4fc   : > { %v9727_v59 = vpack.c.bf16 %v9695_v11, %v9695_v11  ;;  %v9324_v27 = vrot.slane %v9323_v17, 4 }
 0x4fd   : > { %v9551_v37 = vpop.f32.mrf.mxu1 }
 0x4fe   : > { %9759 = vst.msk [vmem:[%s13884_s25 + $0x4] sm:$0xf] %vm5011_vm10, %v9727_v59  ;;  %v9628_v16 = vadd.f32 %v9551_v37, %v8974_v29  ;;  %v9328_v59 = vrot.slane %v9326_v60, 5  ;;  %v9332_v29 = vrot.slane %v9330_v48, 4  ;;  %v9458_v37 = vunpack.c.l.b16 %v9305_v13  ;;  %v9040_v13 = vld [vmem:[#allocation3 + $0x158] sm:$0xf] }
 0x4ff   : > { %v9350_v48 = vshll.u32 %v9041_v56, 16  ;;  %v9341_v5 = vshrl.u32 %v9040_v13, 16  ;;  %v9344_v26 = vshll.u32 %v9040_v13, 16 }
 0x500   : > { %v9664_v36 = vadd.f32 %v13875_v54, %v9628_v16  ;;  %10631 = vmatmul.msk.bf16.gmra.mxu1 %vm5613_vm11, %v9479_v52  ;;  %v9039_v16 = vld [vmem:[#allocation3 + $0x148] sm:$0x1]  ;;  %v9480_v21 = vpack.c.b16 %v9459_v50, %v9458_v37  ;;  %v9333_v34 = vor.u32 %v9332_v29, %v9328_v59  ;;  %v13932_v24 = vpop.f32.mrf.mxu0  ;;  %v8978_v37 = vadd.f32 %v13809_v51, %v13719_v18 }
 0x501   : > { %v9352_v29 = vrot.slane %v9350_v48, 5 }
 0x502   : > { %v9696_v58 = vmax.f32 %v9664_v36, 0.0  ;;  %v9336_v36 = vshll.u32 %v9039_v16, 16  ;;  %v9334_v35 = vrot.slane %v9333_v34, 4  ;;  %v9343_v34 = vrot.slane %v9341_v5, 4 }
 0x504   : > { %v9728_v2 = vpack.c.bf16 %v9696_v58, %v9696_v58 }
 0x505   : > { %v9553_v23 = vpop.f32.mrf.mxu1 }
 0x506   : > { %9760 = vst.msk [vmem:[%s13884_s25 + $0x8] sm:$0xf] %vm5011_vm10, %v9728_v2  ;;  %v9629_v25 = vadd.f32 %v9553_v23, %v8975_v63  ;;  %v9338_v2 = vrot.slane %v9336_v36, 5  ;;  %v8977_v63 = vadd.f32 %v13779_v46, %v13697_v14  ;;  %v13938_v23 = vpop.f32.mrf.mxu3  ;;  %v9329_v14 = vsel %vm11101_vm8, %v9324_v27, %v9328_v59  ;;  %v14269_v27 = vld [vmem:[#allocation15_spill] sm:$0xff] }
 0x507   : > { %v9460_v16 = vunpack.c.l.b16 %v9329_v14  ;;  %v9346_v36 = vrot.slane %v9344_v26, 5 }
 0x508   : > { %v9665_v40 = vadd.f32 %v13875_v54, %v9629_v25  ;;  %v9339_v60 = vsel %vm11101_vm8, %v9334_v35, %v9338_v2  ;;  %v13947_v50 = vpop.f32.mrf.mxu0 }
 0x509   : > { %v9347_v51 = vor.u32 %v9346_v36, %v9343_v34  ;;  %v14270_v36 = vld [vmem:[#allocation16_spill] sm:$0xff] }
 0x50a   : > { %v9697_v11 = vmax.f32 %v9665_v40, 0.0  ;;  %v9354_v40 = vshrl.u32 %v9041_v56, 16  ;;  %v9044_v56 = vld [vmem:[#allocation3 + $0x174] sm:$0xf] }
 0x50b   : > { %v9374_v14 = vshll.u32 %v9044_v56, 16 }
 0x50c   : > { %v9729_v6 = vpack.c.bf16 %v9697_v11, %v9697_v11  ;;  %v9461_v11 = vunpack.c.l.b16 %v9339_v60  ;;  %v8103_v60 = vadd.f32 %v13888_v31, %v14269_v27 }
 0x50d   : > { %v9556_v52 = vpop.f32.mrf.mxu1 }
 0x50e   : > { %9761 = vst.msk [vmem:[%s13884_s25 + $0xc] sm:$0xf] %vm5011_vm10, %v9729_v6  ;;  %v9630_v9 = vadd.f32 %v9556_v52, %v8976_v15  ;;  %v9356_v6 = vrot.slane %v9354_v40, 4  ;;  %v9042_v52 = vld [vmem:[#allocation3 + $0x160] sm:$0x1]  ;;  %v9481_v42 = vpack.c.b16 %v9461_v11, %v9460_v16  ;;  %v13955_v38 = vpop.f32.mrf.mxu3  ;;  %v9376_v16 = vrot.slane %v9374_v14, 5 }
 0x50f   : > { %v9043_v11 = vld [vmem:[#allocation3 + $0x170] sm:$0xf] }
 0x510   : > { %v9666_v58 = vadd.f32 %v13875_v54, %v9630_v9  ;;  %10632 = vmatmul.msk.bf16.gmra.mxu1 %vm5613_vm11, %v9480_v21  ;;  %v13951_v9 = vpop.f32.mrf.mxu2 }
 0x512   : > { %v9698_v62 = vmax.f32 %v9666_v58, 0.0  ;;  %v9357_v58 = vor.u32 %v9356_v6, %v9352_v29 }
 0x514   : > { %v9730_v55 = vpack.c.bf16 %v9698_v62, %v9698_v62  ;;  %v9360_v62 = vshll.u32 %v9042_v52, 16  ;;  %v9358_v35 = vrot.slane %v9357_v58, 4  ;;  %v8104_v58 = vadd.f32 %v13905_v4, %v14270_v36 }
 0x515   : > { %v9558_v25 = vpop.f32.mrf.mxu1 }
 0x516   : > { %9762 = vst.msk [vmem:[%s13884_s25 + $0x10] sm:$0xf] %vm5011_vm10, %v9730_v55  ;;  %v9631_v22 = vadd.f32 %v9558_v25, %v8977_v63  ;;  %v9362_v2 = vrot.slane %v9360_v62, 5  ;;  %v8979_v63 = vadd.f32 %v13825_v20, %v13737_v19  ;;  %v13961_v25 = vpop.f32.mrf.mxu0  ;;  %v8726_v19 = vadd.f32 %v13892_v30, %v8103_v60  ;;  %v13973_v5 = vpop.f32.mrf.mxu3  ;;  %v9045_v30 = vld [vmem:[#allocation3 + $0x178] sm:$0x1] }
 0x518   : > { %v9667_v61 = vadd.f32 %v13875_v54, %v9631_v22  ;;  %v13967_v40 = vpop.f32.mrf.mxu2  ;;  %v9363_v13 = vsel %vm11101_vm8, %v9358_v35, %v9362_v2  ;;  %v9384_v2 = vshll.u32 %v9045_v30, 16 }
 0x519   : > { %v9463_v6 = vunpack.c.l.b16 %v9363_v13  ;;  %v9047_v13 = vld [vmem:[#allocation3 + $0x18c] sm:$0xf] }
 0x51a   : > { %v9699_v46 = vmax.f32 %v9667_v61, 0.0  ;;  %v9348_v61 = vrot.slane %v9347_v51, 4  ;;  %v9386_v60 = vrot.slane %v9384_v2, 5 }
 0x51c   : > { %v9731_v15 = vpack.c.bf16 %v9699_v46, %v9699_v46  ;;  %v9378_v46 = vshrl.u32 %v9044_v56, 16  ;;  %v9353_v31 = vsel %vm11101_vm8, %v9348_v61, %v9352_v29 }
 0x51d   : > { %v9561_v21 = vpop.f32.mrf.mxu1 }
 0x51e   : > { %9763 = vst.msk [vmem:[%s13884_s25 + $0x14] sm:$0xf] %vm5011_vm10, %v9731_v15  ;;  %v9632_v59 = vadd.f32 %v9561_v21, %v8978_v37  ;;  %v9365_v15 = vshrl.u32 %v9043_v11, 16  ;;  %v9368_v37 = vshll.u32 %v9043_v11, 16  ;;  %v9380_v52 = vrot.slane %v9378_v46, 4  ;;  %v13982_v29 = vpop.f32.mrf.mxu0  ;;  %v13989_v56 = vpop.f32.mrf.mxu3  ;;  %v14271_v46 = vld [vmem:[#allocation19_spill] sm:$0xff] }
 0x520   : > { %v9668_v17 = vadd.f32 %v13875_v54, %v9632_v59  ;;  %10633 = vmatmul.msk.bf16.gmra.mxu1 %vm5613_vm11, %v9481_v42  ;;  %v8980_v59 = vadd.f32 %v13901_v53, %v8726_v19  ;;  %v9462_v42 = vunpack.c.l.b16 %v9353_v31  ;;  %v9370_v51 = vrot.slane %v9368_v37, 5 }
 0x521   : > { %v9381_v35 = vor.u32 %v9380_v52, %v9376_v16 }
 0x522   : > { %v9700_v18 = vmax.f32 %v9668_v17, 0.0  ;;  %v9482_v17 = vpack.c.b16 %v9463_v6, %v9462_v42  ;;  %v9402_v6 = vshrl.u32 %v9047_v13, 16 }
 0x523   : > { %v9382_v27 = vrot.slane %v9381_v35, 4 }
 0x524   : > { %v9732_v55 = vpack.c.bf16 %v9700_v18, %v9700_v18  ;;  %v9367_v18 = vrot.slane %v9365_v15, 4  ;;  %v9404_v36 = vrot.slane %v9402_v6, 4  ;;  %v9049_v6 = vld [vmem:[#allocation3 + $0x1a0] sm:$0xf] }
 0x525   : > { %v9563_v22 = vpop.f32.mrf.mxu1  ;;  %v9387_v31 = vsel %vm11101_vm8, %v9382_v27, %v9386_v60 }
 0x526   : > { %9764 = vst.msk [vmem:[%s13884_s25 + $0x18] sm:$0xf] %vm5011_vm10, %v9732_v55  ;;  %v9633_v48 = vadd.f32 %v9563_v22, %v8979_v63  ;;  %v8727_v55 = vadd.f32 %v13909_v47, %v8104_v58  ;;  %v13987_v63 = vpop.f32.mrf.mxu2  ;;  %v9371_v22 = vor.u32 %v9370_v51, %v9367_v18  ;;  %v8105_v47 = vadd.f32 %v13920_v10, %v14271_v46  ;;  %v14007_v18 = vpop.f32.mrf.mxu3 }
 0x527   : > { %v9465_v42 = vunpack.c.l.b16 %v9387_v31  ;;  %v14273_v31 = vld [vmem:[#allocation5_spill] sm:$0xff] }
 0x528   : > { %v9669_v20 = vadd.f32 %v13875_v54, %v9633_v48  ;;  %v8981_v61 = vadd.f32 %v13915_v44, %v8727_v55  ;;  %v9372_v11 = vrot.slane %v9371_v22, 4  ;;  %v8728_v15 = vadd.f32 %v13924_v49, %v8105_v47  ;;  %v14000_v44 = vpop.f32.mrf.mxu0 }
 0x52a   : > { %v9701_v26 = vmax.f32 %v9669_v20, 0.0  ;;  %v9046_v20 = vld [vmem:[#allocation3 + $0x188] sm:$0xf]  ;;  %v9377_v52 = vsel %vm11101_vm8, %v9372_v11, %v9376_v16  ;;  %v14272_v16 = vld [vmem:[#allocation4_spill] sm:$0xff] }
 0x52b   : > { %v9389_v10 = vshrl.u32 %v9046_v20, 16  ;;  %v9464_v49 = vunpack.c.l.b16 %v9377_v52  ;;  %v8106_v55 = vadd.f32 %v13934_v32, %v14272_v16 }
 0x52c   : > { %v9733_v21 = vpack.c.bf16 %v9701_v26, %v9701_v26  ;;  %v9398_v26 = vshll.u32 %v9047_v13, 16 }
 0x52d   : > { %v9566_v34 = vpop.f32.mrf.mxu1  ;;  %v9391_v35 = vrot.slane %v9389_v10, 4  ;;  %v8729_v60 = vadd.f32 %v13938_v23, %v8106_v55  ;;  %v8107_v23 = vadd.f32 %v13951_v9, %v14273_v31  ;;  %v9413_v10 = vshrl.u32 %v9049_v6, 16 }
 0x52e   : > { %9765 = vst.msk [vmem:[%s13884_s25 + $0x1c] sm:$0xf] %vm5011_vm10, %v9733_v21  ;;  %v9634_v62 = vadd.f32 %v9566_v34, %v8980_v59  ;;  %v9392_v21 = vshll.u32 %v9046_v20, 16  ;;  %v14004_v30 = vpop.f32.mrf.mxu2  ;;  %v9400_v34 = vrot.slane %v9398_v26, 5 }
 0x52f   : > { %v8983_v47 = vadd.f32 %v13947_v50, %v8729_v60 }
 0x530   : > { %v9670_v53 = vadd.f32 %v13875_v54, %v9634_v62  ;;  %10634 = vmatmul.msk.bf16.gmra.mxu1 %vm5613_vm11, %v9482_v17  ;;  %v8982_v62 = vadd.f32 %v13932_v24, %v8728_v15  ;;  %v9048_v17 = vld [vmem:[#allocation3 + $0x190] sm:$0x1]  ;;  %v9394_v2 = vrot.slane %v9392_v21, 5  ;;  %v9405_v22 = vor.u32 %v9404_v36, %v9400_v34  ;;  %v14016_v13 = vpop.f32.mrf.mxu0  ;;  %v9050_v15 = vld [vmem:[#allocation3 + $0x1a4] sm:$0xf] }
 0x531   : > { %v9408_v27 = vshll.u32 %v9048_v17, 16  ;;  %v9416_v21 = vshll.u32 %v9049_v6, 16  ;;  %v9422_v50 = vshll.u32 %v9050_v15, 16  ;;  %v9426_v36 = vshrl.u32 %v9050_v15, 16 }
 0x532   : > { %v9702_v4 = vmax.f32 %v9670_v53, 0.0 }
 0x533   : > { %v9410_v46 = vrot.slane %v9408_v27, 5 }
 0x534   : > { %v9734_v48 = vpack.c.bf16 %v9702_v4, %v9702_v4  ;;  %v9483_v4 = vpack.c.b16 %v9465_v42, %v9464_v49  ;;  %v9424_v49 = vrot.slane %v9422_v50, 5 }
 0x535   : > { %v9568_v14 = vpop.f32.mrf.mxu1 }
 0x536   : > { %9766 = vst.msk [vmem:[%s13884_s25 + $0x20] sm:$0xf] %vm5011_vm10, %v9734_v48  ;;  %v9635_v19 = vadd.f32 %v9568_v14, %v8981_v61  ;;  %v9395_v48 = vor.u32 %v9394_v2, %v9391_v35  ;;  %v9406_v14 = vrot.slane %v9405_v22, 4  ;;  %v9051_v35 = vld [vmem:[#allocation3 + $0x1a8] sm:$0x1]  ;;  %v9428_v2 = vrot.slane %v9426_v36, 4 }
 0x537   : > { %v9432_v60 = vshll.u32 %v9051_v35, 16 }
 0x538   : > { %v9671_v37 = vadd.f32 %v13875_v54, %v9635_v19  ;;  %v14019_v19 = vpop.f32.mrf.mxu2  ;;  %v9396_v11 = vrot.slane %v9395_v48, 4  ;;  %v9411_v52 = vsel %vm11101_vm8, %v9406_v14, %v9410_v46  ;;  %v9429_v27 = vor.u32 %v9428_v2, %v9424_v49 }
 0x53a   : > { %v9703_v59 = vmax.f32 %v9671_v37, 0.0  ;;  %v14025_v37 = vpop.f32.mrf.mxu3  ;;  %v9401_v9 = vsel %vm11101_vm8, %v9396_v11, %v9400_v34  ;;  %v9434_v11 = vrot.slane %v9432_v60, 5 }
 0x53c   : > { %v9735_v58 = vpack.c.bf16 %v9703_v59, %v9703_v59  ;;  %v8730_v59 = vadd.f32 %v13955_v38, %v8107_v23 }
 0x53d   : > { %v9571_v51 = vpop.f32.mrf.mxu1 }
 0x53e   : > { %9767 = vst.msk [vmem:[%s13884_s25 + $0x24] sm:$0xf] %vm5011_vm10, %v9735_v58  ;;  %v9636_v53 = vadd.f32 %v9571_v51, %v8982_v62  ;;  %v9415_v58 = vrot.slane %v9413_v10, 4  ;;  %v9418_v62 = vrot.slane %v9416_v21, 5  ;;  %v9467_v51 = vunpack.c.l.b16 %v9411_v52 }
 0x53f   : > { %v8984_v55 = vadd.f32 %v13961_v25, %v8730_v59 }
 0x540   : > { %v9672_v24 = vadd.f32 %v13875_v54, %v9636_v53  ;;  %10635 = vmatmul.msk.bf16.gmra.mxu1 %vm5613_vm11, %v9483_v4  ;;  %v9466_v53 = vunpack.c.l.b16 %v9401_v9  ;;  %v8932_v4 = vpop.f32.mrf.mxu0  ;;  %v9419_v22 = vor.u32 %v9418_v62, %v9415_v58  ;;  %v8057_v14 = vpop.f32.mrf.mxu2 }
 0x542   : > { %v9704_v61 = vmax.f32 %v9672_v24, 0.0  ;;  %v14274_v24 = vld [vmem:[#allocation25_spill] sm:$0xff]  ;;  %v8680_v25 = vpop.f32.mrf.mxu3 }
 0x543   : > { %v8108_v34 = vadd.f32 %v13967_v40, %v14274_v24 }
 0x544   : > { %v9736_v32 = vpack.c.bf16 %v9704_v61, %v9704_v61  ;;  %v9484_v61 = vpack.c.b16 %v9467_v51, %v9466_v53 }
 0x545   : > { %v9573_v20 = vpop.f32.mrf.mxu1  ;;  %v8731_v46 = vadd.f32 %v13973_v5, %v8108_v34  ;;  %v14275_v5 = vld [vmem:[#allocation8_spill] sm:$0xff] }
 0x546   : > { %9768 = vst.msk [vmem:[%s13884_s25 + $0x28] sm:$0xf] %vm5011_vm10, %v9736_v32  ;;  %v9637_v26 = vadd.f32 %v9573_v20, %v8983_v47  ;;  %v9420_v47 = vrot.slane %v9419_v22, 4  ;;  %v9430_v20 = vrot.slane %v9429_v27, 4  ;;  %v8109_v52 = vadd.f32 %v13987_v63, %v14275_v5 }
 0x547   : > { %v8985_v40 = vadd.f32 %v13982_v29, %v8731_v46 }
 0x548   : > { %v9673_v42 = vadd.f32 %v13875_v54, %v9637_v26  ;;  %v9425_v6 = vsel %vm11101_vm8, %v9420_v47, %v9424_v49  ;;  %v9435_v15 = vsel %vm11101_vm8, %v9430_v20, %v9434_v11  ;;  %v8934_v21 = vpop.f32.mrf.mxu0  ;;  %v8732_v50 = vadd.f32 %v13989_v56, %v8109_v52  ;;  %v8060_v36 = vpop.f32.mrf.mxu2 }
 0x549   : > { %v9468_v29 = vunpack.c.l.b16 %v9425_v6 }
 0x54a   : > { %v9705_v17 = vmax.f32 %v9673_v42, 0.0  ;;  %v9469_v42 = vunpack.c.l.b16 %v9435_v15  ;;  %v8683_v58 = vpop.f32.mrf.mxu3  ;;  %v8986_v28 = vadd.f32 %v14000_v44, %v8732_v50  ;;  %v14278_v15 = vld [vmem:[#allocation10_spill] sm:$0xff] }
 0x54b   : > { %v8113_v5 = vadd.f32 %v8060_v36, %v14278_v15 }
 0x54c   : > { %v9737_v16 = vpack.c.bf16 %v9705_v17, %v9705_v17  ;;  %v9485_v49 = vpack.c.b16 %v9469_v42, %v9468_v29  ;;  %v14276_v17 = vld [vmem:[#allocation6_spill] sm:$0xff] }
 0x54d   : > { %v9576_v38 = vpop.f32.mrf.mxu1  ;;  %v8110_v51 = vadd.f32 %v14004_v30, %v14276_v17  ;;  %v8111_v30 = vadd.f32 %v14019_v19, %v13664_v7 }
 0x54e   : > { %9769 = vst.msk [vmem:[%s13884_s25 + $0x2c] sm:$0xf] %vm5011_vm10, %v9737_v16  ;;  %v9638_v48 = vadd.f32 %v9576_v38, %v8984_v55 }
 0x54f   : > { %v8733_v56 = vadd.f32 %v14007_v18, %v8110_v51  ;;  %v8734_v18 = vadd.f32 %v14025_v37, %v8111_v30 }
 0x550   : > { %v9674_v32 = vadd.f32 %v13875_v54, %v9638_v48  ;;  %10636 = vmatmul.msk.bf16.gmra.mxu1 %vm5613_vm11, %v9484_v61  ;;  %v8937_v16 = vpop.f32.mrf.mxu0  ;;  %v8062_v53 = vpop.f32.mrf.mxu2 }
 0x551   : > { %v8987_v44 = vadd.f32 %v14016_v13, %v8733_v56  ;;  %v8988_v46 = vadd.f32 %v8932_v4, %v8734_v18  ;;  %v14277_v13 = vld [vmem:[#allocation9_spill] sm:$0xff] }
 0x552   : > { %v9706_v31 = vmax.f32 %v9674_v32, 0.0  ;;  %v8685_v22 = vpop.f32.mrf.mxu3  ;;  %v8112_v20 = vadd.f32 %v8057_v14, %v14277_v13  ;;  %v8736_v14 = vadd.f32 %v8683_v58, %v8113_v5 }
 0x554   : > { %v9738_v23 = vpack.c.bf16 %v9706_v31, %v9706_v31  ;;  %v8735_v19 = vadd.f32 %v8680_v25, %v8112_v20  ;;  %v8990_v29 = vadd.f32 %v8937_v16, %v8736_v14 }
 0x555   : > { %v9578_v26 = vpop.f32.mrf.mxu1 }
 0x556   : > { %9770 = vst.msk [vmem:[%s13884_s25 + $0x30] sm:$0xf] %vm5011_vm10, %v9738_v23  ;;  %v9639_v10 = vadd.f32 %v9578_v26, %v8985_v40  ;;  %v8989_v40 = vadd.f32 %v8934_v21, %v8735_v19 }
 0x558   : > { %v9675_v59 = vadd.f32 %v13875_v54, %v9639_v10  ;;  %v8939_v48 = vpop.f32.mrf.mxu0  ;;  %v8065_v32 = vpop.f32.mrf.mxu2 }
 0x55a   : > { %v9707_v9 = vmax.f32 %v9675_v59, 0.0  ;;  %v8688_v7 = vpop.f32.mrf.mxu3 }
 0x55c   : > { %v9739_v62 = vpack.c.bf16 %v9707_v9, %v9707_v9  ;;  %v14279_v9 = vld [vmem:[#allocation12_spill] sm:$0xff] }
 0x55d   : > { %v9581_v63 = vpop.f32.mrf.mxu1 }
 0x55e   : > { %9771 = vst.msk [vmem:[%s13884_s25 + $0x34] sm:$0xf] %vm5011_vm10, %v9739_v62  ;;  %v9640_v35 = vadd.f32 %v9581_v63, %v8986_v28  ;;  %v8114_v62 = vadd.f32 %v8062_v53, %v14279_v9 }
 0x560   : > { %v9676_v2 = vadd.f32 %v13875_v54, %v9640_v35  ;;  %10637 = vmatmul.msk.bf16.gmra.mxu1 %vm5613_vm11, %v9485_v49  ;;  %v8942_v26 = vpop.f32.mrf.mxu0  ;;  %v8067_v52 = vpop.f32.mrf.mxu2  ;;  %v8737_v36 = vadd.f32 %v8685_v22, %v8114_v62 }
 0x562   : > { %v9708_v55 = vmax.f32 %v9676_v2, 0.0  ;;  %v8690_v50 = vpop.f32.mrf.mxu3  ;;  %v8991_v35 = vadd.f32 %v8939_v48, %v8737_v36  ;;  %v8115_v2 = vadd.f32 %v8065_v32, %v13752_v1 }
 0x564   : > { %v9740_v38 = vpack.c.bf16 %v9708_v55, %v9708_v55  ;;  %v8738_v55 = vadd.f32 %v8688_v7, %v8115_v2 }
 0x565   : > { %v9583_v27 = vpop.f32.mrf.mxu1 }
 0x566   : > { %9772 = vst.msk [vmem:[%s13884_s25 + $0x38] sm:$0xf] %vm5011_vm10, %v9740_v38  ;;  %v9641_v60 = vadd.f32 %v9583_v27, %v8987_v44  ;;  %v8992_v30 = vadd.f32 %v8942_v26, %v8738_v55 }
 0x568   : > { %v9677_v24 = vadd.f32 %v13875_v54, %v9641_v60  ;;  %v8944_v28 = vpop.f32.mrf.mxu0  ;;  %v8070_v63 = vpop.f32.mrf.mxu2 }
 0x569   : > { %v8117_v7 = vadd.f32 %v8070_v63, %v13784_v8 }
 0x56a   : > { %v9709_v34 = vmax.f32 %v9677_v24, 0.0  ;;  %v8693_v58 = vpop.f32.mrf.mxu3  ;;  %v14280_v24 = vld [vmem:[#allocation11_spill] sm:$0xff] }
 0x56c   : > { %v9741_v61 = vpack.c.bf16 %v9709_v34, %v9709_v34  ;;  %v8116_v34 = vadd.f32 %v8067_v52, %v14280_v24 }
 0x56d   : > { %v9586_v47 = vpop.f32.mrf.mxu1 }
 0x56e   : > { %9773 = vst.msk [vmem:[%s13884_s25 + $0x3c] sm:$0xf] %vm5011_vm10, %v9741_v61  ;;  %v9642_v11 = vadd.f32 %v9586_v47, %v8988_v46  ;;  %v8739_v1 = vadd.f32 %v8690_v50, %v8116_v34 }
 0x570   : > { %v9678_v31 = vadd.f32 %v13875_v54, %v9642_v11  ;;  %v8947_v38 = vpop.f32.mrf.mxu0  ;;  %v8072_v22 = vpop.f32.mrf.mxu2  ;;  %v8993_v13 = vadd.f32 %v8944_v28, %v8739_v1 }
 0x572   : > { %v9710_v23 = vmax.f32 %v9678_v31, 0.0  ;;  %v8695_v60 = vpop.f32.mrf.mxu3 }
 0x574   : > { %v9742_v37 = vpack.c.bf16 %v9710_v23, %v9710_v23  ;;  %v8740_v23 = vadd.f32 %v8693_v58, %v8117_v7 }
 0x575   : > { %v9588_v6 = vpop.f32.mrf.mxu1 }
 0x576   : > { %9774 = vst.msk [vmem:[%s13884_s25 + $0x40] sm:$0xf] %vm5011_vm10, %v9742_v37  ;;  %v9643_v4 = vadd.f32 %v9588_v6, %v8989_v40  ;;  %v8994_v6 = vadd.f32 %v8947_v38, %v8740_v23 }
 0x578   : > { %v9679_v10 = vadd.f32 %v13875_v54, %v9643_v4  ;;  %v8949_v32 = vpop.f32.mrf.mxu0  ;;  %v8075_v20 = vpop.f32.mrf.mxu2  ;;  %v8118_v4 = vadd.f32 %v8072_v22, %v13795_v39 }
 0x579   : > { %v8119_v9 = vadd.f32 %v8075_v20, %v13811_v57 }
 0x57a   : > { %v9711_v59 = vmax.f32 %v9679_v10, 0.0  ;;  %v8698_v31 = vpop.f32.mrf.mxu3  ;;  %v8741_v8 = vadd.f32 %v8695_v60, %v8118_v4 }
 0x57b   : > { %v8742_v39 = vadd.f32 %v8698_v31, %v8119_v9 }
 0x57c   : > { %v9743_v25 = vpack.c.bf16 %v9711_v59, %v9711_v59 }
 0x57d   : > { %v9591_v42 = vpop.f32.mrf.mxu1 }
 0x57e   : > { %9775 = vst.msk [vmem:[%s13884_s25 + $0x44] sm:$0xf] %vm5011_vm10, %v9743_v25  ;;  %v9644_v21 = vadd.f32 %v9591_v42, %v8990_v29  ;;  %v8995_v29 = vadd.f32 %v8949_v32, %v8741_v8 }
 0x580   : > { %v9680_v49 = vadd.f32 %v13875_v54, %v9644_v21  ;;  %v8952_v15 = vpop.f32.mrf.mxu0  ;;  %v8077_v14 = vpop.f32.mrf.mxu2 }
 0x581   : > { %v8996_v58 = vadd.f32 %v8952_v15, %v8742_v39 }
 0x582   : > { %v9712_v17 = vmax.f32 %v9680_v49, 0.0  ;;  %v8700_v50 = vpop.f32.mrf.mxu3 }
 0x584   : > { %v9744_v51 = vpack.c.bf16 %v9712_v17, %v9712_v17 }
 0x585   : > { %v9593_v56 = vpop.f32.mrf.mxu1 }
 0x586   : > { %9776 = vst.msk [vmem:[%s13884_s25 + $0x48] sm:$0xf] %vm5011_vm10, %v9744_v51  ;;  %v9645_v16 = vadd.f32 %v9593_v56, %v8991_v35  ;;  %v8120_v35 = vadd.f32 %v8077_v14, %v13819_v43 }
 0x588   : > { %v9681_v53 = vadd.f32 %v13875_v54, %v9645_v16  ;;  %v8954_v21 = vpop.f32.mrf.mxu0  ;;  %v8080_v36 = vpop.f32.mrf.mxu2  ;;  %v8743_v57 = vadd.f32 %v8700_v50, %v8120_v35 }
 0x58a   : > { %v9713_v44 = vmax.f32 %v9681_v53, 0.0  ;;  %v8703_v63 = vpop.f32.mrf.mxu3 }
 0x58c   : > { %v9745_v27 = vpack.c.bf16 %v9713_v44, %v9713_v44  ;;  %v8997_v44 = vadd.f32 %v8954_v21, %v8743_v57 }
 0x58d   : > { %v9596_v18 = vpop.f32.mrf.mxu1 }
 0x58e   : > { %9777 = vst.msk [vmem:[%s13884_s25 + $0x4c] sm:$0xf] %vm5011_vm10, %v9745_v27  ;;  %v9646_v48 = vadd.f32 %v9596_v18, %v8992_v30  ;;  %v8121_v30 = vadd.f32 %v8080_v36, %v13833_v41 }
 0x590   : > { %v9682_v61 = vadd.f32 %v13875_v54, %v9646_v48  ;;  %v8957_v16 = vpop.f32.mrf.mxu0  ;;  %v8082_v53 = vpop.f32.mrf.mxu2  ;;  %v8744_v43 = vadd.f32 %v8703_v63, %v8121_v30 }
 0x591   : > { %v8122_v32 = vadd.f32 %v8082_v53, %v13838_v33 }
 0x592   : > { %v9714_v46 = vmax.f32 %v9682_v61, 0.0  ;;  %v8705_v22 = vpop.f32.mrf.mxu3  ;;  %v8998_v1 = vadd.f32 %v8957_v16, %v8744_v43 }
 0x593   : > { %v8745_v41 = vadd.f32 %v8705_v22, %v8122_v32 }
 0x594   : > { %v9746_v47 = vpack.c.bf16 %v9714_v46, %v9714_v46 }
 0x595   : > { %v9598_v11 = vpop.f32.mrf.mxu1 }
 0x596   : > { %9778 = vst.msk [vmem:[%s13884_s25 + $0x50] sm:$0xf] %vm5011_vm10, %v9746_v47  ;;  %v9647_v19 = vadd.f32 %v9598_v11, %v8993_v13 }
 0x598   : > { %v9683_v37 = vadd.f32 %v13875_v54, %v9647_v19  ;;  %v8959_v34 = vpop.f32.mrf.mxu0  ;;  %v8085_v61 = vpop.f32.mrf.mxu2 }
 0x599   : > { %v8999_v19 = vadd.f32 %v8959_v34, %v8745_v41 }
 0x59a   : > { %v9715_v40 = vmax.f32 %v9683_v37, 0.0  ;;  %v8708_v13 = vpop.f32.mrf.mxu3  ;;  %v8123_v37 = vadd.f32 %v8085_v61, %v13846_v45 }
 0x59c   : > { %v9747_v26 = vpack.c.bf16 %v9715_v40, %v9715_v40  ;;  %v8746_v33 = vadd.f32 %v8708_v13, %v8123_v37 }
 0x59d   : > { %v9601_v5 = vpop.f32.mrf.mxu1 }
 0x59e   : > { %9779 = vst.msk [vmem:[%s13884_s25 + $0x54] sm:$0xf] %vm5011_vm10, %v9747_v26  ;;  %v9648_v52 = vadd.f32 %v9601_v5, %v8994_v6 }
 0x5a0   : > { %v9684_v10 = vadd.f32 %v13875_v54, %v9648_v52  ;;  %v8962_v31 = vpop.f32.mrf.mxu0  ;;  %v8087_v26 = vpop.f32.mrf.mxu2 }
 0x5a1   : > { %v9000_v52 = vadd.f32 %v8962_v31, %v8746_v33  ;;  %v8124_v8 = vadd.f32 %v8087_v26, %v13851_v3 }
 0x5a2   : > { %v9716_v59 = vmax.f32 %v9684_v10, 0.0  ;;  %v8710_v15 = vpop.f32.mrf.mxu3 }
 0x5a3   : > { %v8747_v45 = vadd.f32 %v8710_v15, %v8124_v8 }
 0x5a4   : > { %v9748_v25 = vpack.c.bf16 %v9716_v59, %v9716_v59 }
 0x5a5   : > { %v9603_v42 = vpop.f32.mrf.mxu1 }
 0x5a6   : > { %9780 = vst.msk [vmem:[%s13884_s25 + $0x58] sm:$0xf] %vm5011_vm10, %v9748_v25  ;;  %v9649_v62 = vadd.f32 %v9603_v42, %v8995_v29 }
 0x5a8   : > { %v9685_v28 = vadd.f32 %v13875_v54, %v9649_v62  ;;  %v8964_v50 = vpop.f32.mrf.mxu0  ;;  %v8090_v25 = vpop.f32.mrf.mxu2 }
 0x5a9   : > { %v9001_v62 = vadd.f32 %v8964_v50, %v8747_v45  ;;  %v8125_v39 = vadd.f32 %v8090_v25, %v13859_v12 }
 0x5aa   : > { %v9717_v49 = vmax.f32 %v9685_v28, 0.0  ;;  %v8713_v42 = vpop.f32.mrf.mxu3 }
 0x5ab   : > { %v8748_v36 = vadd.f32 %v8713_v42, %v8125_v39 }
 0x5ac   : > { %v9749_v17 = vpack.c.bf16 %v9717_v49, %v9717_v49 }
 0x5ad   : > { %v9606_v51 = vpop.f32.mrf.mxu1 }
 0x5ae   : > { %9781 = vst.msk [vmem:[%s13884_s25 + $0x5c] sm:$0xf] %vm5011_vm10, %v9749_v17  ;;  %v9650_v56 = vadd.f32 %v9606_v51, %v8996_v58 }
 0x5b0   : > { %v9686_v2 = vadd.f32 %v13875_v54, %v9650_v56  ;;  %v8967_v3 = vpop.f32.mrf.mxu0  ;;  %v8092_v17 = vpop.f32.mrf.mxu2 }
 0x5b1   : > { %v9002_v58 = vadd.f32 %v8967_v3, %v8748_v36  ;;  %v8126_v57 = vadd.f32 %v8092_v17, %v13864_v0 }
 0x5b2   : > { %v9718_v55 = vmax.f32 %v9686_v2, 0.0  ;;  %v8715_v35 = vpop.f32.mrf.mxu3 }
 0x5b3   : > { %v8749_v2 = vadd.f32 %v8715_v35, %v8126_v57 }
 0x5b4   : > { %v9750_v38 = vpack.c.bf16 %v9718_v55, %v9718_v55 }
 0x5b5   : > { %v9608_v27 = vpop.f32.mrf.mxu1 }
 0x5b6   : > { %9782 = vst.msk [vmem:[%s13884_s25 + $0x60] sm:$0xf] %vm5011_vm10, %v9750_v38  ;;  %v9651_v60 = vadd.f32 %v9608_v27, %v8997_v44 }
 0x5b8   : > { %v9687_v18 = vadd.f32 %v13875_v54, %v9651_v60  ;;  %v8969_v55 = vpop.f32.mrf.mxu0 }
 0x5b9   : > { %v9003_v38 = vadd.f32 %v8969_v55, %v8749_v2 }
 0x5ba   : > { %v9719_v24 = vmax.f32 %v9687_v18, 0.0 }
 0x5bc   : > { %v9751_v48 = vpack.c.bf16 %v9719_v24, %v9719_v24 }
 0x5bd   : > { %v9611_v46 = vpop.f32.mrf.mxu1 }
 0x5be   : > { %9783 = vst.msk [vmem:[%s13884_s25 + $0x64] sm:$0xf] %vm5011_vm10, %v9751_v48  ;;  %v9652_v47 = vadd.f32 %v9611_v46, %v8998_v1 }
 0x5c0   : > { %v9688_v20 = vadd.f32 %v13875_v54, %v9652_v47 }
 0x5c2   : > { %v9720_v11 = vmax.f32 %v9688_v20, 0.0 }
 0x5c4   : > { %v9752_v7 = vpack.c.bf16 %v9720_v11, %v9720_v11 }
 0x5c5   : > { %v9613_v23 = vpop.f32.mrf.mxu1 }
 0x5c6   : > { %9784 = vst.msk [vmem:[%s13884_s25 + $0x68] sm:$0xf] %vm5011_vm10, %v9752_v7  ;;  %v9653_v40 = vadd.f32 %v9613_v23, %v8999_v19 }
 0x5c8   : > { %v9689_v6 = vadd.f32 %v13875_v54, %v9653_v40 }
 0x5ca   : > { %v9721_v5 = vmax.f32 %v9689_v6, 0.0 }
 0x5cc   : > { %v9753_v4 = vpack.c.bf16 %v9721_v5, %v9721_v5 }
 0x5cd   : > { %v9616_v14 = vpop.f32.mrf.mxu1 }
 0x5ce   : > { %9785 = vst.msk [vmem:[%s13884_s25 + $0x6c] sm:$0xf] %vm5011_vm10, %v9753_v4  ;;  %v9654_v10 = vadd.f32 %v9616_v14, %v9000_v52 }
 0x5d0   : > { %v9690_v59 = vadd.f32 %v13875_v54, %v9654_v10 }
 0x5d2   : > { %v9722_v29 = vmax.f32 %v9690_v59, 0.0 }
 0x5d4   : > { %v9754_v9 = vpack.c.bf16 %v9722_v29, %v9722_v29 }
 0x5d5   : > { %v9618_v21 = vpop.f32.mrf.mxu1 }
 0x5d6   : > { %9786 = vst.msk [vmem:[%s13884_s25 + $0x70] sm:$0xf] %vm5011_vm10, %v9754_v9  ;;  %v9655_v28 = vadd.f32 %v9618_v21, %v9001_v62 }
 0x5d8   : > { %v9691_v49 = vadd.f32 %v13875_v54, %v9655_v28 }
 0x5da   : > { %v9723_v63 = vmax.f32 %v9691_v49, 0.0 }
 0x5dc   : > { %v9755_v51 = vpack.c.bf16 %v9723_v63, %v9723_v63 }
 0x5dd   : > { %v9621_v56 = vpop.f32.mrf.mxu1 }
 0x5de   : > { %9787 = vst.msk [vmem:[%s13884_s25 + $0x74] sm:$0xf] %vm5011_vm10, %v9755_v51  ;;  %v9656_v12 = vadd.f32 %v9621_v56, %v9002_v58 }
 0x5e0   : > { %v9692_v16 = vadd.f32 %v13875_v54, %v9656_v12 }
 0x5e2   : > { %v9724_v53 = vmax.f32 %v9692_v16, 0.0 }
 0x5e4   : > { %v9756_v44 = vpack.c.bf16 %v9724_v53, %v9724_v53 }
 0x5e5   : > { %v9623_v22 = vpop.f32.mrf.mxu1 }
 0x5e6   : > { %9788 = vst.msk [vmem:[%s13884_s25 + $0x78] sm:$0xf] %vm5011_vm10, %v9756_v44  ;;  %v9657_v27 = vadd.f32 %v9623_v22, %v9003_v38 }
 0x5e8   : > { %v9693_v30 = vadd.f32 %v13875_v54, %v9657_v27 }
 0x5ea   : > { %v9725_v60 = vmax.f32 %v9693_v30, 0.0 }
 0x5ec   : > { %v9757_v43 = vpack.c.bf16 %v9725_v60, %v9725_v60 }
 0x5ee   : > { %9789 = vst.msk [vmem:[%s13884_s25 + $0x7c] sm:$0xf] %vm5011_vm10, %v9757_v43 }
 0x5ef PF: > { %s15_s18 = sadd.s32 1, %s10759_s18  }
 0x5f0   : > { %p12_p4 = scmp.ge.s32.totalorder %s15_s18, 4  }
 0x5f2   :  { %14 = sbr.rel (!%p12_p4) target bundleno = 1 (0x1), region = 92 }

</bundles_post_ra>
